<compile_context>
chip_gen: v7x
topology: tpu7x:2x2x1
jax: 0.10.0
libtpu: 0.0.40
codegen_flags: <defaults>
</compile_context>

<pallas_src>
import functools

import numpy as np

import jax
import jax.numpy as jnp
from jax import lax
from jax.experimental import pallas as pl
from jax.experimental.pallas import tpu as pltpu

EPS = 1e-5            # PyTorch BatchNorm2d default eps
POOLS = (2, 2, 2, 4)  # pool1, pool2, pool3, pool4 of FiveLayerCNN


# ------------------------------ geometry helpers ----------------------------- #

def _round_up(x, m):
    return ((x + m - 1) // m) * m


def layer_geoms(n_img, h0, w0, pools):
    """Static per-layer geometry for the flat padded+guarded layout."""
    geoms = []
    h, w = h0, w0
    for p in pools:
        hp, wp = h + 2, w + 2          # conv zero-padding (pad=1)
        r = n_img * hp * wp            # flat padded spatial length
        g = wp + 1                     # guard so all 9 shifted slices stay in bounds
        geoms.append(dict(H=h, W=w, Hp=hp, Wp=wp, R=r, G=g, L=r + 2 * g,
                          p=p, Ho=h // p, Wo=w // p))
        h, w = h // p, w // p
    return geoms


def _make_mask(n_img, g):
    """(1, R) float32 mask: 1.0 at the N*H*W valid conv-output pixels."""
    m = np.zeros((n_img, g["Hp"], g["Wp"]), np.float32)
    m[:, 1:g["H"] + 1, 1:g["W"] + 1] = 1.0
    return m.reshape(1, g["R"])


def _make_select_img(g, g_next):
    """Per-image (S, Hp2*Wp2) 0/1 matrix (batch-independent): picks the pool-window-start
    columns of this layer and scatters them into ONE image of the next layer's
    zero-padded flat layout (zeros give the padding ring for free)."""
    hp, wp, p, ho, wo = g["Hp"], g["Wp"], g["p"], g["Ho"], g["Wo"]
    hp2, wp2 = g_next["Hp"], g_next["Wp"]
    s = hp * wp - (p - 1) * (wp + 1)          # per-image window-start extent
    sel = np.zeros((s, hp2 * wp2), np.float32)
    for yo in range(ho):
        for xo in range(wo):
            i = (1 + yo * p) * wp + (1 + xo * p)
            j = (1 + yo) * wp2 + (1 + xo)
            sel[i, j] = 1.0
    return sel


def _build_input(x_nchw, g, cpad):
    """NCHW -> channel-major (padded to cpad channels), spatially zero-padded,
    flat, guarded: (cpad, L)."""
    x = jnp.transpose(x_nchw.astype(jnp.float32), (1, 0, 2, 3))          # (C, N, H, W)
    x = jnp.pad(x, ((0, cpad - x.shape[0]), (0, 0), (1, 1), (1, 1)))     # chan + conv pad
    x = x.reshape(cpad, -1)                                              # (cpad, N*Hp*Wp)
    return jnp.pad(x, ((0, 0), (g["G"], g["G"])))                        # shift guards


# -------------------------------- fused kernel ------------------------------- #

def _fused_forward_kernel(*refs, geoms, n_img, couts, cin_pads):
    n_layers = len(geoms)
    idx = 0
    a1_ref = refs[idx]; idx += 1
    layers = []
    for l in range(n_layers):
        w, b, gam, beta, msk = refs[idx:idx + 5]; idx += 5
        sel = None
        if l + 1 < n_layers:
            sel = refs[idx]; idx += 1
        layers.append((w, b, gam, beta, msk, sel))
    wfc_ref, bfc_ref = refs[idx], refs[idx + 1]; idx += 2
    out_ref = refs[idx]; idx += 1
    col_refs = refs[idx:idx + n_layers]; idx += n_layers
    a_refs = refs[idx:idx + n_layers - 1]

    cur = a1_ref                      # (Cin_pad, L) padded+guarded flat input of layer l
    feat = None
    for l, g in enumerate(geoms):
        w_ref, b_ref, gam_ref, beta_ref, mask_ref, sel_ref = layers[l]
        wp, big_r, guard, p = g["Wp"], g["R"], g["G"], g["p"]
        hpwp = g["Hp"] * g["Wp"]
        cp = cin_pads[l]
        col_ref = col_refs[l]

        # --- Conv2d(3x3, pad=1): im2col (taps stacked on contraction axis) + ONE matmul
        for t in range(9):
            ky, kx = divmod(t, 3)
            off = guard + (ky - 1) * wp + (kx - 1)
            col_ref[t * cp:(t + 1) * cp, :] = cur[:, pl.ds(off, big_r)]
        acc = jnp.dot(w_ref[...], col_ref[...],
                      preferred_element_type=jnp.float32)                 # (Cout, R)

        # --- bias + BatchNorm2d (training-mode batch stats) + ReLU, one FMA pass ----
        # TODO(synk): chunk this reduction over the lane axis to cap vreg live-set.
        mask = mask_ref[...]                          # (1, R): 1.0 at valid pixels only
        inv_cnt = 1.0 / float(n_img * g["H"] * g["W"])
        am = acc * mask
        mean_c = jnp.sum(am, axis=1, keepdims=True) * inv_cnt             # E[conv]
        var = jnp.sum(am * acc, axis=1, keepdims=True) * inv_cnt - mean_c * mean_c
        scale = gam_ref[...] * lax.rsqrt(var + EPS)   # var(conv+bias) == var(conv)
        shift = beta_ref[...] - mean_c * scale        # bias cancels against E[conv+bias]
        y = jnp.maximum(acc * scale + shift, 0.0)                         # (Cout, R)

        # --- MaxPool2d(p): separable running max (x then y) -------------------------
        xlen = big_r - (p - 1)
        xmax = y[:, 0:xlen]
        for ix in range(1, p):
            xmax = jnp.maximum(xmax, y[:, ix:ix + xlen])
        rz = big_r - (p - 1) * (wp + 1)
        zwin = xmax[:, 0:rz]
        for iy in range(1, p):
            zwin = jnp.maximum(zwin, xmax[:, iy * wp:iy * wp + rz])

        if l + 1 < n_layers:
            # Per-image selection matmul: compact window-start columns and re-insert the
            # next layer's zero padding ring in one MXU op; guards / padded channel rows
            # come from the explicit zero-fill.
            g2 = geoms[l + 1]
            hw2 = g2["Hp"] * g2["Wp"]
            s_img = hpwp - (p - 1) * (wp + 1)
            cout = couts[l]
            a_next = a_refs[l]
            a_next[...] = jnp.zeros_like(a_next)
            sel = sel_ref[...]
            for n in range(n_img):
                zimg = zwin[:, n * hpwp:n * hpwp + s_img]
                pooled = jnp.dot(zimg, sel, preferred_element_type=jnp.float32)
                a_next[0:cout, pl.ds(g2["G"] + n * hw2, hw2)] = pooled
            cur = a_next
        else:
            # Last pool reduces spatial to 1x1: the single window start per image sits at
            # per-image offset Wp+1; just slice it out (channel-major features (8k, N)).
            start = wp + 1
            cols_ = [zwin[:, n * hpwp + start:n * hpwp + start + 1] for n in range(n_img)]
            feat = cols_[0] if n_img == 1 else jnp.concatenate(cols_, axis=1)

    # --- Linear(8k -> 10): logits^T = Wfc^T @ feat + b ------------------------------
    out_ref[...] = jnp.dot(wfc_ref[...], feat,
                           preferred_element_type=jnp.float32) + bfc_ref[...]


# --------------------------------- JAX wrapper -------------------------------- #

def forward(params, x_nchw):
    """path='all' of FiveLayerCNN. x_nchw: (N, 3, H, W) float32 -> (N, 10)."""
    n_img, _, h0, w0 = x_nchw.shape
    geoms = layer_geoms(n_img, h0, w0, POOLS)
    assert geoms[-1]["Ho"] == 1 and geoms[-1]["Wo"] == 1, \
        "spatial must reduce to 1x1 for the 8k->10 FC (use 32x32 inputs)"
    n_layers = len(geoms)
    couts = [w4.shape[-1] for (w4, _, _, _) in params["convs"]]
    cins = [w4.shape[2] for (w4, _, _, _) in params["convs"]]
    cin_pads = [max(8, _round_up(c, 8)) for c in cins]

    inputs = [_build_input(x_nchw, geoms[0], cin_pads[0])]
    for l, (w4, b, gam, beta) in enumerate(params["convs"]):
        cin, cout = w4.shape[2], w4.shape[3]
        cp = cin_pads[l]
        # (3,3,Cin,Cout) -> (Cout, 9*Cin_pad), zero-padded channels (matches im2col rows)
        w_p = jnp.pad(w4.astype(jnp.float32), ((0, 0), (0, 0), (0, cp - cin), (0, 0)))
        w_mat = jnp.transpose(w_p.reshape(9, cp, cout), (2, 0, 1)).reshape(cout, 9 * cp)
        inputs += [
            w_mat,
            b.reshape(cout, 1).astype(jnp.float32),
            gam.reshape(cout, 1).astype(jnp.float32),
            beta.reshape(cout, 1).astype(jnp.float32),
            jnp.asarray(_make_mask(n_img, geoms[l])),
        ]
        if l + 1 < n_layers:
            inputs.append(jnp.asarray(_make_select_img(geoms[l], geoms[l + 1])))

    wf, bf = params["fc"]
    inputs += [jnp.transpose(wf).astype(jnp.float32),     # (10, 8k)
               bf.reshape(-1, 1).astype(jnp.float32)]     # (10, 1)

    # Scratch: per-layer im2col slabs + inter-layer activations (all resident in VMEM).
    scratch = [pltpu.VMEM((9 * cin_pads[l], geoms[l]["R"]), jnp.float32)
               for l in range(n_layers)]
    scratch += [pltpu.VMEM((cin_pads[l + 1], geoms[l + 1]["L"]), jnp.float32)
                for l in range(n_layers - 1)]

    kernel = functools.partial(_fused_forward_kernel, geoms=geoms, n_img=n_img,
                               couts=couts, cin_pads=cin_pads)

    out_t = pl.pallas_call(
        kernel,
        out_shape=jax.ShapeDtypeStruct((10, n_img), jnp.float32),
        in_specs=[pl.BlockSpec(memory_space=pltpu.MemorySpace.VMEM)] * len(inputs),
        out_specs=pl.BlockSpec(memory_space=pltpu.MemorySpace.VMEM),
        scratch_shapes=scratch,
    )(*inputs)
    return jnp.transpose(out_t)                          # (N, 10)


# ----------------------- parameter init & pure-JAX reference ------------------ #

def init_params(key, k):
    chans = [(3, k), (k, 2 * k), (2 * k, 4 * k), (4 * k, 8 * k)]
    convs = []
    for (cin, cout) in chans:
        key, k1, k2, k3, k4 = jax.random.split(key, 5)
        w4 = 0.1 * jax.random.normal(k1, (3, 3, cin, cout), jnp.float32)
        b = 0.1 * jax.random.normal(k2, (cout,), jnp.float32)
        g = 1.0 + 0.1 * jax.random.normal(k3, (cout,), jnp.float32)
        beta = 0.1 * jax.random.normal(k4, (cout,), jnp.float32)
        convs.append((w4, b, g, beta))
    key, k1, k2 = jax.random.split(key, 3)
    wf = 0.1 * jax.random.normal(k1, (8 * k, 10), jnp.float32)
    bf = 0.1 * jax.random.normal(k2, (10,), jnp.float32)
    return {"convs": convs, "fc": (wf, bf)}


def ref_forward(params, x_nchw):
    x = x_nchw.astype(jnp.float32)
    for (w4, b, g, beta), p in zip(params["convs"], POOLS):
        w_oihw = jnp.transpose(w4, (3, 2, 0, 1))
        x = lax.conv_general_dilated(
            x, w_oihw, (1, 1), ((1, 1), (1, 1)),
            dimension_numbers=("NCHW", "OIHW", "NCHW"),
            precision=lax.Precision.HIGHEST)
        x = x + b[None, :, None, None]
        mean = jnp.mean(x, axis=(0, 2, 3), keepdims=True)
        var = jnp.mean((x - mean) ** 2, axis=(0, 2, 3), keepdims=True)
        x = (x - mean) * lax.rsqrt(var + EPS)
        x = x * g[None, :, None, None] + beta[None, :, None, None]
        x = jnp.maximum(x, 0.0)
        n, c, h, w = x.shape
        x = x.reshape(n, c, h // p, p, w // p, p).max(axis=(3, 5))
    x = x.reshape(x.shape[0], -1)
    wf, bf = params["fc"]
    return x @ wf + bf


# ------------------------------------- main ----------------------------------- #

if __name__ == "__main__":
    k = 4                 # n_hidden_units of FiveLayerCNN
    N, H, W = 2, 32, 32   # 32x32 input so pools (2,2,2,4) reduce spatial to 1x1

    key = jax.random.PRNGKey(0)
    key, pkey, xkey = jax.random.split(key, 3)
    params = init_params(pkey, k)
    x = jax.random.normal(xkey, (N, 3, H, W), jnp.float32)

    out = jax.block_until_ready(jax.jit(forward)(params, x))
    assert out.shape == (N, 10), out.shape

    ref = jax.block_until_ready(ref_forward(params, x))
    max_err = float(jnp.max(jnp.abs(out - ref)))
    # all-f32 kernel; tolerance covers TPU MXU default f32 matmul precision
    assert max_err < 6e-2, f"mismatch vs reference: {max_err}"

    print("KERNEL_OK")
</pallas_src>

<mosaic_0001>
module attributes {stable_mosaic.version = 11 : i64} {
  func.func @_fused_forward_kernel(%arg0: memref<8x2382xf32, #tpu.memory_space<vmem>>, %arg1: memref<4x72xf32, #tpu.memory_space<vmem>>, %arg2: memref<4x1xf32, #tpu.memory_space<vmem>>, %arg3: memref<4x1xf32, #tpu.memory_space<vmem>>, %arg4: memref<4x1xf32, #tpu.memory_space<vmem>>, %arg5: memref<1x2312xf32, #tpu.memory_space<vmem>>, %arg6: memref<1121x324xf32, #tpu.memory_space<vmem>>, %arg7: memref<8x72xf32, #tpu.memory_space<vmem>>, %arg8: memref<8x1xf32, #tpu.memory_space<vmem>>, %arg9: memref<8x1xf32, #tpu.memory_space<vmem>>, %arg10: memref<8x1xf32, #tpu.memory_space<vmem>>, %arg11: memref<1x648xf32, #tpu.memory_space<vmem>>, %arg12: memref<305x100xf32, #tpu.memory_space<vmem>>, %arg13: memref<16x72xf32, #tpu.memory_space<vmem>>, %arg14: memref<16x1xf32, #tpu.memory_space<vmem>>, %arg15: memref<16x1xf32, #tpu.memory_space<vmem>>, %arg16: memref<16x1xf32, #tpu.memory_space<vmem>>, %arg17: memref<1x200xf32, #tpu.memory_space<vmem>>, %arg18: memref<89x36xf32, #tpu.memory_space<vmem>>, %arg19: memref<32x144xf32, #tpu.memory_space<vmem>>, %arg20: memref<32x1xf32, #tpu.memory_space<vmem>>, %arg21: memref<32x1xf32, #tpu.memory_space<vmem>>, %arg22: memref<32x1xf32, #tpu.memory_space<vmem>>, %arg23: memref<1x72xf32, #tpu.memory_space<vmem>>, %arg24: memref<10x32xf32, #tpu.memory_space<vmem>>, %arg25: memref<10x1xf32, #tpu.memory_space<vmem>>, %arg26: memref<10x2xf32, #tpu.memory_space<vmem>>, %arg27: memref<72x2312xf32, #tpu.memory_space<vmem>>, %arg28: memref<72x648xf32, #tpu.memory_space<vmem>>, %arg29: memref<72x200xf32, #tpu.memory_space<vmem>>, %arg30: memref<144x72xf32, #tpu.memory_space<vmem>>, %arg31: memref<8x686xf32, #tpu.memory_space<vmem>>, %arg32: memref<8x222xf32, #tpu.memory_space<vmem>>, %arg33: memref<16x86xf32, #tpu.memory_space<vmem>>) attributes {dimension_semantics = [], scalar_prefetch = 0 : i64, scratch_operands = 7 : i64, tpu.core_type = #tpu.core_type<tc>} {
    %c0 = arith.constant 0 : index
    %c0_0 = arith.constant 0 : index
    %0 = vector.load %arg0[%c0, %c0_0] : memref<8x2382xf32, #tpu.memory_space<vmem>>, vector<8x2312xf32>
    %c0_1 = arith.constant 0 : index
    %c0_2 = arith.constant 0 : index
    %1 = vector.load %arg27[%c0_1, %c0_2] : memref<72x2312xf32, #tpu.memory_space<vmem>>, vector<8x2312xf32>
    tpu.vector_store %arg27[%c0_1, %c0_2], %0 {strides = array<i32>} : memref<72x2312xf32, #tpu.memory_space<vmem>>, vector<8x2312xf32>,
    %c0_3 = arith.constant 0 : index
    %c1 = arith.constant 1 : index
    %2 = vector.load %arg0[%c0_3, %c1] : memref<8x2382xf32, #tpu.memory_space<vmem>>, vector<8x2312xf32>
    %c8 = arith.constant 8 : index
    %c0_4 = arith.constant 0 : index
    %3 = vector.load %arg27[%c8, %c0_4] : memref<72x2312xf32, #tpu.memory_space<vmem>>, vector<8x2312xf32>
    tpu.vector_store %arg27[%c8, %c0_4], %2 {strides = array<i32>} : memref<72x2312xf32, #tpu.memory_space<vmem>>, vector<8x2312xf32>,
    %c0_5 = arith.constant 0 : index
    %c2 = arith.constant 2 : index
    %4 = vector.load %arg0[%c0_5, %c2] : memref<8x2382xf32, #tpu.memory_space<vmem>>, vector<8x2312xf32>
    %c16 = arith.constant 16 : index
    %c0_6 = arith.constant 0 : index
    %5 = vector.load %arg27[%c16, %c0_6] : memref<72x2312xf32, #tpu.memory_space<vmem>>, vector<8x2312xf32>
    tpu.vector_store %arg27[%c16, %c0_6], %4 {strides = array<i32>} : memref<72x2312xf32, #tpu.memory_space<vmem>>, vector<8x2312xf32>,
    %c0_7 = arith.constant 0 : index
    %c34 = arith.constant 34 : index
    %6 = vector.load %arg0[%c0_7, %c34] : memref<8x2382xf32, #tpu.memory_space<vmem>>, vector<8x2312xf32>
    %c24 = arith.constant 24 : index
    %c0_8 = arith.constant 0 : index
    %7 = vector.load %arg27[%c24, %c0_8] : memref<72x2312xf32, #tpu.memory_space<vmem>>, vector<8x2312xf32>
    tpu.vector_store %arg27[%c24, %c0_8], %6 {strides = array<i32>} : memref<72x2312xf32, #tpu.memory_space<vmem>>, vector<8x2312xf32>,
    %c0_9 = arith.constant 0 : index
    %c35 = arith.constant 35 : index
    %8 = vector.load %arg0[%c0_9, %c35] : memref<8x2382xf32, #tpu.memory_space<vmem>>, vector<8x2312xf32>
    %c32 = arith.constant 32 : index
    %c0_10 = arith.constant 0 : index
    %9 = vector.load %arg27[%c32, %c0_10] : memref<72x2312xf32, #tpu.memory_space<vmem>>, vector<8x2312xf32>
    tpu.vector_store %arg27[%c32, %c0_10], %8 {strides = array<i32>} : memref<72x2312xf32, #tpu.memory_space<vmem>>, vector<8x2312xf32>,
    %c0_11 = arith.constant 0 : index
    %c36 = arith.constant 36 : index
    %10 = vector.load %arg0[%c0_11, %c36] : memref<8x2382xf32, #tpu.memory_space<vmem>>, vector<8x2312xf32>
    %c40 = arith.constant 40 : index
    %c0_12 = arith.constant 0 : index
    %11 = vector.load %arg27[%c40, %c0_12] : memref<72x2312xf32, #tpu.memory_space<vmem>>, vector<8x2312xf32>
    tpu.vector_store %arg27[%c40, %c0_12], %10 {strides = array<i32>} : memref<72x2312xf32, #tpu.memory_space<vmem>>, vector<8x2312xf32>,
    %c0_13 = arith.constant 0 : index
    %c68 = arith.constant 68 : index
    %12 = vector.load %arg0[%c0_13, %c68] : memref<8x2382xf32, #tpu.memory_space<vmem>>, vector<8x2312xf32>
    %c48 = arith.constant 48 : index
    %c0_14 = arith.constant 0 : index
    %13 = vector.load %arg27[%c48, %c0_14] : memref<72x2312xf32, #tpu.memory_space<vmem>>, vector<8x2312xf32>
    tpu.vector_store %arg27[%c48, %c0_14], %12 {strides = array<i32>} : memref<72x2312xf32, #tpu.memory_space<vmem>>, vector<8x2312xf32>,
    %c0_15 = arith.constant 0 : index
    %c69 = arith.constant 69 : index
    %14 = vector.load %arg0[%c0_15, %c69] : memref<8x2382xf32, #tpu.memory_space<vmem>>, vector<8x2312xf32>
    %c56 = arith.constant 56 : index
    %c0_16 = arith.constant 0 : index
    %15 = vector.load %arg27[%c56, %c0_16] : memref<72x2312xf32, #tpu.memory_space<vmem>>, vector<8x2312xf32>
    tpu.vector_store %arg27[%c56, %c0_16], %14 {strides = array<i32>} : memref<72x2312xf32, #tpu.memory_space<vmem>>, vector<8x2312xf32>,
    %c0_17 = arith.constant 0 : index
    %c70 = arith.constant 70 : index
    %16 = vector.load %arg0[%c0_17, %c70] : memref<8x2382xf32, #tpu.memory_space<vmem>>, vector<8x2312xf32>
    %c64 = arith.constant 64 : index
    %c0_18 = arith.constant 0 : index
    %17 = vector.load %arg27[%c64, %c0_18] : memref<72x2312xf32, #tpu.memory_space<vmem>>, vector<8x2312xf32>
    tpu.vector_store %arg27[%c64, %c0_18], %16 {strides = array<i32>} : memref<72x2312xf32, #tpu.memory_space<vmem>>, vector<8x2312xf32>,
    %c0_19 = arith.constant 0 : index
    %c0_20 = arith.constant 0 : index
    %18 = vector.load %arg1[%c0_19, %c0_20] : memref<4x72xf32, #tpu.memory_space<vmem>>, vector<4x72xf32>
    %c0_21 = arith.constant 0 : index
    %c0_22 = arith.constant 0 : index
    %19 = vector.load %arg27[%c0_21, %c0_22] : memref<72x2312xf32, #tpu.memory_space<vmem>>, vector<72x2312xf32>
    %cst = arith.constant dense<0.000000e+00> : vector<4x2312xf32>
    %20 = tpu.matmul %18, %19, %cst {dimension_numbers = #tpu.dot_dimension_numbers<[1], [0], [0], [1], [0, 0, 1, 1], [], []>} : vector<4x72xf32>, vector<72x2312xf32>, vector<4x2312xf32> -> vector<4x2312xf32>
    %c0_23 = arith.constant 0 : index
    %c0_24 = arith.constant 0 : index
    %21 = vector.load %arg5[%c0_23, %c0_24] : memref<1x2312xf32, #tpu.memory_space<vmem>>, vector<1x2312xf32>
    %22 = vector.broadcast %21 : vector<1x2312xf32> to vector<4x2312xf32>
    %23 = arith.mulf %20, %22 : vector<4x2312xf32>
    %cst_25 = arith.constant dense<0.000000e+00> : vector<4xf32>
    %24 = vector.multi_reduction <add>, %23, %cst_25 [1] : vector<4x2312xf32> to vector<4xf32>
    %25 = vector.shape_cast %24 : vector<4xf32> to vector<4x1xf32>
    %cst_26 = arith.constant 4.8828125E-4 : f32
    %26 = vector.broadcast %cst_26 : f32 to vector<4x1xf32>
    %27 = arith.mulf %25, %26 : vector<4x1xf32>
    %28 = arith.mulf %23, %20 : vector<4x2312xf32>
    %cst_27 = arith.constant dense<0.000000e+00> : vector<4xf32>
    %29 = vector.multi_reduction <add>, %28, %cst_27 [1] : vector<4x2312xf32> to vector<4xf32>
    %30 = vector.shape_cast %29 : vector<4xf32> to vector<4x1xf32>
    %cst_28 = arith.constant 4.8828125E-4 : f32
    %31 = vector.broadcast %cst_28 : f32 to vector<4x1xf32>
    %32 = arith.mulf %30, %31 : vector<4x1xf32>
    %33 = arith.mulf %27, %27 : vector<4x1xf32>
    %34 = arith.subf %32, %33 : vector<4x1xf32>
    %c0_29 = arith.constant 0 : index
    %c0_30 = arith.constant 0 : index
    %35 = vector.load %arg3[%c0_29, %c0_30] : memref<4x1xf32, #tpu.memory_space<vmem>>, vector<4x1xf32>
    %cst_31 = arith.constant 9.99999974E-6 : f32
    %36 = vector.broadcast %cst_31 : f32 to vector<4x1xf32>
    %37 = arith.addf %34, %36 : vector<4x1xf32>
    %38 = math.rsqrt %37 : vector<4x1xf32>
    %39 = arith.mulf %35, %38 : vector<4x1xf32>
    %c0_32 = arith.constant 0 : index
    %c0_33 = arith.constant 0 : index
    %40 = vector.load %arg4[%c0_32, %c0_33] : memref<4x1xf32, #tpu.memory_space<vmem>>, vector<4x1xf32>
    %41 = arith.mulf %27, %39 : vector<4x1xf32>
    %42 = arith.subf %40, %41 : vector<4x1xf32>
    %43 = vector.broadcast %39 : vector<4x1xf32> to vector<4x2312xf32>
    %44 = arith.mulf %20, %43 : vector<4x2312xf32>
    %45 = vector.broadcast %42 : vector<4x1xf32> to vector<4x2312xf32>
    %46 = arith.addf %44, %45 : vector<4x2312xf32>
    %cst_34 = arith.constant 0.000000e+00 : f32
    %47 = vector.broadcast %cst_34 : f32 to vector<4x2312xf32>
    %48 = arith.maximumf %46, %47 : vector<4x2312xf32>
    %49 = vector.extract_strided_slice %48 {offsets = [0, 0], sizes = [4, 2311], strides = [1, 1]} : vector<4x2312xf32> to vector<4x2311xf32>
    %50 = vector.extract_strided_slice %48 {offsets = [0, 1], sizes = [4, 2311], strides = [1, 1]} : vector<4x2312xf32> to vector<4x2311xf32>
    %51 = arith.maximumf %49, %50 : vector<4x2311xf32>
    %52 = vector.extract_strided_slice %51 {offsets = [0, 0], sizes = [4, 2277], strides = [1, 1]} : vector<4x2311xf32> to vector<4x2277xf32>
    %53 = vector.extract_strided_slice %51 {offsets = [0, 34], sizes = [4, 2277], strides = [1, 1]} : vector<4x2311xf32> to vector<4x2277xf32>
    %54 = arith.maximumf %52, %53 : vector<4x2277xf32>
    %cst_35 = arith.constant 0.000000e+00 : f32
    %55 = vector.broadcast %cst_35 : f32 to vector<8x686xf32>
    %c0_36 = arith.constant 0 : index
    %c0_37 = arith.constant 0 : index
    %56 = vector.load %arg31[%c0_36, %c0_37] : memref<8x686xf32, #tpu.memory_space<vmem>>, vector<8x686xf32>
    tpu.vector_store %arg31[%c0_36, %c0_37], %55 {strides = array<i32>} : memref<8x686xf32, #tpu.memory_space<vmem>>, vector<8x686xf32>,
    %c0_38 = arith.constant 0 : index
    %c0_39 = arith.constant 0 : index
    %57 = vector.load %arg6[%c0_38, %c0_39] : memref<1121x324xf32, #tpu.memory_space<vmem>>, vector<1121x324xf32>
    %58 = vector.extract_strided_slice %54 {offsets = [0, 0], sizes = [4, 1121], strides = [1, 1]} : vector<4x2277xf32> to vector<4x1121xf32>
    %cst_40 = arith.constant dense<0.000000e+00> : vector<4x324xf32>
    %59 = tpu.matmul %58, %57, %cst_40 {dimension_numbers = #tpu.dot_dimension_numbers<[1], [0], [0], [1], [0, 0, 1, 1], [], []>} : vector<4x1121xf32>, vector<1121x324xf32>, vector<4x324xf32> -> vector<4x324xf32>
    %c0_41 = arith.constant 0 : index
    %c19 = arith.constant 19 : index
    %60 = vector.load %arg31[%c0_41, %c19] : memref<8x686xf32, #tpu.memory_space<vmem>>, vector<4x324xf32>
    tpu.vector_store %arg31[%c0_41, %c19], %59 {strides = array<i32>} : memref<8x686xf32, #tpu.memory_space<vmem>>, vector<4x324xf32>,
    %61 = vector.extract_strided_slice %54 {offsets = [0, 1156], sizes = [4, 1121], strides = [1, 1]} : vector<4x2277xf32> to vector<4x1121xf32>
    %cst_42 = arith.constant dense<0.000000e+00> : vector<4x324xf32>
    %62 = tpu.matmul %61, %57, %cst_42 {dimension_numbers = #tpu.dot_dimension_numbers<[1], [0], [0], [1], [0, 0, 1, 1], [], []>} : vector<4x1121xf32>, vector<1121x324xf32>, vector<4x324xf32> -> vector<4x324xf32>
    %c0_43 = arith.constant 0 : index
    %c343 = arith.constant 343 : index
    %63 = vector.load %arg31[%c0_43, %c343] : memref<8x686xf32, #tpu.memory_space<vmem>>, vector<4x324xf32>
    tpu.vector_store %arg31[%c0_43, %c343], %62 {strides = array<i32>} : memref<8x686xf32, #tpu.memory_space<vmem>>, vector<4x324xf32>,
    %c0_44 = arith.constant 0 : index
    %c0_45 = arith.constant 0 : index
    %64 = vector.load %arg31[%c0_44, %c0_45] : memref<8x686xf32, #tpu.memory_space<vmem>>, vector<8x648xf32>
    %c0_46 = arith.constant 0 : index
    %c0_47 = arith.constant 0 : index
    %65 = vector.load %arg28[%c0_46, %c0_47] : memref<72x648xf32, #tpu.memory_space<vmem>>, vector<8x648xf32>
    tpu.vector_store %arg28[%c0_46, %c0_47], %64 {strides = array<i32>} : memref<72x648xf32, #tpu.memory_space<vmem>>, vector<8x648xf32>,
    %c0_48 = arith.constant 0 : index
    %c1_49 = arith.constant 1 : index
    %66 = vector.load %arg31[%c0_48, %c1_49] : memref<8x686xf32, #tpu.memory_space<vmem>>, vector<8x648xf32>
    %c8_50 = arith.constant 8 : index
    %c0_51 = arith.constant 0 : index
    %67 = vector.load %arg28[%c8_50, %c0_51] : memref<72x648xf32, #tpu.memory_space<vmem>>, vector<8x648xf32>
    tpu.vector_store %arg28[%c8_50, %c0_51], %66 {strides = array<i32>} : memref<72x648xf32, #tpu.memory_space<vmem>>, vector<8x648xf32>,
    %c0_52 = arith.constant 0 : index
    %c2_53 = arith.constant 2 : index
    %68 = vector.load %arg31[%c0_52, %c2_53] : memref<8x686xf32, #tpu.memory_space<vmem>>, vector<8x648xf32>
    %c16_54 = arith.constant 16 : index
    %c0_55 = arith.constant 0 : index
    %69 = vector.load %arg28[%c16_54, %c0_55] : memref<72x648xf32, #tpu.memory_space<vmem>>, vector<8x648xf32>
    tpu.vector_store %arg28[%c16_54, %c0_55], %68 {strides = array<i32>} : memref<72x648xf32, #tpu.memory_space<vmem>>, vector<8x648xf32>,
    %c0_56 = arith.constant 0 : index
    %c18 = arith.constant 18 : index
    %70 = vector.load %arg31[%c0_56, %c18] : memref<8x686xf32, #tpu.memory_space<vmem>>, vector<8x648xf32>
    %c24_57 = arith.constant 24 : index
    %c0_58 = arith.constant 0 : index
    %71 = vector.load %arg28[%c24_57, %c0_58] : memref<72x648xf32, #tpu.memory_space<vmem>>, vector<8x648xf32>
    tpu.vector_store %arg28[%c24_57, %c0_58], %70 {strides = array<i32>} : memref<72x648xf32, #tpu.memory_space<vmem>>, vector<8x648xf32>,
    %c0_59 = arith.constant 0 : index
    %c19_60 = arith.constant 19 : index
    %72 = vector.load %arg31[%c0_59, %c19_60] : memref<8x686xf32, #tpu.memory_space<vmem>>, vector<8x648xf32>
    %c32_61 = arith.constant 32 : index
    %c0_62 = arith.constant 0 : index
    %73 = vector.load %arg28[%c32_61, %c0_62] : memref<72x648xf32, #tpu.memory_space<vmem>>, vector<8x648xf32>
    tpu.vector_store %arg28[%c32_61, %c0_62], %72 {strides = array<i32>} : memref<72x648xf32, #tpu.memory_space<vmem>>, vector<8x648xf32>,
    %c0_63 = arith.constant 0 : index
    %c20 = arith.constant 20 : index
    %74 = vector.load %arg31[%c0_63, %c20] : memref<8x686xf32, #tpu.memory_space<vmem>>, vector<8x648xf32>
    %c40_64 = arith.constant 40 : index
    %c0_65 = arith.constant 0 : index
    %75 = vector.load %arg28[%c40_64, %c0_65] : memref<72x648xf32, #tpu.memory_space<vmem>>, vector<8x648xf32>
    tpu.vector_store %arg28[%c40_64, %c0_65], %74 {strides = array<i32>} : memref<72x648xf32, #tpu.memory_space<vmem>>, vector<8x648xf32>,
    %c0_66 = arith.constant 0 : index
    %c36_67 = arith.constant 36 : index
    %76 = vector.load %arg31[%c0_66, %c36_67] : memref<8x686xf32, #tpu.memory_space<vmem>>, vector<8x648xf32>
    %c48_68 = arith.constant 48 : index
    %c0_69 = arith.constant 0 : index
    %77 = vector.load %arg28[%c48_68, %c0_69] : memref<72x648xf32, #tpu.memory_space<vmem>>, vector<8x648xf32>
    tpu.vector_store %arg28[%c48_68, %c0_69], %76 {strides = array<i32>} : memref<72x648xf32, #tpu.memory_space<vmem>>, vector<8x648xf32>,
    %c0_70 = arith.constant 0 : index
    %c37 = arith.constant 37 : index
    %78 = vector.load %arg31[%c0_70, %c37] : memref<8x686xf32, #tpu.memory_space<vmem>>, vector<8x648xf32>
    %c56_71 = arith.constant 56 : index
    %c0_72 = arith.constant 0 : index
    %79 = vector.load %arg28[%c56_71, %c0_72] : memref<72x648xf32, #tpu.memory_space<vmem>>, vector<8x648xf32>
    tpu.vector_store %arg28[%c56_71, %c0_72], %78 {strides = array<i32>} : memref<72x648xf32, #tpu.memory_space<vmem>>, vector<8x648xf32>,
    %c0_73 = arith.constant 0 : index
    %c38 = arith.constant 38 : index
    %80 = vector.load %arg31[%c0_73, %c38] : memref<8x686xf32, #tpu.memory_space<vmem>>, vector<8x648xf32>
    %c64_74 = arith.constant 64 : index
    %c0_75 = arith.constant 0 : index
    %81 = vector.load %arg28[%c64_74, %c0_75] : memref<72x648xf32, #tpu.memory_space<vmem>>, vector<8x648xf32>
    tpu.vector_store %arg28[%c64_74, %c0_75], %80 {strides = array<i32>} : memref<72x648xf32, #tpu.memory_space<vmem>>, vector<8x648xf32>,
    %c0_76 = arith.constant 0 : index
    %c0_77 = arith.constant 0 : index
    %82 = vector.load %arg7[%c0_76, %c0_77] : memref<8x72xf32, #tpu.memory_space<vmem>>, vector<8x72xf32>
    %c0_78 = arith.constant 0 : index
    %c0_79 = arith.constant 0 : index
    %83 = vector.load %arg28[%c0_78, %c0_79] : memref<72x648xf32, #tpu.memory_space<vmem>>, vector<72x648xf32>
    %cst_80 = arith.constant dense<0.000000e+00> : vector<8x648xf32>
    %84 = tpu.matmul %82, %83, %cst_80 {dimension_numbers = #tpu.dot_dimension_numbers<[1], [0], [0], [1], [0, 0, 1, 1], [], []>} : vector<8x72xf32>, vector<72x648xf32>, vector<8x648xf32> -> vector<8x648xf32>
    %c0_81 = arith.constant 0 : index
    %c0_82 = arith.constant 0 : index
    %85 = vector.load %arg11[%c0_81, %c0_82] : memref<1x648xf32, #tpu.memory_space<vmem>>, vector<1x648xf32>
    %86 = vector.broadcast %85 : vector<1x648xf32> to vector<8x648xf32>
    %87 = arith.mulf %84, %86 : vector<8x648xf32>
    %cst_83 = arith.constant dense<0.000000e+00> : vector<8xf32>
    %88 = vector.multi_reduction <add>, %87, %cst_83 [1] : vector<8x648xf32> to vector<8xf32>
    %89 = vector.shape_cast %88 : vector<8xf32> to vector<8x1xf32>
    %cst_84 = arith.constant 0.001953125 : f32
    %90 = vector.broadcast %cst_84 : f32 to vector<8x1xf32>
    %91 = arith.mulf %89, %90 : vector<8x1xf32>
    %92 = arith.mulf %87, %84 : vector<8x648xf32>
    %cst_85 = arith.constant dense<0.000000e+00> : vector<8xf32>
    %93 = vector.multi_reduction <add>, %92, %cst_85 [1] : vector<8x648xf32> to vector<8xf32>
    %94 = vector.shape_cast %93 : vector<8xf32> to vector<8x1xf32>
    %cst_86 = arith.constant 0.001953125 : f32
    %95 = vector.broadcast %cst_86 : f32 to vector<8x1xf32>
    %96 = arith.mulf %94, %95 : vector<8x1xf32>
    %97 = arith.mulf %91, %91 : vector<8x1xf32>
    %98 = arith.subf %96, %97 : vector<8x1xf32>
    %c0_87 = arith.constant 0 : index
    %c0_88 = arith.constant 0 : index
    %99 = vector.load %arg9[%c0_87, %c0_88] : memref<8x1xf32, #tpu.memory_space<vmem>>, vector<8x1xf32>
    %cst_89 = arith.constant 9.99999974E-6 : f32
    %100 = vector.broadcast %cst_89 : f32 to vector<8x1xf32>
    %101 = arith.addf %98, %100 : vector<8x1xf32>
    %102 = math.rsqrt %101 : vector<8x1xf32>
    %103 = arith.mulf %99, %102 : vector<8x1xf32>
    %c0_90 = arith.constant 0 : index
    %c0_91 = arith.constant 0 : index
    %104 = vector.load %arg10[%c0_90, %c0_91] : memref<8x1xf32, #tpu.memory_space<vmem>>, vector<8x1xf32>
    %105 = arith.mulf %91, %103 : vector<8x1xf32>
    %106 = arith.subf %104, %105 : vector<8x1xf32>
    %107 = vector.broadcast %103 : vector<8x1xf32> to vector<8x648xf32>
    %108 = arith.mulf %84, %107 : vector<8x648xf32>
    %109 = vector.broadcast %106 : vector<8x1xf32> to vector<8x648xf32>
    %110 = arith.addf %108, %109 : vector<8x648xf32>
    %cst_92 = arith.constant 0.000000e+00 : f32
    %111 = vector.broadcast %cst_92 : f32 to vector<8x648xf32>
    %112 = arith.maximumf %110, %111 : vector<8x648xf32>
    %113 = vector.extract_strided_slice %112 {offsets = [0, 0], sizes = [8, 647], strides = [1, 1]} : vector<8x648xf32> to vector<8x647xf32>
    %114 = vector.extract_strided_slice %112 {offsets = [0, 1], sizes = [8, 647], strides = [1, 1]} : vector<8x648xf32> to vector<8x647xf32>
    %115 = arith.maximumf %113, %114 : vector<8x647xf32>
    %116 = vector.extract_strided_slice %115 {offsets = [0, 0], sizes = [8, 629], strides = [1, 1]} : vector<8x647xf32> to vector<8x629xf32>
    %117 = vector.extract_strided_slice %115 {offsets = [0, 18], sizes = [8, 629], strides = [1, 1]} : vector<8x647xf32> to vector<8x629xf32>
    %118 = arith.maximumf %116, %117 : vector<8x629xf32>
    %cst_93 = arith.constant 0.000000e+00 : f32
    %119 = vector.broadcast %cst_93 : f32 to vector<8x222xf32>
    %c0_94 = arith.constant 0 : index
    %c0_95 = arith.constant 0 : index
    %120 = vector.load %arg32[%c0_94, %c0_95] : memref<8x222xf32, #tpu.memory_space<vmem>>, vector<8x222xf32>
    tpu.vector_store %arg32[%c0_94, %c0_95], %119 {strides = array<i32>} : memref<8x222xf32, #tpu.memory_space<vmem>>, vector<8x222xf32>,
    %c0_96 = arith.constant 0 : index
    %c0_97 = arith.constant 0 : index
    %121 = vector.load %arg12[%c0_96, %c0_97] : memref<305x100xf32, #tpu.memory_space<vmem>>, vector<305x100xf32>
    %122 = vector.extract_strided_slice %118 {offsets = [0, 0], sizes = [8, 305], strides = [1, 1]} : vector<8x629xf32> to vector<8x305xf32>
    %cst_98 = arith.constant dense<0.000000e+00> : vector<8x100xf32>
    %123 = tpu.matmul %122, %121, %cst_98 {dimension_numbers = #tpu.dot_dimension_numbers<[1], [0], [0], [1], [0, 0, 1, 1], [], []>} : vector<8x305xf32>, vector<305x100xf32>, vector<8x100xf32> -> vector<8x100xf32>
    %c0_99 = arith.constant 0 : index
    %c11 = arith.constant 11 : index
    %124 = vector.load %arg32[%c0_99, %c11] : memref<8x222xf32, #tpu.memory_space<vmem>>, vector<8x100xf32>
    tpu.vector_store %arg32[%c0_99, %c11], %123 {strides = array<i32>} : memref<8x222xf32, #tpu.memory_space<vmem>>, vector<8x100xf32>,
    %125 = vector.extract_strided_slice %118 {offsets = [0, 324], sizes = [8, 305], strides = [1, 1]} : vector<8x629xf32> to vector<8x305xf32>
    %cst_100 = arith.constant dense<0.000000e+00> : vector<8x100xf32>
    %126 = tpu.matmul %125, %121, %cst_100 {dimension_numbers = #tpu.dot_dimension_numbers<[1], [0], [0], [1], [0, 0, 1, 1], [], []>} : vector<8x305xf32>, vector<305x100xf32>, vector<8x100xf32> -> vector<8x100xf32>
    %c0_101 = arith.constant 0 : index
    %c111 = arith.constant 111 : index
    %127 = vector.load %arg32[%c0_101, %c111] : memref<8x222xf32, #tpu.memory_space<vmem>>, vector<8x100xf32>
    tpu.vector_store %arg32[%c0_101, %c111], %126 {strides = array<i32>} : memref<8x222xf32, #tpu.memory_space<vmem>>, vector<8x100xf32>,
    %c0_102 = arith.constant 0 : index
    %c0_103 = arith.constant 0 : index
    %128 = vector.load %arg32[%c0_102, %c0_103] : memref<8x222xf32, #tpu.memory_space<vmem>>, vector<8x200xf32>
    %c0_104 = arith.constant 0 : index
    %c0_105 = arith.constant 0 : index
    %129 = vector.load %arg29[%c0_104, %c0_105] : memref<72x200xf32, #tpu.memory_space<vmem>>, vector<8x200xf32>
    tpu.vector_store %arg29[%c0_104, %c0_105], %128 {strides = array<i32>} : memref<72x200xf32, #tpu.memory_space<vmem>>, vector<8x200xf32>,
    %c0_106 = arith.constant 0 : index
    %c1_107 = arith.constant 1 : index
    %130 = vector.load %arg32[%c0_106, %c1_107] : memref<8x222xf32, #tpu.memory_space<vmem>>, vector<8x200xf32>
    %c8_108 = arith.constant 8 : index
    %c0_109 = arith.constant 0 : index
    %131 = vector.load %arg29[%c8_108, %c0_109] : memref<72x200xf32, #tpu.memory_space<vmem>>, vector<8x200xf32>
    tpu.vector_store %arg29[%c8_108, %c0_109], %130 {strides = array<i32>} : memref<72x200xf32, #tpu.memory_space<vmem>>, vector<8x200xf32>,
    %c0_110 = arith.constant 0 : index
    %c2_111 = arith.constant 2 : index
    %132 = vector.load %arg32[%c0_110, %c2_111] : memref<8x222xf32, #tpu.memory_space<vmem>>, vector<8x200xf32>
    %c16_112 = arith.constant 16 : index
    %c0_113 = arith.constant 0 : index
    %133 = vector.load %arg29[%c16_112, %c0_113] : memref<72x200xf32, #tpu.memory_space<vmem>>, vector<8x200xf32>
    tpu.vector_store %arg29[%c16_112, %c0_113], %132 {strides = array<i32>} : memref<72x200xf32, #tpu.memory_space<vmem>>, vector<8x200xf32>,
    %c0_114 = arith.constant 0 : index
    %c10 = arith.constant 10 : index
    %134 = vector.load %arg32[%c0_114, %c10] : memref<8x222xf32, #tpu.memory_space<vmem>>, vector<8x200xf32>
    %c24_115 = arith.constant 24 : index
    %c0_116 = arith.constant 0 : index
    %135 = vector.load %arg29[%c24_115, %c0_116] : memref<72x200xf32, #tpu.memory_space<vmem>>, vector<8x200xf32>
    tpu.vector_store %arg29[%c24_115, %c0_116], %134 {strides = array<i32>} : memref<72x200xf32, #tpu.memory_space<vmem>>, vector<8x200xf32>,
    %c0_117 = arith.constant 0 : index
    %c11_118 = arith.constant 11 : index
    %136 = vector.load %arg32[%c0_117, %c11_118] : memref<8x222xf32, #tpu.memory_space<vmem>>, vector<8x200xf32>
    %c32_119 = arith.constant 32 : index
    %c0_120 = arith.constant 0 : index
    %137 = vector.load %arg29[%c32_119, %c0_120] : memref<72x200xf32, #tpu.memory_space<vmem>>, vector<8x200xf32>
    tpu.vector_store %arg29[%c32_119, %c0_120], %136 {strides = array<i32>} : memref<72x200xf32, #tpu.memory_space<vmem>>, vector<8x200xf32>,
    %c0_121 = arith.constant 0 : index
    %c12 = arith.constant 12 : index
    %138 = vector.load %arg32[%c0_121, %c12] : memref<8x222xf32, #tpu.memory_space<vmem>>, vector<8x200xf32>
    %c40_122 = arith.constant 40 : index
    %c0_123 = arith.constant 0 : index
    %139 = vector.load %arg29[%c40_122, %c0_123] : memref<72x200xf32, #tpu.memory_space<vmem>>, vector<8x200xf32>
    tpu.vector_store %arg29[%c40_122, %c0_123], %138 {strides = array<i32>} : memref<72x200xf32, #tpu.memory_space<vmem>>, vector<8x200xf32>,
    %c0_124 = arith.constant 0 : index
    %c20_125 = arith.constant 20 : index
    %140 = vector.load %arg32[%c0_124, %c20_125] : memref<8x222xf32, #tpu.memory_space<vmem>>, vector<8x200xf32>
    %c48_126 = arith.constant 48 : index
    %c0_127 = arith.constant 0 : index
    %141 = vector.load %arg29[%c48_126, %c0_127] : memref<72x200xf32, #tpu.memory_space<vmem>>, vector<8x200xf32>
    tpu.vector_store %arg29[%c48_126, %c0_127], %140 {strides = array<i32>} : memref<72x200xf32, #tpu.memory_space<vmem>>, vector<8x200xf32>,
    %c0_128 = arith.constant 0 : index
    %c21 = arith.constant 21 : index
    %142 = vector.load %arg32[%c0_128, %c21] : memref<8x222xf32, #tpu.memory_space<vmem>>, vector<8x200xf32>
    %c56_129 = arith.constant 56 : index
    %c0_130 = arith.constant 0 : index
    %143 = vector.load %arg29[%c56_129, %c0_130] : memref<72x200xf32, #tpu.memory_space<vmem>>, vector<8x200xf32>
    tpu.vector_store %arg29[%c56_129, %c0_130], %142 {strides = array<i32>} : memref<72x200xf32, #tpu.memory_space<vmem>>, vector<8x200xf32>,
    %c0_131 = arith.constant 0 : index
    %c22 = arith.constant 22 : index
    %144 = vector.load %arg32[%c0_131, %c22] : memref<8x222xf32, #tpu.memory_space<vmem>>, vector<8x200xf32>
    %c64_132 = arith.constant 64 : index
    %c0_133 = arith.constant 0 : index
    %145 = vector.load %arg29[%c64_132, %c0_133] : memref<72x200xf32, #tpu.memory_space<vmem>>, vector<8x200xf32>
    tpu.vector_store %arg29[%c64_132, %c0_133], %144 {strides = array<i32>} : memref<72x200xf32, #tpu.memory_space<vmem>>, vector<8x200xf32>,
    %c0_134 = arith.constant 0 : index
    %c0_135 = arith.constant 0 : index
    %146 = vector.load %arg13[%c0_134, %c0_135] : memref<16x72xf32, #tpu.memory_space<vmem>>, vector<16x72xf32>
    %c0_136 = arith.constant 0 : index
    %c0_137 = arith.constant 0 : index
    %147 = vector.load %arg29[%c0_136, %c0_137] : memref<72x200xf32, #tpu.memory_space<vmem>>, vector<72x200xf32>
    %cst_138 = arith.constant dense<0.000000e+00> : vector<16x200xf32>
    %148 = tpu.matmul %146, %147, %cst_138 {dimension_numbers = #tpu.dot_dimension_numbers<[1], [0], [0], [1], [0, 0, 1, 1], [], []>} : vector<16x72xf32>, vector<72x200xf32>, vector<16x200xf32> -> vector<16x200xf32>
    %c0_139 = arith.constant 0 : index
    %c0_140 = arith.constant 0 : index
    %149 = vector.load %arg17[%c0_139, %c0_140] : memref<1x200xf32, #tpu.memory_space<vmem>>, vector<1x200xf32>
    %150 = vector.broadcast %149 : vector<1x200xf32> to vector<16x200xf32>
    %151 = arith.mulf %148, %150 : vector<16x200xf32>
    %cst_141 = arith.constant dense<0.000000e+00> : vector<16xf32>
    %152 = vector.multi_reduction <add>, %151, %cst_141 [1] : vector<16x200xf32> to vector<16xf32>
    %153 = vector.shape_cast %152 : vector<16xf32> to vector<16x1xf32>
    %cst_142 = arith.constant 7.812500e-03 : f32
    %154 = vector.broadcast %cst_142 : f32 to vector<16x1xf32>
    %155 = arith.mulf %153, %154 : vector<16x1xf32>
    %156 = arith.mulf %151, %148 : vector<16x200xf32>
    %cst_143 = arith.constant dense<0.000000e+00> : vector<16xf32>
    %157 = vector.multi_reduction <add>, %156, %cst_143 [1] : vector<16x200xf32> to vector<16xf32>
    %158 = vector.shape_cast %157 : vector<16xf32> to vector<16x1xf32>
    %cst_144 = arith.constant 7.812500e-03 : f32
    %159 = vector.broadcast %cst_144 : f32 to vector<16x1xf32>
    %160 = arith.mulf %158, %159 : vector<16x1xf32>
    %161 = arith.mulf %155, %155 : vector<16x1xf32>
    %162 = arith.subf %160, %161 : vector<16x1xf32>
    %c0_145 = arith.constant 0 : index
    %c0_146 = arith.constant 0 : index
    %163 = vector.load %arg15[%c0_145, %c0_146] : memref<16x1xf32, #tpu.memory_space<vmem>>, vector<16x1xf32>
    %cst_147 = arith.constant 9.99999974E-6 : f32
    %164 = vector.broadcast %cst_147 : f32 to vector<16x1xf32>
    %165 = arith.addf %162, %164 : vector<16x1xf32>
    %166 = math.rsqrt %165 : vector<16x1xf32>
    %167 = arith.mulf %163, %166 : vector<16x1xf32>
    %c0_148 = arith.constant 0 : index
    %c0_149 = arith.constant 0 : index
    %168 = vector.load %arg16[%c0_148, %c0_149] : memref<16x1xf32, #tpu.memory_space<vmem>>, vector<16x1xf32>
    %169 = arith.mulf %155, %167 : vector<16x1xf32>
    %170 = arith.subf %168, %169 : vector<16x1xf32>
    %171 = vector.broadcast %167 : vector<16x1xf32> to vector<16x200xf32>
    %172 = arith.mulf %148, %171 : vector<16x200xf32>
    %173 = vector.broadcast %170 : vector<16x1xf32> to vector<16x200xf32>
    %174 = arith.addf %172, %173 : vector<16x200xf32>
    %cst_150 = arith.constant 0.000000e+00 : f32
    %175 = vector.broadcast %cst_150 : f32 to vector<16x200xf32>
    %176 = arith.maximumf %174, %175 : vector<16x200xf32>
    %177 = vector.extract_strided_slice %176 {offsets = [0, 0], sizes = [16, 199], strides = [1, 1]} : vector<16x200xf32> to vector<16x199xf32>
    %178 = vector.extract_strided_slice %176 {offsets = [0, 1], sizes = [16, 199], strides = [1, 1]} : vector<16x200xf32> to vector<16x199xf32>
    %179 = arith.maximumf %177, %178 : vector<16x199xf32>
    %180 = vector.extract_strided_slice %179 {offsets = [0, 0], sizes = [16, 189], strides = [1, 1]} : vector<16x199xf32> to vector<16x189xf32>
    %181 = vector.extract_strided_slice %179 {offsets = [0, 10], sizes = [16, 189], strides = [1, 1]} : vector<16x199xf32> to vector<16x189xf32>
    %182 = arith.maximumf %180, %181 : vector<16x189xf32>
    %cst_151 = arith.constant 0.000000e+00 : f32
    %183 = vector.broadcast %cst_151 : f32 to vector<16x86xf32>
    %c0_152 = arith.constant 0 : index
    %c0_153 = arith.constant 0 : index
    %184 = vector.load %arg33[%c0_152, %c0_153] : memref<16x86xf32, #tpu.memory_space<vmem>>, vector<16x86xf32>
    tpu.vector_store %arg33[%c0_152, %c0_153], %183 {strides = array<i32>} : memref<16x86xf32, #tpu.memory_space<vmem>>, vector<16x86xf32>,
    %c0_154 = arith.constant 0 : index
    %c0_155 = arith.constant 0 : index
    %185 = vector.load %arg18[%c0_154, %c0_155] : memref<89x36xf32, #tpu.memory_space<vmem>>, vector<89x36xf32>
    %186 = vector.extract_strided_slice %182 {offsets = [0, 0], sizes = [16, 89], strides = [1, 1]} : vector<16x189xf32> to vector<16x89xf32>
    %cst_156 = arith.constant dense<0.000000e+00> : vector<16x36xf32>
    %187 = tpu.matmul %186, %185, %cst_156 {dimension_numbers = #tpu.dot_dimension_numbers<[1], [0], [0], [1], [0, 0, 1, 1], [], []>} : vector<16x89xf32>, vector<89x36xf32>, vector<16x36xf32> -> vector<16x36xf32>
    %c0_157 = arith.constant 0 : index
    %c7 = arith.constant 7 : index
    %188 = vector.load %arg33[%c0_157, %c7] : memref<16x86xf32, #tpu.memory_space<vmem>>, vector<16x36xf32>
    tpu.vector_store %arg33[%c0_157, %c7], %187 {strides = array<i32>} : memref<16x86xf32, #tpu.memory_space<vmem>>, vector<16x36xf32>,
    %189 = vector.extract_strided_slice %182 {offsets = [0, 100], sizes = [16, 89], strides = [1, 1]} : vector<16x189xf32> to vector<16x89xf32>
    %cst_158 = arith.constant dense<0.000000e+00> : vector<16x36xf32>
    %190 = tpu.matmul %189, %185, %cst_158 {dimension_numbers = #tpu.dot_dimension_numbers<[1], [0], [0], [1], [0, 0, 1, 1], [], []>} : vector<16x89xf32>, vector<89x36xf32>, vector<16x36xf32> -> vector<16x36xf32>
    %c0_159 = arith.constant 0 : index
    %c43 = arith.constant 43 : index
    %191 = vector.load %arg33[%c0_159, %c43] : memref<16x86xf32, #tpu.memory_space<vmem>>, vector<16x36xf32>
    tpu.vector_store %arg33[%c0_159, %c43], %190 {strides = array<i32>} : memref<16x86xf32, #tpu.memory_space<vmem>>, vector<16x36xf32>,
    %c0_160 = arith.constant 0 : index
    %c0_161 = arith.constant 0 : index
    %192 = vector.load %arg33[%c0_160, %c0_161] : memref<16x86xf32, #tpu.memory_space<vmem>>, vector<16x72xf32>
    %c0_162 = arith.constant 0 : index
    %c0_163 = arith.constant 0 : index
    %193 = vector.load %arg30[%c0_162, %c0_163] : memref<144x72xf32, #tpu.memory_space<vmem>>, vector<16x72xf32>
    tpu.vector_store %arg30[%c0_162, %c0_163], %192 {strides = array<i32>} : memref<144x72xf32, #tpu.memory_space<vmem>>, vector<16x72xf32>,
    %c0_164 = arith.constant 0 : index
    %c1_165 = arith.constant 1 : index
    %194 = vector.load %arg33[%c0_164, %c1_165] : memref<16x86xf32, #tpu.memory_space<vmem>>, vector<16x72xf32>
    %c16_166 = arith.constant 16 : index
    %c0_167 = arith.constant 0 : index
    %195 = vector.load %arg30[%c16_166, %c0_167] : memref<144x72xf32, #tpu.memory_space<vmem>>, vector<16x72xf32>
    tpu.vector_store %arg30[%c16_166, %c0_167], %194 {strides = array<i32>} : memref<144x72xf32, #tpu.memory_space<vmem>>, vector<16x72xf32>,
    %c0_168 = arith.constant 0 : index
    %c2_169 = arith.constant 2 : index
    %196 = vector.load %arg33[%c0_168, %c2_169] : memref<16x86xf32, #tpu.memory_space<vmem>>, vector<16x72xf32>
    %c32_170 = arith.constant 32 : index
    %c0_171 = arith.constant 0 : index
    %197 = vector.load %arg30[%c32_170, %c0_171] : memref<144x72xf32, #tpu.memory_space<vmem>>, vector<16x72xf32>
    tpu.vector_store %arg30[%c32_170, %c0_171], %196 {strides = array<i32>} : memref<144x72xf32, #tpu.memory_space<vmem>>, vector<16x72xf32>,
    %c0_172 = arith.constant 0 : index
    %c6 = arith.constant 6 : index
    %198 = vector.load %arg33[%c0_172, %c6] : memref<16x86xf32, #tpu.memory_space<vmem>>, vector<16x72xf32>
    %c48_173 = arith.constant 48 : index
    %c0_174 = arith.constant 0 : index
    %199 = vector.load %arg30[%c48_173, %c0_174] : memref<144x72xf32, #tpu.memory_space<vmem>>, vector<16x72xf32>
    tpu.vector_store %arg30[%c48_173, %c0_174], %198 {strides = array<i32>} : memref<144x72xf32, #tpu.memory_space<vmem>>, vector<16x72xf32>,
    %c0_175 = arith.constant 0 : index
    %c7_176 = arith.constant 7 : index
    %200 = vector.load %arg33[%c0_175, %c7_176] : memref<16x86xf32, #tpu.memory_space<vmem>>, vector<16x72xf32>
    %c64_177 = arith.constant 64 : index
    %c0_178 = arith.constant 0 : index
    %201 = vector.load %arg30[%c64_177, %c0_178] : memref<144x72xf32, #tpu.memory_space<vmem>>, vector<16x72xf32>
    tpu.vector_store %arg30[%c64_177, %c0_178], %200 {strides = array<i32>} : memref<144x72xf32, #tpu.memory_space<vmem>>, vector<16x72xf32>,
    %c0_179 = arith.constant 0 : index
    %c8_180 = arith.constant 8 : index
    %202 = vector.load %arg33[%c0_179, %c8_180] : memref<16x86xf32, #tpu.memory_space<vmem>>, vector<16x72xf32>
    %c80 = arith.constant 80 : index
    %c0_181 = arith.constant 0 : index
    %203 = vector.load %arg30[%c80, %c0_181] : memref<144x72xf32, #tpu.memory_space<vmem>>, vector<16x72xf32>
    tpu.vector_store %arg30[%c80, %c0_181], %202 {strides = array<i32>} : memref<144x72xf32, #tpu.memory_space<vmem>>, vector<16x72xf32>,
    %c0_182 = arith.constant 0 : index
    %c12_183 = arith.constant 12 : index
    %204 = vector.load %arg33[%c0_182, %c12_183] : memref<16x86xf32, #tpu.memory_space<vmem>>, vector<16x72xf32>
    %c96 = arith.constant 96 : index
    %c0_184 = arith.constant 0 : index
    %205 = vector.load %arg30[%c96, %c0_184] : memref<144x72xf32, #tpu.memory_space<vmem>>, vector<16x72xf32>
    tpu.vector_store %arg30[%c96, %c0_184], %204 {strides = array<i32>} : memref<144x72xf32, #tpu.memory_space<vmem>>, vector<16x72xf32>,
    %c0_185 = arith.constant 0 : index
    %c13 = arith.constant 13 : index
    %206 = vector.load %arg33[%c0_185, %c13] : memref<16x86xf32, #tpu.memory_space<vmem>>, vector<16x72xf32>
    %c112 = arith.constant 112 : index
    %c0_186 = arith.constant 0 : index
    %207 = vector.load %arg30[%c112, %c0_186] : memref<144x72xf32, #tpu.memory_space<vmem>>, vector<16x72xf32>
    tpu.vector_store %arg30[%c112, %c0_186], %206 {strides = array<i32>} : memref<144x72xf32, #tpu.memory_space<vmem>>, vector<16x72xf32>,
    %c0_187 = arith.constant 0 : index
    %c14 = arith.constant 14 : index
    %208 = vector.load %arg33[%c0_187, %c14] : memref<16x86xf32, #tpu.memory_space<vmem>>, vector<16x72xf32>
    %c128 = arith.constant 128 : index
    %c0_188 = arith.constant 0 : index
    %209 = vector.load %arg30[%c128, %c0_188] : memref<144x72xf32, #tpu.memory_space<vmem>>, vector<16x72xf32>
    tpu.vector_store %arg30[%c128, %c0_188], %208 {strides = array<i32>} : memref<144x72xf32, #tpu.memory_space<vmem>>, vector<16x72xf32>,
    %c0_189 = arith.constant 0 : index
    %c0_190 = arith.constant 0 : index
    %210 = vector.load %arg19[%c0_189, %c0_190] : memref<32x144xf32, #tpu.memory_space<vmem>>, vector<32x144xf32>
    %c0_191 = arith.constant 0 : index
    %c0_192 = arith.constant 0 : index
    %211 = vector.load %arg30[%c0_191, %c0_192] : memref<144x72xf32, #tpu.memory_space<vmem>>, vector<144x72xf32>
    %cst_193 = arith.constant dense<0.000000e+00> : vector<32x72xf32>
    %212 = tpu.matmul %210, %211, %cst_193 {dimension_numbers = #tpu.dot_dimension_numbers<[1], [0], [0], [1], [0, 0, 1, 1], [], []>} : vector<32x144xf32>, vector<144x72xf32>, vector<32x72xf32> -> vector<32x72xf32>
    %c0_194 = arith.constant 0 : index
    %c0_195 = arith.constant 0 : index
    %213 = vector.load %arg23[%c0_194, %c0_195] : memref<1x72xf32, #tpu.memory_space<vmem>>, vector<1x72xf32>
    %214 = vector.broadcast %213 : vector<1x72xf32> to vector<32x72xf32>
    %215 = arith.mulf %212, %214 : vector<32x72xf32>
    %cst_196 = arith.constant dense<0.000000e+00> : vector<32xf32>
    %216 = vector.multi_reduction <add>, %215, %cst_196 [1] : vector<32x72xf32> to vector<32xf32>
    %217 = vector.shape_cast %216 : vector<32xf32> to vector<32x1xf32>
    %cst_197 = arith.constant 3.125000e-02 : f32
    %218 = vector.broadcast %cst_197 : f32 to vector<32x1xf32>
    %219 = arith.mulf %217, %218 : vector<32x1xf32>
    %220 = arith.mulf %215, %212 : vector<32x72xf32>
    %cst_198 = arith.constant dense<0.000000e+00> : vector<32xf32>
    %221 = vector.multi_reduction <add>, %220, %cst_198 [1] : vector<32x72xf32> to vector<32xf32>
    %222 = vector.shape_cast %221 : vector<32xf32> to vector<32x1xf32>
    %cst_199 = arith.constant 3.125000e-02 : f32
    %223 = vector.broadcast %cst_199 : f32 to vector<32x1xf32>
    %224 = arith.mulf %222, %223 : vector<32x1xf32>
    %225 = arith.mulf %219, %219 : vector<32x1xf32>
    %226 = arith.subf %224, %225 : vector<32x1xf32>
    %c0_200 = arith.constant 0 : index
    %c0_201 = arith.constant 0 : index
    %227 = vector.load %arg21[%c0_200, %c0_201] : memref<32x1xf32, #tpu.memory_space<vmem>>, vector<32x1xf32>
    %cst_202 = arith.constant 9.99999974E-6 : f32
    %228 = vector.broadcast %cst_202 : f32 to vector<32x1xf32>
    %229 = arith.addf %226, %228 : vector<32x1xf32>
    %230 = math.rsqrt %229 : vector<32x1xf32>
    %231 = arith.mulf %227, %230 : vector<32x1xf32>
    %c0_203 = arith.constant 0 : index
    %c0_204 = arith.constant 0 : index
    %232 = vector.load %arg22[%c0_203, %c0_204] : memref<32x1xf32, #tpu.memory_space<vmem>>, vector<32x1xf32>
    %233 = arith.mulf %219, %231 : vector<32x1xf32>
    %234 = arith.subf %232, %233 : vector<32x1xf32>
    %235 = vector.broadcast %231 : vector<32x1xf32> to vector<32x72xf32>
    %236 = arith.mulf %212, %235 : vector<32x72xf32>
    %237 = vector.broadcast %234 : vector<32x1xf32> to vector<32x72xf32>
    %238 = arith.addf %236, %237 : vector<32x72xf32>
    %cst_205 = arith.constant 0.000000e+00 : f32
    %239 = vector.broadcast %cst_205 : f32 to vector<32x72xf32>
    %240 = arith.maximumf %238, %239 : vector<32x72xf32>
    %241 = vector.extract_strided_slice %240 {offsets = [0, 0], sizes = [32, 69], strides = [1, 1]} : vector<32x72xf32> to vector<32x69xf32>
    %242 = vector.extract_strided_slice %240 {offsets = [0, 1], sizes = [32, 69], strides = [1, 1]} : vector<32x72xf32> to vector<32x69xf32>
    %243 = arith.maximumf %241, %242 : vector<32x69xf32>
    %244 = vector.extract_strided_slice %240 {offsets = [0, 2], sizes = [32, 69], strides = [1, 1]} : vector<32x72xf32> to vector<32x69xf32>
    %245 = arith.maximumf %243, %244 : vector<32x69xf32>
    %246 = vector.extract_strided_slice %240 {offsets = [0, 3], sizes = [32, 69], strides = [1, 1]} : vector<32x72xf32> to vector<32x69xf32>
    %247 = arith.maximumf %245, %246 : vector<32x69xf32>
    %248 = vector.extract_strided_slice %247 {offsets = [0, 0], sizes = [32, 51], strides = [1, 1]} : vector<32x69xf32> to vector<32x51xf32>
    %249 = vector.extract_strided_slice %247 {offsets = [0, 6], sizes = [32, 51], strides = [1, 1]} : vector<32x69xf32> to vector<32x51xf32>
    %250 = arith.maximumf %248, %249 : vector<32x51xf32>
    %251 = vector.extract_strided_slice %247 {offsets = [0, 12], sizes = [32, 51], strides = [1, 1]} : vector<32x69xf32> to vector<32x51xf32>
    %252 = arith.maximumf %250, %251 : vector<32x51xf32>
    %253 = vector.extract_strided_slice %247 {offsets = [0, 18], sizes = [32, 51], strides = [1, 1]} : vector<32x69xf32> to vector<32x51xf32>
    %254 = arith.maximumf %252, %253 : vector<32x51xf32>
    %255 = vector.extract_strided_slice %254 {offsets = [0, 7], sizes = [32, 1], strides = [1, 1]} : vector<32x51xf32> to vector<32x1xf32>
    %256 = vector.extract_strided_slice %254 {offsets = [0, 43], sizes = [32, 1], strides = [1, 1]} : vector<32x51xf32> to vector<32x1xf32>
    %257 = tpu.concatenate %255, %256 in 1 : vector<32x1xf32>, vector<32x1xf32> -> vector<32x2xf32>
    %c0_206 = arith.constant 0 : index
    %c0_207 = arith.constant 0 : index
    %258 = vector.load %arg24[%c0_206, %c0_207] : memref<10x32xf32, #tpu.memory_space<vmem>>, vector<10x32xf32>
    %cst_208 = arith.constant dense<0.000000e+00> : vector<10x2xf32>
    %259 = tpu.matmul %258, %257, %cst_208 {dimension_numbers = #tpu.dot_dimension_numbers<[1], [0], [0], [1], [0, 0, 1, 1], [], []>} : vector<10x32xf32>, vector<32x2xf32>, vector<10x2xf32> -> vector<10x2xf32>
    %c0_209 = arith.constant 0 : index
    %c0_210 = arith.constant 0 : index
    %260 = vector.load %arg25[%c0_209, %c0_210] : memref<10x1xf32, #tpu.memory_space<vmem>>, vector<10x1xf32>
    %261 = vector.broadcast %260 : vector<10x1xf32> to vector<10x2xf32>
    %262 = arith.addf %259, %261 : vector<10x2xf32>
    %c0_211 = arith.constant 0 : index
    %c0_212 = arith.constant 0 : index
    %263 = vector.load %arg26[%c0_211, %c0_212] : memref<10x2xf32, #tpu.memory_space<vmem>>, vector<10x2xf32>
    tpu.vector_store %arg26[%c0_211, %c0_212], %262 {strides = array<i32>} : memref<10x2xf32, #tpu.memory_space<vmem>>, vector<10x2xf32>,
    return
  }
}

</mosaic_0001>

<bundles_post_ra>
// kernel: forward.1
= control target key start
LH: loop header
LB: loop body
LE: loop exit
PB: predicated region body
PF: predicated region fallthrough
CT: control target
= control target key end

     0   :  { %s13628_s0 = inlined_call_operand.vmem [shape: f32[8,2382], index: 0, kind: input, shape index: {}]   ;;  %s13629_s1 = inlined_call_operand.vmem [shape: f32[4,72], index: 1, kind: input, shape index: {}]   ;;  %s13630_s2 = inlined_call_operand.vmem [shape: f32[4,1], index: 2, kind: input, shape index: {}]   ;;  %s13631_s3 = inlined_call_operand.vmem [shape: f32[4,1], index: 3, kind: input, shape index: {}]   ;;  %s13632_s4 = inlined_call_operand.vmem [shape: f32[4,1], index: 4, kind: input, shape index: {}]   ;;  %s13633_s5 = inlined_call_operand.vmem [shape: f32[1,2312], index: 5, kind: input, shape index: {}]   ;;  %s13634_s6 = inlined_call_operand.vmem [shape: f32[1121,324], index: 6, kind: input, shape index: {}]   ;;  %s13635_s7 = inlined_call_operand.vmem [shape: f32[8,72], index: 7, kind: input, shape index: {}]   ;;  %s13636_s8 = inlined_call_operand.vmem [shape: f32[8,1], index: 8, kind: input, shape index: {}]   ;;  %s13637_s9 = inlined_call_operand.vmem [shape: f32[8,1], index: 9, kind: input, shape index: {}]   ;;  %s13638_s10 = inlined_call_operand.vmem [shape: f32[8,1], index: 10, kind: input, shape index: {}]   ;;  %s13639_s11 = inlined_call_operand.vmem [shape: f32[1,648], index: 11, kind: input, shape index: {}]   ;;  %s13640_s12 = inlined_call_operand.vmem [shape: f32[305,100], index: 12, kind: input, shape index: {}]   ;;  %s13641_s13 = inlined_call_operand.vmem [shape: f32[16,72], index: 13, kind: input, shape index: {}]   ;;  %s13642_s14 = inlined_call_operand.vmem [shape: f32[16,1], index: 14, kind: input, shape index: {}]   ;;  %s13643_s15 = inlined_call_operand.vmem [shape: f32[16,1], index: 15, kind: input, shape index: {}]   ;;  %s13644_s16 = inlined_call_operand.vmem [shape: f32[16,1], index: 16, kind: input, shape index: {}]   ;;  %s13645_s17 = inlined_call_operand.vmem [shape: f32[1,200], index: 17, kind: input, shape index: {}]   ;;  %s13646_s18 = inlined_call_operand.hbm [shape: f32[89,36], index: 18, kind: input, shape index: {}]   ;;  %s13647_s19 = inlined_call_operand.vmem [shape: f32[32,144], index: 19, kind: input, shape index: {}]   ;;  %s13648_s20 = inlined_call_operand.vmem [shape: f32[32,1], index: 20, kind: input, shape index: {}]   ;;  %s13649_s21 = inlined_call_operand.vmem [shape: f32[32,1], index: 21, kind: input, shape index: {}]   ;;  %s13650_s22 = inlined_call_operand.vmem [shape: f32[32,1], index: 22, kind: input, shape index: {}]   ;;  %s13651_s23 = inlined_call_operand.vmem [shape: f32[1,72], index: 23, kind: input, shape index: {}]   ;;  %s13652_s24 = inlined_call_operand.vmem [shape: f32[10,32], index: 24, kind: input, shape index: {}]   ;;  %s13653_s25 = inlined_call_operand.vmem [shape: f32[10,1], index: 25, kind: input, shape index: {}]   ;;  %s13654_s26 = inlined_call_operand.vmem [shape: f32[10,2], index: 26, kind: output, shape index: {}]  }
   0x1   :  { %13851 = sst [smem:[#allocation178_spill]] %s13628_s0 }
   0x2   :  { %13852 = sst [smem:[#allocation179_spill]] %s13629_s1 }
   0x3   :  { %13853 = sst [smem:[#allocation180_spill]] %s13631_s3 }
   0x4   :  { %13854 = sst [smem:[#allocation181_spill]] %s13632_s4 }
   0x5   :  { %13855 = sst [smem:[#allocation182_spill]] %s13633_s5 }
   0x6   :  { %13856 = sst [smem:[#allocation183_spill]] %s13634_s6 }
   0x7   :  { %13857 = sst [smem:[#allocation184_spill]] %s13635_s7 }
   0x8   :  { %13858 = sst [smem:[#allocation185_spill]] %s13637_s9 }
   0x9   :  { %13859 = sst [smem:[#allocation186_spill]] %s13638_s10 }
   0xa   :  { %31 = vsyncpa [#allocation10], 0  ;;  %s9028_s20 = smov [#allocation9]   ;;  %s9004_s7 = scalar_lea.hbm %s13646_s18, 1536 }
   0xb   :  { %s73_s1 = sshll.u32 %s9028_s20, 4  ;;  %p9005_p0 = scmp.ne.s32.totalorder %s13646_s18, %s9004_s7  ;;  %s74_s1 = int_to_ptr.vmem [resolvable:$true] %s73_s1 }
   0xc   :  { %p9008_p1 = scmp.lt.u32.totalorder %s9004_s7, %s13646_s18 }
   0xe   :  { %p9010_p2 = pnand %p9008_p1, %p9005_p0 }
  0x10   :  { %9013 = shalt.err (!%p9010_p2)
}
  0x11   :  { %s9014_s29 = scalar_lea.vmem %s74_s1, 1536  ;;  %p9019_p4 = scmp.lt.s32.totalorder %s74_s1, %s74_s1 }
  0x12   :  { %p9015_p3 = scmp.ne.s32.totalorder %s74_s1, %s9014_s29  ;;  %p9020_p5 = scmp.lt.s32.totalorder %s9014_s29, %s9014_s29 }
  0x14   :  { %p9021_p6 = por %p9020_p5, %p9019_p4 }
  0x16   :  { %p9022_p7 = pnand %p9021_p6, %p9015_p3 }
  0x18   :  { %9025 = shalt.err (!%p9022_p7)
}
  0x19   :  { %s9029_s9 = smov 128   ;;  %s9030_s0 = smov 8  }
  0x1a   :  { %79 = dma.hbm_to_vmem [thread:$0]  %s13646_s18, 1536, %s74_s1, [#allocation10], %s9029_s9, %s9029_s9, %s9030_s0  }
  0x1b   :  { %9026 = dma.done.wait [#allocation10], 1536  }
  0x1c   :  { %9027 = vsyncadd [#allocation10], 4294965760  ;;  %s13860_s6 = sld [smem:[#allocation178_spill]]  ;;  %s9031_s28 = smov 127   ;;  %vm478_vm0 = vcmask 769024   ;;  %v9038_v9 = vmov 0.0  }
  0x1d   :  { %s9032_s10 = smov 126   ;;  %s9033_s27 = smov 94   ;;  %1440 = vmatprep.mubr.f32.mxu1 %v9038_v9  ;;  %2606 = vst [vmem:[#allocation6] sm:$0xff] %v9038_v9  ;;  %2607 = vst [vmem:[#allocation6 + $0x8] sm:$0xff] %v9038_v9  ;;  %1582 = vmatprep.mubr.f32.mxu0 %v9038_v9  ;;  %vm212_vm1 = vcmask 1039360   ;;  %vm345_vm2 = vcmask 1031168  }
  0x1e   :  { %s9034_s3 = smov 93   ;;  %s9035_s7 = smov 92   ;;  %2608 = vst [vmem:[#allocation6 + $0x10] sm:$0xff] %v9038_v9  ;;  %2609 = vst [vmem:[#allocation6 + $0x18] sm:$0xff] %v9038_v9  ;;  %vm611_vm3 = vcmask 760832   ;;  %vm744_vm4 = vcmask 752640  }
  0x1f   :  { %s13823_s18 = smov 60   ;;  %s9037_s1 = smov 59   ;;  %2610 = vst [vmem:[#allocation6 + $0x20] sm:$0xff] %v9038_v9  ;;  %5331 = vst [vmem:[#allocation7] sm:$0xff] %v9038_v9  ;;  %vm877_vm5 = vcmask 490496   ;;  %vm1010_vm6 = vcmask 482304  }
  0x20   :  { %5332 = vst.msk [vmem:[#allocation7 + $0x8] sm:$0xff] %vm478_vm0, %v9038_v9  ;;  %s9039_s14 = smov 58   ;;  %vm1143_vm7 = vcmask 474112   ;;  %s13861_s0 = sld [smem:[#allocation179_spill]]  ;;  %vm1372_vm8 = vcmask 588800   ;;  %vm134_vm9 = vcmask 64512  }
  0x21   :  { %vm2205_vm10 = vcmask 1043456   ;;  %vm9041_vm11 = vmmov 0   ;;  %vm2241_vm12 = vcmask 60416   ;;  %s13871_s5 = sld [smem:[#allocation180_spill]]  ;;  %s13873_s4 = sld [smem:[#allocation183_spill]]  ;;  %vm3040_vm13 = vcmask 1040384  }
  0x22   :  { %v9219_v0 = vld [vmem:[%s13860_s6 + $0x8] sm:$0xff]  ;;  %v9224_v1 = vld [vmem:[%s13860_s6] sm:$0xff]  ;;  %v9229_v2 = vld [vmem:[%s13860_s6 + $0x10] sm:$0xff]  ;;  %vm3036_vm14 = vcmask 793600   ;;  %vm3802_vm15 = vcmask 1014784   ;;  %s9048_s20 = smov 91  }
  0x23   :  { %176 = vrot.lane.b32.xlu0 %v9219_v0, %s9031_s28  ;;  %174 = vrot.lane.b32.xlu1 %v9224_v1, %s9031_s28  ;;  %v9238_v3 = vld [vmem:[%s13860_s6 + $0x18] sm:$0xff]  ;;  %v9243_v4 = vld [vmem:[%s13860_s6 + $0x20] sm:$0xff]  ;;  %s14230_s9 = sld [smem:[#allocation185_spill]]  ;;  %s9055_s8 = smov 116  }
  0x24   :  { %v9248_v5 = vld [vmem:[%s13860_s6 + $0x28] sm:$0xff]  ;;  %v9253_v6 = vld [vmem:[%s13860_s6 + $0x30] sm:$0xff]  ;;  %v9258_v7 = vld [vmem:[%s13860_s6 + $0x38] sm:$0xff]  ;;  %s9056_s29 = smov 107   ;;  %s9066_s30 = smov 114  }
  0x25   :  { %v9267_v8 = vld [vmem:[%s13860_s6 + $0x48] sm:$0xff]  ;;  %v9360_v11 = vld [vmem:[%s13860_s6 + $0x40] sm:$0xff]  ;;  %v9369_v12 = vld [vmem:[%s13860_s6 + $0x78] sm:$0xff] }
  0x26   :  { %v9350_v10 = vld [vmem:[%s13860_s6 + $0x68] sm:$0xff]  ;;  %131 = vst [vmem:[#allocation2 + $0x78] sm:$0xff] %v9369_v12  ;;  %v9430_v24 = vld [vmem:[%s13860_s6 + $0x40] sm:$0xff]  ;;  %v9449_v34 = vld [vmem:[%s13860_s6 + $0x50] sm:$0xff] }
  0x27   :  { %178 = vrot.lane.b32.xlu0 %v9229_v2, %s9031_s28  ;;  %309 = vrot.lane.b32.xlu1 %v9219_v0, %s9032_s10  ;;  %129 = vst [vmem:[#allocation2 + $0x68] sm:$0xff] %v9350_v10  ;;  %v9454_v35 = vld [vmem:[%s13860_s6 + $0x58] sm:$0xff]  ;;  %v9459_v36 = vld [vmem:[%s13860_s6 + $0x50] sm:$0xff] }
  0x28   :  { %v9472_v40 = vld [vmem:[%s13860_s6 + $0x88] sm:$0xff]  ;;  %v9487_v46 = vld [vmem:[%s13860_s6 + $0x58] sm:$0xff]  ;;  %v9492_v47 = vld [vmem:[%s13860_s6 + $0x60] sm:$0xff] }
  0x29   :  { %133 = vst [vmem:[#allocation2 + $0x88] sm:$0xff] %v9472_v40 }
  0x2b   :  { %311 = vrot.lane.b32.xlu0 %v9229_v2, %s9032_s10  ;;  %442 = vrot.lane.b32.xlu1 %v9219_v0, %s9033_s27 }
  0x2f   :  { %444 = vrot.lane.b32.xlu0 %v9229_v2, %s9033_s27  ;;  %307 = vrot.lane.b32.xlu1 %v9224_v1, %s9032_s10 }
  0x33   :  { %440 = vrot.lane.b32.xlu0 %v9224_v1, %s9033_s27  ;;  %575 = vrot.lane.b32.xlu1 %v9219_v0, %s9034_s3 }
  0x37   :  { %577 = vrot.lane.b32.xlu0 %v9229_v2, %s9034_s3  ;;  %708 = vrot.lane.b32.xlu1 %v9219_v0, %s9035_s7 }
  0x3b   :  { %710 = vrot.lane.b32.xlu0 %v9229_v2, %s9035_s7  ;;  %573 = vrot.lane.b32.xlu1 %v9224_v1, %s9034_s3 }
  0x3f   :  { %706 = vrot.lane.b32.xlu0 %v9224_v1, %s9035_s7  ;;  %841 = vrot.lane.b32.xlu1 %v9219_v0, %s13823_s18 }
  0x43   :  { %843 = vrot.lane.b32.xlu0 %v9229_v2, %s13823_s18  ;;  %974 = vrot.lane.b32.xlu1 %v9219_v0, %s9037_s1 }
  0x47   :  { %976 = vrot.lane.b32.xlu0 %v9229_v2, %s9037_s1  ;;  %839 = vrot.lane.b32.xlu1 %v9224_v1, %s13823_s18 }
  0x4b   :  { %972 = vrot.lane.b32.xlu0 %v9224_v1, %s9037_s1  ;;  %180 = vrot.lane.b32.xlu1 %v9238_v3, %s9031_s28 }
  0x4f   :  { %182 = vrot.lane.b32.xlu0 %v9243_v4, %s9031_s28  ;;  %1107 = vrot.lane.b32.xlu1 %v9219_v0, %s9039_s14 }
  0x53   :  { %1109 = vrot.lane.b32.xlu0 %v9229_v2, %s9039_s14  ;;  %1105 = vrot.lane.b32.xlu1 %v9224_v1, %s9039_s14 }
  0x57   :  { %313 = vrot.lane.b32.xlu0 %v9238_v3, %s9032_s10  ;;  %315 = vrot.lane.b32.xlu1 %v9243_v4, %s9032_s10 }
  0x5b   :  { %446 = vrot.lane.b32.xlu0 %v9238_v3, %s9033_s27  ;;  %448 = vrot.lane.b32.xlu1 %v9243_v4, %s9033_s27 }
  0x5f   :  { %579 = vrot.lane.b32.xlu0 %v9238_v3, %s9034_s3  ;;  %581 = vrot.lane.b32.xlu1 %v9243_v4, %s9034_s3 }
  0x63   :  { %712 = vrot.lane.b32.xlu0 %v9238_v3, %s9035_s7  ;;  %714 = vrot.lane.b32.xlu1 %v9243_v4, %s9035_s7 }
  0x67   :  { %845 = vrot.lane.b32.xlu0 %v9238_v3, %s13823_s18  ;;  %847 = vrot.lane.b32.xlu1 %v9243_v4, %s13823_s18 }
  0x6b   :  { %978 = vrot.lane.b32.xlu0 %v9238_v3, %s9037_s1  ;;  %980 = vrot.lane.b32.xlu1 %v9243_v4, %s9037_s1 }
  0x6f   :  { %184 = vrot.lane.b32.xlu0 %v9248_v5, %s9031_s28  ;;  %186 = vrot.lane.b32.xlu1 %v9253_v6, %s9031_s28 }
  0x73   :  { %188 = vrot.lane.b32.xlu0 %v9258_v7, %s9031_s28  ;;  %190 = vrot.lane.b32.xlu1 %v9360_v11, %s9031_s28 }
  0x77   :  { %317 = vrot.lane.b32.xlu0 %v9248_v5, %s9032_s10  ;;  %319 = vrot.lane.b32.xlu1 %v9253_v6, %s9032_s10 }
  0x7b   :  { %450 = vrot.lane.b32.xlu0 %v9248_v5, %s9033_s27  ;;  %452 = vrot.lane.b32.xlu1 %v9253_v6, %s9033_s27 }
  0x7f   :  { %1111 = vrot.lane.b32.xlu0 %v9238_v3, %s9039_s14  ;;  %1113 = vrot.lane.b32.xlu1 %v9243_v4, %s9039_s14 }
  0x83   :  { %321 = vrot.lane.b32.xlu0 %v9258_v7, %s9032_s10  ;;  %323 = vrot.lane.b32.xlu1 %v9360_v11, %s9032_s10 }
  0x87   :  { %454 = vrot.lane.b32.xlu0 %v9258_v7, %s9033_s27  ;;  %456 = vrot.lane.b32.xlu1 %v9360_v11, %s9033_s27 }
  0x8b   :  { %583 = vrot.lane.b32.xlu0 %v9248_v5, %s9034_s3  ;;  %585 = vrot.lane.b32.xlu1 %v9253_v6, %s9034_s3 }
  0x8f   :  { %716 = vrot.lane.b32.xlu0 %v9248_v5, %s9035_s7  ;;  %718 = vrot.lane.b32.xlu1 %v9253_v6, %s9035_s7 }
  0x93   :  { %587 = vrot.lane.b32.xlu0 %v9258_v7, %s9034_s3  ;;  %589 = vrot.lane.b32.xlu1 %v9360_v11, %s9034_s3 }
  0x95   :  { %v177_v13 = vpop.permute.xlu0 %176  ;;  %v175_v14 = vpop.permute.xlu1 %174 }
  0x96   :  { %v213_v15 = vsel %vm212_vm1, %v175_v14, %v177_v13 }
  0x97   :  { %720 = vrot.lane.b32.xlu0 %v9258_v7, %s9035_s7  ;;  %722 = vrot.lane.b32.xlu1 %v9360_v11, %s9035_s7  ;;  %v7512_v20 = vpack.c.bf16 %v213_v15, %v9224_v1 }
  0x99   :  { %v9409_v16 = vpop.permute.xlu0 %178  ;;  %v310_v17 = vpop.permute.xlu1 %309 }
  0x9a   :  { %v214_v18 = vsel %vm212_vm1, %v177_v13, %v9409_v16 }
  0x9b   :  { %849 = vrot.lane.b32.xlu0 %v9248_v5, %s13823_s18  ;;  %851 = vrot.lane.b32.xlu1 %v9253_v6, %s13823_s18  ;;  %v7510_v19 = vpack.c.bf16 %v214_v18, %v9219_v0  ;;  %v9543_v18 = vld [vmem:[%s13861_s0] sm:$0xf] }
  0x9d   :  { %v9419_v21 = vpop.permute.xlu0 %311  ;;  %v443_v22 = vpop.permute.xlu1 %442  ;;  %7511 = vmatprep.subr.bf16.mxu1 %v7510_v19 }
  0x9e   :  { %v347_v23 = vsel %vm345_vm2, %v310_v17, %v9419_v21  ;;  %7513 = vmatpush1.bf16.msra.mxu1 %v7512_v20 }
  0x9f   :  { %982 = vrot.lane.b32.xlu0 %v9248_v5, %s9037_s1  ;;  %984 = vrot.lane.b32.xlu1 %v9253_v6, %s9037_s1 }
  0xa1   :  { %v9432_v25 = vpop.permute.xlu0 %444  ;;  %v308_v26 = vpop.permute.xlu1 %307 }
  0xa2   :  { %v480_v27 = vsel %vm478_vm0, %v443_v22, %v9432_v25  ;;  %v346_v28 = vsel %vm345_vm2, %v308_v26, %v310_v17 }
  0xa3   :  { %853 = vrot.lane.b32.xlu0 %v9258_v7, %s13823_s18  ;;  %855 = vrot.lane.b32.xlu1 %v9360_v11, %s13823_s18  ;;  %v7514_v29 = vpack.c.bf16 %v480_v27, %v347_v23 }
  0xa5   :  { %v441_v30 = vpop.permute.xlu0 %440  ;;  %v576_v31 = vpop.permute.xlu1 %575  ;;  %7515 = vmatprep.subr.bf16.mxu1 %v7514_v29 }
  0xa6   :  { %v479_v32 = vsel %vm478_vm0, %v441_v30, %v443_v22 }
  0xa7   :  { %986 = vrot.lane.b32.xlu0 %v9258_v7, %s9037_s1  ;;  %988 = vrot.lane.b32.xlu1 %v9360_v11, %s9037_s1  ;;  %v7516_v33 = vpack.c.bf16 %v479_v32, %v346_v28 }
  0xa9   :  { %v9461_v37 = vpop.permute.xlu0 %577  ;;  %v709_v38 = vpop.permute.xlu1 %708  ;;  %7517 = vmatpush1.bf16.msra.mxu1 %v7516_v33 }
  0xaa   :  { %v613_v39 = vsel %vm611_vm3, %v576_v31, %v9461_v37 }
  0xab   :  { %192 = vrot.lane.b32.xlu0 %v9267_v8, %s9031_s28  ;;  %194 = vrot.lane.b32.xlu1 %v9449_v34, %s9031_s28 }
  0xad   :  { %v9475_v41 = vpop.permute.xlu0 %710  ;;  %v574_v42 = vpop.permute.xlu1 %573 }
  0xae   :  { %v746_v43 = vsel %vm744_vm4, %v709_v38, %v9475_v41  ;;  %v612_v44 = vsel %vm611_vm3, %v574_v42, %v576_v31 }
  0xaf   :  { %1115 = vrot.lane.b32.xlu0 %v9248_v5, %s9039_s14  ;;  %1117 = vrot.lane.b32.xlu1 %v9253_v6, %s9039_s14  ;;  %v7518_v45 = vpack.c.bf16 %v746_v43, %v613_v39 }
  0xb1   :  { %v707_v48 = vpop.permute.xlu0 %706  ;;  %v842_v49 = vpop.permute.xlu1 %841  ;;  %7519 = vmatprep.subr.bf16.mxu1 %v7518_v45 }
  0xb2   :  { %v745_v50 = vsel %vm744_vm4, %v707_v48, %v709_v38 }
  0xb3   :  { %196 = vrot.lane.b32.xlu0 %v9487_v46, %s9031_s28  ;;  %198 = vrot.lane.b32.xlu1 %v9492_v47, %s9031_s28  ;;  %v7520_v51 = vpack.c.bf16 %v745_v50, %v612_v44 }
  0xb5   :  { %v9499_v52 = vpop.permute.xlu0 %843  ;;  %v975_v53 = vpop.permute.xlu1 %974  ;;  %7521 = vmatpush1.bf16.msra.mxu1 %v7520_v51 }
  0xb6   :  { %v879_v54 = vsel %vm877_vm5, %v842_v49, %v9499_v52 }
  0xb7   :  { %325 = vrot.lane.b32.xlu0 %v9267_v8, %s9032_s10  ;;  %327 = vrot.lane.b32.xlu1 %v9449_v34, %s9032_s10 }
  0xb9   :  { %v9507_v55 = vpop.permute.xlu0 %976  ;;  %v840_v56 = vpop.permute.xlu1 %839 }
  0xba   :  { %v1012_v57 = vsel %vm1010_vm6, %v975_v53, %v9507_v55  ;;  %v878_v58 = vsel %vm877_vm5, %v840_v56, %v842_v49 }
  0xbb   :  { %458 = vrot.lane.b32.xlu0 %v9267_v8, %s9033_s27  ;;  %460 = vrot.lane.b32.xlu1 %v9449_v34, %s9033_s27  ;;  %v7522_v59 = vpack.c.bf16 %v1012_v57, %v879_v54  ;;  %v9613_v57 = vld [vmem:[%s13860_s6 + $0x60] sm:$0xff] }
  0xbd   :  { %v973_v60 = vpop.permute.xlu0 %972  ;;  %v181_v61 = vpop.permute.xlu1 %180  ;;  %7523 = vmatprep.subr.bf16.mxu1 %v7522_v59 }
  0xbe   :  { %v1011_v62 = vsel %vm1010_vm6, %v973_v60, %v975_v53  ;;  %v215_v63 = vsel %vm212_vm1, %v9409_v16, %v181_v61 }
  0xbf   :  { %1119 = vrot.lane.b32.xlu0 %v9258_v7, %s9039_s14  ;;  %1121 = vrot.lane.b32.xlu1 %v9360_v11, %s9039_s14  ;;  %v7524_v0 = vpack.c.bf16 %v1011_v62, %v878_v58  ;;  %v7528_v27 = vpack.c.bf16 %v215_v63, %v9229_v2 }
  0xc1   :  { %v9523_v1 = vpop.permute.xlu0 %182  ;;  %v1108_v13 = vpop.permute.xlu1 %1107  ;;  %7525 = vmatpush1.bf16.msra.mxu1 %v7524_v0 }
  0xc2   :  { %v216_v14 = vsel %vm212_vm1, %v181_v61, %v9523_v1 }
  0xc3   :  { %329 = vrot.lane.b32.xlu0 %v9487_v46, %s9032_s10  ;;  %331 = vrot.lane.b32.xlu1 %v9492_v47, %s9032_s10  ;;  %v7526_v19 = vpack.c.bf16 %v216_v14, %v9238_v3 }
  0xc5   :  { %v9531_v15 = vpop.permute.xlu0 %1109  ;;  %v1106_v16 = vpop.permute.xlu1 %1105 }
  0xc6   :  { %v1145_v11 = vsel %vm1143_vm7, %v1108_v13, %v9531_v15  ;;  %v1144_v17 = vsel %vm1143_vm7, %v1106_v16, %v1108_v13 }
  0xc7   :  { %462 = vrot.lane.b32.xlu0 %v9487_v46, %s9033_s27  ;;  %464 = vrot.lane.b32.xlu1 %v9492_v47, %s9033_s27 }
  0xc8   :  { %1392 = vmatprep.subr.mxu1 %v1145_v11 }
  0xc9   :  { %v314_v20 = vpop.permute.xlu0 %313  ;;  %v9546_v22 = vpop.permute.xlu1 %315  ;;  %1393 = vmatpush1.msra.mxu1 %v1144_v17 }
  0xca   :  { %v348_v23 = vsel %vm345_vm2, %v9419_v21, %v314_v20  ;;  %v349_v26 = vsel %vm345_vm2, %v314_v20, %v9546_v22  ;;  %7527 = vmatprep.subr.bf16.mxu1 %v7526_v19  ;;  %6852 = vmatmul.mubr.msk.f32.vlgmr.msra.gmra.mrb[0].mxu1 %vm1372_vm8, %v9543_v18 }
  0xcb   :  { %591 = vrot.lane.b32.xlu0 %v9267_v8, %s9034_s3  ;;  %593 = vrot.lane.b32.xlu1 %v9449_v34, %s9034_s3 }
  0xcc   :  { %7529 = vmatpush1.bf16.msra.mxu1 %v7528_v27  ;;  %1511 = vmatprep.mubr.f32.mxu1 %v9038_v9 }
  0xcd   :  { %v447_v3 = vpop.permute.xlu0 %446  ;;  %v9560_v21 = vpop.permute.xlu1 %448 }
  0xce   :  { %v481_v28 = vsel %vm478_vm0, %v9432_v25, %v447_v3  ;;  %v482_v29 = vsel %vm478_vm0, %v447_v3, %v9560_v21  ;;  %v9660_v3 = vld [vmem:[%s13860_s6 + $0x80] sm:$0xff] }
  0xcf   :  { %724 = vrot.lane.b32.xlu0 %v9267_v8, %s9035_s7  ;;  %726 = vrot.lane.b32.xlu1 %v9449_v34, %s9035_s7  ;;  %v7530_v2 = vpack.c.bf16 %v482_v29, %v349_v26  ;;  %v7532_v30 = vpack.c.bf16 %v481_v28, %v348_v23 }
  0xd1   :  { %v580_v31 = vpop.permute.xlu0 %579  ;;  %v9570_v32 = vpop.permute.xlu1 %581  ;;  %7531 = vmatprep.subr.bf16.mxu1 %v7530_v2 }
  0xd2   :  { %v614_v33 = vsel %vm611_vm3, %v9461_v37, %v580_v31  ;;  %v615_v25 = vsel %vm611_vm3, %v580_v31, %v9570_v32  ;;  %7533 = vmatpush1.bf16.msra.mxu1 %v7532_v30 }
  0xd3   :  { %595 = vrot.lane.b32.xlu0 %v9487_v46, %s9034_s3  ;;  %597 = vrot.lane.b32.xlu1 %v9492_v47, %s9034_s3 }
  0xd5   :  { %v713_v38 = vpop.permute.xlu0 %712  ;;  %v9580_v39 = vpop.permute.xlu1 %714 }
  0xd6   :  { %v747_v42 = vsel %vm744_vm4, %v9475_v41, %v713_v38  ;;  %v748_v43 = vsel %vm744_vm4, %v713_v38, %v9580_v39 }
  0xd7   :  { %728 = vrot.lane.b32.xlu0 %v9487_v46, %s9035_s7  ;;  %730 = vrot.lane.b32.xlu1 %v9492_v47, %s9035_s7  ;;  %v7534_v37 = vpack.c.bf16 %v748_v43, %v615_v25  ;;  %v7536_v44 = vpack.c.bf16 %v747_v42, %v614_v33 }
  0xd9   :  { %v846_v45 = vpop.permute.xlu0 %845  ;;  %v9590_v48 = vpop.permute.xlu1 %847  ;;  %7535 = vmatprep.subr.bf16.mxu1 %v7534_v37 }
  0xda   :  { %v880_v49 = vsel %vm877_vm5, %v9499_v52, %v846_v45  ;;  %v881_v41 = vsel %vm877_vm5, %v846_v45, %v9590_v48  ;;  %7537 = vmatpush1.bf16.msra.mxu1 %v7536_v44 }
  0xdb   :  { %857 = vrot.lane.b32.xlu0 %v9267_v8, %s13823_s18  ;;  %859 = vrot.lane.b32.xlu1 %v9449_v34, %s13823_s18 }
  0xdd   :  { %v979_v50 = vpop.permute.xlu0 %978  ;;  %v9600_v51 = vpop.permute.xlu1 %980 }
  0xde   :  { %v1013_v53 = vsel %vm1010_vm6, %v9507_v55, %v979_v50  ;;  %v1014_v54 = vsel %vm1010_vm6, %v979_v50, %v9600_v51 }
  0xdf   :  { %990 = vrot.lane.b32.xlu0 %v9267_v8, %s9037_s1  ;;  %992 = vrot.lane.b32.xlu1 %v9449_v34, %s9037_s1  ;;  %v7538_v52 = vpack.c.bf16 %v1014_v54, %v881_v41  ;;  %v7540_v56 = vpack.c.bf16 %v1013_v53, %v880_v49 }
  0xe1   :  { %v185_v58 = vpop.permute.xlu0 %184  ;;  %v187_v59 = vpop.permute.xlu1 %186  ;;  %7539 = vmatprep.subr.bf16.mxu1 %v7538_v52 }
  0xe2   :  { %v217_v55 = vsel %vm212_vm1, %v9523_v1, %v185_v58  ;;  %v218_v60 = vsel %vm212_vm1, %v185_v58, %v187_v59  ;;  %7541 = vmatpush1.bf16.msra.mxu1 %v7540_v56 }
  0xe3   :  { %861 = vrot.lane.b32.xlu0 %v9487_v46, %s13823_s18  ;;  %863 = vrot.lane.b32.xlu1 %v9492_v47, %s13823_s18  ;;  %v7542_v61 = vpack.c.bf16 %v218_v60, %v9248_v5  ;;  %v7544_v62 = vpack.c.bf16 %v217_v55, %v9243_v4  ;;  %v9636_v4 = vld [vmem:[%s13860_s6 + $0x70] sm:$0xff] }
  0xe4   :  { %v9641_v5 = vld [vmem:[%s13860_s6 + $0x70] sm:$0xff] }
  0xe5   :  { %v189_v63 = vpop.permute.xlu0 %188  ;;  %v9624_v0 = vpop.permute.xlu1 %190  ;;  %7543 = vmatprep.subr.bf16.mxu0 %v7542_v61 }
  0xe6   :  { %v219_v13 = vsel %vm212_vm1, %v187_v59, %v189_v63  ;;  %v220_v1 = vsel %vm212_vm1, %v189_v63, %v9624_v0  ;;  %7545 = vmatpush1.bf16.msra.mxu0 %v7544_v62 }
  0xe7   :  { %994 = vrot.lane.b32.xlu0 %v9487_v46, %s9037_s1  ;;  %996 = vrot.lane.b32.xlu1 %v9492_v47, %s9037_s1  ;;  %v7560_v25 = vpack.c.bf16 %v219_v13, %v9253_v6 }
  0xe9   :  { %v318_v14 = vpop.permute.xlu0 %317  ;;  %v320_v16 = vpop.permute.xlu1 %319 }
  0xea   :  { %v350_v11 = vsel %vm345_vm2, %v9546_v22, %v318_v14  ;;  %v351_v17 = vsel %vm345_vm2, %v318_v14, %v320_v16 }
  0xeb   :  { %200 = vrot.lane.b32.xlu0 %v9350_v10, %s9031_s28  ;;  %202 = vrot.lane.b32.xlu1 %v9636_v4, %s9031_s28 }
  0xed   :  { %v451_v19 = vpop.permute.xlu0 %450  ;;  %v453_v20 = vpop.permute.xlu1 %452 }
  0xee   :  { %v483_v23 = vsel %vm478_vm0, %v9560_v21, %v451_v19  ;;  %v484_v26 = vsel %vm478_vm0, %v451_v19, %v453_v20 }
  0xef   :  { %1123 = vrot.lane.b32.xlu0 %v9267_v8, %s9039_s14  ;;  %1125 = vrot.lane.b32.xlu1 %v9449_v34, %s9039_s14  ;;  %v7546_v22 = vpack.c.bf16 %v484_v26, %v351_v17  ;;  %v7548_v27 = vpack.c.bf16 %v483_v23, %v350_v11  ;;  %v7558_v34 = vpack.c.bf16 %v220_v1, %v9258_v7 }
  0xf1   :  { %v1112_v28 = vpop.permute.xlu0 %1111  ;;  %v9662_v29 = vpop.permute.xlu1 %1113  ;;  %7547 = vmatprep.subr.bf16.mxu0 %v7546_v22 }
  0xf2   :  { %v1146_v21 = vsel %vm1143_vm7, %v9531_v15, %v1112_v28  ;;  %v1147_v2 = vsel %vm1143_vm7, %v1112_v28, %v9662_v29  ;;  %7549 = vmatpush1.bf16.msra.mxu0 %v7548_v27 }
  0xf3   :  { %204 = vrot.lane.b32.xlu0 %v9369_v12, %s9031_s28  ;;  %206 = vrot.lane.b32.xlu1 %v9660_v3, %s9031_s28 }
  0xf4   :  { %1463 = vmatprep.subr.mxu1 %v1147_v2 }
  0xf5   :  { %v322_v30 = vpop.permute.xlu0 %321  ;;  %v9673_v31 = vpop.permute.xlu1 %323  ;;  %1464 = vmatpush1.msra.mxu1 %v1146_v21 }
  0xf6   :  { %v352_v33 = vsel %vm345_vm2, %v320_v16, %v322_v30  ;;  %v353_v15 = vsel %vm345_vm2, %v322_v30, %v9673_v31  ;;  %7559 = vmatprep.subr.bf16.mxu1 %v7558_v34  ;;  %6853 = vmatmul.mubr.msk.f32.vlgmr.msra.gmra.mrb[2].mxu1 %vm1372_vm8, %v9543_v18 }
  0xf7   :  { %333 = vrot.lane.b32.xlu0 %v9350_v10, %s9032_s10  ;;  %335 = vrot.lane.b32.xlu1 %v9636_v4, %s9032_s10 }
  0xf8   :  { %7561 = vmatpush1.bf16.msra.mxu1 %v7560_v25  ;;  %1653 = vmatprep.mubr.f32.mxu1 %v9038_v9 }
  0xf9   :  { %v455_v7 = vpop.permute.xlu0 %454  ;;  %v9686_v38 = vpop.permute.xlu1 %456 }
  0xfa   :  { %v485_v42 = vsel %vm478_vm0, %v453_v20, %v455_v7  ;;  %v486_v43 = vsel %vm478_vm0, %v455_v7, %v9686_v38 }
  0xfb   :  { %466 = vrot.lane.b32.xlu0 %v9350_v10, %s9033_s27  ;;  %468 = vrot.lane.b32.xlu1 %v9636_v4, %s9033_s27  ;;  %v7562_v6 = vpack.c.bf16 %v486_v43, %v353_v15  ;;  %v7564_v37 = vpack.c.bf16 %v485_v42, %v352_v33  ;;  %v9769_v43 = vld [vmem:[%s13860_s6 + $0x90] sm:$0xff] }
  0xfc   :  { %135 = vst.msk [vmem:[#allocation2 + $0x90] sm:$0xff] %vm134_vm9, %v9769_v43 }
  0xfd   :  { %v584_v44 = vpop.permute.xlu0 %583  ;;  %v586_v45 = vpop.permute.xlu1 %585  ;;  %7563 = vmatprep.subr.bf16.mxu1 %v7562_v6  ;;  %v9774_v6 = vld [vmem:[%s13860_s6 + $0x80] sm:$0xff]  ;;  %s9043_s6 = smov 124  }
  0xfe   :  { %v616_v49 = vsel %vm611_vm3, %v9570_v32, %v584_v44  ;;  %v617_v41 = vsel %vm611_vm3, %v584_v44, %v586_v45  ;;  %7565 = vmatpush1.bf16.msra.mxu1 %v7564_v37 }
  0xff   :  { %1127 = vrot.lane.b32.xlu0 %v9487_v46, %s9039_s14  ;;  %1129 = vrot.lane.b32.xlu1 %v9492_v47, %s9039_s14 }
 0x101   :  { %v717_v50 = vpop.permute.xlu0 %716  ;;  %v719_v53 = vpop.permute.xlu1 %718 }
 0x102   :  { %v749_v54 = vsel %vm744_vm4, %v9580_v39, %v717_v50  ;;  %v750_v52 = vsel %vm744_vm4, %v717_v50, %v719_v53 }
 0x103   :  { %337 = vrot.lane.b32.xlu0 %v9369_v12, %s9032_s10  ;;  %339 = vrot.lane.b32.xlu1 %v9660_v3, %s9032_s10  ;;  %v7550_v32 = vpack.c.bf16 %v750_v52, %v617_v41  ;;  %v7552_v56 = vpack.c.bf16 %v749_v54, %v616_v49 }
 0x105   :  { %v588_v58 = vpop.permute.xlu0 %587  ;;  %v9709_v46 = vpop.permute.xlu1 %589  ;;  %7551 = vmatprep.subr.bf16.mxu0 %v7550_v32 }
 0x106   :  { %v618_v47 = vsel %vm611_vm3, %v586_v45, %v588_v58  ;;  %v619_v59 = vsel %vm611_vm3, %v588_v58, %v9709_v46  ;;  %7553 = vmatpush1.bf16.msra.mxu0 %v7552_v56 }
 0x107   :  { %470 = vrot.lane.b32.xlu0 %v9369_v12, %s9033_s27  ;;  %472 = vrot.lane.b32.xlu1 %v9660_v3, %s9033_s27 }
 0x109   :  { %v721_v39 = vpop.permute.xlu0 %720  ;;  %v9718_v55 = vpop.permute.xlu1 %722 }
 0x10a   :  { %v751_v60 = vsel %vm744_vm4, %v719_v53, %v721_v39  ;;  %v752_v61 = vsel %vm744_vm4, %v721_v39, %v9718_v55 }
 0x10b   :  { %599 = vrot.lane.b32.xlu0 %v9350_v10, %s9034_s3  ;;  %601 = vrot.lane.b32.xlu1 %v9636_v4, %s9034_s3  ;;  %v7566_v62 = vpack.c.bf16 %v752_v61, %v619_v59  ;;  %v7568_v63 = vpack.c.bf16 %v751_v60, %v618_v47 }
 0x10d   :  { %v850_v13 = vpop.permute.xlu0 %849  ;;  %v852_v1 = vpop.permute.xlu1 %851  ;;  %7567 = vmatprep.subr.bf16.mxu1 %v7566_v62 }
 0x10e   :  { %v882_v14 = vsel %vm877_vm5, %v9590_v48, %v850_v13  ;;  %v883_v16 = vsel %vm877_vm5, %v850_v13, %v852_v1  ;;  %7569 = vmatpush1.bf16.msra.mxu1 %v7568_v63 }
 0x10f   :  { %732 = vrot.lane.b32.xlu0 %v9350_v10, %s9035_s7  ;;  %734 = vrot.lane.b32.xlu1 %v9636_v4, %s9035_s7 }
 0x111   :  { %v983_v11 = vpop.permute.xlu0 %982  ;;  %v985_v17 = vpop.permute.xlu1 %984 }
 0x112   :  { %v1015_v19 = vsel %vm1010_vm6, %v9600_v51, %v983_v11  ;;  %v1016_v20 = vsel %vm1010_vm6, %v983_v11, %v985_v17 }
 0x113   :  { %603 = vrot.lane.b32.xlu0 %v9369_v12, %s9034_s3  ;;  %605 = vrot.lane.b32.xlu1 %v9660_v3, %s9034_s3  ;;  %v7554_v48 = vpack.c.bf16 %v1016_v20, %v883_v16  ;;  %v7556_v23 = vpack.c.bf16 %v1015_v19, %v882_v14 }
 0x115   :  { %v854_v26 = vpop.permute.xlu0 %853  ;;  %v9741_v22 = vpop.permute.xlu1 %855  ;;  %7555 = vmatprep.subr.bf16.mxu0 %v7554_v48 }
 0x116   :  { %v884_v27 = vsel %vm877_vm5, %v852_v1, %v854_v26  ;;  %v885_v28 = vsel %vm877_vm5, %v854_v26, %v9741_v22  ;;  %7557 = vmatpush1.bf16.msra.mxu0 %v7556_v23 }
 0x117   :  { %736 = vrot.lane.b32.xlu0 %v9369_v12, %s9035_s7  ;;  %738 = vrot.lane.b32.xlu1 %v9660_v3, %s9035_s7 }
 0x119   :  { %v987_v51 = vpop.permute.xlu0 %986  ;;  %v9750_v21 = vpop.permute.xlu1 %988 }
 0x11a   :  { %v1017_v2 = vsel %vm1010_vm6, %v985_v17, %v987_v51  ;;  %v1018_v34 = vsel %vm1010_vm6, %v987_v51, %v9750_v21 }
 0x11b   :  { %865 = vrot.lane.b32.xlu0 %v9350_v10, %s13823_s18  ;;  %867 = vrot.lane.b32.xlu1 %v9636_v4, %s13823_s18  ;;  %v7570_v30 = vpack.c.bf16 %v1018_v34, %v885_v28  ;;  %v7572_v33 = vpack.c.bf16 %v1017_v2, %v884_v27 }
 0x11d   :  { %v193_v15 = vpop.permute.xlu0 %192  ;;  %v195_v25 = vpop.permute.xlu1 %194  ;;  %7571 = vmatprep.subr.bf16.mxu1 %v7570_v30 }
 0x11e   :  { %v221_v7 = vsel %vm212_vm1, %v9624_v0, %v193_v15  ;;  %v222_v42 = vsel %vm212_vm1, %v193_v15, %v195_v25  ;;  %7573 = vmatpush1.bf16.msra.mxu1 %v7572_v33 }
 0x11f   :  { %998 = vrot.lane.b32.xlu0 %v9350_v10, %s9037_s1  ;;  %1000 = vrot.lane.b32.xlu1 %v9636_v4, %s9037_s1  ;;  %v7574_v49 = vpack.c.bf16 %v222_v42, %v9267_v8  ;;  %v7576_v54 = vpack.c.bf16 %v221_v7, %v9430_v24 }
 0x121   :  { %v1116_v0 = vpop.permute.xlu0 %1115  ;;  %v1118_v37 = vpop.permute.xlu1 %1117 }
 0x122   :  { %v1148_v44 = vsel %vm1143_vm7, %v9662_v29, %v1116_v0  ;;  %v1149_v45 = vsel %vm1143_vm7, %v1116_v0, %v1118_v37 }
 0x123   :  { %869 = vrot.lane.b32.xlu0 %v9369_v12, %s13823_s18  ;;  %871 = vrot.lane.b32.xlu1 %v9660_v3, %s13823_s18 }
 0x124   :  { %1534 = vmatprep.subr.mxu0 %v1149_v45 }
 0x125   :  { %v197_v41 = vpop.permute.xlu0 %196  ;;  %v9786_v50 = vpop.permute.xlu1 %198  ;;  %1535 = vmatpush1.msra.mxu0 %v1148_v44 }
 0x126   :  { %v223_v53 = vsel %vm212_vm1, %v195_v25, %v197_v41  ;;  %v224_v29 = vsel %vm212_vm1, %v197_v41, %v9786_v50  ;;  %7575 = vmatprep.subr.bf16.mxu0 %v7574_v49  ;;  %6854 = vmatmul.mubr.msk.f32.vlgmr.msra.gmra.mrb[0].mxu0 %vm1372_vm8, %v9543_v18 }
 0x127   :  { %1002 = vrot.lane.b32.xlu0 %v9369_v12, %s9037_s1  ;;  %1004 = vrot.lane.b32.xlu1 %v9660_v3, %s9037_s1  ;;  %v7592_v14 = vpack.c.bf16 %v223_v53, %v9459_v36 }
 0x128   :  { %7577 = vmatpush1.bf16.msra.mxu0 %v7576_v54  ;;  %1724 = vmatprep.mubr.f32.mxu0 %v9038_v9 }
 0x129   :  { %v326_v8 = vpop.permute.xlu0 %325  ;;  %v328_v52 = vpop.permute.xlu1 %327 }
 0x12a   :  { %v354_v32 = vsel %vm345_vm2, %v9673_v31, %v326_v8  ;;  %v355_v56 = vsel %vm345_vm2, %v326_v8, %v328_v52 }
 0x12b   :  { %208 = vrot.lane.b32.xlu0 %v9472_v40, %s9031_s28  ;;  %210 = vrot.lane.b32.xlu1 %v9769_v43, %s9031_s28 }
 0x12d   :  { %v459_v24 = vpop.permute.xlu0 %458  ;;  %v461_v58 = vpop.permute.xlu1 %460 }
 0x12e   :  { %v487_v47 = vsel %vm478_vm0, %v9686_v38, %v459_v24  ;;  %v488_v59 = vsel %vm478_vm0, %v459_v24, %v461_v58 }
 0x12f   :  { %1131 = vrot.lane.b32.xlu0 %v9350_v10, %s9039_s14  ;;  %1133 = vrot.lane.b32.xlu1 %v9636_v4, %s9039_s14  ;;  %v7578_v31 = vpack.c.bf16 %v488_v59, %v355_v56  ;;  %v7580_v39 = vpack.c.bf16 %v487_v47, %v354_v32  ;;  %v7590_v10 = vpack.c.bf16 %v224_v29, %v9454_v35 }
 0x131   :  { %v1120_v60 = vpop.permute.xlu0 %1119  ;;  %v9813_v61 = vpop.permute.xlu1 %1121  ;;  %7579 = vmatprep.subr.bf16.mxu0 %v7578_v31 }
 0x132   :  { %v1150_v62 = vsel %vm1143_vm7, %v1118_v37, %v1120_v60  ;;  %v1151_v63 = vsel %vm1143_vm7, %v1120_v60, %v9813_v61  ;;  %7581 = vmatpush1.bf16.msra.mxu0 %v7580_v39 }
 0x133   :  { %341 = vrot.lane.b32.xlu0 %v9472_v40, %s9032_s10  ;;  %343 = vrot.lane.b32.xlu1 %v9769_v43, %s9032_s10 }
 0x134   :  { %1605 = vmatprep.subr.mxu1 %v1151_v63 }
 0x135   :  { %v330_v4 = vpop.permute.xlu0 %329  ;;  %v9823_v38 = vpop.permute.xlu1 %331  ;;  %1606 = vmatpush1.msra.mxu1 %v1150_v62 }
 0x136   :  { %v356_v13 = vsel %vm345_vm2, %v328_v52, %v330_v4  ;;  %v357_v1 = vsel %vm345_vm2, %v330_v4, %v9823_v38  ;;  %7591 = vmatprep.subr.bf16.mxu1 %v7590_v10  ;;  %6855 = vmatmul.mubr.msk.f32.vlgmr.msra.gmra.mrb[4].mxu1 %vm1372_vm8, %v9543_v18 }
 0x137   :  { %474 = vrot.lane.b32.xlu0 %v9472_v40, %s9033_s27  ;;  %476 = vrot.lane.b32.xlu1 %v9769_v43, %s9033_s27 }
 0x138   :  { %7593 = vmatpush1.bf16.msra.mxu1 %v7592_v14  ;;  %1795 = vmatprep.mubr.f32.mxu1 %v9038_v9 }
 0x139   :  { %v463_v35 = vpop.permute.xlu0 %462  ;;  %v9836_v16 = vpop.permute.xlu1 %464 }
 0x13a   :  { %v489_v11 = vsel %vm478_vm0, %v461_v58, %v463_v35  ;;  %v490_v17 = vsel %vm478_vm0, %v463_v35, %v9836_v16 }
 0x13b   :  { %1135 = vrot.lane.b32.xlu0 %v9369_v12, %s9039_s14  ;;  %1137 = vrot.lane.b32.xlu1 %v9660_v3, %s9039_s14  ;;  %v7594_v36 = vpack.c.bf16 %v490_v17, %v357_v1  ;;  %v7596_v19 = vpack.c.bf16 %v489_v11, %v356_v13  ;;  %v8996_v13 = vld [vmem:[#allocation2 + $0x68] sm:$0xff] }
 0x13c   :  { %v9911_v17 = vld [vmem:[#allocation6] sm:$0xff] }
 0x13d   :  { %v592_v20 = vpop.permute.xlu0 %591  ;;  %v594_v48 = vpop.permute.xlu1 %593  ;;  %7595 = vmatprep.subr.bf16.mxu1 %v7594_v36 }
 0x13e   :  { %v620_v9 = vsel %vm611_vm3, %v9709_v46, %v592_v20  ;;  %v621_v23 = vsel %vm611_vm3, %v592_v20, %v594_v48  ;;  %7597 = vmatpush1.bf16.msra.mxu1 %v7596_v19 }
 0x13f   :  { %607 = vrot.lane.b32.xlu0 %v9472_v40, %s9034_s3  ;;  %609 = vrot.lane.b32.xlu1 %v9769_v43, %s9034_s3  ;;  %s13872_s3 = sld [smem:[#allocation181_spill]] }
 0x141   :  { %v725_v12 = vpop.permute.xlu0 %724  ;;  %v727_v26 = vpop.permute.xlu1 %726 }
 0x142   :  { %v753_v3 = vsel %vm744_vm4, %v9718_v55, %v725_v12  ;;  %v754_v27 = vsel %vm744_vm4, %v725_v12, %v727_v26 }
 0x143   :  { %740 = vrot.lane.b32.xlu0 %v9472_v40, %s9035_s7  ;;  %742 = vrot.lane.b32.xlu1 %v9769_v43, %s9035_s7  ;;  %v7582_v46 = vpack.c.bf16 %v754_v27, %v621_v23  ;;  %v7584_v28 = vpack.c.bf16 %v753_v3, %v620_v9 }
 0x145   :  { %v596_v51 = vpop.permute.xlu0 %595  ;;  %v9859_v2 = vpop.permute.xlu1 %597  ;;  %7583 = vmatprep.subr.bf16.mxu0 %v7582_v46 }
 0x146   :  { %v622_v34 = vsel %vm611_vm3, %v594_v48, %v596_v51  ;;  %v623_v30 = vsel %vm611_vm3, %v596_v51, %v9859_v2  ;;  %7585 = vmatpush1.bf16.msra.mxu0 %v7584_v28  ;;  %v8998_v51 = vld [vmem:[#allocation2 + $0x78] sm:$0xff] }
 0x147   :  { %873 = vrot.lane.b32.xlu0 %v9472_v40, %s13823_s18  ;;  %875 = vrot.lane.b32.xlu1 %v9769_v43, %s13823_s18 }
 0x149   :  { %v729_v55 = vpop.permute.xlu0 %728  ;;  %v9868_v33 = vpop.permute.xlu1 %730 }
 0x14a   :  { %v755_v15 = vsel %vm744_vm4, %v727_v26, %v729_v55  ;;  %v756_v25 = vsel %vm744_vm4, %v729_v55, %v9868_v33 }
 0x14b   :  { %1006 = vrot.lane.b32.xlu0 %v9472_v40, %s9037_s1  ;;  %1008 = vrot.lane.b32.xlu1 %v9769_v43, %s9037_s1  ;;  %v7598_v7 = vpack.c.bf16 %v756_v25, %v623_v30  ;;  %v7600_v42 = vpack.c.bf16 %v755_v15, %v622_v34  ;;  %s13863_s1 = sld [smem:[#allocation182_spill]] }
 0x14d   :  { %v858_v0 = vpop.permute.xlu0 %857  ;;  %v860_v37 = vpop.permute.xlu1 %859  ;;  %7599 = vmatprep.subr.bf16.mxu1 %v7598_v7 }
 0x14e   :  { %v886_v44 = vsel %vm877_vm5, %v9741_v22, %v858_v0  ;;  %v887_v45 = vsel %vm877_vm5, %v858_v0, %v860_v37  ;;  %7601 = vmatpush1.bf16.msra.mxu1 %v7600_v42 }
 0x14f   :  { %1139 = vrot.lane.b32.xlu0 %v9472_v40, %s9039_s14  ;;  %1141 = vrot.lane.b32.xlu1 %v9769_v43, %s9039_s14  ;;  %s9053_s14 = smov 118  }
 0x151   :  { %v991_v49 = vpop.permute.xlu0 %990  ;;  %v993_v41 = vpop.permute.xlu1 %992 }
 0x152   :  { %v1019_v53 = vsel %vm1010_vm6, %v9750_v21, %v991_v49  ;;  %v1020_v29 = vsel %vm1010_vm6, %v991_v49, %v993_v41 }
 0x153   :  { %v7586_v54 = vpack.c.bf16 %v1020_v29, %v887_v45  ;;  %v7588_v8 = vpack.c.bf16 %v1019_v53, %v886_v44 }
 0x155   :  { %v862_v52 = vpop.permute.xlu0 %861  ;;  %v9887_v22 = vpop.permute.xlu1 %863  ;;  %7587 = vmatprep.subr.bf16.mxu0 %v7586_v54 }
 0x156   :  { %v888_v32 = vsel %vm877_vm5, %v860_v37, %v862_v52  ;;  %v889_v40 = vsel %vm877_vm5, %v862_v52, %v9887_v22  ;;  %7589 = vmatpush1.bf16.msra.mxu0 %v7588_v8 }
 0x159   :  { %v995_v43 = vpop.permute.xlu0 %994  ;;  %v9892_v56 = vpop.permute.xlu1 %996 }
 0x15a   :  { %v1021_v24 = vsel %vm1010_vm6, %v993_v41, %v995_v43  ;;  %v1022_v21 = vsel %vm1010_vm6, %v995_v43, %v9892_v56 }
 0x15b   :  { %v7602_v58 = vpack.c.bf16 %v1022_v21, %v889_v40  ;;  %v7604_v47 = vpack.c.bf16 %v1021_v24, %v888_v32 }
 0x15d   :  { %v201_v59 = vpop.permute.xlu0 %200  ;;  %v203_v31 = vpop.permute.xlu1 %202  ;;  %7603 = vmatprep.subr.bf16.mxu1 %v7602_v58 }
 0x15e   :  { %v225_v39 = vsel %vm212_vm1, %v9786_v50, %v201_v59  ;;  %v226_v60 = vsel %vm212_vm1, %v201_v59, %v203_v31  ;;  %7605 = vmatpush1.bf16.msra.mxu1 %v7604_v47 }
 0x15f   :  { %v7606_v1 = vpack.c.bf16 %v226_v60, %v8996_v13  ;;  %v7608_v14 = vpack.c.bf16 %v225_v39, %v9613_v57 }
 0x161   :  { %v1124_v62 = vpop.permute.xlu0 %1123  ;;  %v1126_v63 = vpop.permute.xlu1 %1125 }
 0x162   :  { %v1152_v10 = vsel %vm1143_vm7, %v9813_v61, %v1124_v62  ;;  %v1153_v4 = vsel %vm1143_vm7, %v1124_v62, %v1126_v63 }
 0x163   :  { %1676 = vmatprep.subr.mxu0 %v1153_v4 }
 0x164   :  { %1677 = vmatpush1.msra.mxu0 %v1152_v10  ;;  %v2091_v10 = vlaneseq }
 0x165   :  { %v205_v35 = vpop.permute.xlu0 %204  ;;  %v9904_v11 = vpop.permute.xlu1 %206  ;;  %7607 = vmatprep.subr.bf16.mxu0 %v7606_v1  ;;  %6856 = vmatmul.mubr.msk.f32.vlgmr.msra.gmra.mrb[2].mxu0 %vm1372_vm8, %v9543_v18 }
 0x166   :  { %v227_v50 = vsel %vm212_vm1, %v203_v31, %v205_v35  ;;  %v228_v61 = vsel %vm212_vm1, %v205_v35, %v9904_v11  ;;  %7609 = vmatpush1.bf16.msra.mxu0 %v7608_v14  ;;  %1866 = vmatprep.mubr.f32.mxu0 %v9911_v17 }
 0x167   :  { %v7622_v34 = vpack.c.bf16 %v228_v61, %v8998_v51  ;;  %v9961_v61 = vshrl.u32 %v2091_v10, 7 }
 0x169   :  { %v334_v36 = vpop.permute.xlu0 %333  ;;  %v336_v19 = vpop.permute.xlu1 %335 }
 0x16a   :  { %v358_v57 = vsel %vm345_vm2, %v9823_v38, %v334_v36  ;;  %v359_v20 = vsel %vm345_vm2, %v334_v36, %v336_v19 }
 0x16d   :  { %v467_v48 = vpop.permute.xlu0 %466  ;;  %v469_v9 = vpop.permute.xlu1 %468 }
 0x16e   :  { %v491_v23 = vsel %vm478_vm0, %v9836_v16, %v467_v48  ;;  %v492_v12 = vsel %vm478_vm0, %v467_v48, %v469_v9  ;;  %v7624_v16 = vpack.c.bf16 %v227_v50, %v9641_v5  ;;  %v9977_v48 = vsub.s32 1, %v9961_v61 }
 0x16f   :  { %v7610_v26 = vpack.c.bf16 %v492_v12, %v359_v20  ;;  %v7612_v3 = vpack.c.bf16 %v491_v23, %v358_v57  ;;  %v9969_v20 = vsub.s32 0, %v9961_v61 }
 0x170   :  { %13864 = vst [vmem:[#allocation13_spill] sm:$0xff] %v9977_v48 }
 0x171   :  { %v1128_v27 = vpop.permute.xlu0 %1127  ;;  %v9920_v46 = vpop.permute.xlu1 %1129  ;;  %7611 = vmatprep.subr.bf16.mxu0 %v7610_v26  ;;  %13862 = vst [vmem:[#allocation12_spill] sm:$0xff] %v9969_v20 }
 0x172   :  { %v1154_v28 = vsel %vm1143_vm7, %v1126_v63, %v1128_v27  ;;  %v1155_v38 = vsel %vm1143_vm7, %v1128_v27, %v9920_v46  ;;  %7613 = vmatpush1.bf16.msra.mxu0 %v7612_v3 }
 0x173   :  { %1747 = vmatprep.subr.mxu1 %v1155_v38 }
 0x174   :  { %1748 = vmatpush1.msra.mxu1 %v1154_v28 }
 0x175   :  { %v338_v30 = vpop.permute.xlu0 %337  ;;  %v9926_v55 = vpop.permute.xlu1 %339  ;;  %7623 = vmatprep.subr.bf16.mxu1 %v7622_v34  ;;  %6857 = vmatmul.mubr.msk.f32.vlgmr.msra.gmra.mrb[6].mxu1 %vm1372_vm8, %v9543_v18 }
 0x176   :  { %v360_v15 = vsel %vm345_vm2, %v336_v19, %v338_v30  ;;  %v361_v25 = vsel %vm345_vm2, %v338_v30, %v9926_v55  ;;  %7625 = vmatpush1.bf16.msra.mxu1 %v7624_v16  ;;  %1937 = vmatprep.mubr.f32.mxu1 %v9911_v17 }
 0x179   :  { %v471_v7 = vpop.permute.xlu0 %470  ;;  %v9934_v42 = vpop.permute.xlu1 %472 }
 0x17a   :  { %v493_v5 = vsel %vm478_vm0, %v469_v9, %v471_v7  ;;  %v494_v0 = vsel %vm478_vm0, %v471_v7, %v9934_v42 }
 0x17b   :  { %v7626_v37 = vpack.c.bf16 %v494_v0, %v361_v25  ;;  %v7628_v44 = vpack.c.bf16 %v493_v5, %v360_v15 }
 0x17d   :  { %v600_v45 = vpop.permute.xlu0 %599  ;;  %v602_v18 = vpop.permute.xlu1 %601  ;;  %7627 = vmatprep.subr.bf16.mxu1 %v7626_v37 }
 0x17e   :  { %v624_v49 = vsel %vm611_vm3, %v9859_v2, %v600_v45  ;;  %v625_v41 = vsel %vm611_vm3, %v600_v45, %v602_v18  ;;  %7629 = vmatpush1.bf16.msra.mxu1 %v7628_v44 }
 0x181   :  { %v733_v53 = vpop.permute.xlu0 %732  ;;  %v735_v29 = vpop.permute.xlu1 %734 }
 0x182   :  { %v757_v54 = vsel %vm744_vm4, %v9868_v33, %v733_v53  ;;  %v758_v8 = vsel %vm744_vm4, %v733_v53, %v735_v29  ;;  %v8999_v53 = vld [vmem:[#allocation2 + $0x88] sm:$0xff] }
 0x183   :  { %v7614_v52 = vpack.c.bf16 %v758_v8, %v625_v41  ;;  %v7616_v32 = vpack.c.bf16 %v757_v54, %v624_v49 }
 0x185   :  { %v604_v40 = vpop.permute.xlu0 %603  ;;  %v9945_v43 = vpop.permute.xlu1 %605  ;;  %7615 = vmatprep.subr.bf16.mxu0 %v7614_v52 }
 0x186   :  { %v626_v24 = vsel %vm611_vm3, %v602_v18, %v604_v40  ;;  %v627_v2 = vsel %vm611_vm3, %v604_v40, %v9945_v43  ;;  %7617 = vmatpush1.bf16.msra.mxu0 %v7616_v32 }
 0x189   :  { %v737_v21 = vpop.permute.xlu0 %736  ;;  %v9950_v58 = vpop.permute.xlu1 %738 }
 0x18a   :  { %v759_v47 = vsel %vm744_vm4, %v735_v29, %v737_v21  ;;  %v760_v33 = vsel %vm744_vm4, %v737_v21, %v9950_v58 }
 0x18b   :  { %v7630_v59 = vpack.c.bf16 %v760_v33, %v627_v2  ;;  %v7632_v31 = vpack.c.bf16 %v759_v47, %v626_v24  ;;  %v10013_v24 = vld [vmem:[%s13861_s0] sm:$0xf]  ;;  %s14223_s0 = sld [smem:[#allocation184_spill]] }
 0x18d   :  { %v866_v39 = vpop.permute.xlu0 %865  ;;  %v868_v60 = vpop.permute.xlu1 %867  ;;  %7631 = vmatprep.subr.bf16.mxu1 %v7630_v59 }
 0x18e   :  { %v890_v62 = vsel %vm877_vm5, %v9887_v22, %v866_v39  ;;  %v891_v63 = vsel %vm877_vm5, %v866_v39, %v868_v60  ;;  %7633 = vmatpush1.bf16.msra.mxu1 %v7632_v31 }
 0x191   :  { %v999_v4 = vpop.permute.xlu0 %998  ;;  %v1001_v13 = vpop.permute.xlu1 %1000 }
 0x192   :  { %v1023_v1 = vsel %vm1010_vm6, %v9892_v56, %v999_v4  ;;  %v1024_v14 = vsel %vm1010_vm6, %v999_v4, %v1001_v13  ;;  %v9974_v56 = vld [vmem:[%s13863_s1] sm:$0xff] }
 0x193   :  { %v7618_v35 = vpack.c.bf16 %v1024_v14, %v891_v63  ;;  %v7620_v50 = vpack.c.bf16 %v1023_v1, %v890_v62  ;;  %v2094_v28 = vrot.slane %v9974_v56, %v9969_v20  ;;  %v2098_v38 = vrot.slane %v9974_v56, %v9977_v48  ;;  %v1219_v63 = vld [vmem:[#allocation2 + $0x90] sm:$0xff] }
 0x195   :  { %v870_v36 = vpop.permute.xlu0 %869  ;;  %v9963_v19 = vpop.permute.xlu1 %871  ;;  %7619 = vmatprep.subr.bf16.mxu0 %v7618_v35  ;;  %v13659_v35 = vmov 0.0|0.0  }
 0x196   :  { %v892_v22 = vsel %vm877_vm5, %v868_v60, %v870_v36  ;;  %v893_v57 = vsel %vm877_vm5, %v870_v36, %v9963_v19  ;;  %7621 = vmatpush1.bf16.msra.mxu0 %v7620_v50 }
 0x199   :  { %v1003_v9 = vpop.permute.xlu0 %1002  ;;  %v9979_v23 = vpop.permute.xlu1 %1004 }
 0x19a   :  { %v1025_v12 = vsel %vm1010_vm6, %v1001_v13, %v1003_v9  ;;  %v1026_v26 = vsel %vm1010_vm6, %v1003_v9, %v9979_v23 }
 0x19b   :  { %v7634_v3 = vpack.c.bf16 %v1026_v26, %v893_v57  ;;  %v7636_v27 = vpack.c.bf16 %v1025_v12, %v892_v22 }
 0x19d   :  { %v209_v51 = vpop.permute.xlu0 %208  ;;  %v211_v34 = vpop.permute.xlu1 %210  ;;  %7635 = vmatprep.subr.bf16.mxu1 %v7634_v3 }
 0x19e   :  { %v229_v16 = vsel %vm212_vm1, %v9904_v11, %v209_v51  ;;  %v230_v30 = vsel %vm212_vm1, %v209_v51, %v211_v34  ;;  %268 = vst.msk [vmem:[#allocation2 + $0x128] sm:$0xff] %vm134_vm9, %v211_v34  ;;  %7637 = vmatpush1.bf16.msra.mxu1 %v7636_v27  ;;  %v9992_v15 = vpop.f32.mrb[0].mxu1 }
 0x19f   :  { %v2186_v25 = vmul.f32 %v2094_v28, %v9992_v15  ;;  %v9995_v7 = vpop.f32.mrb[1].mxu1  ;;  %v7638_v29 = vpack.c.bf16 %v230_v30, %v8999_v53  ;;  %v7640_v52 = vpack.c.bf16 %v229_v16, %v9774_v6  ;;  %v10061_v53 = vsub.s32 3, %v9961_v61 }
 0x1a0   :  { %v2187_v5 = vmul.f32 %v2098_v38, %v9995_v7 }
 0x1a1   :  { %v1132_v0 = vpop.permute.xlu0 %1131  ;;  %v1134_v37 = vpop.permute.xlu1 %1133  ;;  %v2206_v44 = vsel %vm2205_vm10, %v2186_v25, 0.0  ;;  %v2247_v11 = vmul.f32 %v2186_v25, %v9992_v15  ;;  %13866 = vst [vmem:[#allocation15_spill] sm:$0xff] %v10061_v53 }
 0x1a2   :  { %v1156_v45 = vsel %vm1143_vm7, %v9920_v46, %v1132_v0  ;;  %v1157_v18 = vsel %vm1143_vm7, %v1132_v0, %v1134_v37  ;;  %v2207_v49 = vsel %vm2205_vm10, %v2187_v5, 0.0  ;;  %v2248_v41 = vmul.f32 %v2187_v5, %v9995_v7 }
 0x1a3   :  { %1818 = vmatprep.subr.mxu0 %v1157_v18  ;;  %v2266_v54 = vsel %vm2205_vm10, %v2247_v11, 0.0  ;;  %v10006_v8 = vadd.f32 %v2207_v49, %v2206_v44 }
 0x1a4   :  { %1819 = vmatpush1.msra.mxu0 %v1156_v45  ;;  %v2267_v32 = vsel %vm2205_vm10, %v2248_v41, 0.0 }
 0x1a5   :  { %v342_v40 = vpop.permute.xlu0 %341  ;;  %v344_v46 = vpop.permute.xlu1 %343  ;;  %6858 = vmatmul.mubr.msk.f32.vlgmr.msra.gmra.mrb[4].mxu0 %vm1372_vm8, %v10013_v24  ;;  %7639 = vmatprep.subr.bf16.mxu0 %v7638_v29  ;;  %v10017_v2 = vadd.f32 %v2267_v32, %v2266_v54  ;;  %v1238_v10 = vld [vmem:[#allocation2 + $0x128] sm:$0xff] }
 0x1a6   :  { %v362_v21 = vsel %vm345_vm2, %v9926_v55, %v342_v40  ;;  %v363_v6 = vsel %vm345_vm2, %v342_v40, %v344_v46  ;;  %401 = vst.msk [vmem:[#allocation2 + $0x1c0] sm:$0xff] %vm134_vm9, %v344_v46  ;;  %7641 = vmatpush1.bf16.msra.mxu0 %v7640_v52  ;;  %2008 = vmatprep.mubr.f32.mxu0 %v9911_v17 }
 0x1a7   :  { %v7655_v1 = vpack.c.bf16 %v1238_v10, %v1219_v63  ;;  %v2106_v40 = vrot.slane %v9974_v56, %v10061_v53 }
 0x1a9   :  { %v475_v47 = vpop.permute.xlu0 %474  ;;  %v477_v33 = vpop.permute.xlu1 %476 }
 0x1aa   :  { %v495_v59 = vsel %vm478_vm0, %v9934_v42, %v475_v47  ;;  %v496_v31 = vsel %vm478_vm0, %v475_v47, %v477_v33  ;;  %534 = vst.msk [vmem:[#allocation2 + $0x258] sm:$0xff] %vm134_vm9, %v477_v33 }
 0x1ab   :  { %v7642_v39 = vpack.c.bf16 %v496_v31, %v363_v6  ;;  %v7644_v60 = vpack.c.bf16 %v495_v59, %v362_v21 }
 0x1ad   :  { %v1136_v62 = vpop.permute.xlu0 %1135  ;;  %v1138_v55 = vpop.permute.xlu1 %1137  ;;  %7643 = vmatprep.subr.bf16.mxu0 %v7642_v39  ;;  %v1257_v57 = vld [vmem:[#allocation2 + $0x1c0] sm:$0xff] }
 0x1ae   :  { %v1158_v4 = vsel %vm1143_vm7, %v1134_v37, %v1136_v62  ;;  %v1159_v13 = vsel %vm1143_vm7, %v1136_v62, %v1138_v55  ;;  %7645 = vmatpush1.bf16.msra.mxu0 %v7644_v60 }
 0x1af   :  { %1889 = vmatprep.subr.mxu1 %v1159_v13  ;;  %v10087_v13 = vsub.s32 4, %v9961_v61 }
 0x1b0   :  { %1890 = vmatpush1.msra.mxu1 %v1158_v4 }
 0x1b1   :  { %v608_v42 = vpop.permute.xlu0 %607  ;;  %v610_v14 = vpop.permute.xlu1 %609  ;;  %6859 = vmatmul.mubr.msk.f32.vlgmr.msra.gmra.mrb[8].mxu1 %vm1372_vm8, %v10013_v24  ;;  %7654 = vmatprep.subr.bf16.mxu1 %v13659_v35  ;;  %v1276_v50 = vld [vmem:[#allocation2 + $0x258] sm:$0xff]  ;;  %13867 = vst [vmem:[#allocation16_spill] sm:$0xff] %v10087_v13 }
 0x1b2   :  { %v628_v36 = vsel %vm611_vm3, %v9945_v43, %v608_v42  ;;  %v629_v22 = vsel %vm611_vm3, %v608_v42, %v610_v14  ;;  %667 = vst.msk [vmem:[#allocation2 + $0x2f0] sm:$0xff] %vm134_vm9, %v610_v14  ;;  %7656 = vmatpush3.bf16.msra.mxu1 %v7655_v1  ;;  %7350 = vmatprep.mubr.msk.f32.mxu1 %vm9041_vm11, %v9911_v17  ;;  %v10090_v1 = vsub.s32 5, %v9961_v61  ;;  %vm3764_vm3 = vcmask 154624  }
 0x1b3   :  { %7657 = vmatprep.subr.bf16.mxu1 %v13659_v35  ;;  %v7658_v9 = vpack.c.bf16 %v1276_v50, %v1257_v57 }
 0x1b4   :  { %13868 = vst [vmem:[#allocation17_spill] sm:$0xff] %v10090_v1 }
 0x1b5   :  { %v741_v12 = vpop.permute.xlu0 %740  ;;  %v743_v26 = vpop.permute.xlu1 %742 }
 0x1b6   :  { %v761_v3 = vsel %vm744_vm4, %v9950_v58, %v741_v12  ;;  %v762_v43 = vsel %vm744_vm4, %v741_v12, %v743_v26  ;;  %800 = vst.msk [vmem:[#allocation2 + $0x388] sm:$0xff] %vm134_vm9, %v743_v26  ;;  %7659 = vmatpush3.bf16.msra.mxu1 %v7658_v9 }
 0x1b7   :  { %v7646_v27 = vpack.c.bf16 %v762_v43, %v629_v22  ;;  %7660 = vmatprep.subr.bf16.mxu1 %v13659_v35  ;;  %v7648_v28 = vpack.c.bf16 %v761_v3, %v628_v36 }
 0x1b9   :  { %v874_v38 = vpop.permute.xlu0 %873  ;;  %v876_v51 = vpop.permute.xlu1 %875  ;;  %7647 = vmatprep.subr.bf16.mxu0 %v7646_v27  ;;  %v1295_v25 = vld [vmem:[#allocation2 + $0x2f0] sm:$0xff] }
 0x1ba   :  { %v894_v34 = vsel %vm877_vm5, %v9963_v19, %v874_v38  ;;  %v895_v16 = vsel %vm877_vm5, %v874_v38, %v876_v51  ;;  %933 = vst.msk [vmem:[#allocation2 + $0x420] sm:$0xff] %vm134_vm9, %v876_v51  ;;  %7649 = vmatpush1.bf16.msra.mxu0 %v7648_v28  ;;  %v2117_v38 = vsub.s32 6, %v9961_v61  ;;  %v2121_v51 = vsub.s32 7, %v9961_v61 }
 0x1bd   :  { %v1007_v58 = vpop.permute.xlu0 %1006  ;;  %v1009_v30 = vpop.permute.xlu1 %1008  ;;  %v1314_v5 = vld [vmem:[#allocation2 + $0x388] sm:$0xff] }
 0x1be   :  { %v1027_v0 = vsel %vm1010_vm6, %v9979_v23, %v1007_v58  ;;  %v1028_v37 = vsel %vm1010_vm6, %v1007_v58, %v1009_v30  ;;  %1066 = vst.msk [vmem:[#allocation2 + $0x4b8] sm:$0xff] %vm134_vm9, %v1009_v30  ;;  %v7661_v44 = vpack.c.bf16 %v1314_v5, %v1295_v25  ;;  %v10058_v23 = vsub.s32 2, %v9961_v61 }
 0x1bf   :  { %v7650_v11 = vpack.c.bf16 %v1028_v37, %v895_v16  ;;  %v7652_v45 = vpack.c.bf16 %v1027_v0, %v894_v34  ;;  %v2118_v34 = vrot.slane %v9974_v56, %v2117_v38  ;;  %v2122_v16 = vrot.slane %v9974_v56, %v2121_v51 }
 0x1c0   :  { %7662 = vmatpush3.bf16.msra.mxu1 %v7661_v44  ;;  %13865 = vst [vmem:[#allocation14_spill] sm:$0xff] %v10058_v23  ;;  %v2102_v32 = vrot.slane %v9974_v56, %v10058_v23  ;;  %vm3773_vm6 = vcmask 707584  }
 0x1c1   :  { %v1140_v19 = vpop.permute.xlu0 %1139  ;;  %v1142_v18 = vpop.permute.xlu1 %1141  ;;  %7663 = vmatprep.subr.bf16.mxu1 %v13659_v35  ;;  %7651 = vmatprep.subr.bf16.mxu0 %v7650_v11  ;;  %v1333_v29 = vld [vmem:[#allocation2 + $0x420] sm:$0xff]  ;;  %v2658_v35 = vld [vmem:[%s13873_s4 + $0x168] sm:$0xff] }
 0x1c2   :  { %v1160_v49 = vsel %vm1143_vm7, %v1138_v55, %v1140_v19  ;;  %v1161_v41 = vsel %vm1143_vm7, %v1140_v19, %v1142_v18  ;;  %1199 = vst.msk [vmem:[#allocation2 + $0x550] sm:$0xff] %vm134_vm9, %v1142_v18  ;;  %7653 = vmatpush1.bf16.msra.mxu0 %v7652_v45  ;;  %vm2611_vm7 = vcmask 375808  }
 0x1c3   :  { %1960 = vmatprep.subr.mxu0 %v1161_v41 }
 0x1c5   :  { %v1352_v54 = vld [vmem:[#allocation2 + $0x4b8] sm:$0xff] }
 0x1c6   :  { %v7664_v52 = vpack.c.bf16 %v1352_v54, %v1333_v29  ;;  %1961 = vmatpush1.msra.mxu0 %v1160_v49  ;;  %v2086_v29 = vld [vmem:[%s13863_s1 + $0x8] sm:$0xff] }
 0x1c7   :  { %6860 = vmatmul.mubr.msk.f32.vlgmr.msra.gmra.mrb[6].mxu0 %vm1372_vm8, %v10013_v24  ;;  %v2126_v54 = vrot.slane %v2086_v29, %v9969_v20 }
 0x1c8   :  { %7665 = vmatpush3.bf16.msra.mxu1 %v7664_v52  ;;  %v2130_v52 = vrot.slane %v2086_v29, %v9977_v48 }
 0x1c9   :  { %7348 = vmatprep.subr.mxu1 %v9911_v17  ;;  %v1371_v46 = vld [vmem:[#allocation2 + $0x550] sm:$0xff]  ;;  %v10070_v21 = vpop.f32.mrb[2].mxu1 }
 0x1ca   :  { %v2188_v6 = vmul.f32 %v2102_v32, %v10070_v21  ;;  %v10073_v47 = vpop.f32.mrb[3].mxu1 }
 0x1cb   :  { %v2189_v33 = vmul.f32 %v2106_v40, %v10073_v47 }
 0x1cc   :  { %7349 = vmatpush3.msra.mxu1 %v1371_v46  ;;  %v2209_v59 = vsel %vm2205_vm10, %v2188_v6, 0.0  ;;  %v2249_v31 = vmul.f32 %v2188_v6, %v10070_v21 }
 0x1cd   :  { %7351 = vmatmul.mubr.msk.f32.vlgmr.msra.gmra.mrb[10].mxu1 %vm1372_vm8, %v10013_v24  ;;  %v2210_v39 = vadd.f32 %v2209_v59, %v10006_v8  ;;  %v2211_v17 = vsel %vm2205_vm10, %v2189_v33, 0.0  ;;  %v2250_v60 = vmul.f32 %v2189_v33, %v10073_v47  ;;  %v2110_v8 = vrot.slane %v9974_v56, %v10087_v13 }
 0x1ce   :  { %v2269_v62 = vsel %vm2205_vm10, %v2249_v31, 0.0  ;;  %v2114_v24 = vrot.slane %v9974_v56, %v10090_v1 }
 0x1cf   :  { %v2270_v55 = vadd.f32 %v2269_v62, %v10017_v2  ;;  %v2212_v63 = vadd.f32 %v2211_v17, %v2210_v39  ;;  %v2271_v10 = vsel %vm2205_vm10, %v2250_v60, 0.0 }
 0x1d1   :  { %v2272_v4 = vadd.f32 %v2271_v10, %v2270_v55 }
 0x1f9   :  { %v10096_v42 = vpop.f32.mrb[0].mxu0 }
 0x1fa   :  { %v2190_v2 = vmul.f32 %v2110_v8, %v10096_v42  ;;  %v10099_v14 = vpop.f32.mrb[1].mxu0  ;;  %v2138_v8 = vrot.slane %v2086_v29, %v10061_v53 }
 0x1fb   :  { %v2191_v50 = vmul.f32 %v2114_v24, %v10099_v14 }
 0x1fc   :  { %v2213_v36 = vsel %vm2205_vm10, %v2190_v2, 0.0  ;;  %v2251_v22 = vmul.f32 %v2190_v2, %v10096_v42 }
 0x1fd   :  { %v2214_v57 = vadd.f32 %v2213_v36, %v2212_v63  ;;  %v2215_v9 = vsel %vm2205_vm10, %v2191_v50, 0.0  ;;  %v2252_v12 = vmul.f32 %v2191_v50, %v10099_v14 }
 0x1fe   :  { %v2273_v26 = vsel %vm2205_vm10, %v2251_v22, 0.0 }
 0x1ff   :  { %v2274_v3 = vadd.f32 %v2273_v26, %v2272_v4  ;;  %v2216_v43 = vadd.f32 %v2215_v9, %v2214_v57  ;;  %v2275_v27 = vsel %vm2205_vm10, %v2252_v12, 0.0  ;;  %v2134_v4 = vrot.slane %v2086_v29, %v10058_v23 }
 0x201   :  { %v2276_v28 = vadd.f32 %v2275_v27, %v2274_v3 }
 0x209   :  { %v10116_v58 = vpop.f32.mrb[4].mxu1 }
 0x20a   :  { %v2192_v30 = vmul.f32 %v2118_v34, %v10116_v58  ;;  %v10119_v25 = vpop.f32.mrb[5].mxu1 }
 0x20b   :  { %v2193_v5 = vmul.f32 %v2122_v16, %v10119_v25  ;;  %v2142_v16 = vrot.slane %v2086_v29, %v10087_v13 }
 0x20c   :  { %v2217_v0 = vsel %vm2205_vm10, %v2192_v30, 0.0  ;;  %v2253_v37 = vmul.f32 %v2192_v30, %v10116_v58  ;;  %v2146_v30 = vrot.slane %v2086_v29, %v10090_v1  ;;  %v2645_v1 = vld [vmem:[%s13873_s4 + $0x100] sm:$0xff] }
 0x20d   :  { %v2218_v44 = vadd.f32 %v2217_v0, %v2216_v43  ;;  %v2219_v11 = vsel %vm2205_vm10, %v2193_v5, 0.0  ;;  %v2254_v45 = vmul.f32 %v2193_v5, %v10119_v25 }
 0x20e   :  { %v2277_v19 = vsel %vm2205_vm10, %v2253_v37, 0.0 }
 0x20f   :  { %v2278_v56 = vadd.f32 %v2277_v19, %v2276_v28  ;;  %v2220_v18 = vadd.f32 %v2219_v11, %v2218_v44  ;;  %v2279_v49 = vsel %vm2205_vm10, %v2254_v45, 0.0 }
 0x211   :  { %v2280_v41 = vadd.f32 %v2279_v49, %v2278_v56 }
 0x238   :  { %v10133_v32 = vpop.f32.mrb[2].mxu0 }
 0x239   :  { %v2194_v40 = vmul.f32 %v2126_v54, %v10133_v32  ;;  %v10136_v46 = vpop.f32.mrb[3].mxu0 }
 0x23a   :  { %v2195_v6 = vmul.f32 %v2130_v52, %v10136_v46 }
 0x23b   :  { %v2221_v33 = vsel %vm2205_vm10, %v2194_v40, 0.0  ;;  %v2255_v59 = vmul.f32 %v2194_v40, %v10133_v32 }
 0x23c   :  { %v2222_v31 = vadd.f32 %v2221_v33, %v2220_v18  ;;  %v2223_v39 = vsel %vm2205_vm10, %v2195_v6, 0.0  ;;  %v2256_v17 = vmul.f32 %v2195_v6, %v10136_v46  ;;  %v2150_v6 = vrot.slane %v2086_v29, %v2117_v38 }
 0x23d   :  { %v2281_v60 = vsel %vm2205_vm10, %v2255_v59, 0.0  ;;  %v2154_v33 = vrot.slane %v2086_v29, %v2121_v51 }
 0x23e   :  { %v2282_v62 = vadd.f32 %v2281_v60, %v2280_v41  ;;  %v2224_v55 = vadd.f32 %v2223_v39, %v2222_v31  ;;  %v2283_v63 = vsel %vm2205_vm10, %v2256_v17, 0.0 }
 0x240   :  { %v2284_v10 = vadd.f32 %v2283_v63, %v2282_v62 }
 0x248   :  { %v10147_v24 = vpop.f32.mrb[6].mxu1 }
 0x249   :  { %v2196_v2 = vmul.f32 %v2134_v4, %v10147_v24  ;;  %v10150_v50 = vpop.f32.mrb[7].mxu1 }
 0x24a   :  { %v2197_v36 = vmul.f32 %v2138_v8, %v10150_v50  ;;  %v2087_v8 = vld [vmem:[%s13863_s1 + $0x10] sm:$0x7]  ;;  %s9050_s1 = smov 109  }
 0x24b   :  { %v2225_v22 = vsel %vm2205_vm10, %v2196_v2, 0.0  ;;  %v2257_v57 = vmul.f32 %v2196_v2, %v10147_v24  ;;  %v2158_v2 = vrot.slane %v2087_v8, %v9969_v20  ;;  %v2676_v20 = vld [vmem:[%s13873_s4 + $0x1f8] sm:$0xff] }
 0x24c   :  { %v2226_v9 = vadd.f32 %v2225_v22, %v2224_v55  ;;  %v2227_v12 = vsel %vm2205_vm10, %v2197_v36, 0.0  ;;  %v2258_v26 = vmul.f32 %v2197_v36, %v10150_v50  ;;  %v2162_v36 = vrot.slane %v2087_v8, %v9977_v48  ;;  %v2673_v48 = vld [vmem:[%s13873_s4 + $0x1e0] sm:$0xff] }
 0x24d   :  { %v2285_v3 = vsel %vm2205_vm10, %v2257_v57, 0.0 }
 0x24e   :  { %v2286_v43 = vadd.f32 %v2285_v3, %v2284_v10  ;;  %v2228_v27 = vadd.f32 %v2227_v12, %v2226_v9  ;;  %v2287_v28 = vsel %vm2205_vm10, %v2258_v26, 0.0 }
 0x250   :  { %v2288_v34 = vadd.f32 %v2287_v28, %v2286_v43  ;;  %v2166_v43 = vrot.slane %v2087_v8, %v10058_v23  ;;  %v2670_v23 = vld [vmem:[%s13873_s4 + $0x1c8] sm:$0xff] }
 0x278   :  { %v10161_v5 = vpop.f32.mrb[4].mxu0 }
 0x279   :  { %v2198_v0 = vmul.f32 %v2142_v16, %v10161_v5  ;;  %v10164_v37 = vpop.f32.mrb[5].mxu0 }
 0x27a   :  { %v2199_v44 = vmul.f32 %v2146_v30, %v10164_v37 }
 0x27b   :  { %v2229_v11 = vsel %vm2205_vm10, %v2198_v0, 0.0  ;;  %v2259_v45 = vmul.f32 %v2198_v0, %v10161_v5 }
 0x27c   :  { %v2230_v19 = vadd.f32 %v2229_v11, %v2228_v27  ;;  %v2231_v56 = vsel %vm2205_vm10, %v2199_v44, 0.0  ;;  %v2260_v18 = vmul.f32 %v2199_v44, %v10164_v37 }
 0x27d   :  { %v2289_v49 = vsel %vm2205_vm10, %v2259_v45, 0.0 }
 0x27e   :  { %v2290_v41 = vadd.f32 %v2289_v49, %v2288_v34  ;;  %v2232_v54 = vadd.f32 %v2231_v56, %v2230_v19  ;;  %v2291_v52 = vsel %vm2205_vm10, %v2260_v18, 0.0 }
 0x280   :  { %v2292_v40 = vadd.f32 %v2291_v52, %v2290_v41 }
 0x284   :  { %v10177_v59 = vpop.f32.mrb[8].mxu1 }
 0x285   :  { %v2200_v31 = vmul.f32 %v2150_v6, %v10177_v59  ;;  %v10180_v39 = vpop.f32.mrb[9].mxu1 }
 0x286   :  { %v2201_v17 = vmul.f32 %v2154_v33, %v10180_v39 }
 0x287   :  { %v2233_v60 = vsel %vm2205_vm10, %v2200_v31, 0.0  ;;  %v2261_v62 = vmul.f32 %v2200_v31, %v10177_v59 }
 0x288   :  { %v2234_v55 = vadd.f32 %v2233_v60, %v2232_v54  ;;  %v2235_v63 = vsel %vm2205_vm10, %v2201_v17, 0.0  ;;  %v2262_v38 = vmul.f32 %v2201_v17, %v10180_v39 }
 0x289   :  { %v2293_v61 = vsel %vm2205_vm10, %v2261_v62, 0.0 }
 0x28a   :  { %v2294_v51 = vadd.f32 %v2293_v61, %v2292_v40  ;;  %v2236_v29 = vadd.f32 %v2235_v63, %v2234_v55  ;;  %v2295_v10 = vsel %vm2205_vm10, %v2262_v38, 0.0  ;;  %v9042_v40 = vmov 0   ;;  %v2308_v63 = vld [vmem:[%s13871_s5] sm:$0xf]  ;;  %s9047_s5 = smov 108  }
 0x28b   :  { %8808 = vset.pattern.permute.xlu0 %v9042_v40  ;;  %8809 = vset.pattern.permute.xlu1 %v9042_v40 }
 0x28c   :  { %v2296_v4 = vadd.f32 %v2295_v10, %v2294_v51  ;;  %v2312_v51 = vld [vmem:[%s13872_s3] sm:$0xf]  ;;  %s9049_s3 = smov 90  }
 0x29a   :  { %v10194_v22 = vpop.f32.mrb[6].mxu0 }
 0x29b   :  { %v2202_v57 = vmul.f32 %v2158_v2, %v10194_v22  ;;  %v10197_v9 = vpop.f32.mrb[7].mxu0 }
 0x29c   :  { %13869 = vst [vmem:[#allocation18_spill] sm:$0xff] %v10197_v9  ;;  %v2203_v12 = vmul.f32 %v2162_v36, %v10197_v9 }
 0x29d   :  { %v2237_v26 = vsel %vm2205_vm10, %v2202_v57, 0.0  ;;  %v2263_v3 = vmul.f32 %v2202_v57, %v10194_v22 }
 0x29e   :  { %v2238_v27 = vadd.f32 %v2237_v26, %v2236_v29  ;;  %v2239_v28 = vsel %vm2205_vm10, %v2203_v12, 0.0  ;;  %v2264_v34 = vmul.f32 %v2203_v12, %v10197_v9  ;;  %v2688_v9 = vld [vmem:[%s13873_s4 + $0x258] sm:$0xff] }
 0x29f   :  { %v2297_v16 = vsel %vm2205_vm10, %v2263_v3, 0.0 }
 0x2a0   :  { %v2298_v30 = vadd.f32 %v2297_v16, %v2296_v4  ;;  %v2299_v0 = vsel %vm2205_vm10, %v2264_v34, 0.0  ;;  %v10207_v44 = vpop.f32.mrb[10].mxu1  ;;  %v2240_v11 = vadd.f32 %v2239_v28, %v2238_v27  ;;  %vm4542_vm10 = vcmask 1044152  }
 0x2a1   :  { %13870 = vst [vmem:[#allocation19_spill] sm:$0xff] %v10207_v44  ;;  %v2204_v45 = vmul.f32 %v2166_v43, %v10207_v44  ;;  %v7352_v19 = vpop.f32.mrb[11].mxu1 }
 0x2a2   :  { %v2300_v56 = vadd.f32 %v2299_v0, %v2298_v30  ;;  %v2614_v19 = vld [vmem:[%s13873_s4 + $0x8] sm:$0xff] }
 0x2a3   :  { %v2265_v18 = vmul.f32 %v2204_v45, %v10207_v44  ;;  %v2242_v49 = vsel %vm2241_vm12, %v2204_v45, 0.0  ;;  %v2686_v44 = vld [vmem:[%s13873_s4 + $0x248] sm:$0xff] }
 0x2a4   :  { %v2243_v41 = vadd.f32 %v2242_v49, %v2240_v11 }
 0x2a5   :  { %v2301_v54 = vsel %vm2241_vm12, %v2265_v18, 0.0  ;;  %v2613_v18 = vld [vmem:[%s13873_s4] sm:$0xff]  ;;  %vm4535_vm12 = vcmask 711680  }
 0x2a6   :  { %2244 = vadd.xlane.f32.xlu0 %v2243_v41  ;;  %v2302_v52 = vadd.f32 %v2301_v54, %v2300_v56  ;;  %v2617_v56 = vld [vmem:[%s13873_s4 + $0x20] sm:$0xff]  ;;  %v2616_v41 = vld [vmem:[%s13873_s4 + $0x18] sm:$0xff] }
 0x2a7   :  { %v10281_v49 = vpack.c.bf16 %v2617_v56, %v2614_v19  ;;  %v2620_v54 = vld [vmem:[%s13873_s4 + $0x38] sm:$0xff]  ;;  %v10292_v40 = vpack.c.bf16 %v2616_v41, %v2613_v18  ;;  %v2615_v19 = vld [vmem:[%s13873_s4 + $0x10] sm:$0xff] }
 0x2a8   :  { %2303 = vadd.xlane.f32.xlu1 %v2302_v52  ;;  %v2623_v52 = vld [vmem:[%s13873_s4 + $0x50] sm:$0xff]  ;;  %v2640_v18 = vld [vmem:[%s13873_s4 + $0xd8] sm:$0xff] }
 0x2a9   :  { %7667 = vmatprep.subr.bf16.mxu0 %v10281_v49  ;;  %v2644_v41 = vld [vmem:[%s13873_s4 + $0xf8] sm:$0xff] }
 0x2aa   :  { %7669 = vmatpush1.bf16.msra.mxu0 %v10292_v40 }
 0x333   :  { %v2245_v6 = vpop.xlane.xlu0 %2244 }
 0x334   :  { %v2246_v33 = vmul.f32 0.00048828125, %v2245_v6  ;;  %v10294_v6 = vpack.c.bf16 %v2623_v52, %v2620_v54  ;;  %v2618_v54 = vld [vmem:[%s13873_s4 + $0x28] sm:$0xff]  ;;  %v2647_v52 = vld [vmem:[%s13873_s4 + $0x110] sm:$0xff] }
 0x335   :  { %v2304_v31 = vpop.xlane.xlu1 %2303 }
 0x336   :  { %v2306_v17 = vmul.f32 %v2246_v33, %v2246_v33  ;;  %v2305_v60 = vmul.f32 0.00048828125, %v2304_v31  ;;  %v2622_v31 = vld [vmem:[%s13873_s4 + $0x48] sm:$0xff]  ;;  %7671 = vmatprep.subr.bf16.mxu0 %v10294_v6 }
 0x338   :  { %v2307_v62 = vsub.f32 %v2305_v60, %v2306_v17  ;;  %v2626_v17 = vld [vmem:[%s13873_s4 + $0x68] sm:$0xff]  ;;  %v2629_v60 = vld [vmem:[%s13873_s4 + $0x80] sm:$0xff] }
 0x33a   :  { %v2309_v55 = vadd.f32 1e-05, %v2307_v62 }
 0x33c   :  { %8980 = vrsqrt.f32 %v2309_v55  ;;  %v10313_v55 = vpack.c.bf16 %v2629_v60, %v2626_v17  ;;  %v2672_v17 = vld [vmem:[%s13873_s4 + $0x1d8] sm:$0xff] }
 0x346   :  { %v8981_v38 = vpop.eup %8980 }
 0x347   :  { %v2311_v61 = vmul.f32 %v8981_v38, %v2308_v63  ;;  %v2625_v63 = vld [vmem:[%s13873_s4 + $0x60] sm:$0xff]  ;;  %v2628_v38 = vld [vmem:[%s13873_s4 + $0x78] sm:$0xff] }
 0x349   :  { %2317 = vperm.xlu0 %8808, %v2311_v61   ;;  %v2313_v29 = vmul.f32 %v2311_v61, %v2246_v33  ;;  %v2619_v33 = vld [vmem:[%s13873_s4 + $0x30] sm:$0xff]  ;;  %v2632_v61 = vld [vmem:[%s13873_s4 + $0x98] sm:$0xff] }
 0x34a   :  { %v10310_v62 = vpack.c.bf16 %v2622_v31, %v2619_v33  ;;  %v10378_v33 = vpack.c.bf16 %v2618_v54, %v2615_v19  ;;  %v2669_v31 = vld [vmem:[%s13873_s4 + $0x1c0] sm:$0xff] }
 0x34b   :  { %v2314_v10 = vsub.f32 %v2312_v51, %v2313_v29  ;;  %v2635_v51 = vld [vmem:[%s13873_s4 + $0xb0] sm:$0xff]  ;;  %v10328_v29 = vpack.c.bf16 %v2628_v38, %v2625_v63  ;;  %v10386_v60 = vpack.c.bf16 %v2672_v17, %v2669_v31  ;;  %v2621_v63 = vld [vmem:[%s13873_s4 + $0x40] sm:$0xff]  ;;  %v2624_v38 = vld [vmem:[%s13873_s4 + $0x58] sm:$0xff] }
 0x34c   :  { %7673 = vmatpush1.bf16.msra.mxu0 %v10310_v62  ;;  %v2681_v54 = vld [vmem:[%s13873_s4 + $0x220] sm:$0xff] }
 0x34d   :  { %2341 = vperm.xlu1 %8809, %v2314_v10   ;;  %7675 = vmatprep.subr.bf16.mxu0 %v10313_v55  ;;  %v10331_v10 = vpack.c.bf16 %v2635_v51, %v2632_v61  ;;  %v2643_v51 = vld [vmem:[%s13873_s4 + $0xf0] sm:$0xff]  ;;  %v2649_v17 = vld [vmem:[%s13873_s4 + $0x120] sm:$0xff] }
 0x350   :  { %7677 = vmatpush1.bf16.msra.mxu0 %v10328_v29 }
 0x351   :  { %7679 = vmatprep.subr.bf16.mxu0 %v10331_v10 }
 0x3c8   :  { %v10217_v4 = vpop.permute.xlu0 %2317 }
 0x3c9   :  { %v2321_v8 = vmul.f32 %v10217_v4, %v9995_v7  ;;  %v2322_v2 = vmul.f32 %v10217_v4, %v10070_v21  ;;  %v2320_v36 = vmul.f32 %v10217_v4, %v9992_v15  ;;  %v2323_v57 = vmul.f32 %v10217_v4, %v10073_v47 }
 0x3ca   :  { %v2324_v15 = vmul.f32 %v10217_v4, %v10096_v42  ;;  %v2325_v27 = vmul.f32 %v10217_v4, %v10099_v14 }
 0x3cc   :  { %v10227_v12 = vpop.permute.xlu1 %2341 }
 0x3cd   :  { %v10230_v26 = vadd.f32 %v10227_v12, %v2321_v8  ;;  %v10233_v3 = vadd.f32 %v10227_v12, %v2322_v2  ;;  %v10236_v43 = vadd.f32 %v10227_v12, %v2320_v36  ;;  %v10239_v7 = vadd.f32 %v10227_v12, %v2323_v57  ;;  %v2631_v8 = vld [vmem:[%s13873_s4 + $0x90] sm:$0xff]  ;;  %v2634_v2 = vld [vmem:[%s13873_s4 + $0xa8] sm:$0xff]  ;;  %v2641_v57 = vld [vmem:[%s13873_s4 + $0xe0] sm:$0xff] }
 0x3ce   :  { %v10248_v28 = vadd.f32 %v10227_v12, %v2324_v15  ;;  %v10257_v42 = vadd.f32 %v10227_v12, %v2325_v27  ;;  %v2638_v36 = vld [vmem:[%s13873_s4 + $0xc8] sm:$0xff]  ;;  %v2663_v15 = vld [vmem:[%s13873_s4 + $0x190] sm:$0xff] }
 0x3cf   :  { %v13666_v21 = vmax.f32 %v10230_v26, 0.0  ;;  %v13665_v47 = vmax.f32 %v10233_v3, 0.0  ;;  %v13662_v16 = vmax.f32 %v10236_v43, 0.0  ;;  %v13664_v30 = vmax.f32 %v10239_v7, 0.0  ;;  %v2666_v27 = vld [vmem:[%s13873_s4 + $0x1a8] sm:$0xff] }
 0x3d0   :  { %v13663_v0 = vmax.f32 %v10248_v28, 0.0  ;;  %v13661_v11 = vmax.f32 %v10257_v42, 0.0  ;;  %v10363_v56 = vpack.c.bf16 %v2641_v57, %v2638_v36  ;;  %v10407_v36 = vpack.c.bf16 %v2647_v52, %v2644_v41  ;;  %v2646_v57 = vld [vmem:[%s13873_s4 + $0x108] sm:$0xff]  ;;  %v2684_v52 = vld [vmem:[%s13873_s4 + $0x238] sm:$0xff] }
 0x3d1   :  { %v8810_v34 = vpack.i.bf16 %v13665_v47, %v13666_v21  ;;  %v8815_v14 = vpack.i.bf16 %v13662_v16, %v13664_v30  ;;  %v2630_v41 = vld [vmem:[%s13873_s4 + $0x88] sm:$0xff]  ;;  %v10437_v31 = vpack.c.bf16 %v2646_v57, %v2643_v51  ;;  %v2656_v51 = vld [vmem:[%s13873_s4 + $0x158] sm:$0xff]  ;;  %v10455_v57 = vpack.c.bf16 %v2684_v52, %v2681_v54  ;;  %v2655_v52 = vld [vmem:[%s13873_s4 + $0x150] sm:$0xff] }
 0x3d2   :  { %v8820_v45 = vpack.i.bf16 %v13661_v11, %v13663_v0  ;;  %v2639_v0 = vld [vmem:[%s13873_s4 + $0xd0] sm:$0xff]  ;;  %v2664_v30 = vld [vmem:[%s13873_s4 + $0x198] sm:$0xff] }
 0x3d3   :  { %8811 = vrot.lane.b32.xlu1 %v8810_v34, %s9031_s28  ;;  %v10352_v34 = vpack.c.bf16 %v2634_v2, %v2631_v8  ;;  %v10401_v8 = vpack.c.bf16 %v2624_v38, %v2621_v63  ;;  %v2675_v2 = vld [vmem:[%s13873_s4 + $0x1f0] sm:$0xff]  ;;  %v2652_v63 = vld [vmem:[%s13873_s4 + $0x138] sm:$0xff]  ;;  %13877 = vst [vmem:[#allocation23_spill] sm:$0xff] %v10455_v57 }
 0x3d4   :  { %v10473_v54 = vpack.c.bf16 %v2652_v63, %v2649_v17  ;;  %v2662_v17 = vld [vmem:[%s13873_s4 + $0x188] sm:$0xff] }
 0x3d5   :  { %7681 = vmatpush1.bf16.msra.mxu0 %v10352_v34  ;;  %13874 = vst [vmem:[#allocation20_spill] sm:$0xff] %v10401_v8 }
 0x3d6   :  { %7683 = vmatprep.subr.bf16.mxu0 %v10363_v56 }
 0x3d7   :  { %8816 = vrot.lane.b32.xlu1 %v8815_v14, %s9031_s28  ;;  %v2637_v14 = vld [vmem:[%s13873_s4 + $0xc0] sm:$0xff] }
 0x3d8   :  { %v10395_v61 = vpack.c.bf16 %v2640_v18, %v2637_v14  ;;  %v2653_v14 = vld [vmem:[%s13873_s4 + $0x140] sm:$0xff]  ;;  %v2627_v18 = vld [vmem:[%s13873_s4 + $0x70] sm:$0xff] }
 0x3d9   :  { %v10446_v38 = vpack.c.bf16 %v2630_v41, %v2627_v18  ;;  %v2636_v18 = vld [vmem:[%s13873_s4 + $0xb8] sm:$0xff]  ;;  %v2690_v41 = vld [vmem:[%s13873_s4 + $0x268] sm:$0xff] }
 0x3da   :  { %7685 = vmatpush1.bf16.msra.mxu0 %v10395_v61 }
 0x3db   :  { %8821 = vrot.lane.b32.xlu1 %v8820_v45, %s9031_s28  ;;  %v10357_v45 = vpack.c.bf16 %v2666_v27, %v2663_v15  ;;  %v2650_v15 = vld [vmem:[%s13873_s4 + $0x128] sm:$0xff]  ;;  %13876 = vst [vmem:[#allocation22_spill] sm:$0xff] %v10446_v38  ;;  %7687 = vmatprep.subr.bf16.mxu0 %v10407_v36 }
 0x3dc   :  { %v2678_v27 = vld [vmem:[%s13873_s4 + $0x208] sm:$0xff] }
 0x3dd   :  { %7947 = vmatprep.subr.bf16.mxu1 %v10357_v45  ;;  %v10422_v19 = vpack.c.bf16 %v2678_v27, %v2675_v2  ;;  %v10449_v2 = vpack.c.bf16 %v2653_v14, %v2650_v15  ;;  %v2633_v27 = vld [vmem:[%s13873_s4 + $0xa0] sm:$0xff]  ;;  %v2659_v15 = vld [vmem:[%s13873_s4 + $0x170] sm:$0xff] }
 0x3de   :  { %7949 = vmatpush3.bf16.msra.mxu1 %v10378_v33  ;;  %v2687_v14 = vld [vmem:[%s13873_s4 + $0x250] sm:$0xff]  ;;  %7689 = vmatpush1.bf16.msra.mxu0 %v10437_v31  ;;  %v10482_v11 = vpack.c.bf16 %v2636_v18, %v2633_v27  ;;  %v10485_v16 = vpack.c.bf16 %v2659_v15, %v2656_v51  ;;  %v2642_v27 = vld [vmem:[%s13873_s4 + $0xe8] sm:$0xff]  ;;  %v2665_v51 = vld [vmem:[%s13873_s4 + $0x1a0] sm:$0xff] }
 0x3df   :  { %7951 = vmatprep.subr.bf16.mxu1 %v10386_v60  ;;  %13875 = vst [vmem:[#allocation21_spill] sm:$0xff] %v10422_v19  ;;  %7691 = vmatprep.subr.bf16.mxu0 %v10449_v2  ;;  %v10491_v63 = vpack.c.bf16 %v2690_v41, %v2687_v14  ;;  %v2693_v18 = vld [vmem:[%s13873_s4 + $0x280] sm:$0xff]  ;;  %v2696_v15 = vld [vmem:[%s13873_s4 + $0x298] sm:$0xff]  ;;  %v10509_v14 = vpack.c.bf16 %v2658_v35, %v2655_v52 }
 0x3e0   :  { %13878 = vst [vmem:[#allocation24_spill] sm:$0xff] %v10482_v11  ;;  %v2661_v41 = vld [vmem:[%s13873_s4 + $0x180] sm:$0xff]  ;;  %v10518_v47 = vpack.c.bf16 %v2642_v27, %v2639_v0  ;;  %v10521_v21 = vpack.c.bf16 %v2665_v51, %v2662_v17  ;;  %v2668_v35 = vld [vmem:[%s13873_s4 + $0x1b8] sm:$0xff]  ;;  %v10527_v52 = vpack.c.bf16 %v2696_v15, %v2693_v18  ;;  %v2671_v17 = vld [vmem:[%s13873_s4 + $0x1d0] sm:$0xff] }
 0x3e1   :  { %13879 = vst [vmem:[#allocation25_spill] sm:$0xff] %v10491_v63  ;;  %v2648_v0 = vld [vmem:[%s13873_s4 + $0x118] sm:$0xff]  ;;  %v2699_v27 = vld [vmem:[%s13873_s4 + $0x2b0] sm:$0xff]  ;;  %v2702_v51 = vld [vmem:[%s13873_s4 + $0x2c8] sm:$0xff]  ;;  %v10545_v18 = vpack.c.bf16 %v2664_v30, %v2661_v41  ;;  %v10554_v53 = vpack.c.bf16 %v2671_v17, %v2668_v35 }
 0x3e2   :  { %7953 = vmatpush3.bf16.msra.mxu1 %v10401_v8  ;;  %7693 = vmatpush1.bf16.msra.mxu0 %v10473_v54  ;;  %13880 = vst [vmem:[#allocation26_spill] sm:$0xff] %v10518_v47  ;;  %13881 = vst [vmem:[#allocation27_spill] sm:$0xff] %v10527_v52  ;;  %v2667_v15 = vld [vmem:[%s13873_s4 + $0x1b0] sm:$0xff]  ;;  %v10551_v13 = vpack.c.bf16 %v2648_v0, %v2645_v1  ;;  %v10560_v30 = vpack.c.bf16 %v2702_v51, %v2699_v27  ;;  %v2654_v1 = vld [vmem:[%s13873_s4 + $0x148] sm:$0xff] }
 0x3e3   :  { %7955 = vmatprep.subr.bf16.mxu1 %v10422_v19  ;;  %7695 = vmatprep.subr.bf16.mxu0 %v10485_v16  ;;  %v2651_v41 = vld [vmem:[%s13873_s4 + $0x130] sm:$0xff]  ;;  %v2674_v35 = vld [vmem:[%s13873_s4 + $0x1e8] sm:$0xff]  ;;  %v2677_v0 = vld [vmem:[%s13873_s4 + $0x200] sm:$0xff]  ;;  %v10575_v17 = vpack.c.bf16 %v2670_v23, %v2667_v15 }
 0x3e4   :  { %13882 = vst [vmem:[#allocation28_spill] sm:$0xff] %v10551_v13  ;;  %13883 = vst [vmem:[#allocation29_spill] sm:$0xff] %v10560_v30  ;;  %v10578_v27 = vpack.c.bf16 %v2654_v1, %v2651_v41  ;;  %v10581_v51 = vpack.c.bf16 %v2677_v0, %v2674_v35  ;;  %v2680_v23 = vld [vmem:[%s13873_s4 + $0x218] sm:$0xff]  ;;  %v2683_v15 = vld [vmem:[%s13873_s4 + $0x230] sm:$0xff]  ;;  %v10597_v41 = vpack.c.bf16 %v2676_v20, %v2673_v48 }
 0x3e5   :  { %13884 = vst [vmem:[#allocation30_spill] sm:$0xff] %v10575_v17  ;;  %v10601_v1 = vpack.c.bf16 %v2683_v15, %v2680_v23  ;;  %v2679_v35 = vld [vmem:[%s13873_s4 + $0x210] sm:$0xff]  ;;  %v2682_v0 = vld [vmem:[%s13873_s4 + $0x228] sm:$0xff]  ;;  %v2689_v20 = vld [vmem:[%s13873_s4 + $0x260] sm:$0xff] }
 0x3e6   :  { %7957 = vmatpush3.bf16.msra.mxu1 %v10446_v38  ;;  %7697 = vmatpush1.bf16.msra.mxu0 %v10509_v14  ;;  %13885 = vst [vmem:[#allocation31_spill] sm:$0xff] %v10578_v27  ;;  %13886 = vst [vmem:[#allocation32_spill] sm:$0xff] %v10581_v51  ;;  %v10616_v48 = vpack.c.bf16 %v2682_v0, %v2679_v35  ;;  %v10619_v23 = vpack.c.bf16 %v2689_v20, %v2686_v44  ;;  %v2685_v15 = vld [vmem:[%s13873_s4 + $0x240] sm:$0xff]  ;;  %v2695_v35 = vld [vmem:[%s13873_s4 + $0x290] sm:$0xff] }
 0x3e7   :  { %7959 = vmatprep.subr.bf16.mxu1 %v10455_v57  ;;  %7699 = vmatprep.subr.bf16.mxu0 %v10521_v21  ;;  %13887 = vst [vmem:[#allocation33_spill] sm:$0xff] %v10597_v41  ;;  %13888 = vst [vmem:[#allocation34_spill] sm:$0xff] %v10601_v1  ;;  %v10634_v44 = vpack.c.bf16 %v2688_v9, %v2685_v15  ;;  %v2691_v20 = vld [vmem:[%s13873_s4 + $0x270] sm:$0xff]  ;;  %v2701_v9 = vld [vmem:[%s13873_s4 + $0x2c0] sm:$0xff] }
 0x3e8   :  { %13889 = vst [vmem:[#allocation35_spill] sm:$0xff] %v10616_v48  ;;  %13890 = vst [vmem:[#allocation36_spill] sm:$0xff] %v10619_v23  ;;  %v2774_v19 = vld [vmem:[%s13873_s4 + $0x508] sm:$0xff] }
 0x3e9   :  { %13891 = vst [vmem:[#allocation37_spill] sm:$0xff] %v10634_v44 }
 0x3ea   :  { %7961 = vmatpush3.bf16.msra.mxu1 %v10482_v11  ;;  %7701 = vmatpush1.bf16.msra.mxu0 %v10545_v18 }
 0x3eb   :  { %7963 = vmatprep.subr.bf16.mxu1 %v10491_v63  ;;  %7703 = vmatprep.subr.bf16.mxu0 %v10554_v53 }
 0x3ee   :  { %7965 = vmatpush3.bf16.msra.mxu1 %v10518_v47  ;;  %7705 = vmatpush1.bf16.msra.mxu0 %v10575_v17 }
 0x3ef   :  { %7967 = vmatprep.subr.bf16.mxu1 %v10527_v52  ;;  %7707 = vmatprep.subr.bf16.mxu0 %v10581_v51  ;;  %v2700_v52 = vld [vmem:[%s13873_s4 + $0x2b8] sm:$0xff]  ;;  %v2771_v51 = vld [vmem:[%s13873_s4 + $0x4f0] sm:$0xff] }
 0x3f2   :  { %7969 = vmatpush3.bf16.msra.mxu1 %v10551_v13  ;;  %7709 = vmatpush1.bf16.msra.mxu0 %v10597_v41  ;;  %v2698_v13 = vld [vmem:[%s13873_s4 + $0x2a8] sm:$0xff] }
 0x3f3   :  { %7971 = vmatprep.subr.bf16.mxu1 %v10560_v30  ;;  %7711 = vmatprep.subr.bf16.mxu0 %v10601_v1  ;;  %v2694_v30 = vld [vmem:[%s13873_s4 + $0x288] sm:$0xff]  ;;  %v10655_v15 = vpack.c.bf16 %v2701_v9, %v2698_v13  ;;  %v2704_v13 = vld [vmem:[%s13873_s4 + $0x2d8] sm:$0xff]  ;;  %v13903_v1 = vmax.f32 %v10233_v3, 0.0 }
 0x3f5   :  { %13894 = vst [vmem:[#allocation40_spill] sm:$0xff] %v10655_v15 }
 0x3f6   :  { %7973 = vmatpush3.bf16.msra.mxu1 %v10578_v27  ;;  %v2692_v27 = vld [vmem:[%s13873_s4 + $0x278] sm:$0xff]  ;;  %7713 = vmatpush1.bf16.msra.mxu0 %v10616_v48  ;;  %v13902_v48 = vmax.f32 %v10230_v26, 0.0 }
 0x3f7   :  { %7715 = vmatprep.subr.bf16.mxu0 %v10619_v23  ;;  %v10637_v0 = vpack.c.bf16 %v2695_v35, %v2692_v27  ;;  %v10652_v27 = vpack.c.bf16 %v2694_v30, %v2691_v20  ;;  %v2697_v35 = vld [vmem:[%s13873_s4 + $0x2a0] sm:$0xff]  ;;  %v2707_v30 = vld [vmem:[%s13873_s4 + $0x2f0] sm:$0xff] }
 0x3f8   :  { %v10664_v47 = vpack.c.bf16 %v2700_v52, %v2697_v35  ;;  %v2705_v20 = vld [vmem:[%s13873_s4 + $0x2e0] sm:$0xff]  ;;  %v2708_v52 = vld [vmem:[%s13873_s4 + $0x2f8] sm:$0xff]  ;;  %v2703_v35 = vld [vmem:[%s13873_s4 + $0x2d0] sm:$0xff] }
 0x3f9   :  { %13892 = vst [vmem:[#allocation38_spill] sm:$0xff] %v10637_v0  ;;  %13893 = vst [vmem:[#allocation39_spill] sm:$0xff] %v10652_v27 }
 0x3fa   :  { %7717 = vmatpush1.bf16.msra.mxu0 %v10634_v44  ;;  %13895 = vst [vmem:[#allocation41_spill] sm:$0xff] %v10664_v47  ;;  %v10688_v44 = vpack.c.bf16 %v2708_v52, %v2705_v20  ;;  %v2710_v52 = vld [vmem:[%s13873_s4 + $0x308] sm:$0xff] }
 0x3fb   :  { %7719 = vmatprep.subr.bf16.mxu0 %v10637_v0 }
 0x3fc   :  { %13897 = vst [vmem:[#allocation43_spill] sm:$0xff] %v10688_v44  ;;  %7975 = vmatprep.subr.bf16.mxu1 %v10688_v44 }
 0x3fe   :  { %7721 = vmatpush1.bf16.msra.mxu0 %v10652_v27  ;;  %v10677_v27 = vpack.c.bf16 %v2707_v30, %v2704_v13  ;;  %v2657_v13 = vld [vmem:[%s13873_s4 + $0x160] sm:$0xff]  ;;  %v2660_v30 = vld [vmem:[%s13873_s4 + $0x178] sm:$0xff] }
 0x3ff   :  { %7723 = vmatprep.subr.bf16.mxu0 %v10655_v15  ;;  %v10699_v63 = vpack.c.bf16 %v2660_v30, %v2657_v13  ;;  %v2759_v13 = vld [vmem:[%s13873_s4 + $0x490] sm:$0xff] }
 0x400   :  { %13896 = vst [vmem:[#allocation42_spill] sm:$0xff] %v10677_v27 }
 0x401   :  { %13899 = vst [vmem:[#allocation45_spill] sm:$0xff] %v10699_v63  ;;  %7977 = vmatpush3.bf16.msra.mxu1 %v10699_v63 }
 0x402   :  { %7725 = vmatpush1.bf16.msra.mxu0 %v10664_v47  ;;  %v2706_v47 = vld [vmem:[%s13873_s4 + $0x2e8] sm:$0xff] }
 0x403   :  { %v10690_v23 = vpack.c.bf16 %v2706_v47, %v2703_v35  ;;  %7727 = vmatprep.subr.bf16.mxu0 %v10677_v27  ;;  %v2713_v35 = vld [vmem:[%s13873_s4 + $0x320] sm:$0xff] }
 0x404   :  { %v10714_v30 = vpack.c.bf16 %v2713_v35, %v2710_v52  ;;  %v2326_v52 = vmul.f32 %v10217_v4, %v10116_v58  ;;  %v2327_v35 = vmul.f32 %v10217_v4, %v10119_v25 }
 0x405   :  { %13898 = vst [vmem:[#allocation44_spill] sm:$0xff] %v10690_v23 }
 0x406   :  { %7729 = vmatpush1.bf16.msra.mxu0 %v10690_v23  ;;  %13900 = vst [vmem:[#allocation46_spill] sm:$0xff] %v10714_v30  ;;  %v2762_v23 = vld [vmem:[%s13873_s4 + $0x4a8] sm:$0xff]  ;;  %v10740_v3 = vadd.f32 %v10227_v12, %v2326_v52 }
 0x407   :  { %v10720_v44 = vpack.c.bf16 %v2762_v23, %v2759_v13  ;;  %7731 = vmatprep.subr.bf16.mxu0 %v10714_v30  ;;  %v13905_v13 = vmax.f32 %v10248_v28, 0.0  ;;  %v2328_v28 = vmul.f32 %v10217_v4, %v10133_v32  ;;  %v2331_v32 = vmul.f32 %v10217_v4, %v10150_v50  ;;  %v2717_v30 = vld [vmem:[%s13873_s4 + $0x340] sm:$0xff] }
 0x409   :  { %13901 = vst [vmem:[#allocation47_spill] sm:$0xff] %v10720_v44  ;;  %7979 = vmatprep.subr.bf16.mxu1 %v10720_v44 }
 0x445   :  { %v8812_v9 = vpop.permute.xlu1 %8811 }
 0x446   :  { %v8814_v15 = vunpack.i.h.bf16 %v8812_v9  ;;  %v8813_v0 = vunpack.i.l.bf16 %v8812_v9 }
 0x448   :  { %v2440_v47 = vsel %vm212_vm1, %v8813_v0, %v8814_v15 }
 0x449   :  { %v8817_v20 = vpop.permute.xlu1 %8816  ;;  %v2477_v11 = vmax.f32 %v13902_v48, %v2440_v47 }
 0x44a   :  { %v8818_v9 = vunpack.i.l.bf16 %v8817_v20  ;;  %v8819_v63 = vunpack.i.h.bf16 %v8817_v20  ;;  %v13904_v20 = vmax.f32 %v10239_v7, 0.0 }
 0x44c   :  { %v2441_v27 = vsel %vm212_vm1, %v8814_v15, %v8818_v9  ;;  %v2439_v58 = vsel %vm212_vm1, %v8819_v63, %v8813_v0 }
 0x44d   :  { %v10726_v57 = vmax.f32 %v13903_v1, %v2441_v27  ;;  %v10728_v41 = vpop.permute.xlu1 %8821  ;;  %v10743_v1 = vadd.f32 %v10227_v12, %v2327_v35  ;;  %v2329_v27 = vmul.f32 %v10217_v4, %v10136_v46  ;;  %v13704_v46 = vmax.f32 %v10740_v3, 0.0 }
 0x44e   :  { %v13705_v23 = vunpack.i.h.bf16 %v10728_v41  ;;  %v8823_v15 = vunpack.i.l.bf16 %v10728_v41 }
 0x44f   :  { %v8825_v26 = vpack.i.bf16 %v10726_v57, %v2477_v11  ;;  %v10762_v63 = vadd.f32 %v10227_v12, %v2329_v27  ;;  %v13703_v7 = vmax.f32 %v10743_v1, 0.0 }
 0x450   :  { %v2442_v25 = vsel %vm212_vm1, %v8818_v9, %v8823_v15  ;;  %v2443_v48 = vsel %vm212_vm1, %v8823_v15, %v13705_v23  ;;  %v13906_v9 = vmax.f32 %v10236_v43, 0.0  ;;  %v10780_v43 = vadd.f32 %v10227_v12, %v2328_v28  ;;  %v2765_v23 = vld [vmem:[%s13873_s4 + $0x4c0] sm:$0xff] }
 0x451   :  { %v10754_v47 = vmax.f32 %v13904_v20, %v2442_v25  ;;  %v10758_v52 = vmax.f32 %v13905_v13, %v2443_v48  ;;  %8826 = vrot.lane.b32.xlu1 %v8825_v26, %s9033_s27  ;;  %v13702_v15 = vmax.f32 %v10762_v63, 0.0  ;;  %v8830_v26 = vpack.i.bf16 %v13703_v7, %v13704_v46  ;;  %v2719_v46 = vld [vmem:[%s13873_s4 + $0x350] sm:$0xff] }
 0x452   :  { %v2476_v35 = vmax.f32 %v13906_v9, %v2439_v58  ;;  %v2330_v58 = vmul.f32 %v10217_v4, %v10147_v24  ;;  %v2332_v25 = vmul.f32 %v10217_v4, %v10161_v5  ;;  %v13701_v48 = vmax.f32 %v10780_v43, 0.0 }
 0x453   :  { %v8835_v0 = vpack.i.bf16 %v10758_v52, %v10754_v47  ;;  %v10797_v20 = vadd.f32 %v10227_v12, %v2331_v32  ;;  %v2712_v32 = vld [vmem:[%s13873_s4 + $0x318] sm:$0xff] }
 0x454   :  { %v10794_v27 = vadd.f32 %v10227_v12, %v2330_v58  ;;  %v10800_v13 = vadd.f32 %v10227_v12, %v2332_v25  ;;  %v2709_v58 = vld [vmem:[%s13873_s4 + $0x300] sm:$0xff]  ;;  %v2711_v25 = vld [vmem:[%s13873_s4 + $0x310] sm:$0xff] }
 0x455   :  { %8836 = vrot.lane.b32.xlu0 %v8835_v0, %s9033_s27  ;;  %2514 = vrot.lane.b32.xlu1 %v2476_v35, %s9033_s27  ;;  %v13699_v50 = vmax.f32 %v10797_v20, 0.0  ;;  %v10840_v7 = vpack.c.bf16 %v2712_v32, %v2709_v58  ;;  %v2715_v58 = vld [vmem:[%s13873_s4 + $0x330] sm:$0xff]  ;;  %v2718_v32 = vld [vmem:[%s13873_s4 + $0x348] sm:$0xff] }
 0x456   :  { %v13700_v24 = vmax.f32 %v10794_v27, 0.0  ;;  %v13698_v5 = vmax.f32 %v10800_v13, 0.0 }
 0x457   :  { %13907 = vst [vmem:[#allocation48_spill] sm:$0xff] %v10840_v7 }
 0x458   :  { %v8840_v0 = vpack.i.bf16 %v13698_v5, %v13699_v50  ;;  %v2716_v50 = vld [vmem:[%s13873_s4 + $0x338] sm:$0xff] }
 0x459   :  { %2419 = vrot.lane.b32.xlu0 %v13702_v15, %s9031_s28  ;;  %8831 = vrot.lane.b32.xlu1 %v8830_v26, %s9031_s28 }
 0x45d   :  { %2417 = vrot.lane.b32.xlu1 %v13701_v48, %s9031_s28 }
 0x461   :  { %2421 = vrot.lane.b32.xlu1 %v13700_v24, %s9031_s28 }
 0x465   :  { %8841 = vrot.lane.b32.xlu1 %v8840_v0, %s9031_s28  ;;  %v2714_v0 = vld [vmem:[%s13873_s4 + $0x328] sm:$0xff] }
 0x4c3   :  { %v10816_v9 = vpop.permute.xlu1 %8826 }
 0x4c4   :  { %v13706_v28 = vunpack.i.h.bf16 %v10816_v9  ;;  %v8828_v26 = vunpack.i.l.bf16 %v10816_v9 }
 0x4c6   :  { %v2553_v5 = vsel %vm478_vm0, %v8828_v26, %v13706_v28  ;;  %v2768_v28 = vld [vmem:[%s13873_s4 + $0x4d8] sm:$0xff] }
 0x4c7   :  { %v10838_v24 = vpop.permute.xlu0 %8836  ;;  %v2515_v48 = vpop.permute.xlu1 %2514  ;;  %v2589_v15 = vmax.f32 %v2477_v11, %v2553_v5  ;;  %v10854_v5 = vpack.c.bf16 %v2714_v0, %v2711_v25  ;;  %v10876_v0 = vpack.c.bf16 %v2719_v46, %v2716_v50 }
 0x4c8   :  { %v13713_v44 = vunpack.i.l.bf16 %v10838_v24  ;;  %v2552_v11 = vsel %vm478_vm0, %v2515_v48, %v8828_v26  ;;  %v2720_v48 = vld [vmem:[%s13873_s4 + $0x358] sm:$0xff]  ;;  %v2722_v26 = vld [vmem:[%s13873_s4 + $0x368] sm:$0xff]  ;;  %v13909_v25 = vunpack.i.h.bf16 %v10838_v24 }
 0x4c9   :  { %13908 = vst [vmem:[#allocation49_spill] sm:$0xff] %v10854_v5  ;;  %v2588_v38 = vmax.f32 %v2476_v35, %v2552_v11  ;;  %3114 = vmatprep.mubr.f32.mxu0 %v2589_v15  ;;  %3469 = vmatprep.mubr.f32.mxu1 %v2589_v15  ;;  %13910 = vst [vmem:[#allocation50_spill] sm:$0xff] %v10876_v0  ;;  %v10878_v15 = vpack.c.bf16 %v2768_v28, %v2765_v23  ;;  %v2725_v11 = vld [vmem:[%s13873_s4 + $0x380] sm:$0xff] }
 0x4ca   :  { %v2555_v35 = vsel %vm478_vm0, %v13713_v44, %v13909_v25  ;;  %v10892_v28 = vpack.c.bf16 %v2718_v32, %v2715_v58  ;;  %v10894_v25 = vpack.c.bf16 %v2720_v48, %v2717_v30  ;;  %v2721_v44 = vld [vmem:[%s13873_s4 + $0x360] sm:$0xff]  ;;  %v10907_v58 = vpack.c.bf16 %v2774_v19, %v2771_v51  ;;  %v2726_v30 = vld [vmem:[%s13873_s4 + $0x388] sm:$0xff]  ;;  %v2728_v32 = vld [vmem:[%s13873_s4 + $0x398] sm:$0xff] }
 0x4cb   :  { %13911 = vst [vmem:[#allocation51_spill] sm:$0xff] %v10878_v15  ;;  %v8832_v17 = vpop.permute.xlu1 %8831  ;;  %3115 = vmatmul.mubr.f32.vlgmr.msra.gmra.mrb[8].mxu0 %v2588_v38  ;;  %3470 = vmatmul.mubr.f32.vlgmr.msra.gmra.mrb[12].mxu1 %v2588_v38  ;;  %v2591_v46 = vmax.f32 %v10754_v47, %v2555_v35  ;;  %v2724_v38 = vld [vmem:[%s13873_s4 + $0x378] sm:$0xff]  ;;  %v10905_v47 = vpack.c.bf16 %v2725_v11, %v2722_v26  ;;  %v2731_v48 = vld [vmem:[%s13873_s4 + $0x3b0] sm:$0xff]  ;;  %v13914_v26 = vunpack.i.h.bf16 %v10728_v41  ;;  %v2777_v11 = vld [vmem:[%s13873_s4 + $0x520] sm:$0xff]  ;;  %v13916_v41 = vmax.f32 %v10740_v3, 0.0 }
 0x4cc   :  { %v8834_v50 = vunpack.i.h.bf16 %v8832_v17  ;;  %v8833_v23 = vunpack.i.l.bf16 %v8832_v17  ;;  %7733 = vmatpush1.bf16.msra.mxu0 %v10840_v7  ;;  %7981 = vmatpush3.bf16.msra.mxu1 %v10854_v5  ;;  %v2723_v17 = vld [vmem:[%s13873_s4 + $0x370] sm:$0xff]  ;;  %13913 = vst [vmem:[#allocation53_spill] sm:$0xff] %v10907_v58  ;;  %v2333_v35 = vmul.f32 %v10217_v4, %v10164_v37  ;;  %v13915_v37 = vmax.f32 %v10257_v42, 0.0 }
 0x4cd   :  { %3185 = vmatprep.mubr.f32.mxu0 %v2591_v46  ;;  %3539 = vmatprep.mubr.f32.mxu1 %v2591_v46  ;;  %13912 = vst [vmem:[#allocation52_spill] sm:$0xff] %v10905_v47  ;;  %v2780_v46 = vld [vmem:[%s13873_s4 + $0x538] sm:$0xff]  ;;  %v10948_v8 = vpack.c.bf16 %v2726_v30, %v2723_v17  ;;  %v10950_v42 = vpack.c.bf16 %v2731_v48, %v2728_v32  ;;  %v2727_v3 = vld [vmem:[%s13873_s4 + $0x390] sm:$0xff]  ;;  %v2729_v30 = vld [vmem:[%s13873_s4 + $0x3a0] sm:$0xff] }
 0x4ce   :  { %v2444_v19 = vsel %vm212_vm1, %v13914_v26, %v8833_v23  ;;  %v2445_v51 = vsel %vm212_vm1, %v8833_v23, %v8834_v50  ;;  %7735 = vmatprep.subr.bf16.mxu0 %v10876_v0  ;;  %7983 = vmatprep.subr.bf16.mxu1 %v10878_v15  ;;  %v10940_v0 = vpack.c.bf16 %v2724_v38, %v2721_v44  ;;  %v2730_v44 = vld [vmem:[%s13873_s4 + $0x3a8] sm:$0xff]  ;;  %v13920_v38 = vmax.f32 %v10743_v1, 0.0  ;;  %v2732_v32 = vld [vmem:[%s13873_s4 + $0x3b8] sm:$0xff]  ;;  %v2783_v48 = vld [vmem:[%s13873_s4 + $0x550] sm:$0xff] }
 0x4cf   :  { %v10934_v5 = vmax.f32 %v13915_v37, %v2444_v19  ;;  %v10938_v26 = vmax.f32 %v13916_v41, %v2445_v51  ;;  %v2418_v23 = vpop.permute.xlu1 %2417  ;;  %v10943_v15 = vadd.f32 %v10227_v12, %v2333_v35  ;;  %13918 = vst [vmem:[#allocation55_spill] sm:$0xff] %v10948_v8  ;;  %13919 = vst [vmem:[#allocation56_spill] sm:$0xff] %v10950_v42  ;;  %v2734_v1 = vld [vmem:[%s13873_s4 + $0x3c8] sm:$0xff]  ;;  %v2420_v51 = vpop.permute.xlu0 %2419 }
 0x4d0   :  { %13917 = vst [vmem:[#allocation54_spill] sm:$0xff] %v10940_v0  ;;  %v2446_v7 = vsel %vm212_vm1, %v8834_v50, %v2418_v23  ;;  %7737 = vmatpush1.bf16.msra.mxu0 %v10892_v28  ;;  %7985 = vmatpush3.bf16.msra.mxu1 %v10894_v25  ;;  %v10966_v17 = vpack.c.bf16 %v2780_v46, %v2777_v11  ;;  %v2786_v19 = vld [vmem:[%s13873_s4 + $0x568] sm:$0xff] }
 0x4d1   :  { %v10960_v35 = vmax.f32 %v13920_v38, %v2446_v7  ;;  %7739 = vmatprep.subr.bf16.mxu0 %v10905_v47  ;;  %7987 = vmatprep.subr.bf16.mxu1 %v10907_v58  ;;  %v8845_v50 = vpack.i.bf16 %v10938_v26, %v10934_v5  ;;  %v2737_v7 = vld [vmem:[%s13873_s4 + $0x3e0] sm:$0xff]  ;;  %v2334_v46 = vmul.f32 %v10217_v4, %v10177_v59  ;;  %v2736_v59 = vld [vmem:[%s13873_s4 + $0x3d8] sm:$0xff] }
 0x4d2   :  { %13921 = vst [vmem:[#allocation57_spill] sm:$0xff] %v10966_v17  ;;  %v2335_v37 = vmul.f32 %v10217_v4, %v10180_v39  ;;  %v10996_v38 = vpack.c.bf16 %v2730_v44, %v2727_v3  ;;  %v10998_v58 = vpack.c.bf16 %v2732_v32, %v2729_v30  ;;  %v13924_v39 = vmax.f32 %v10762_v63, 0.0  ;;  %v2735_v32 = vld [vmem:[%s13873_s4 + $0x3d0] sm:$0xff]  ;;  %v2738_v63 = vld [vmem:[%s13873_s4 + $0x3e8] sm:$0xff] }
 0x4d3   :  { %v2422_v11 = vpop.permute.xlu1 %2421  ;;  %2528 = vrot.lane.b32.xlu1 %v10960_v35, %s9033_s27  ;;  %8846 = vrot.lane.b32.xlu0 %v8845_v50, %s9033_s27  ;;  %v2733_v50 = vld [vmem:[%s13873_s4 + $0x3c0] sm:$0xff]  ;;  %v13725_v3 = vmax.f32 %v10943_v15, 0.0  ;;  %v11013_v44 = vpack.c.bf16 %v2737_v7, %v2734_v1  ;;  %v11015_v30 = vpack.c.bf16 %v2786_v19, %v2783_v48  ;;  %v2743_v1 = vld [vmem:[%s13873_s4 + $0x410] sm:$0xff] }
 0x4d4   :  { %v2448_v41 = vsel %vm212_vm1, %v2420_v51, %v2422_v11  ;;  %7741 = vmatpush1.bf16.msra.mxu0 %v10940_v0  ;;  %7989 = vmatpush3.bf16.msra.mxu1 %v10948_v8  ;;  %13922 = vst [vmem:[#allocation58_spill] sm:$0xff] %v10996_v38  ;;  %13923 = vst [vmem:[#allocation59_spill] sm:$0xff] %v10998_v58  ;;  %v2789_v7 = vld [vmem:[%s13873_s4 + $0x580] sm:$0xff]  ;;  %v2792_v48 = vld [vmem:[%s13873_s4 + $0x598] sm:$0xff]  ;;  %v11055_v0 = vpack.c.bf16 %v2738_v63, %v2735_v32 }
 0x4d5   :  { %v11008_v47 = vmax.f32 %v13924_v39, %v2448_v41  ;;  %7743 = vmatprep.subr.bf16.mxu0 %v10950_v42  ;;  %7991 = vmatprep.subr.bf16.mxu1 %v10966_v17  ;;  %13925 = vst [vmem:[#allocation60_spill] sm:$0xff] %v11013_v44  ;;  %13926 = vst [vmem:[#allocation61_spill] sm:$0xff] %v11015_v30  ;;  %v2740_v41 = vld [vmem:[%s13873_s4 + $0x3f8] sm:$0xff]  ;;  %v2447_v39 = vsel %vm212_vm1, %v2418_v23, %v2420_v51  ;;  %v2741_v32 = vld [vmem:[%s13873_s4 + $0x400] sm:$0xff] }
 0x4d6   :  { %v11044_v23 = vadd.f32 %v10227_v12, %v2334_v46  ;;  %v11047_v51 = vadd.f32 %v10227_v12, %v2335_v37  ;;  %v11053_v42 = vpack.c.bf16 %v2736_v59, %v2733_v50  ;;  %v2739_v46 = vld [vmem:[%s13873_s4 + $0x3f0] sm:$0xff]  ;;  %v2742_v37 = vld [vmem:[%s13873_s4 + $0x408] sm:$0xff]  ;;  %v11069_v50 = vpack.c.bf16 %v2743_v1, %v2740_v41  ;;  %v2744_v63 = vld [vmem:[%s13873_s4 + $0x418] sm:$0xff] }
 0x4d7   :  { %v11036_v19 = vpop.permute.xlu1 %8841  ;;  %2532 = vrot.lane.b32.xlu1 %v11008_v47, %s9033_s27  ;;  %2427 = vrot.lane.b32.xlu0 %v13725_v3, %s9031_s28  ;;  %v13927_v3 = vmax.f32 %v10780_v43, 0.0  ;;  %v11071_v59 = vpack.c.bf16 %v2792_v48, %v2789_v7  ;;  %v2746_v43 = vld [vmem:[%s13873_s4 + $0x428] sm:$0xff]  ;;  %v2749_v1 = vld [vmem:[%s13873_s4 + $0x440] sm:$0xff] }
 0x4d8   :  { %v8843_v8 = vunpack.i.l.bf16 %v11036_v19  ;;  %7745 = vmatpush1.bf16.msra.mxu0 %v10996_v38  ;;  %7993 = vmatpush3.bf16.msra.mxu1 %v10998_v58  ;;  %v2795_v7 = vld [vmem:[%s13873_s4 + $0x5b0] sm:$0xff]  ;;  %v2798_v48 = vld [vmem:[%s13873_s4 + $0x5c8] sm:$0xff] }
 0x4d9   :  { %v11065_v17 = vmax.f32 %v13927_v3, %v2447_v39  ;;  %7747 = vmatprep.subr.bf16.mxu0 %v11013_v44  ;;  %7995 = vmatprep.subr.bf16.mxu1 %v11015_v30  ;;  %13928 = vst [vmem:[#allocation62_spill] sm:$0xff] %v11071_v59  ;;  %v13929_v39 = vunpack.i.h.bf16 %v11036_v19  ;;  %v13930_v30 = vmax.f32 %v10794_v27, 0.0  ;;  %v2745_v27 = vld [vmem:[%s13873_s4 + $0x420] sm:$0xff]  ;;  %v2754_v38 = vld [vmem:[%s13873_s4 + $0x468] sm:$0xff] }
 0x4da   :  { %v2449_v3 = vsel %vm212_vm1, %v2422_v11, %v8843_v8  ;;  %v13931_v11 = vmax.f32 %v10797_v20, 0.0  ;;  %v2748_v20 = vld [vmem:[%s13873_s4 + $0x438] sm:$0xff] }
 0x4db   :  { %v2450_v41 = vsel %vm212_vm1, %v8843_v8, %v13929_v39  ;;  %v11097_v58 = vmax.f32 %v13930_v30, %v2449_v3  ;;  %2530 = vrot.lane.b32.xlu0 %v11065_v17, %s9033_s27  ;;  %v11107_v8 = vpack.c.bf16 %v2742_v37, %v2739_v46  ;;  %v11109_v39 = vpack.c.bf16 %v2744_v63, %v2741_v32  ;;  %v2747_v63 = vld [vmem:[%s13873_s4 + $0x430] sm:$0xff]  ;;  %v2750_v3 = vld [vmem:[%s13873_s4 + $0x448] sm:$0xff] }
 0x4dc   :  { %v11101_v44 = vmax.f32 %v13931_v11, %v2450_v41  ;;  %7749 = vmatpush1.bf16.msra.mxu0 %v11053_v42  ;;  %7997 = vmatpush3.bf16.msra.mxu1 %v11055_v0  ;;  %v11122_v46 = vpack.c.bf16 %v2749_v1, %v2746_v43  ;;  %v11124_v37 = vpack.c.bf16 %v2798_v48, %v2795_v7  ;;  %v2752_v41 = vld [vmem:[%s13873_s4 + $0x458] sm:$0xff]  ;;  %v2755_v43 = vld [vmem:[%s13873_s4 + $0x470] sm:$0xff]  ;;  %v2801_v1 = vld [vmem:[%s13873_s4 + $0x5e0] sm:$0xff] }
 0x4dd   :  { %13932 = vst [vmem:[#allocation63_spill] sm:$0xff] %v11107_v8  ;;  %13933 = vst [vmem:[#allocation64_spill] sm:$0xff] %v11109_v39  ;;  %7751 = vmatprep.subr.bf16.mxu0 %v11069_v50  ;;  %7999 = vmatprep.subr.bf16.mxu1 %v11071_v59  ;;  %v2804_v7 = vld [vmem:[%s13873_s4 + $0x5f8] sm:$0xff]  ;;  %v11148_v48 = vpack.c.bf16 %v2748_v20, %v2745_v27  ;;  %v11150_v11 = vpack.c.bf16 %v2750_v3, %v2747_v63  ;;  %v2751_v32 = vld [vmem:[%s13873_s4 + $0x450] sm:$0xff] }
 0x4de   :  { %v8850_v30 = vpack.i.bf16 %v11101_v44, %v11097_v58  ;;  %13934 = vst [vmem:[#allocation65_spill] sm:$0xff] %v11122_v46  ;;  %13935 = vst [vmem:[#allocation66_spill] sm:$0xff] %v11124_v37  ;;  %v11164_v20 = vpack.c.bf16 %v2755_v43, %v2752_v41  ;;  %v11166_v63 = vpack.c.bf16 %v2804_v7, %v2801_v1  ;;  %v2753_v3 = vld [vmem:[%s13873_s4 + $0x460] sm:$0xff]  ;;  %v2855_v41 = vld [vmem:[%s13873_s4 + $0x790] sm:$0xff] }
 0x4df   :  { %13936 = vst [vmem:[#allocation67_spill] sm:$0xff] %v11148_v48  ;;  %13937 = vst [vmem:[#allocation68_spill] sm:$0xff] %v11150_v11  ;;  %v2858_v43 = vld [vmem:[%s13873_s4 + $0x7a8] sm:$0xff]  ;;  %v11189_v1 = vpack.c.bf16 %v2754_v38, %v2751_v32  ;;  %v2764_v38 = vld [vmem:[%s13873_s4 + $0x4b8] sm:$0xff] }
 0x4e0   :  { %8851 = vrot.lane.b32.xlu0 %v8850_v30, %s9033_s27  ;;  %7753 = vmatpush1.bf16.msra.mxu0 %v11107_v8  ;;  %v13938_v30 = vmax.f32 %v11044_v23, 0.0  ;;  %13940 = vst [vmem:[#allocation69_spill] sm:$0xff] %v11164_v20  ;;  %13941 = vst [vmem:[#allocation70_spill] sm:$0xff] %v11166_v63  ;;  %v2756_v8 = vld [vmem:[%s13873_s4 + $0x478] sm:$0xff]  ;;  %v2807_v32 = vld [vmem:[%s13873_s4 + $0x610] sm:$0xff] }
 0x4e1   :  { %8001 = vmatpush3.bf16.msra.mxu1 %v11109_v39  ;;  %7755 = vmatprep.subr.bf16.mxu0 %v11122_v46  ;;  %v13939_v39 = vmax.f32 %v11047_v51, 0.0  ;;  %13942 = vst [vmem:[#allocation71_spill] sm:$0xff] %v11189_v1  ;;  %v11191_v7 = vpack.c.bf16 %v2756_v8, %v2753_v3  ;;  %v2760_v46 = vld [vmem:[%s13873_s4 + $0x498] sm:$0xff]  ;;  %v11206_v8 = vpack.c.bf16 %v2858_v43, %v2855_v41  ;;  %v2810_v3 = vld [vmem:[%s13873_s4 + $0x628] sm:$0xff]  ;;  %v2861_v41 = vld [vmem:[%s13873_s4 + $0x7c0] sm:$0xff] }
 0x4e2   :  { %8003 = vmatprep.subr.bf16.mxu1 %v11124_v37  ;;  %v2758_v37 = vld [vmem:[%s13873_s4 + $0x488] sm:$0xff]  ;;  %v2864_v43 = vld [vmem:[%s13873_s4 + $0x7d8] sm:$0xff] }
 0x4e3   :  { %v8855_v27 = vpack.i.bf16 %v13939_v39, %v13938_v30  ;;  %v2761_v39 = vld [vmem:[%s13873_s4 + $0x4a0] sm:$0xff]  ;;  %13943 = vst [vmem:[#allocation72_spill] sm:$0xff] %v11191_v7  ;;  %13945 = vst [vmem:[#allocation74_spill] sm:$0xff] %v11206_v8 }
 0x4e4   :  { %7757 = vmatpush1.bf16.msra.mxu0 %v11148_v48  ;;  %v2757_v30 = vld [vmem:[%s13873_s4 + $0x480] sm:$0xff] }
 0x4e5   :  { %8856 = vrot.lane.b32.xlu0 %v8855_v27, %s9031_s28  ;;  %8005 = vmatpush3.bf16.msra.mxu1 %v11150_v11  ;;  %v11201_v27 = vpack.c.bf16 %v2761_v39, %v2758_v37  ;;  %v13946_v11 = vunpack.i.l.bf16 %v10838_v24  ;;  %v2767_v39 = vld [vmem:[%s13873_s4 + $0x4d0] sm:$0xff] }
 0x4e6   :  { %7759 = vmatprep.subr.bf16.mxu0 %v11164_v20  ;;  %8007 = vmatprep.subr.bf16.mxu1 %v11166_v63  ;;  %v13947_v63 = vunpack.i.h.bf16 %v10816_v9  ;;  %v11230_v20 = vpack.c.bf16 %v2760_v46, %v2757_v30  ;;  %v2763_v9 = vld [vmem:[%s13873_s4 + $0x4b0] sm:$0xff]  ;;  %v2770_v46 = vld [vmem:[%s13873_s4 + $0x4e8] sm:$0xff]  ;;  %v11250_v30 = vpack.c.bf16 %v2864_v43, %v2861_v41  ;;  %v2769_v41 = vld [vmem:[%s13873_s4 + $0x4e0] sm:$0xff] }
 0x4e7   :  { %13944 = vst [vmem:[#allocation73_spill] sm:$0xff] %v11201_v27  ;;  %v2772_v43 = vld [vmem:[%s13873_s4 + $0x4f8] sm:$0xff] }
 0x4e8   :  { %v2554_v37 = vsel %vm478_vm0, %v13947_v63, %v13946_v11  ;;  %7761 = vmatpush1.bf16.msra.mxu0 %v11189_v1  ;;  %13948 = vst [vmem:[#allocation75_spill] sm:$0xff] %v11230_v20  ;;  %v2766_v11 = vld [vmem:[%s13873_s4 + $0x4c8] sm:$0xff]  ;;  %v11238_v63 = vpack.c.bf16 %v2810_v3, %v2807_v32  ;;  %v11244_v1 = vpack.c.bf16 %v2767_v39, %v2764_v38  ;;  %13951 = vst [vmem:[#allocation78_spill] sm:$0xff] %v11250_v30  ;;  %v2813_v32 = vld [vmem:[%s13873_s4 + $0x640] sm:$0xff] }
 0x4e9   :  { %8009 = vmatpush3.bf16.msra.mxu1 %v11191_v7  ;;  %7763 = vmatprep.subr.bf16.mxu0 %v11201_v27  ;;  %v11242_v48 = vmax.f32 %v10726_v57, %v2554_v37  ;;  %v2816_v3 = vld [vmem:[%s13873_s4 + $0x658] sm:$0xff]  ;;  %v2773_v57 = vld [vmem:[%s13873_s4 + $0x500] sm:$0xff]  ;;  %v2867_v38 = vld [vmem:[%s13873_s4 + $0x7f0] sm:$0xff]  ;;  %v11269_v39 = vpack.c.bf16 %v2766_v11, %v2763_v9 }
 0x4ea   :  { %13949 = vst [vmem:[#allocation76_spill] sm:$0xff] %v11238_v63  ;;  %13950 = vst [vmem:[#allocation77_spill] sm:$0xff] %v11244_v1  ;;  %8011 = vmatprep.subr.bf16.mxu1 %v11206_v8  ;;  %v2870_v37 = vld [vmem:[%s13873_s4 + $0x808] sm:$0xff]  ;;  %v11278_v8 = vpack.c.bf16 %v2816_v3, %v2813_v32  ;;  %v11281_v7 = vpack.c.bf16 %v2773_v57, %v2770_v46  ;;  %v2776_v9 = vld [vmem:[%s13873_s4 + $0x518] sm:$0xff] }
 0x4eb   :  { %13952 = vst [vmem:[#allocation79_spill] sm:$0xff] %v11269_v39  ;;  %v11287_v11 = vpack.c.bf16 %v2870_v37, %v2867_v38  ;;  %v2822_v32 = vld [vmem:[%s13873_s4 + $0x688] sm:$0xff]  ;;  %v2779_v46 = vld [vmem:[%s13873_s4 + $0x530] sm:$0xff]  ;;  %v2873_v3 = vld [vmem:[%s13873_s4 + $0x820] sm:$0xff]  ;;  %v11305_v38 = vpack.c.bf16 %v2772_v43, %v2769_v41 }
 0x4ec   :  { %3540 = vmatmul.mubr.f32.vlgmr.msra.gmra.mrb[14].mxu1 %v11242_v48  ;;  %7765 = vmatpush1.bf16.msra.mxu0 %v11230_v20  ;;  %13953 = vst [vmem:[#allocation80_spill] sm:$0xff] %v11278_v8  ;;  %13954 = vst [vmem:[#allocation81_spill] sm:$0xff] %v11281_v7  ;;  %v2819_v20 = vld [vmem:[%s13873_s4 + $0x670] sm:$0xff]  ;;  %v2876_v57 = vld [vmem:[%s13873_s4 + $0x838] sm:$0xff] }
 0x4ed   :  { %8013 = vmatpush3.bf16.msra.mxu1 %v11238_v63  ;;  %7767 = vmatprep.subr.bf16.mxu0 %v11244_v1  ;;  %13955 = vst [vmem:[#allocation82_spill] sm:$0xff] %v11287_v11  ;;  %13956 = vst [vmem:[#allocation83_spill] sm:$0xff] %v11305_v38  ;;  %v2775_v37 = vld [vmem:[%s13873_s4 + $0x510] sm:$0xff]  ;;  %v11314_v63 = vpack.c.bf16 %v2822_v32, %v2819_v20  ;;  %v11317_v1 = vpack.c.bf16 %v2779_v46, %v2776_v9  ;;  %v2782_v41 = vld [vmem:[%s13873_s4 + $0x548] sm:$0xff] }
 0x4ee   :  { %8015 = vmatprep.subr.bf16.mxu1 %v11250_v30  ;;  %v2778_v30 = vld [vmem:[%s13873_s4 + $0x528] sm:$0xff]  ;;  %v11323_v43 = vpack.c.bf16 %v2876_v57, %v2873_v3  ;;  %v2828_v20 = vld [vmem:[%s13873_s4 + $0x6b8] sm:$0xff]  ;;  %v2785_v9 = vld [vmem:[%s13873_s4 + $0x560] sm:$0xff] }
 0x4ef   :  { %13957 = vst [vmem:[#allocation84_spill] sm:$0xff] %v11314_v63  ;;  %13958 = vst [vmem:[#allocation85_spill] sm:$0xff] %v11317_v1  ;;  %v2879_v32 = vld [vmem:[%s13873_s4 + $0x850] sm:$0xff]  ;;  %v2882_v46 = vld [vmem:[%s13873_s4 + $0x868] sm:$0xff]  ;;  %v11341_v3 = vpack.c.bf16 %v2778_v30, %v2775_v37 }
 0x4f0   :  { %7769 = vmatpush1.bf16.msra.mxu0 %v11269_v39  ;;  %13959 = vst [vmem:[#allocation86_spill] sm:$0xff] %v11323_v43  ;;  %v2825_v39 = vld [vmem:[%s13873_s4 + $0x6a0] sm:$0xff]  ;;  %v2788_v30 = vld [vmem:[%s13873_s4 + $0x578] sm:$0xff]  ;;  %v11359_v37 = vpack.c.bf16 %v2882_v46, %v2879_v32  ;;  %v2787_v46 = vld [vmem:[%s13873_s4 + $0x570] sm:$0xff] }
 0x4f1   :  { %8017 = vmatpush3.bf16.msra.mxu1 %v11278_v8  ;;  %7771 = vmatprep.subr.bf16.mxu0 %v11281_v7  ;;  %13960 = vst [vmem:[#allocation87_spill] sm:$0xff] %v11341_v3  ;;  %v2781_v57 = vld [vmem:[%s13873_s4 + $0x540] sm:$0xff]  ;;  %v11350_v8 = vpack.c.bf16 %v2828_v20, %v2825_v39  ;;  %v11353_v7 = vpack.c.bf16 %v2785_v9, %v2782_v41  ;;  %v2834_v39 = vld [vmem:[%s13873_s4 + $0x6e8] sm:$0xff]  ;;  %v2791_v41 = vld [vmem:[%s13873_s4 + $0x590] sm:$0xff] }
 0x4f2   :  { %8019 = vmatprep.subr.bf16.mxu1 %v11287_v11  ;;  %v2784_v11 = vld [vmem:[%s13873_s4 + $0x558] sm:$0xff]  ;;  %13963 = vst [vmem:[#allocation90_spill] sm:$0xff] %v11359_v37  ;;  %v2885_v20 = vld [vmem:[%s13873_s4 + $0x880] sm:$0xff] }
 0x4f3   :  { %13961 = vst [vmem:[#allocation88_spill] sm:$0xff] %v11350_v8  ;;  %13962 = vst [vmem:[#allocation89_spill] sm:$0xff] %v11353_v7  ;;  %v2888_v9 = vld [vmem:[%s13873_s4 + $0x898] sm:$0xff]  ;;  %v11377_v32 = vpack.c.bf16 %v2784_v11, %v2781_v57  ;;  %v2794_v11 = vld [vmem:[%s13873_s4 + $0x5a8] sm:$0xff] }
 0x4f4   :  { %7773 = vmatpush1.bf16.msra.mxu0 %v11305_v38  ;;  %v2831_v38 = vld [vmem:[%s13873_s4 + $0x6d0] sm:$0xff]  ;;  %v11395_v57 = vpack.c.bf16 %v2888_v9, %v2885_v20  ;;  %v2793_v9 = vld [vmem:[%s13873_s4 + $0x5a0] sm:$0xff] }
 0x4f5   :  { %8021 = vmatpush3.bf16.msra.mxu1 %v11314_v63  ;;  %7775 = vmatprep.subr.bf16.mxu0 %v11317_v1  ;;  %13964 = vst [vmem:[#allocation91_spill] sm:$0xff] %v11377_v32  ;;  %v11386_v63 = vpack.c.bf16 %v2834_v39, %v2831_v38  ;;  %v11389_v1 = vpack.c.bf16 %v2791_v41, %v2788_v30  ;;  %v2840_v38 = vld [vmem:[%s13873_s4 + $0x718] sm:$0xff]  ;;  %v2797_v30 = vld [vmem:[%s13873_s4 + $0x5c0] sm:$0xff]  ;;  %v2891_v39 = vld [vmem:[%s13873_s4 + $0x8b0] sm:$0xff] }
 0x4f6   :  { %8023 = vmatprep.subr.bf16.mxu1 %v11323_v43  ;;  %v2790_v43 = vld [vmem:[%s13873_s4 + $0x588] sm:$0xff]  ;;  %13967 = vst [vmem:[#allocation94_spill] sm:$0xff] %v11395_v57 }
 0x4f7   :  { %13965 = vst [vmem:[#allocation92_spill] sm:$0xff] %v11386_v63  ;;  %13966 = vst [vmem:[#allocation93_spill] sm:$0xff] %v11389_v1  ;;  %v2894_v41 = vld [vmem:[%s13873_s4 + $0x8c8] sm:$0xff]  ;;  %v11413_v20 = vpack.c.bf16 %v2790_v43, %v2787_v46  ;;  %v2800_v43 = vld [vmem:[%s13873_s4 + $0x5d8] sm:$0xff] }
 0x4f8   :  { %7777 = vmatpush1.bf16.msra.mxu0 %v11341_v3  ;;  %v2837_v3 = vld [vmem:[%s13873_s4 + $0x700] sm:$0xff]  ;;  %v11431_v46 = vpack.c.bf16 %v2894_v41, %v2891_v39  ;;  %v2799_v41 = vld [vmem:[%s13873_s4 + $0x5d0] sm:$0xff] }
 0x4f9   :  { %8025 = vmatpush3.bf16.msra.mxu1 %v11350_v8  ;;  %7779 = vmatprep.subr.bf16.mxu0 %v11353_v7  ;;  %13968 = vst [vmem:[#allocation95_spill] sm:$0xff] %v11413_v20  ;;  %v11422_v8 = vpack.c.bf16 %v2840_v38, %v2837_v3  ;;  %v11425_v7 = vpack.c.bf16 %v2797_v30, %v2794_v11  ;;  %v2846_v3 = vld [vmem:[%s13873_s4 + $0x748] sm:$0xff]  ;;  %v2803_v11 = vld [vmem:[%s13873_s4 + $0x5f0] sm:$0xff]  ;;  %v2897_v38 = vld [vmem:[%s13873_s4 + $0x8e0] sm:$0xff] }
 0x4fa   :  { %8027 = vmatprep.subr.bf16.mxu1 %v11359_v37  ;;  %v2796_v37 = vld [vmem:[%s13873_s4 + $0x5b8] sm:$0xff]  ;;  %13971 = vst [vmem:[#allocation98_spill] sm:$0xff] %v11431_v46 }
 0x4fb   :  { %13969 = vst [vmem:[#allocation96_spill] sm:$0xff] %v11422_v8  ;;  %13970 = vst [vmem:[#allocation97_spill] sm:$0xff] %v11425_v7  ;;  %v2900_v30 = vld [vmem:[%s13873_s4 + $0x8f8] sm:$0xff]  ;;  %v11449_v39 = vpack.c.bf16 %v2796_v37, %v2793_v9  ;;  %v2806_v37 = vld [vmem:[%s13873_s4 + $0x608] sm:$0xff] }
 0x4fc   :  { %7781 = vmatpush1.bf16.msra.mxu0 %v11377_v32  ;;  %v2843_v32 = vld [vmem:[%s13873_s4 + $0x730] sm:$0xff]  ;;  %v11467_v9 = vpack.c.bf16 %v2900_v30, %v2897_v38 }
 0x4fd   :  { %8029 = vmatpush3.bf16.msra.mxu1 %v11386_v63  ;;  %7783 = vmatprep.subr.bf16.mxu0 %v11389_v1  ;;  %13972 = vst [vmem:[#allocation99_spill] sm:$0xff] %v11449_v39  ;;  %v11458_v63 = vpack.c.bf16 %v2846_v3, %v2843_v32  ;;  %v11461_v1 = vpack.c.bf16 %v2803_v11, %v2800_v43  ;;  %v2852_v32 = vld [vmem:[%s13873_s4 + $0x778] sm:$0xff]  ;;  %v2809_v43 = vld [vmem:[%s13873_s4 + $0x620] sm:$0xff]  ;;  %v2951_v3 = vld [vmem:[%s13873_s4 + $0xa90] sm:$0xff] }
 0x4fe   :  { %8031 = vmatprep.subr.bf16.mxu1 %v11395_v57  ;;  %v2802_v57 = vld [vmem:[%s13873_s4 + $0x5e8] sm:$0xff]  ;;  %13975 = vst [vmem:[#allocation102_spill] sm:$0xff] %v11467_v9 }
 0x4ff   :  { %13973 = vst [vmem:[#allocation100_spill] sm:$0xff] %v11458_v63  ;;  %13974 = vst [vmem:[#allocation101_spill] sm:$0xff] %v11461_v1  ;;  %v2954_v11 = vld [vmem:[%s13873_s4 + $0xaa8] sm:$0xff]  ;;  %v11485_v38 = vpack.c.bf16 %v2802_v57, %v2799_v41  ;;  %v2815_v41 = vld [vmem:[%s13873_s4 + $0x650] sm:$0xff] }
 0x500   :  { %7785 = vmatpush1.bf16.msra.mxu0 %v11413_v20  ;;  %v2849_v20 = vld [vmem:[%s13873_s4 + $0x760] sm:$0xff]  ;;  %v11500_v57 = vpack.c.bf16 %v2954_v11, %v2951_v3  ;;  %v2814_v3 = vld [vmem:[%s13873_s4 + $0x648] sm:$0xff] }
 0x501   :  { %8033 = vmatpush3.bf16.msra.mxu1 %v11422_v8  ;;  %7787 = vmatprep.subr.bf16.mxu0 %v11425_v7  ;;  %13976 = vst [vmem:[#allocation103_spill] sm:$0xff] %v11485_v38  ;;  %v11488_v30 = vpack.c.bf16 %v2852_v32, %v2849_v20  ;;  %v2805_v8 = vld [vmem:[%s13873_s4 + $0x600] sm:$0xff]  ;;  %v2808_v7 = vld [vmem:[%s13873_s4 + $0x618] sm:$0xff] }
 0x502   :  { %8035 = vmatprep.subr.bf16.mxu1 %v11431_v46  ;;  %v11491_v46 = vpack.c.bf16 %v2809_v43, %v2806_v37  ;;  %13979 = vst [vmem:[#allocation106_spill] sm:$0xff] %v11500_v57  ;;  %v2812_v20 = vld [vmem:[%s13873_s4 + $0x638] sm:$0xff]  ;;  %v11509_v37 = vpack.c.bf16 %v2808_v7, %v2805_v8  ;;  %v2811_v43 = vld [vmem:[%s13873_s4 + $0x630] sm:$0xff]  ;;  %v2818_v7 = vld [vmem:[%s13873_s4 + $0x668] sm:$0xff] }
 0x503   :  { %13977 = vst [vmem:[#allocation104_spill] sm:$0xff] %v11488_v30  ;;  %v11513_v32 = vpack.c.bf16 %v2815_v41, %v2812_v20  ;;  %v2821_v8 = vld [vmem:[%s13873_s4 + $0x680] sm:$0xff]  ;;  %v11530_v11 = vpack.c.bf16 %v2814_v3, %v2811_v43  ;;  %v2827_v43 = vld [vmem:[%s13873_s4 + $0x6b0] sm:$0xff] }
 0x504   :  { %7789 = vmatpush1.bf16.msra.mxu0 %v11449_v39  ;;  %13978 = vst [vmem:[#allocation105_spill] sm:$0xff] %v11491_v46  ;;  %13980 = vst [vmem:[#allocation107_spill] sm:$0xff] %v11509_v37  ;;  %v11533_v20 = vpack.c.bf16 %v2821_v8, %v2818_v7  ;;  %v2817_v41 = vld [vmem:[%s13873_s4 + $0x660] sm:$0xff]  ;;  %v2823_v8 = vld [vmem:[%s13873_s4 + $0x690] sm:$0xff] }
 0x505   :  { %8037 = vmatpush3.bf16.msra.mxu1 %v11458_v63  ;;  %7791 = vmatprep.subr.bf16.mxu0 %v11461_v1  ;;  %13981 = vst [vmem:[#allocation108_spill] sm:$0xff] %v11513_v32  ;;  %13982 = vst [vmem:[#allocation109_spill] sm:$0xff] %v11530_v11  ;;  %v2832_v63 = vld [vmem:[%s13873_s4 + $0x6d8] sm:$0xff] }
 0x506   :  { %8039 = vmatprep.subr.bf16.mxu1 %v11467_v9  ;;  %13983 = vst [vmem:[#allocation110_spill] sm:$0xff] %v11533_v20  ;;  %v2830_v9 = vld [vmem:[%s13873_s4 + $0x6c8] sm:$0xff] }
 0x508   :  { %7793 = vmatpush1.bf16.msra.mxu0 %v11485_v38  ;;  %v2960_v38 = vld [vmem:[%s13873_s4 + $0xad8] sm:$0xff] }
 0x509   :  { %8041 = vmatpush3.bf16.msra.mxu1 %v11488_v30  ;;  %7795 = vmatprep.subr.bf16.mxu0 %v11491_v46  ;;  %v2826_v30 = vld [vmem:[%s13873_s4 + $0x6a8] sm:$0xff]  ;;  %v2957_v46 = vld [vmem:[%s13873_s4 + $0xac0] sm:$0xff] }
 0x50a   :  { %8043 = vmatprep.subr.bf16.mxu1 %v11500_v57  ;;  %v2820_v57 = vld [vmem:[%s13873_s4 + $0x678] sm:$0xff] }
 0x50b   :  { %3186 = vmatmul.mubr.f32.vlgmr.msra.gmra.mrb[8].mxu0 %v11242_v48  ;;  %v2824_v48 = vld [vmem:[%s13873_s4 + $0x698] sm:$0xff]  ;;  %v11548_v3 = vpack.c.bf16 %v2820_v57, %v2817_v41  ;;  %v2833_v57 = vld [vmem:[%s13873_s4 + $0x6e0] sm:$0xff]  ;;  %v11566_v41 = vpack.c.bf16 %v2826_v30, %v2823_v8  ;;  %v2839_v30 = vld [vmem:[%s13873_s4 + $0x710] sm:$0xff] }
 0x50c   :  { %7797 = vmatpush1.bf16.msra.mxu0 %v11509_v37  ;;  %v11551_v7 = vpack.c.bf16 %v2827_v43, %v2824_v48  ;;  %v11569_v48 = vpack.c.bf16 %v2833_v57, %v2830_v9  ;;  %v2829_v43 = vld [vmem:[%s13873_s4 + $0x6c0] sm:$0xff]  ;;  %v2835_v57 = vld [vmem:[%s13873_s4 + $0x6f0] sm:$0xff] }
 0x50d   :  { %7799 = vmatprep.subr.bf16.mxu0 %v11513_v32  ;;  %13984 = vst [vmem:[#allocation111_spill] sm:$0xff] %v11548_v3  ;;  %13986 = vst [vmem:[#allocation113_spill] sm:$0xff] %v11566_v41  ;;  %v11584_v9 = vpack.c.bf16 %v2832_v63, %v2829_v43  ;;  %v2845_v63 = vld [vmem:[%s13873_s4 + $0x740] sm:$0xff] }
 0x50e   :  { %13985 = vst [vmem:[#allocation112_spill] sm:$0xff] %v11551_v7  ;;  %13987 = vst [vmem:[#allocation114_spill] sm:$0xff] %v11569_v48 }
 0x50f   :  { %13988 = vst [vmem:[#allocation115_spill] sm:$0xff] %v11584_v9 }
 0x510   :  { %7801 = vmatpush1.bf16.msra.mxu0 %v11530_v11 }
 0x511   :  { %7803 = vmatprep.subr.bf16.mxu0 %v11533_v20  ;;  %v2836_v20 = vld [vmem:[%s13873_s4 + $0x6f8] sm:$0xff] }
 0x512   :  { %v11587_v8 = vpack.c.bf16 %v2839_v30, %v2836_v20  ;;  %v2841_v30 = vld [vmem:[%s13873_s4 + $0x720] sm:$0xff] }
 0x514   :  { %7805 = vmatpush1.bf16.msra.mxu0 %v11548_v3  ;;  %13989 = vst [vmem:[#allocation116_spill] sm:$0xff] %v11587_v8  ;;  %v2842_v3 = vld [vmem:[%s13873_s4 + $0x728] sm:$0xff] }
 0x515   :  { %7807 = vmatprep.subr.bf16.mxu0 %v11551_v7  ;;  %v2838_v7 = vld [vmem:[%s13873_s4 + $0x708] sm:$0xff]  ;;  %v11605_v43 = vpack.c.bf16 %v2845_v63, %v2842_v3  ;;  %v2847_v63 = vld [vmem:[%s13873_s4 + $0x750] sm:$0xff] }
 0x516   :  { %v11602_v20 = vpack.c.bf16 %v2838_v7, %v2835_v57  ;;  %v2851_v7 = vld [vmem:[%s13873_s4 + $0x770] sm:$0xff] }
 0x517   :  { %13991 = vst [vmem:[#allocation118_spill] sm:$0xff] %v11605_v43 }
 0x518   :  { %7809 = vmatpush1.bf16.msra.mxu0 %v11566_v41  ;;  %13990 = vst [vmem:[#allocation117_spill] sm:$0xff] %v11602_v20  ;;  %v2848_v41 = vld [vmem:[%s13873_s4 + $0x758] sm:$0xff] }
 0x519   :  { %7811 = vmatprep.subr.bf16.mxu0 %v11569_v48  ;;  %v2844_v48 = vld [vmem:[%s13873_s4 + $0x738] sm:$0xff]  ;;  %v11623_v57 = vpack.c.bf16 %v2851_v7, %v2848_v41  ;;  %v2853_v7 = vld [vmem:[%s13873_s4 + $0x780] sm:$0xff] }
 0x51a   :  { %v11620_v3 = vpack.c.bf16 %v2844_v48, %v2841_v30  ;;  %v2857_v48 = vld [vmem:[%s13873_s4 + $0x7a0] sm:$0xff] }
 0x51b   :  { %13993 = vst [vmem:[#allocation120_spill] sm:$0xff] %v11623_v57 }
 0x51c   :  { %7813 = vmatpush1.bf16.msra.mxu0 %v11584_v9  ;;  %13992 = vst [vmem:[#allocation119_spill] sm:$0xff] %v11620_v3  ;;  %v2854_v9 = vld [vmem:[%s13873_s4 + $0x788] sm:$0xff] }
 0x51d   :  { %7815 = vmatprep.subr.bf16.mxu0 %v11587_v8  ;;  %v2850_v8 = vld [vmem:[%s13873_s4 + $0x768] sm:$0xff]  ;;  %v11641_v30 = vpack.c.bf16 %v2857_v48, %v2854_v9  ;;  %v2859_v48 = vld [vmem:[%s13873_s4 + $0x7b0] sm:$0xff] }
 0x51e   :  { %v11638_v41 = vpack.c.bf16 %v2850_v8, %v2847_v63  ;;  %v2863_v8 = vld [vmem:[%s13873_s4 + $0x7d0] sm:$0xff] }
 0x51f   :  { %13995 = vst [vmem:[#allocation122_spill] sm:$0xff] %v11641_v30 }
 0x520   :  { %7817 = vmatpush1.bf16.msra.mxu0 %v11602_v20  ;;  %13994 = vst [vmem:[#allocation121_spill] sm:$0xff] %v11638_v41  ;;  %v2860_v20 = vld [vmem:[%s13873_s4 + $0x7b8] sm:$0xff] }
 0x521   :  { %7819 = vmatprep.subr.bf16.mxu0 %v11605_v43  ;;  %v2856_v43 = vld [vmem:[%s13873_s4 + $0x798] sm:$0xff]  ;;  %v11659_v63 = vpack.c.bf16 %v2863_v8, %v2860_v20  ;;  %v2865_v8 = vld [vmem:[%s13873_s4 + $0x7e0] sm:$0xff] }
 0x522   :  { %v11656_v9 = vpack.c.bf16 %v2856_v43, %v2853_v7  ;;  %v2869_v43 = vld [vmem:[%s13873_s4 + $0x800] sm:$0xff] }
 0x523   :  { %13997 = vst [vmem:[#allocation124_spill] sm:$0xff] %v11659_v63 }
 0x524   :  { %7821 = vmatpush1.bf16.msra.mxu0 %v11620_v3  ;;  %13996 = vst [vmem:[#allocation123_spill] sm:$0xff] %v11656_v9  ;;  %v2866_v3 = vld [vmem:[%s13873_s4 + $0x7e8] sm:$0xff] }
 0x525   :  { %7823 = vmatprep.subr.bf16.mxu0 %v11623_v57  ;;  %v2862_v57 = vld [vmem:[%s13873_s4 + $0x7c8] sm:$0xff]  ;;  %v11677_v7 = vpack.c.bf16 %v2869_v43, %v2866_v3  ;;  %v2871_v43 = vld [vmem:[%s13873_s4 + $0x810] sm:$0xff] }
 0x526   :  { %v11674_v20 = vpack.c.bf16 %v2862_v57, %v2859_v48  ;;  %v2875_v57 = vld [vmem:[%s13873_s4 + $0x830] sm:$0xff] }
 0x527   :  { %13999 = vst [vmem:[#allocation126_spill] sm:$0xff] %v11677_v7 }
 0x528   :  { %7825 = vmatpush1.bf16.msra.mxu0 %v11638_v41  ;;  %13998 = vst [vmem:[#allocation125_spill] sm:$0xff] %v11674_v20  ;;  %v2872_v41 = vld [vmem:[%s13873_s4 + $0x818] sm:$0xff] }
 0x529   :  { %7827 = vmatprep.subr.bf16.mxu0 %v11641_v30  ;;  %v2868_v30 = vld [vmem:[%s13873_s4 + $0x7f8] sm:$0xff]  ;;  %v11695_v48 = vpack.c.bf16 %v2875_v57, %v2872_v41  ;;  %v2877_v57 = vld [vmem:[%s13873_s4 + $0x840] sm:$0xff] }
 0x52a   :  { %v11692_v3 = vpack.c.bf16 %v2868_v30, %v2865_v8  ;;  %v2881_v30 = vld [vmem:[%s13873_s4 + $0x860] sm:$0xff] }
 0x52b   :  { %14001 = vst [vmem:[#allocation128_spill] sm:$0xff] %v11695_v48 }
 0x52c   :  { %7829 = vmatpush1.bf16.msra.mxu0 %v11656_v9  ;;  %14000 = vst [vmem:[#allocation127_spill] sm:$0xff] %v11692_v3  ;;  %v2878_v9 = vld [vmem:[%s13873_s4 + $0x848] sm:$0xff] }
 0x52d   :  { %7831 = vmatprep.subr.bf16.mxu0 %v11659_v63  ;;  %v2874_v63 = vld [vmem:[%s13873_s4 + $0x828] sm:$0xff]  ;;  %v11713_v8 = vpack.c.bf16 %v2881_v30, %v2878_v9  ;;  %v2883_v30 = vld [vmem:[%s13873_s4 + $0x870] sm:$0xff] }
 0x52e   :  { %v11710_v41 = vpack.c.bf16 %v2874_v63, %v2871_v43  ;;  %v2887_v63 = vld [vmem:[%s13873_s4 + $0x890] sm:$0xff] }
 0x52f   :  { %14003 = vst [vmem:[#allocation130_spill] sm:$0xff] %v11713_v8 }
 0x530   :  { %7833 = vmatpush1.bf16.msra.mxu0 %v11674_v20  ;;  %14002 = vst [vmem:[#allocation129_spill] sm:$0xff] %v11710_v41  ;;  %v2884_v20 = vld [vmem:[%s13873_s4 + $0x878] sm:$0xff] }
 0x531   :  { %7835 = vmatprep.subr.bf16.mxu0 %v11677_v7  ;;  %v2880_v7 = vld [vmem:[%s13873_s4 + $0x858] sm:$0xff]  ;;  %v11731_v43 = vpack.c.bf16 %v2887_v63, %v2884_v20  ;;  %v2889_v63 = vld [vmem:[%s13873_s4 + $0x8a0] sm:$0xff] }
 0x532   :  { %v11728_v9 = vpack.c.bf16 %v2880_v7, %v2877_v57  ;;  %v2893_v7 = vld [vmem:[%s13873_s4 + $0x8c0] sm:$0xff] }
 0x533   :  { %14005 = vst [vmem:[#allocation132_spill] sm:$0xff] %v11731_v43 }
 0x534   :  { %7837 = vmatpush1.bf16.msra.mxu0 %v11692_v3  ;;  %14004 = vst [vmem:[#allocation131_spill] sm:$0xff] %v11728_v9  ;;  %v2890_v3 = vld [vmem:[%s13873_s4 + $0x8a8] sm:$0xff] }
 0x535   :  { %7839 = vmatprep.subr.bf16.mxu0 %v11695_v48  ;;  %v2886_v48 = vld [vmem:[%s13873_s4 + $0x888] sm:$0xff]  ;;  %v11749_v57 = vpack.c.bf16 %v2893_v7, %v2890_v3  ;;  %v2895_v7 = vld [vmem:[%s13873_s4 + $0x8d0] sm:$0xff] }
 0x536   :  { %v11746_v20 = vpack.c.bf16 %v2886_v48, %v2883_v30  ;;  %v2899_v48 = vld [vmem:[%s13873_s4 + $0x8f0] sm:$0xff] }
 0x537   :  { %14007 = vst [vmem:[#allocation134_spill] sm:$0xff] %v11749_v57 }
 0x538   :  { %7841 = vmatpush1.bf16.msra.mxu0 %v11710_v41  ;;  %14006 = vst [vmem:[#allocation133_spill] sm:$0xff] %v11746_v20  ;;  %v2896_v41 = vld [vmem:[%s13873_s4 + $0x8d8] sm:$0xff] }
 0x539   :  { %7843 = vmatprep.subr.bf16.mxu0 %v11713_v8  ;;  %v2892_v8 = vld [vmem:[%s13873_s4 + $0x8b8] sm:$0xff]  ;;  %v11767_v30 = vpack.c.bf16 %v2899_v48, %v2896_v41 }
 0x53a   :  { %v11764_v3 = vpack.c.bf16 %v2892_v8, %v2889_v63  ;;  %v2905_v8 = vld [vmem:[%s13873_s4 + $0x920] sm:$0xff] }
 0x53b   :  { %14009 = vst [vmem:[#allocation136_spill] sm:$0xff] %v11767_v30 }
 0x53c   :  { %7845 = vmatpush1.bf16.msra.mxu0 %v11728_v9  ;;  %14008 = vst [vmem:[#allocation135_spill] sm:$0xff] %v11764_v3  ;;  %v2902_v9 = vld [vmem:[%s13873_s4 + $0x908] sm:$0xff] }
 0x53d   :  { %7847 = vmatprep.subr.bf16.mxu0 %v11731_v43  ;;  %v2898_v43 = vld [vmem:[%s13873_s4 + $0x8e8] sm:$0xff]  ;;  %v11787_v48 = vpack.c.bf16 %v2905_v8, %v2902_v9  ;;  %v2911_v8 = vld [vmem:[%s13873_s4 + $0x950] sm:$0xff] }
 0x53e   :  { %v11782_v41 = vpack.c.bf16 %v2898_v43, %v2895_v7  ;;  %v2903_v43 = vld [vmem:[%s13873_s4 + $0x910] sm:$0xff]  ;;  %v2906_v9 = vld [vmem:[%s13873_s4 + $0x928] sm:$0xff]  ;;  %v2908_v7 = vld [vmem:[%s13873_s4 + $0x938] sm:$0xff] }
 0x53f   :  { %14011 = vst [vmem:[#allocation138_spill] sm:$0xff] %v11787_v48  ;;  %v11829_v39 = vpack.c.bf16 %v2906_v9, %v2903_v43  ;;  %v11838_v59 = vpack.c.bf16 %v2911_v8, %v2908_v7  ;;  %v2917_v43 = vld [vmem:[%s13873_s4 + $0x980] sm:$0xff] }
 0x540   :  { %7849 = vmatpush1.bf16.msra.mxu0 %v11746_v20  ;;  %14010 = vst [vmem:[#allocation137_spill] sm:$0xff] %v11782_v41  ;;  %v14012_v20 = vunpack.i.h.bf16 %v10838_v24  ;;  %v2913_v8 = vld [vmem:[%s13873_s4 + $0x960] sm:$0xff] }
 0x541   :  { %7851 = vmatprep.subr.bf16.mxu0 %v11749_v57  ;;  %v2901_v57 = vld [vmem:[%s13873_s4 + $0x900] sm:$0xff]  ;;  %14015 = vst [vmem:[#allocation140_spill] sm:$0xff] %v11829_v39  ;;  %14017 = vst [vmem:[#allocation141_spill] sm:$0xff] %v11838_v59 }
 0x544   :  { %7853 = vmatpush1.bf16.msra.mxu0 %v11764_v3  ;;  %v2904_v3 = vld [vmem:[%s13873_s4 + $0x918] sm:$0xff] }
 0x545   :  { %v11784_v63 = vpop.permute.xlu0 %8846  ;;  %7855 = vmatprep.subr.bf16.mxu0 %v11767_v30 }
 0x546   :  { %v8848_v11 = vunpack.i.l.bf16 %v11784_v63  ;;  %v14013_v32 = vunpack.i.h.bf16 %v11784_v63 }
 0x548   :  { %v2556_v30 = vsel %vm478_vm0, %v14012_v20, %v8848_v11  ;;  %7857 = vmatpush1.bf16.msra.mxu0 %v11782_v41  ;;  %v2557_v37 = vsel %vm478_vm0, %v8848_v11, %v14013_v32  ;;  %v11827_v41 = vpack.c.bf16 %v2904_v3, %v2901_v57  ;;  %v2907_v32 = vld [vmem:[%s13873_s4 + $0x930] sm:$0xff]  ;;  %v14016_v11 = vunpack.i.h.bf16 %v11036_v19 }
 0x549   :  { %v11822_v1 = vpop.permute.xlu0 %2427  ;;  %v2593_v24 = vmax.f32 %v10934_v5, %v2557_v37  ;;  %7859 = vmatprep.subr.bf16.mxu0 %v11787_v48  ;;  %v2592_v20 = vmax.f32 %v10758_v52, %v2556_v30  ;;  %v2910_v5 = vld [vmem:[%s13873_s4 + $0x948] sm:$0xff]  ;;  %v2909_v52 = vld [vmem:[%s13873_s4 + $0x940] sm:$0xff]  ;;  %v2912_v37 = vld [vmem:[%s13873_s4 + $0x958] sm:$0xff]  ;;  %v14018_v57 = vmax.f32 %v10800_v13, 0.0  ;;  %v11853_v19 = vpack.c.bf16 %v2960_v38, %v2957_v46  ;;  %v11867_v46 = vpop.permute.xlu1 %2528 }
 0x54a   :  { %14014 = vst [vmem:[#allocation139_spill] sm:$0xff] %v11827_v41  ;;  %v2451_v27 = vsel %vm212_vm1, %v14016_v11, %v11822_v1  ;;  %v2914_v30 = vld [vmem:[%s13873_s4 + $0x968] sm:$0xff]  ;;  %v2963_v13 = vld [vmem:[%s13873_s4 + $0xaf0] sm:$0xff]  ;;  %v11873_v9 = vpack.c.bf16 %v2910_v5, %v2907_v32  ;;  %v11875_v7 = vpack.c.bf16 %v2912_v37, %v2909_v52  ;;  %v2920_v5 = vld [vmem:[%s13873_s4 + $0x998] sm:$0xff] }
 0x54b   :  { %v11851_v3 = vmax.f32 %v14018_v57, %v2451_v27  ;;  %3256 = vmatprep.mubr.f32.mxu0 %v2593_v24  ;;  %3609 = vmatprep.mubr.f32.mxu1 %v2593_v24  ;;  %14019 = vst [vmem:[#allocation142_spill] sm:$0xff] %v11853_v19  ;;  %v2966_v27 = vld [vmem:[%s13873_s4 + $0xb08] sm:$0xff]  ;;  %v2916_v24 = vld [vmem:[%s13873_s4 + $0x978] sm:$0xff]  ;;  %v2915_v32 = vld [vmem:[%s13873_s4 + $0x970] sm:$0xff]  ;;  %v11900_v37 = vpack.c.bf16 %v2917_v43, %v2914_v30 }
 0x54c   :  { %3257 = vmatmul.mubr.f32.vlgmr.msra.gmra.mrb[8].mxu0 %v2592_v20  ;;  %3610 = vmatmul.mubr.f32.vlgmr.msra.gmra.mrb[16].mxu1 %v2592_v20  ;;  %14020 = vst [vmem:[#allocation143_spill] sm:$0xff] %v11873_v9  ;;  %14021 = vst [vmem:[#allocation144_spill] sm:$0xff] %v11875_v7  ;;  %v2918_v11 = vld [vmem:[%s13873_s4 + $0x988] sm:$0xff]  ;;  %v11902_v57 = vpack.c.bf16 %v2966_v27, %v2963_v13  ;;  %v11917_v30 = vpack.c.bf16 %v2916_v24, %v2913_v8  ;;  %v2919_v13 = vld [vmem:[%s13873_s4 + $0x990] sm:$0xff] }
 0x54d   :  { %7861 = vmatpush1.bf16.msra.mxu0 %v11827_v41  ;;  %8045 = vmatpush3.bf16.msra.mxu1 %v11829_v39  ;;  %v11871_v38 = vpop.permute.xlu0 %2530  ;;  %14022 = vst [vmem:[#allocation145_spill] sm:$0xff] %v11900_v37  ;;  %v2923_v39 = vld [vmem:[%s13873_s4 + $0x9b0] sm:$0xff]  ;;  %v2972_v41 = vld [vmem:[%s13873_s4 + $0xb38] sm:$0xff]  ;;  %v11919_v43 = vpack.c.bf16 %v2918_v11, %v2915_v32  ;;  %v2922_v27 = vld [vmem:[%s13873_s4 + $0x9a8] sm:$0xff]  ;;  %v2336_v32 = vmul.f32 %v10217_v4, %v10194_v22 }
 0x54e   :  { %2538 = vrot.lane.b32.xlu1 %v11851_v3, %s9033_s27  ;;  %v2559_v20 = vsel %vm478_vm0, %v11867_v46, %v11871_v38  ;;  %7863 = vmatprep.subr.bf16.mxu0 %v11838_v59  ;;  %14023 = vst [vmem:[#allocation146_spill] sm:$0xff] %v11902_v57  ;;  %v2969_v59 = vld [vmem:[%s13873_s4 + $0xb20] sm:$0xff]  ;;  %v2924_v24 = vld [vmem:[%s13873_s4 + $0x9b8] sm:$0xff]  ;;  %v2926_v11 = vld [vmem:[%s13873_s4 + $0x9c8] sm:$0xff] }
 0x54f   :  { %8047 = vmatprep.subr.bf16.mxu1 %v11853_v19  ;;  %v2595_v52 = vmax.f32 %v10960_v35, %v2559_v20  ;;  %14024 = vst [vmem:[#allocation147_spill] sm:$0xff] %v11919_v43  ;;  %v2921_v8 = vld [vmem:[%s13873_s4 + $0x9a0] sm:$0xff]  ;;  %v2978_v22 = vld [vmem:[%s13873_s4 + $0xb68] sm:$0xff] }
 0x550   :  { %v11968_v19 = vpack.c.bf16 %v2924_v24, %v2921_v8  ;;  %v2925_v48 = vld [vmem:[%s13873_s4 + $0x9c0] sm:$0xff]  ;;  %v2935_v8 = vld [vmem:[%s13873_s4 + $0xa10] sm:$0xff] }
 0x551   :  { %7865 = vmatpush1.bf16.msra.mxu0 %v11873_v9  ;;  %8049 = vmatpush3.bf16.msra.mxu1 %v11875_v7  ;;  %v11928_v9 = vpack.c.bf16 %v2923_v39, %v2920_v5  ;;  %v11930_v7 = vpack.c.bf16 %v2972_v41, %v2969_v59  ;;  %v2929_v59 = vld [vmem:[%s13873_s4 + $0x9e0] sm:$0xff]  ;;  %v2975_v39 = vld [vmem:[%s13873_s4 + $0xb50] sm:$0xff]  ;;  %v11961_v5 = vadd.f32 %v10227_v12, %v2336_v32 }
 0x552   :  { %v11915_v35 = vpop.permute.xlu0 %8851  ;;  %3327 = vmatprep.mubr.f32.mxu0 %v2595_v52  ;;  %3679 = vmatprep.mubr.f32.mxu1 %v2595_v52  ;;  %v11943_v52 = vpop.permute.xlu1 %2532  ;;  %14026 = vst [vmem:[#allocation149_spill] sm:$0xff] %v11968_v19  ;;  %v11978_v32 = vpack.c.bf16 %v2929_v59, %v2926_v11  ;;  %v2981_v24 = vld [vmem:[%s13873_s4 + $0xb80] sm:$0xff]  ;;  %v2984_v11 = vld [vmem:[%s13873_s4 + $0xb98] sm:$0xff] }
 0x553   :  { %v13815_v20 = vunpack.i.l.bf16 %v11915_v35  ;;  %7867 = vmatprep.subr.bf16.mxu0 %v11900_v37  ;;  %8051 = vmatprep.subr.bf16.mxu1 %v11902_v57  ;;  %v11966_v37 = vpack.c.bf16 %v2922_v27, %v2919_v13  ;;  %v2930_v13 = vld [vmem:[%s13873_s4 + $0x9e8] sm:$0xff]  ;;  %v2932_v27 = vld [vmem:[%s13873_s4 + $0x9f8] sm:$0xff]  ;;  %v13819_v59 = vmax.f32 %v11961_v5, 0.0 }
 0x554   :  { %14027 = vst [vmem:[#allocation150_spill] sm:$0xff] %v11978_v32 }
 0x555   :  { %v2561_v41 = vsel %vm478_vm0, %v11943_v52, %v13815_v20  ;;  %7869 = vmatpush1.bf16.msra.mxu0 %v11917_v30  ;;  %8053 = vmatpush3.bf16.msra.mxu1 %v11919_v43  ;;  %14025 = vst [vmem:[#allocation148_spill] sm:$0xff] %v11966_v37  ;;  %v2928_v20 = vld [vmem:[%s13873_s4 + $0x9d8] sm:$0xff]  ;;  %v11980_v43 = vpack.c.bf16 %v2978_v22, %v2975_v39  ;;  %v2931_v22 = vld [vmem:[%s13873_s4 + $0x9f0] sm:$0xff] }
 0x556   :  { %v2597_v57 = vmax.f32 %v11008_v47, %v2561_v41  ;;  %7871 = vmatprep.subr.bf16.mxu0 %v11928_v9  ;;  %8055 = vmatprep.subr.bf16.mxu1 %v11930_v7  ;;  %v2927_v47 = vld [vmem:[%s13873_s4 + $0x9d0] sm:$0xff]  ;;  %v12004_v39 = vpack.c.bf16 %v2928_v20, %v2925_v48  ;;  %v2934_v41 = vld [vmem:[%s13873_s4 + $0xa08] sm:$0xff]  ;;  %v2933_v48 = vld [vmem:[%s13873_s4 + $0xa00] sm:$0xff] }
 0x557   :  { %14028 = vst [vmem:[#allocation151_spill] sm:$0xff] %v11980_v43  ;;  %v2936_v20 = vld [vmem:[%s13873_s4 + $0xa18] sm:$0xff] }
 0x558   :  { %3784 = vrot.lane.b32.xlu0 %v2597_v57, %s9043_s6  ;;  %14029 = vst [vmem:[#allocation152_spill] sm:$0xff] %v12004_v39  ;;  %v12006_v57 = vpack.c.bf16 %v2930_v13, %v2927_v47  ;;  %v2938_v47 = vld [vmem:[%s13873_s4 + $0xa28] sm:$0xff]  ;;  %v2941_v13 = vld [vmem:[%s13873_s4 + $0xa40] sm:$0xff] }
 0x559   :  { %7873 = vmatpush1.bf16.msra.mxu0 %v11966_v37  ;;  %8057 = vmatpush3.bf16.msra.mxu1 %v11968_v19  ;;  %v12016_v37 = vpack.c.bf16 %v2935_v8, %v2932_v27  ;;  %v12018_v19 = vpack.c.bf16 %v2984_v11, %v2981_v24  ;;  %v2987_v27 = vld [vmem:[%s13873_s4 + $0xbb0] sm:$0xff]  ;;  %v2990_v8 = vld [vmem:[%s13873_s4 + $0xbc8] sm:$0xff]  ;;  %v12043_v24 = vpack.c.bf16 %v2934_v41, %v2931_v22 }
 0x55a   :  { %14030 = vst [vmem:[#allocation153_spill] sm:$0xff] %v12006_v57  ;;  %7875 = vmatprep.subr.bf16.mxu0 %v11978_v32  ;;  %8059 = vmatprep.subr.bf16.mxu1 %v11980_v43  ;;  %v12045_v11 = vpack.c.bf16 %v2936_v20, %v2933_v48  ;;  %v2940_v43 = vld [vmem:[%s13873_s4 + $0xa38] sm:$0xff]  ;;  %v12055_v32 = vpack.c.bf16 %v2941_v13, %v2938_v47  ;;  %v2939_v22 = vld [vmem:[%s13873_s4 + $0xa30] sm:$0xff]  ;;  %v2942_v41 = vld [vmem:[%s13873_s4 + $0xa48] sm:$0xff] }
 0x55b   :  { %14031 = vst [vmem:[#allocation154_spill] sm:$0xff] %v12016_v37  ;;  %14032 = vst [vmem:[#allocation155_spill] sm:$0xff] %v12018_v19  ;;  %v2944_v48 = vld [vmem:[%s13873_s4 + $0xa58] sm:$0xff]  ;;  %v2947_v20 = vld [vmem:[%s13873_s4 + $0xa70] sm:$0xff] }
 0x55c   :  { %2433 = vrot.lane.b32.xlu0 %v13819_v59, %s9031_s28  ;;  %14033 = vst [vmem:[#allocation156_spill] sm:$0xff] %v12045_v11  ;;  %v2937_v59 = vld [vmem:[%s13873_s4 + $0xa20] sm:$0xff]  ;;  %v2996_v13 = vld [vmem:[%s13873_s4 + $0xbf8] sm:$0xff] }
 0x55d   :  { %7877 = vmatpush1.bf16.msra.mxu0 %v12004_v39  ;;  %8061 = vmatpush3.bf16.msra.mxu1 %v12006_v57  ;;  %v12057_v39 = vpack.c.bf16 %v2990_v8, %v2987_v27  ;;  %v2993_v47 = vld [vmem:[%s13873_s4 + $0xbe0] sm:$0xff]  ;;  %v12079_v27 = vpack.c.bf16 %v2940_v43, %v2937_v59  ;;  %v12081_v8 = vpack.c.bf16 %v2942_v41, %v2939_v22  ;;  %v2948_v59 = vld [vmem:[%s13873_s4 + $0xa78] sm:$0xff]  ;;  %v2950_v22 = vld [vmem:[%s13873_s4 + $0xa88] sm:$0xff] }
 0x55e   :  { %7879 = vmatprep.subr.bf16.mxu0 %v12016_v37  ;;  %8063 = vmatprep.subr.bf16.mxu1 %v12018_v19  ;;  %v2943_v19 = vld [vmem:[%s13873_s4 + $0xa50] sm:$0xff]  ;;  %v12088_v57 = vpack.c.bf16 %v2947_v20, %v2944_v48  ;;  %v12090_v37 = vpack.c.bf16 %v2996_v13, %v2993_v47  ;;  %v2945_v43 = vld [vmem:[%s13873_s4 + $0xa60] sm:$0xff] }
 0x55f   :  { %14034 = vst [vmem:[#allocation157_spill] sm:$0xff] %v12079_v27  ;;  %14035 = vst [vmem:[#allocation158_spill] sm:$0xff] %v12081_v8  ;;  %v2953_v41 = vld [vmem:[%s13873_s4 + $0xaa0] sm:$0xff]  ;;  %v12111_v20 = vpack.c.bf16 %v2948_v59, %v2945_v43  ;;  %v14040_v43 = vunpack.i.h.bf16 %v11784_v63  ;;  %v2955_v63 = vld [vmem:[%s13873_s4 + $0xab0] sm:$0xff] }
 0x560   :  { %14036 = vst [vmem:[#allocation159_spill] sm:$0xff] %v12088_v57  ;;  %14037 = vst [vmem:[#allocation160_spill] sm:$0xff] %v12090_v37  ;;  %v2949_v47 = vld [vmem:[%s13873_s4 + $0xa80] sm:$0xff]  ;;  %v12118_v13 = vpack.c.bf16 %v2953_v41, %v2950_v22  ;;  %v2956_v22 = vld [vmem:[%s13873_s4 + $0xab8] sm:$0xff] }
 0x561   :  { %7881 = vmatpush1.bf16.msra.mxu0 %v12043_v24  ;;  %8065 = vmatpush3.bf16.msra.mxu1 %v12045_v11  ;;  %v2946_v11 = vld [vmem:[%s13873_s4 + $0xa68] sm:$0xff]  ;;  %14038 = vst [vmem:[#allocation161_spill] sm:$0xff] %v12111_v20  ;;  %v2558_v59 = vsel %vm478_vm0, %v14040_v43, %v11867_v46  ;;  %v2959_v41 = vld [vmem:[%s13873_s4 + $0xad0] sm:$0xff]  ;;  %v14043_v43 = vmov 0.0|0.0  }
 0x562   :  { %7883 = vmatprep.subr.bf16.mxu0 %v12055_v32  ;;  %8067 = vmatprep.subr.bf16.mxu1 %v12057_v39  ;;  %v12109_v48 = vpack.c.bf16 %v2946_v11, %v2943_v19  ;;  %14039 = vst [vmem:[#allocation162_spill] sm:$0xff] %v12118_v13  ;;  %v2999_v19 = vld [vmem:[%s13873_s4 + $0xc10] sm:$0xff]  ;;  %v3002_v11 = vld [vmem:[%s13873_s4 + $0xc28] sm:$0xff]  ;;  %v12150_v46 = vmax.f32 %v10938_v26, %v2558_v59 }
 0x563   :  { %v2962_v26 = vld [vmem:[%s13873_s4 + $0xae8] sm:$0xff] }
 0x565   :  { %7885 = vmatpush1.bf16.msra.mxu0 %v12079_v27  ;;  %8069 = vmatpush3.bf16.msra.mxu1 %v12081_v8  ;;  %v2952_v27 = vld [vmem:[%s13873_s4 + $0xa98] sm:$0xff]  ;;  %v12143_v8 = vpack.c.bf16 %v3002_v11, %v2999_v19  ;;  %v2965_v11 = vld [vmem:[%s13873_s4 + $0xb00] sm:$0xff] }
 0x566   :  { %7887 = vmatprep.subr.bf16.mxu0 %v12088_v57  ;;  %8071 = vmatprep.subr.bf16.mxu1 %v12090_v37  ;;  %v12141_v37 = vpack.c.bf16 %v2952_v27, %v2949_v47  ;;  %v12153_v57 = vpack.c.bf16 %v2959_v41, %v2956_v22  ;;  %v2958_v27 = vld [vmem:[%s13873_s4 + $0xac8] sm:$0xff]  ;;  %v3005_v47 = vld [vmem:[%s13873_s4 + $0xc40] sm:$0xff]  ;;  %v3008_v19 = vld [vmem:[%s13873_s4 + $0xc58] sm:$0xff] }
 0x567   :  { %14042 = vst [vmem:[#allocation164_spill] sm:$0xff] %v12143_v8  ;;  %v12173_v59 = vpack.c.bf16 %v2958_v27, %v2955_v63  ;;  %v12175_v22 = vpack.c.bf16 %v3008_v19, %v3005_v47  ;;  %v2961_v41 = vld [vmem:[%s13873_s4 + $0xae0] sm:$0xff]  ;;  %v3011_v63 = vld [vmem:[%s13873_s4 + $0xc70] sm:$0xff]  ;;  %v3014_v27 = vld [vmem:[%s13873_s4 + $0xc88] sm:$0xff] }
 0x568   :  { %14041 = vst [vmem:[#allocation163_spill] sm:$0xff] %v12141_v37  ;;  %14044 = vst [vmem:[#allocation165_spill] sm:$0xff] %v12153_v57  ;;  %v2968_v47 = vld [vmem:[%s13873_s4 + $0xb18] sm:$0xff]  ;;  %v2971_v19 = vld [vmem:[%s13873_s4 + $0xb30] sm:$0xff] }
 0x569   :  { %7889 = vmatpush1.bf16.msra.mxu0 %v12109_v48  ;;  %8073 = vmatpush3.bf16.msra.mxu1 %v12111_v20  ;;  %14045 = vst [vmem:[#allocation166_spill] sm:$0xff] %v12173_v59  ;;  %14046 = vst [vmem:[#allocation167_spill] sm:$0xff] %v12175_v22  ;;  %v12182_v20 = vpack.c.bf16 %v2965_v11, %v2962_v26  ;;  %v12199_v26 = vld [vmem:[#allocation6] sm:$0xff] }
 0x56a   :  { %7891 = vmatprep.subr.bf16.mxu0 %v12118_v13  ;;  %8074 = vmatprep.subr.bf16.mxu1 %v14043_v43  ;;  %v12214_v13 = vpack.c.bf16 %v2971_v19, %v2968_v47 }
 0x56b   :  { %14047 = vst [vmem:[#allocation168_spill] sm:$0xff] %v12182_v20 }
 0x56c   :  { %3680 = vmatmul.mubr.f32.vlgmr.msra.gmra.mrb[18].mxu1 %v12150_v46  ;;  %14050 = vst [vmem:[#allocation171_spill] sm:$0xff] %v12214_v13 }
 0x56d   :  { %7893 = vmatpush1.bf16.msra.mxu0 %v12141_v37  ;;  %8076 = vmatpush3.bf16.msra.mxu1 %v12143_v8  ;;  %v2964_v37 = vld [vmem:[%s13873_s4 + $0xaf8] sm:$0xff]  ;;  %v12207_v8 = vpack.c.bf16 %v3014_v27, %v3011_v63  ;;  %v2974_v63 = vld [vmem:[%s13873_s4 + $0xb48] sm:$0xff]  ;;  %v2977_v27 = vld [vmem:[%s13873_s4 + $0xb60] sm:$0xff] }
 0x56e   :  { %7895 = vmatprep.subr.bf16.mxu0 %v12153_v57  ;;  %8077 = vmatprep.subr.bf16.mxu1 %v14043_v43  ;;  %v12205_v11 = vpack.c.bf16 %v2964_v37, %v2961_v41  ;;  %v2967_v57 = vld [vmem:[%s13873_s4 + $0xb10] sm:$0xff]  ;;  %v3017_v37 = vld [vmem:[%s13873_s4 + $0xca0] sm:$0xff]  ;;  %v3020_v41 = vld [vmem:[%s13873_s4 + $0xcb8] sm:$0xff] }
 0x56f   :  { %7379 = vmatprep.mubr.msk.f32.mxu1 %vm9041_vm11, %v12199_v26  ;;  %14049 = vst [vmem:[#allocation170_spill] sm:$0xff] %v12207_v8  ;;  %v12235_v19 = vpack.c.bf16 %v3020_v41, %v3017_v37  ;;  %v2980_v37 = vld [vmem:[%s13873_s4 + $0xb78] sm:$0xff]  ;;  %v2983_v41 = vld [vmem:[%s13873_s4 + $0xb90] sm:$0xff] }
 0x570   :  { %14048 = vst [vmem:[#allocation169_spill] sm:$0xff] %v12205_v11 }
 0x571   :  { %7897 = vmatpush1.bf16.msra.mxu0 %v12173_v59  ;;  %8079 = vmatpush3.bf16.msra.mxu1 %v12175_v22  ;;  %v2970_v59 = vld [vmem:[%s13873_s4 + $0xb28] sm:$0xff]  ;;  %14052 = vst [vmem:[#allocation173_spill] sm:$0xff] %v12235_v19  ;;  %v2973_v22 = vld [vmem:[%s13873_s4 + $0xb40] sm:$0xff] }
 0x572   :  { %7899 = vmatprep.subr.bf16.mxu0 %v12182_v20  ;;  %8080 = vmatprep.subr.bf16.mxu1 %v14043_v43  ;;  %v12233_v47 = vpack.c.bf16 %v2970_v59, %v2967_v57  ;;  %v12242_v20 = vpack.c.bf16 %v2977_v27, %v2974_v63  ;;  %v3023_v57 = vld [vmem:[%s13873_s4 + $0xcd0] sm:$0xff]  ;;  %v3026_v59 = vld [vmem:[%s13873_s4 + $0xce8] sm:$0xff] }
 0x573   :  { %v12263_v27 = vpack.c.bf16 %v3026_v59, %v3023_v57  ;;  %v2986_v57 = vld [vmem:[%s13873_s4 + $0xba8] sm:$0xff]  ;;  %v2989_v59 = vld [vmem:[%s13873_s4 + $0xbc0] sm:$0xff] }
 0x574   :  { %14051 = vst [vmem:[#allocation172_spill] sm:$0xff] %v12233_v47  ;;  %14053 = vst [vmem:[#allocation174_spill] sm:$0xff] %v12242_v20 }
 0x575   :  { %7901 = vmatpush1.bf16.msra.mxu0 %v12205_v11  ;;  %8082 = vmatpush3.bf16.msra.mxu1 %v12207_v8  ;;  %v2976_v11 = vld [vmem:[%s13873_s4 + $0xb58] sm:$0xff]  ;;  %14055 = vst [vmem:[#allocation176_spill] sm:$0xff] %v12263_v27  ;;  %v2979_v8 = vld [vmem:[%s13873_s4 + $0xb70] sm:$0xff] }
 0x576   :  { %7903 = vmatprep.subr.bf16.mxu0 %v12214_v13  ;;  %8083 = vmatprep.subr.bf16.mxu1 %v14043_v43  ;;  %v12261_v63 = vpack.c.bf16 %v2976_v11, %v2973_v22  ;;  %v12270_v13 = vpack.c.bf16 %v2983_v41, %v2980_v37  ;;  %v3029_v22 = vld [vmem:[%s13873_s4 + $0xd00] sm:$0xff]  ;;  %v3032_v11 = vld [vmem:[%s13873_s4 + $0xd18] sm:$0xff] }
 0x577   :  { %v12291_v41 = vpack.c.bf16 %v3032_v11, %v3029_v22  ;;  %v2560_v22 = vsel %vm478_vm0, %v11871_v38, %v11943_v52  ;;  %v2991_v38 = vld [vmem:[%s13873_s4 + $0xbd0] sm:$0xff]  ;;  %v2994_v52 = vld [vmem:[%s13873_s4 + $0xbe8] sm:$0xff] }
 0x578   :  { %14054 = vst [vmem:[#allocation175_spill] sm:$0xff] %v12261_v63 }
 0x579   :  { %7905 = vmatpush1.bf16.msra.mxu0 %v12233_v47  ;;  %8085 = vmatpush3.bf16.msra.mxu1 %v12235_v19  ;;  %v2982_v47 = vld [vmem:[%s13873_s4 + $0xb88] sm:$0xff]  ;;  %14056 = vst [vmem:[#allocation177_spill] sm:$0xff] %v12291_v41  ;;  %v12295_v19 = vpack.c.bf16 %v2989_v59, %v2986_v57  ;;  %v12321_v57 = vld [vmem:[%s13873_s4 + $0xd30] sm:$0x1] }
 0x57a   :  { %7907 = vmatprep.subr.bf16.mxu0 %v12242_v20  ;;  %8086 = vmatprep.subr.bf16.mxu1 %v14043_v43  ;;  %v12289_v37 = vpack.c.bf16 %v2982_v47, %v2979_v8  ;;  %v2985_v20 = vld [vmem:[%s13873_s4 + $0xba0] sm:$0xff]  ;;  %v2992_v8 = vld [vmem:[%s13873_s4 + $0xbd8] sm:$0xff]  ;;  %v2995_v47 = vld [vmem:[%s13873_s4 + $0xbf0] sm:$0xff] }
 0x57b   :  { %v12323_v59 = vpack.c.bf16 %v2995_v47, %v2992_v8  ;;  %v12338_v8 = vmax.f32 %v11065_v17, %v2560_v22  ;;  %v12343_v47 = vpack.c.bf16 %v2994_v52, %v2991_v38  ;;  %v3000_v17 = vld [vmem:[%s13873_s4 + $0xc18] sm:$0xff]  ;;  %v3007_v38 = vld [vmem:[%s13873_s4 + $0xc50] sm:$0xff] }
 0x57c   :  { %v3004_v22 = vld [vmem:[%s13873_s4 + $0xc38] sm:$0xff] }
 0x57d   :  { %7909 = vmatpush1.bf16.msra.mxu0 %v12261_v63  ;;  %8088 = vmatpush3.bf16.msra.mxu1 %v12263_v27  ;;  %v2988_v63 = vld [vmem:[%s13873_s4 + $0xbb8] sm:$0xff]  ;;  %v2997_v27 = vld [vmem:[%s13873_s4 + $0xc00] sm:$0xff] }
 0x57e   :  { %7911 = vmatprep.subr.bf16.mxu0 %v12270_v13  ;;  %8089 = vmatprep.subr.bf16.mxu1 %v14043_v43  ;;  %v12314_v11 = vpack.c.bf16 %v2988_v63, %v2985_v20  ;;  %v2998_v20 = vld [vmem:[%s13873_s4 + $0xc08] sm:$0xff]  ;;  %v3001_v63 = vld [vmem:[%s13873_s4 + $0xc20] sm:$0xff]  ;;  %v12365_v52 = vpack.c.bf16 %v3000_v17, %v2997_v27 }
 0x581   :  { %7913 = vmatpush1.bf16.msra.mxu0 %v12289_v37  ;;  %8091 = vmatpush3.bf16.msra.mxu1 %v12291_v41  ;;  %v12348_v41 = vpack.c.bf16 %v3001_v63, %v2998_v20  ;;  %v12369_v20 = vpack.c.bf16 %v3007_v38, %v3004_v22  ;;  %v3003_v63 = vld [vmem:[%s13873_s4 + $0xc30] sm:$0xff]  ;;  %v3009_v22 = vld [vmem:[%s13873_s4 + $0xc60] sm:$0xff] }
 0x582   :  { %7915 = vmatprep.subr.bf16.mxu0 %v12295_v19  ;;  %7377 = vmatprep.subr.mxu1 %v12199_v26  ;;  %v3019_v38 = vld [vmem:[%s13873_s4 + $0xcb0] sm:$0xff] }
 0x585   :  { %7917 = vmatpush1.bf16.msra.mxu0 %v12314_v11  ;;  %7378 = vmatpush3.msk.msra.mxu1 %vm3040_vm13, %v12321_v57 }
 0x586   :  { %7380 = vmatmul.mubr.msk.f32.vlgmr.msra.gmra.mrb[20].mxu1 %vm3036_vm14, %v12338_v8  ;;  %7919 = vmatprep.subr.bf16.mxu0 %v12323_v59 }
 0x587   :  { %8093 = vmatprep.subr.bf16.mxu1 %v10281_v49  ;;  %v3006_v49 = vld [vmem:[%s13873_s4 + $0xc48] sm:$0xff] }
 0x588   :  { %8095 = vmatpush1.bf16.msra.mxu1 %v10292_v40  ;;  %v3010_v40 = vld [vmem:[%s13873_s4 + $0xc68] sm:$0xff]  ;;  %v12386_v27 = vpack.c.bf16 %v3006_v49, %v3003_v63 }
 0x589   :  { %7921 = vmatpush1.bf16.msra.mxu0 %v12343_v47  ;;  %8097 = vmatprep.subr.bf16.mxu1 %v10294_v6  ;;  %v3013_v6 = vld [vmem:[%s13873_s4 + $0xc80] sm:$0xff] }
 0x58a   :  { %7923 = vmatprep.subr.bf16.mxu0 %v12348_v41  ;;  %v12390_v17 = vpack.c.bf16 %v3013_v6, %v3010_v40  ;;  %v3018_v40 = vld [vmem:[%s13873_s4 + $0xca8] sm:$0xff] }
 0x58c   :  { %3328 = vmatmul.mubr.f32.vlgmr.msra.gmra.mrb[8].mxu0 %v12150_v46  ;;  %8099 = vmatpush1.bf16.msra.mxu1 %v10310_v62  ;;  %v3012_v46 = vld [vmem:[%s13873_s4 + $0xc78] sm:$0xff] }
 0x58d   :  { %7925 = vmatpush1.bf16.msra.mxu0 %v12365_v52  ;;  %3398 = vmatprep.mubr.f32.mxu0 %v12199_v26  ;;  %v3016_v62 = vld [vmem:[%s13873_s4 + $0xc98] sm:$0xff]  ;;  %v12407_v63 = vpack.c.bf16 %v3012_v46, %v3009_v22  ;;  %v3021_v46 = vld [vmem:[%s13873_s4 + $0xcc0] sm:$0xff] }
 0x58e   :  { %7927 = vmatprep.subr.bf16.mxu0 %v12369_v20  ;;  %8101 = vmatprep.subr.bf16.mxu1 %v10313_v55  ;;  %v12411_v49 = vpack.c.bf16 %v3019_v38, %v3016_v62  ;;  %v3015_v55 = vld [vmem:[%s13873_s4 + $0xc90] sm:$0xff]  ;;  %v3024_v62 = vld [vmem:[%s13873_s4 + $0xcd8] sm:$0xff] }
 0x58f   :  { %v12427_v6 = vpack.c.bf16 %v3018_v40, %v3015_v55  ;;  %v12447_v38 = vpack.c.bf16 %v3024_v62, %v3021_v46  ;;  %v3027_v40 = vld [vmem:[%s13873_s4 + $0xcf0] sm:$0xff]  ;;  %v12468_v46 = vld [vmem:[%s13873_s4 + $0xd28] sm:$0x1] }
 0x590   :  { %8103 = vmatpush1.bf16.msra.mxu1 %v10328_v29  ;;  %v3022_v29 = vld [vmem:[%s13873_s4 + $0xcc8] sm:$0xff] }
 0x591   :  { %7929 = vmatpush1.bf16.msra.mxu0 %v12386_v27  ;;  %8105 = vmatprep.subr.bf16.mxu1 %v10331_v10  ;;  %v3025_v10 = vld [vmem:[%s13873_s4 + $0xce0] sm:$0xff] }
 0x592   :  { %7931 = vmatprep.subr.bf16.mxu0 %v12390_v17  ;;  %v12431_v22 = vpack.c.bf16 %v3025_v10, %v3022_v29  ;;  %v3030_v29 = vld [vmem:[%s13873_s4 + $0xd08] sm:$0xff] }
 0x594   :  { %8107 = vmatpush1.bf16.msra.mxu1 %v10352_v34  ;;  %v3028_v34 = vld [vmem:[%s13873_s4 + $0xcf8] sm:$0xff] }
 0x595   :  { %7933 = vmatpush1.bf16.msra.mxu0 %v12407_v63  ;;  %8109 = vmatprep.subr.bf16.mxu1 %v10363_v56  ;;  %v3031_v56 = vld [vmem:[%s13873_s4 + $0xd10] sm:$0xff] }
 0x596   :  { %7935 = vmatprep.subr.bf16.mxu0 %v12411_v49  ;;  %v12451_v55 = vpack.c.bf16 %v3031_v56, %v3028_v34  ;;  %v14068_v34 = vld [vmem:[#allocation36_spill] sm:$0xff]  ;;  %v14069_v56 = vld [vmem:[#allocation26_spill] sm:$0xff] }
 0x598   :  { %8111 = vmatpush1.bf16.msra.mxu1 %v10395_v61  ;;  %v12461_v61 = vpack.c.bf16 %v3030_v29, %v3027_v40  ;;  %v14070_v40 = vld [vmem:[#allocation37_spill] sm:$0xff]  ;;  %v14071_v29 = vld [vmem:[#allocation27_spill] sm:$0xff] }
 0x599   :  { %7937 = vmatpush1.bf16.msra.mxu0 %v12427_v6  ;;  %8113 = vmatprep.subr.bf16.mxu1 %v10407_v36 }
 0x59a   :  { %7939 = vmatprep.subr.bf16.mxu0 %v12431_v22 }
 0x59c   :  { %8115 = vmatpush1.bf16.msra.mxu1 %v10437_v31  ;;  %v12478_v31 = vld [vmem:[%s13873_s4 + $0xd20] sm:$0x1]  ;;  %s9045_s4 = smov 87  }
 0x59d   :  { %7941 = vmatpush1.bf16.msra.mxu0 %v12447_v38  ;;  %8117 = vmatprep.subr.bf16.mxu1 %v10449_v2  ;;  %v14058_v2 = vld [vmem:[#allocation30_spill] sm:$0xff] }
 0x59e   :  { %v6936_v36 = vpop.f32.mrb[12].mxu1  ;;  %7943 = vmatprep.subr.bf16.mxu0 %v12451_v55 }
 0x59f   :  { %v6937_v10 = vpop.f32.mrb[13].mxu1 }
 0x5a0   :  { %v6938_v62 = vadd.f32 %v6937_v10, %v6936_v36  ;;  %8119 = vmatpush1.bf16.msra.mxu1 %v10473_v54  ;;  %v14059_v54 = vld [vmem:[#allocation21_spill] sm:$0xff]  ;;  %v14072_v36 = vld [vmem:[#allocation38_spill] sm:$0xff]  ;;  %v8857_v10 = vpop.permute.xlu0 %8856 }
 0x5a1   :  { %7945 = vmatpush1.bf16.msra.mxu0 %v12461_v61  ;;  %8121 = vmatprep.subr.bf16.mxu1 %v10485_v16  ;;  %v14057_v16 = vld [vmem:[#allocation20_spill] sm:$0xff] }
 0x5a2   :  { %6862 = vmatprep.subr.msk.mxu0 %vm3040_vm13, %v12468_v46 }
 0x5a4   :  { %8123 = vmatpush1.bf16.msra.mxu1 %v10509_v14  ;;  %v14061_v14 = vld [vmem:[#allocation22_spill] sm:$0xff] }
 0x5a5   :  { %6863 = vmatpush1.msk.msra.mxu0 %vm3040_vm13, %v12478_v31  ;;  %8125 = vmatprep.subr.bf16.mxu1 %v10521_v21  ;;  %v14060_v21 = vld [vmem:[#allocation32_spill] sm:$0xff] }
 0x5a6   :  { %6864 = vmatmul.mubr.msk.f32.vlgmr.msra.gmra.mrb[8].mxu0 %vm3036_vm14, %v12338_v8  ;;  %8373 = vmatprep.subr.bf16.mxu0 %v10357_v45  ;;  %v14062_v8 = vld [vmem:[#allocation33_spill] sm:$0xff]  ;;  %v14063_v45 = vld [vmem:[#allocation23_spill] sm:$0xff] }
 0x5a7   :  { %8375 = vmatpush3.bf16.msra.mxu0 %v10378_v33  ;;  %v14064_v33 = vld [vmem:[#allocation34_spill] sm:$0xff] }
 0x5a8   :  { %8127 = vmatpush1.bf16.msra.mxu1 %v10545_v18  ;;  %8377 = vmatprep.subr.bf16.mxu0 %v10386_v60  ;;  %v14065_v18 = vld [vmem:[#allocation24_spill] sm:$0xff]  ;;  %v14066_v60 = vld [vmem:[#allocation35_spill] sm:$0xff] }
 0x5a9   :  { %8129 = vmatprep.subr.bf16.mxu1 %v10554_v53  ;;  %v14067_v53 = vld [vmem:[#allocation25_spill] sm:$0xff] }
 0x5ab   :  { %8379 = vmatpush3.bf16.msra.mxu0 %v14057_v16  ;;  %v8854_v16 = vunpack.i.h.bf16 %v11915_v35 }
 0x5ac   :  { %8131 = vmatpush1.bf16.msra.mxu1 %v14058_v2  ;;  %8381 = vmatprep.subr.bf16.mxu0 %v14059_v54  ;;  %v14073_v2 = vld [vmem:[#allocation28_spill] sm:$0xff]  ;;  %v14074_v54 = vld [vmem:[#allocation39_spill] sm:$0xff] }
 0x5ad   :  { %8133 = vmatprep.subr.bf16.mxu1 %v14060_v21  ;;  %v14075_v21 = vld [vmem:[#allocation29_spill] sm:$0xff] }
 0x5af   :  { %8383 = vmatpush3.bf16.msra.mxu0 %v14061_v14  ;;  %v8859_v14 = vunpack.i.h.bf16 %v8857_v10 }
 0x5b0   :  { %8135 = vmatpush1.bf16.msra.mxu1 %v14062_v8  ;;  %8385 = vmatprep.subr.bf16.mxu0 %v14063_v45  ;;  %v8858_v8 = vunpack.i.l.bf16 %v8857_v10  ;;  %v14076_v45 = vld [vmem:[#allocation40_spill] sm:$0xff] }
 0x5b1   :  { %8137 = vmatprep.subr.bf16.mxu1 %v14064_v33 }
 0x5b2   :  { %v2453_v10 = vsel %vm212_vm1, %v8858_v8, %v8859_v14 }
 0x5b3   :  { %8387 = vmatpush3.bf16.msra.mxu0 %v14065_v18  ;;  %v14077_v18 = vunpack.i.l.bf16 %v11915_v35 }
 0x5b4   :  { %8139 = vmatpush1.bf16.msra.mxu1 %v14066_v60  ;;  %8389 = vmatprep.subr.bf16.mxu0 %v14067_v53 }
 0x5b5   :  { %8141 = vmatprep.subr.bf16.mxu1 %v14068_v34  ;;  %v2562_v60 = vsel %vm478_vm0, %v14077_v18, %v8854_v16  ;;  %v14078_v34 = vld [vmem:[#allocation31_spill] sm:$0xff] }
 0x5b7   :  { %8391 = vmatpush3.bf16.msra.mxu0 %v14069_v56 }
 0x5b8   :  { %8143 = vmatpush1.bf16.msra.mxu1 %v14070_v40  ;;  %8393 = vmatprep.subr.bf16.mxu0 %v14071_v29  ;;  %v14079_v29 = vld [vmem:[#allocation41_spill] sm:$0xff] }
 0x5b9   :  { %8145 = vmatprep.subr.bf16.mxu1 %v14072_v36  ;;  %v14080_v36 = vld [vmem:[#allocation43_spill] sm:$0xff] }
 0x5bb   :  { %8395 = vmatpush3.bf16.msra.mxu0 %v14073_v2  ;;  %v2452_v2 = vsel %vm212_vm1, %v11822_v1, %v8858_v8  ;;  %v14085_v8 = vld [vmem:[#allocation44_spill] sm:$0xff] }
 0x5bc   :  { %8147 = vmatpush1.bf16.msra.mxu1 %v14074_v54  ;;  %8397 = vmatprep.subr.bf16.mxu0 %v14075_v21  ;;  %v14081_v21 = vld [vmem:[#allocation42_spill] sm:$0xff] }
 0x5bd   :  { %8149 = vmatprep.subr.bf16.mxu1 %v14076_v45  ;;  %v2598_v45 = vmax.f32 %v11097_v58, %v2562_v60  ;;  %v14088_v58 = vld [vmem:[#allocation18_spill] sm:$0xff] }
 0x5bf   :  { %v6971_v33 = vpop.f32.mrb[14].mxu1  ;;  %8399 = vmatpush3.bf16.msra.mxu0 %v14078_v34 }
 0x5c0   :  { %v6972_v53 = vpop.f32.mrb[15].mxu1  ;;  %v2539_v40 = vpop.permute.xlu1 %2538  ;;  %8151 = vmatpush1.bf16.msra.mxu1 %v14079_v29  ;;  %8401 = vmatprep.subr.bf16.mxu0 %v14080_v36  ;;  %v14084_v29 = vmax.f32 %v11044_v23, 0.0 }
 0x5c1   :  { %v6973_v56 = vadd.f32 %v6972_v53, %v6971_v33  ;;  %v2563_v54 = vsel %vm478_vm0, %v8854_v16, %v2539_v40  ;;  %8153 = vmatprep.subr.bf16.mxu1 %v14081_v21  ;;  %v14082_v33 = vld [vmem:[#allocation45_spill] sm:$0xff]  ;;  %v14083_v53 = vmax.f32 %v10943_v15, 0.0  ;;  %v14086_v16 = vld [vmem:[#allocation47_spill] sm:$0xff]  ;;  %v14087_v21 = vld [vmem:[#allocation46_spill] sm:$0xff] }
 0x5c2   :  { %v2599_v18 = vmax.f32 %v11101_v44, %v2563_v54  ;;  %v12530_v36 = vmax.f32 %v14084_v29, %v2453_v10  ;;  %v2337_v44 = vmul.f32 %v10217_v4, %v14088_v58 }
 0x5c3   :  { %v3542_v35 = vadd.f32 %v6973_v56, %v6938_v62  ;;  %8403 = vmatpush3.bf16.msra.mxu0 %v14082_v33  ;;  %v2489_v34 = vmax.f32 %v14083_v53, %v2452_v2 }
 0x5c4   :  { %v8860_v1 = vpack.i.bf16 %v2599_v18, %v2598_v45  ;;  %8155 = vmatpush1.bf16.msra.mxu1 %v14085_v8  ;;  %8405 = vmatprep.subr.bf16.mxu0 %v14086_v16  ;;  %v12540_v15 = vadd.f32 %v10227_v12, %v2337_v44  ;;  %v14090_v44 = vld [vmem:[#allocation48_spill] sm:$0xff] }
 0x5c5   :  { %8157 = vmatprep.subr.bf16.mxu1 %v14087_v21  ;;  %v8865_v62 = vpack.i.bf16 %v12530_v36, %v2489_v34  ;;  %v14089_v21 = vld [vmem:[#allocation19_spill] sm:$0xff] }
 0x5c6   :  { %8861 = vrot.lane.b32.xlu1 %v8860_v1, %s9043_s6  ;;  %v13850_v23 = vmax.f32 %v12540_v15, 0.0  ;;  %v2338_v58 = vmul.f32 %v10217_v4, %v14089_v21 }
 0x5ca   :  { %8866 = vrot.lane.b32.xlu1 %v8865_v62, %s9033_s27  ;;  %v3785_v54 = vpop.permute.xlu0 %3784  ;;  %v14091_v62 = vld [vmem:[#allocation49_spill] sm:$0xff] }
 0x5ce   :  { %2435 = vrot.lane.b32.xlu1 %v13850_v23, %s9031_s28  ;;  %v2434_v1 = vpop.permute.xlu0 %2433 }
 0x61f   :  { %v7006_v60 = vpop.f32.mrb[16].mxu1 }
 0x620   :  { %v7007_v56 = vpop.f32.mrb[17].mxu1 }
 0x621   :  { %v7008_v2 = vadd.f32 %v7007_v56, %v7006_v60  ;;  %v2454_v60 = vsel %vm212_vm1, %v8859_v14, %v2434_v1 }
 0x623   :  { %v3612_v10 = vadd.f32 %v7008_v2, %v3542_v35 }
 0x638   :  { %v12547_v45 = vpop.permute.xlu1 %8861 }
 0x639   :  { %v8864_v18 = vunpack.i.h.bf16 %v12547_v45  ;;  %v8863_v33 = vunpack.i.l.bf16 %v12547_v45 }
 0x63b   :  { %v3804_v53 = vsel %vm3802_vm15, %v8863_v33, %v8864_v18  ;;  %v3803_v29 = vsel %vm3802_vm15, %v3785_v54, %v8863_v33  ;;  %v14092_v33 = vld [vmem:[#allocation50_spill] sm:$0xff] }
 0x63c   :  { %v12555_v8 = vpop.permute.xlu1 %8866  ;;  %3885 = vmatprep.mubr.f32.mxu1 %v3804_v53  ;;  %4240 = vmatprep.mubr.f32.mxu0 %v3804_v53  ;;  %v14093_v53 = vld [vmem:[#allocation51_spill] sm:$0xff] }
 0x63d   :  { %v8869_v35 = vunpack.i.h.bf16 %v12555_v8  ;;  %v8868_v16 = vunpack.i.l.bf16 %v12555_v8  ;;  %3886 = vmatmul.mubr.f32.vlgmr.msra.gmra.mrb[22].mxu1 %v3803_v29  ;;  %4241 = vmatmul.mubr.f32.vlgmr.msra.gmra.mrb[10].mxu0 %v3803_v29  ;;  %v14136_v8 = vld [vmem:[#allocation107_spill] sm:$0xff] }
 0x63e   :  { %8159 = vmatpush1.bf16.msra.mxu1 %v14090_v44  ;;  %8407 = vmatpush3.bf16.msra.mxu0 %v14091_v62 }
 0x63f   :  { %v2564_v56 = vsel %vm478_vm0, %v2539_v40, %v8868_v16  ;;  %v2565_v2 = vsel %vm478_vm0, %v8868_v16, %v8869_v35  ;;  %v7041_v54 = vpop.f32.mrb[18].mxu1  ;;  %8161 = vmatprep.subr.bf16.mxu1 %v14092_v33  ;;  %8409 = vmatprep.subr.bf16.mxu0 %v14093_v53  ;;  %v12576_v40 = vadd.f32 %v10227_v12, %v2338_v58  ;;  %v14094_v16 = vmax.f32 %v11047_v51, 0.0  ;;  %v14099_v58 = vld [vmem:[#allocation56_spill] sm:$0xff] }
 0x640   :  { %v2600_v29 = vmax.f32 %v11851_v3, %v2564_v56  ;;  %v2601_v4 = vmax.f32 %v2489_v34, %v2565_v2  ;;  %v12571_v21 = vpop.permute.xlu1 %2435  ;;  %v7042_v44 = vpop.f32.mrb[19].mxu1  ;;  %v14095_v33 = vmax.f32 %v11961_v5, 0.0  ;;  %v14096_v56 = vld [vmem:[#allocation52_spill] sm:$0xff]  ;;  %v14098_v5 = vld [vmem:[#allocation54_spill] sm:$0xff]  ;;  %v14104_v2 = vld [vmem:[#allocation59_spill] sm:$0xff] }
 0x641   :  { %v2455_v14 = vsel %vm212_vm1, %v2434_v1, %v12571_v21  ;;  %v7043_v62 = vadd.f32 %v7042_v44, %v7041_v54  ;;  %v12580_v23 = vmax.f32 %v14094_v16, %v2454_v60  ;;  %v14097_v1 = vld [vmem:[#allocation53_spill] sm:$0xff]  ;;  %v2381_v51 = vmax.f32 %v12576_v40, 0.0  ;;  %v14103_v60 = vld [vmem:[#allocation60_spill] sm:$0xff]  ;;  %v14111_v16 = vld [vmem:[#allocation67_spill] sm:$0xff] }
 0x642   :  { %v12584_v53 = vmax.f32 %v14095_v33, %v2455_v14  ;;  %v8870_v3 = vpack.i.bf16 %v2601_v4, %v2600_v29  ;;  %8163 = vmatpush1.bf16.msra.mxu1 %v10892_v28  ;;  %8411 = vmatpush3.bf16.msra.mxu0 %v10894_v25  ;;  %v14100_v28 = vld [vmem:[#allocation55_spill] sm:$0xff]  ;;  %v14101_v25 = vld [vmem:[#allocation57_spill] sm:$0xff]  ;;  %v14106_v29 = vld [vmem:[#allocation62_spill] sm:$0xff] }
 0x643   :  { %v3682_v34 = vadd.f32 %v7043_v62, %v3612_v10  ;;  %8165 = vmatprep.subr.bf16.mxu1 %v14096_v56  ;;  %8413 = vmatprep.subr.bf16.mxu0 %v14097_v1  ;;  %v14102_v10 = vld [vmem:[#allocation58_spill] sm:$0xff]  ;;  %v14105_v54 = vld [vmem:[#allocation61_spill] sm:$0xff]  ;;  %v14107_v4 = vld [vmem:[#allocation63_spill] sm:$0xff] }
 0x644   :  { %v8875_v12 = vpack.i.bf16 %v12584_v53, %v12580_v23  ;;  %8871 = vrot.lane.b32.xlu0 %v8870_v3, %s9043_s6  ;;  %v14108_v44 = vld [vmem:[#allocation65_spill] sm:$0xff]  ;;  %v14109_v14 = vld [vmem:[#allocation64_spill] sm:$0xff]  ;;  %v14110_v62 = vld [vmem:[#allocation66_spill] sm:$0xff] }
 0x645   :  { %v14112_v33 = vld [vmem:[#allocation69_spill] sm:$0xff]  ;;  %v14113_v3 = vld [vmem:[#allocation68_spill] sm:$0xff]  ;;  %v14115_v1 = vld [vmem:[#allocation71_spill] sm:$0xff] }
 0x646   :  { %8876 = vrot.lane.b32.xlu1 %v8875_v12, %s9033_s27  ;;  %8167 = vmatpush1.bf16.msra.mxu1 %v14098_v5  ;;  %v14116_v12 = vld [vmem:[#allocation73_spill] sm:$0xff]  ;;  %v14117_v5 = vld [vmem:[#allocation72_spill] sm:$0xff]  ;;  %v14151_v40 = vld [vmem:[#allocation90_spill] sm:$0xff] }
 0x647   :  { %8169 = vmatprep.subr.bf16.mxu1 %v14099_v58  ;;  %8415 = vmatpush3.bf16.msra.mxu0 %v14100_v28  ;;  %v14118_v58 = vld [vmem:[#allocation74_spill] sm:$0xff]  ;;  %v14119_v28 = vld [vmem:[#allocation75_spill] sm:$0xff] }
 0x648   :  { %2437 = vrot.lane.b32.xlu0 %v2381_v51, %s9031_s28  ;;  %8417 = vmatprep.subr.bf16.mxu0 %v14101_v25  ;;  %v14120_v25 = vld [vmem:[#allocation77_spill] sm:$0xff] }
 0x64a   :  { %8171 = vmatpush1.bf16.msra.mxu1 %v14102_v10  ;;  %v14121_v10 = vld [vmem:[#allocation79_spill] sm:$0xff] }
 0x64b   :  { %8173 = vmatprep.subr.bf16.mxu1 %v14103_v60  ;;  %8419 = vmatpush3.bf16.msra.mxu0 %v14104_v2  ;;  %v14122_v60 = vld [vmem:[#allocation81_spill] sm:$0xff]  ;;  %v14123_v2 = vld [vmem:[#allocation83_spill] sm:$0xff] }
 0x64c   :  { %8421 = vmatprep.subr.bf16.mxu0 %v14105_v54  ;;  %v14125_v54 = vld [vmem:[#allocation87_spill] sm:$0xff] }
 0x64e   :  { %8175 = vmatpush1.bf16.msra.mxu1 %v11053_v42  ;;  %v14114_v42 = vld [vmem:[#allocation70_spill] sm:$0xff] }
 0x64f   :  { %8177 = vmatprep.subr.bf16.mxu1 %v11069_v50  ;;  %8423 = vmatpush3.bf16.msra.mxu0 %v11055_v0 }
 0x650   :  { %8425 = vmatprep.subr.bf16.mxu0 %v14106_v29  ;;  %v14126_v29 = vld [vmem:[#allocation89_spill] sm:$0xff] }
 0x652   :  { %8179 = vmatpush1.bf16.msra.mxu1 %v14107_v4  ;;  %v14127_v4 = vld [vmem:[#allocation91_spill] sm:$0xff] }
 0x653   :  { %8181 = vmatprep.subr.bf16.mxu1 %v14108_v44  ;;  %8427 = vmatpush3.bf16.msra.mxu0 %v14109_v14  ;;  %v14128_v44 = vld [vmem:[#allocation93_spill] sm:$0xff]  ;;  %v14129_v14 = vld [vmem:[#allocation95_spill] sm:$0xff] }
 0x654   :  { %8429 = vmatprep.subr.bf16.mxu0 %v14110_v62  ;;  %v14130_v62 = vld [vmem:[#allocation97_spill] sm:$0xff] }
 0x656   :  { %8183 = vmatpush1.bf16.msra.mxu1 %v14111_v16  ;;  %v14131_v16 = vld [vmem:[#allocation99_spill] sm:$0xff] }
 0x657   :  { %8185 = vmatprep.subr.bf16.mxu1 %v14112_v33  ;;  %8431 = vmatpush3.bf16.msra.mxu0 %v14113_v3  ;;  %v14132_v33 = vld [vmem:[#allocation101_spill] sm:$0xff] }
 0x658   :  { %8433 = vmatprep.subr.bf16.mxu0 %v14114_v42 }
 0x659   :  { %v3751_v50 = vpop.f32.mrb[20].mxu1 }
 0x65a   :  { %v12618_v0 = vadd.f32 %v3751_v50, %v3682_v34  ;;  %v7381_v56 = vpop.f32.mrb[21].mxu1  ;;  %8187 = vmatpush1.bf16.msra.mxu1 %v14115_v1  ;;  %v14124_v34 = vld [vmem:[#allocation85_spill] sm:$0xff]  ;;  %v14133_v50 = vld [vmem:[#allocation103_spill] sm:$0xff] }
 0x65b   :  { %8189 = vmatprep.subr.bf16.mxu1 %v14116_v12  ;;  %8435 = vmatpush3.bf16.msra.mxu0 %v14117_v5  ;;  %v14134_v56 = vld [vmem:[#allocation105_spill] sm:$0xff] }
 0x65c   :  { %8437 = vmatprep.subr.bf16.mxu0 %v14118_v58 }
 0x65e   :  { %8191 = vmatpush1.bf16.msra.mxu1 %v14119_v28 }
 0x65f   :  { %8193 = vmatprep.subr.bf16.mxu1 %v14120_v25 }
 0x662   :  { %8195 = vmatpush1.bf16.msra.mxu1 %v14121_v10 }
 0x663   :  { %8197 = vmatprep.subr.bf16.mxu1 %v14122_v60 }
 0x666   :  { %8199 = vmatpush1.bf16.msra.mxu1 %v14123_v2 }
 0x667   :  { %8201 = vmatprep.subr.bf16.mxu1 %v14124_v34 }
 0x66a   :  { %8203 = vmatpush1.bf16.msra.mxu1 %v14125_v54 }
 0x66b   :  { %8205 = vmatprep.subr.bf16.mxu1 %v14126_v29 }
 0x66e   :  { %8207 = vmatpush1.bf16.msra.mxu1 %v14127_v4 }
 0x66f   :  { %8209 = vmatprep.subr.bf16.mxu1 %v14128_v44 }
 0x672   :  { %8211 = vmatpush1.bf16.msra.mxu1 %v14129_v14  ;;  %v14138_v14 = vld [vmem:[#allocation76_spill] sm:$0xff] }
 0x673   :  { %8213 = vmatprep.subr.bf16.mxu1 %v14130_v62  ;;  %v14139_v62 = vld [vmem:[#allocation78_spill] sm:$0xff] }
 0x676   :  { %8215 = vmatpush1.bf16.msra.mxu1 %v14131_v16 }
 0x677   :  { %8217 = vmatprep.subr.bf16.mxu1 %v14132_v33  ;;  %v14143_v33 = vld [vmem:[#allocation82_spill] sm:$0xff] }
 0x679   :  { %v12638_v3 = vpop.f32.mrb[8].mxu0 }
 0x67a   :  { %v12640_v42 = vpop.f32.mrb[9].mxu0  ;;  %8219 = vmatpush1.bf16.msra.mxu1 %v14133_v50  ;;  %v14144_v50 = vld [vmem:[#allocation111_spill] sm:$0xff] }
 0x67b   :  { %8221 = vmatprep.subr.bf16.mxu1 %v14134_v56  ;;  %v14145_v56 = vld [vmem:[#allocation112_spill] sm:$0xff] }
 0x6b6   :  { %v12644_v1 = vpop.permute.xlu0 %8871 }
 0x6b7   :  { %v8874_v12 = vunpack.i.h.bf16 %v12644_v1  ;;  %v8873_v5 = vunpack.i.l.bf16 %v12644_v1  ;;  %v14187_v1 = vld [vmem:[#allocation142_spill] sm:$0xff] }
 0x6b8   :  { %v12648_v58 = vpop.permute.xlu1 %8876 }
 0x6b9   :  { %v8879_v28 = vunpack.i.h.bf16 %v12648_v58  ;;  %v8878_v25 = vunpack.i.l.bf16 %v12648_v58  ;;  %v3806_v10 = vsel %vm3802_vm15, %v8873_v5, %v8874_v12  ;;  %v3805_v60 = vsel %vm3802_vm15, %v8864_v18, %v8873_v5  ;;  %v14146_v5 = vld [vmem:[#allocation84_spill] sm:$0xff] }
 0x6ba   :  { %v2438_v2 = vpop.permute.xlu0 %2437  ;;  %3956 = vmatprep.mubr.f32.mxu1 %v3806_v10  ;;  %4310 = vmatprep.mubr.f32.mxu0 %v3806_v10  ;;  %v14135_v18 = vmax.f32 %v12540_v15, 0.0  ;;  %v14141_v15 = vld [vmem:[#allocation110_spill] sm:$0xff]  ;;  %v14148_v10 = vld [vmem:[#allocation113_spill] sm:$0xff] }
 0x6bb   :  { %v2566_v34 = vsel %vm478_vm0, %v8869_v35, %v8878_v25  ;;  %v2567_v54 = vsel %vm478_vm0, %v8878_v25, %v8879_v28  ;;  %v2456_v29 = vsel %vm212_vm1, %v12571_v21, %v2438_v2  ;;  %3957 = vmatmul.mubr.f32.vlgmr.msra.gmra.mrb[22].mxu1 %v3805_v60  ;;  %4311 = vmatmul.mubr.f32.vlgmr.msra.gmra.mrb[12].mxu0 %v3805_v60  ;;  %v14137_v35 = vld [vmem:[#allocation108_spill] sm:$0xff]  ;;  %v14147_v25 = vld [vmem:[#allocation86_spill] sm:$0xff] }
 0x6bc   :  { %v2602_v4 = vmax.f32 %v12530_v36, %v2566_v34  ;;  %v2603_v45 = vmax.f32 %v12580_v23, %v2567_v54  ;;  %v12670_v44 = vmax.f32 %v14135_v18, %v2456_v29  ;;  %8223 = vmatpush1.bf16.msra.mxu1 %v14136_v8  ;;  %8439 = vmatpush3.bf16.msra.mxu0 %v14138_v14  ;;  %v14140_v36 = vld [vmem:[#allocation109_spill] sm:$0xff]  ;;  %v14142_v23 = vld [vmem:[#allocation80_spill] sm:$0xff]  ;;  %v14149_v60 = vld [vmem:[#allocation114_spill] sm:$0xff] }
 0x6bd   :  { %8225 = vmatprep.subr.bf16.mxu1 %v14137_v35  ;;  %8441 = vmatprep.subr.bf16.mxu0 %v14139_v62  ;;  %v2494_v16 = vmax.f32 %v2381_v51, %v2438_v2  ;;  %v14150_v34 = vld [vmem:[#allocation88_spill] sm:$0xff]  ;;  %v14152_v51 = vld [vmem:[#allocation115_spill] sm:$0xff]  ;;  %v14155_v29 = vld [vmem:[#allocation94_spill] sm:$0xff] }
 0x6be   :  { %2548 = vrot.lane.b32.xlu0 %v12670_v44, %s9033_s27  ;;  %v8880_v21 = vpack.i.bf16 %v2603_v45, %v2602_v4  ;;  %v14153_v2 = vld [vmem:[#allocation116_spill] sm:$0xff]  ;;  %v14156_v4 = vld [vmem:[#allocation117_spill] sm:$0xff]  ;;  %v14157_v45 = vld [vmem:[#allocation118_spill] sm:$0xff] }
 0x6bf   :  { %v14154_v54 = vld [vmem:[#allocation92_spill] sm:$0xff]  ;;  %v14159_v8 = vld [vmem:[#allocation98_spill] sm:$0xff]  ;;  %v14160_v35 = vld [vmem:[#allocation119_spill] sm:$0xff] }
 0x6c0   :  { %8881 = vrot.lane.b32.xlu1 %v8880_v21, %s9043_s6  ;;  %8227 = vmatpush1.bf16.msra.mxu1 %v14140_v36  ;;  %v14158_v18 = vld [vmem:[#allocation96_spill] sm:$0xff]  ;;  %v14163_v62 = vld [vmem:[#allocation102_spill] sm:$0xff]  ;;  %v14164_v36 = vld [vmem:[#allocation121_spill] sm:$0xff] }
 0x6c1   :  { %8229 = vmatprep.subr.bf16.mxu1 %v14141_v15  ;;  %8443 = vmatpush3.bf16.msra.mxu0 %v14142_v23  ;;  %v14161_v14 = vld [vmem:[#allocation120_spill] sm:$0xff]  ;;  %v14165_v15 = vld [vmem:[#allocation122_spill] sm:$0xff] }
 0x6c2   :  { %8445 = vmatprep.subr.bf16.mxu0 %v14143_v33  ;;  %v14162_v21 = vld [vmem:[#allocation100_spill] sm:$0xff]  ;;  %v14168_v33 = vld [vmem:[#allocation123_spill] sm:$0xff] }
 0x6c3   :  { %v14166_v23 = vld [vmem:[#allocation104_spill] sm:$0xff] }
 0x6c4   :  { %2550 = vrot.lane.b32.xlu1 %v2494_v16, %s9033_s27  ;;  %8231 = vmatpush1.bf16.msra.mxu1 %v14144_v50  ;;  %v14167_v16 = vld [vmem:[#allocation106_spill] sm:$0xff]  ;;  %v14169_v50 = vld [vmem:[#allocation124_spill] sm:$0xff]  ;;  %s9044_s27 = smov 19  }
 0x6c5   :  { %8233 = vmatprep.subr.bf16.mxu1 %v14145_v56  ;;  %8447 = vmatpush3.bf16.msra.mxu0 %v14146_v5  ;;  %v14170_v56 = vld [vmem:[#allocation125_spill] sm:$0xff]  ;;  %v14171_v5 = vld [vmem:[#allocation126_spill] sm:$0xff] }
 0x6c6   :  { %8449 = vmatprep.subr.bf16.mxu0 %v14147_v25  ;;  %v14172_v25 = vld [vmem:[#allocation127_spill] sm:$0xff] }
 0x6c8   :  { %8235 = vmatpush1.bf16.msra.mxu1 %v14148_v10  ;;  %v14173_v10 = vld [vmem:[#allocation128_spill] sm:$0xff] }
 0x6c9   :  { %8237 = vmatprep.subr.bf16.mxu1 %v14149_v60  ;;  %8451 = vmatpush3.bf16.msra.mxu0 %v14150_v34  ;;  %v14174_v60 = vld [vmem:[#allocation129_spill] sm:$0xff]  ;;  %v14175_v34 = vld [vmem:[#allocation130_spill] sm:$0xff] }
 0x6ca   :  { %8453 = vmatprep.subr.bf16.mxu0 %v14151_v40  ;;  %v14176_v40 = vld [vmem:[#allocation131_spill] sm:$0xff] }
 0x6cc   :  { %8239 = vmatpush1.bf16.msra.mxu1 %v14152_v51  ;;  %v14177_v51 = vld [vmem:[#allocation132_spill] sm:$0xff] }
 0x6cd   :  { %8241 = vmatprep.subr.bf16.mxu1 %v14153_v2  ;;  %8455 = vmatpush3.bf16.msra.mxu0 %v14154_v54  ;;  %v14178_v2 = vld [vmem:[#allocation133_spill] sm:$0xff]  ;;  %v14179_v54 = vld [vmem:[#allocation134_spill] sm:$0xff] }
 0x6ce   :  { %8457 = vmatprep.subr.bf16.mxu0 %v14155_v29  ;;  %v14180_v29 = vld [vmem:[#allocation135_spill] sm:$0xff] }
 0x6d0   :  { %8243 = vmatpush1.bf16.msra.mxu1 %v14156_v4  ;;  %v14181_v4 = vld [vmem:[#allocation136_spill] sm:$0xff] }
 0x6d1   :  { %8245 = vmatprep.subr.bf16.mxu1 %v14157_v45  ;;  %8459 = vmatpush3.bf16.msra.mxu0 %v14158_v18  ;;  %v14182_v45 = vld [vmem:[#allocation137_spill] sm:$0xff]  ;;  %v14183_v18 = vld [vmem:[#allocation138_spill] sm:$0xff] }
 0x6d2   :  { %8461 = vmatprep.subr.bf16.mxu0 %v14159_v8 }
 0x6d4   :  { %8247 = vmatpush1.bf16.msra.mxu1 %v14160_v35 }
 0x6d5   :  { %8249 = vmatprep.subr.bf16.mxu1 %v14161_v14  ;;  %8463 = vmatpush3.bf16.msra.mxu0 %v14162_v21 }
 0x6d6   :  { %8465 = vmatprep.subr.bf16.mxu0 %v14163_v62 }
 0x6d8   :  { %8251 = vmatpush1.bf16.msra.mxu1 %v14164_v36 }
 0x6d9   :  { %8253 = vmatprep.subr.bf16.mxu1 %v14165_v15  ;;  %8467 = vmatpush3.bf16.msra.mxu0 %v14166_v23 }
 0x6da   :  { %8469 = vmatprep.subr.bf16.mxu0 %v14167_v16 }
 0x6dc   :  { %8255 = vmatpush1.bf16.msra.mxu1 %v14168_v33 }
 0x6dd   :  { %8257 = vmatprep.subr.bf16.mxu1 %v14169_v50 }
 0x6e0   :  { %8259 = vmatpush1.bf16.msra.mxu1 %v14170_v56  ;;  %v14184_v56 = vld [vmem:[#allocation139_spill] sm:$0xff] }
 0x6e1   :  { %8261 = vmatprep.subr.bf16.mxu1 %v14171_v5  ;;  %v14185_v5 = vld [vmem:[#allocation141_spill] sm:$0xff] }
 0x6e4   :  { %8263 = vmatpush1.bf16.msra.mxu1 %v14172_v25  ;;  %v14186_v25 = vld [vmem:[#allocation140_spill] sm:$0xff] }
 0x6e5   :  { %8265 = vmatprep.subr.bf16.mxu1 %v14173_v10  ;;  %v14189_v10 = vld [vmem:[#allocation145_spill] sm:$0xff] }
 0x6e8   :  { %8267 = vmatpush1.bf16.msra.mxu1 %v14174_v60  ;;  %v14192_v60 = vld [vmem:[#allocation147_spill] sm:$0xff] }
 0x6e9   :  { %8269 = vmatprep.subr.bf16.mxu1 %v14175_v34  ;;  %v14193_v34 = vld [vmem:[#allocation148_spill] sm:$0xff] }
 0x6ec   :  { %8271 = vmatpush1.bf16.msra.mxu1 %v14176_v40  ;;  %v14195_v40 = vld [vmem:[#allocation149_spill] sm:$0xff] }
 0x6ed   :  { %8273 = vmatprep.subr.bf16.mxu1 %v14177_v51  ;;  %v14196_v51 = vld [vmem:[#allocation151_spill] sm:$0xff] }
 0x6f0   :  { %8275 = vmatpush1.bf16.msra.mxu1 %v14178_v2  ;;  %v14197_v2 = vld [vmem:[#allocation152_spill] sm:$0xff] }
 0x6f1   :  { %8277 = vmatprep.subr.bf16.mxu1 %v14179_v54  ;;  %v14199_v54 = vld [vmem:[#allocation153_spill] sm:$0xff] }
 0x6f4   :  { %8279 = vmatpush1.bf16.msra.mxu1 %v14180_v29  ;;  %v14203_v29 = vld [vmem:[#allocation159_spill] sm:$0xff] }
 0x6f5   :  { %8281 = vmatprep.subr.bf16.mxu1 %v14181_v4  ;;  %v14204_v4 = vld [vmem:[#allocation158_spill] sm:$0xff] }
 0x6f8   :  { %8283 = vmatpush1.bf16.msra.mxu1 %v14182_v45  ;;  %v14205_v45 = vld [vmem:[#allocation160_spill] sm:$0xff] }
 0x6f9   :  { %8285 = vmatprep.subr.bf16.mxu1 %v14183_v18  ;;  %v14206_v18 = vld [vmem:[#allocation162_spill] sm:$0xff] }
 0x710   :  { %v7090_v8 = vpop.f32.mrb[10].mxu0 }
 0x711   :  { %v7091_v35 = vpop.f32.mrb[11].mxu0 }
 0x712   :  { %v12726_v14 = vadd.f32 %v7091_v35, %v7090_v8  ;;  %v14207_v8 = vld [vmem:[#allocation161_spill] sm:$0xff]  ;;  %v14211_v35 = vld [vmem:[#allocation168_spill] sm:$0xff] }
 0x730   :  { %v2549_v21 = vpop.permute.xlu0 %2548 }
 0x731   :  { %v2568_v62 = vsel %vm478_vm0, %v8879_v28, %v2549_v21 }
 0x732   :  { %v2604_v36 = vmax.f32 %v12584_v53, %v2568_v62  ;;  %v12732_v15 = vpop.permute.xlu1 %8881  ;;  %v14213_v62 = vld [vmem:[#allocation171_spill] sm:$0xff] }
 0x733   :  { %v8884_v23 = vunpack.i.h.bf16 %v12732_v15  ;;  %v8883_v16 = vunpack.i.l.bf16 %v12732_v15  ;;  %v14218_v15 = vld [vmem:[#allocation167_spill] sm:$0xff] }
 0x734   :  { %3798 = vrot.lane.b32.xlu0 %v2604_v36, %s9043_s6  ;;  %v14214_v36 = vld [vmem:[#allocation172_spill] sm:$0xff] }
 0x735   :  { %v3808_v33 = vsel %vm3802_vm15, %v8883_v16, %v8884_v23  ;;  %v3807_v58 = vsel %vm3802_vm15, %v8874_v12, %v8883_v16  ;;  %v14188_v12 = vld [vmem:[#allocation143_spill] sm:$0xff] }
 0x736   :  { %v2551_v50 = vpop.permute.xlu1 %2550  ;;  %4027 = vmatprep.mubr.f32.mxu1 %v3808_v33  ;;  %4380 = vmatprep.mubr.f32.mxu0 %v3808_v33  ;;  %v14216_v16 = vld [vmem:[#allocation175_spill] sm:$0xff] }
 0x737   :  { %v2569_v53 = vsel %vm478_vm0, %v2549_v21, %v2551_v50  ;;  %4028 = vmatmul.mubr.f32.vlgmr.msra.gmra.mrb[22].mxu1 %v3807_v58  ;;  %4381 = vmatmul.mubr.f32.vlgmr.msra.gmra.mrb[14].mxu0 %v3807_v58  ;;  %v14212_v21 = vld [vmem:[#allocation169_spill] sm:$0xff]  ;;  %vm3770_vm0 = vcmask 1043608  }
 0x738   :  { %v2605_v28 = vmax.f32 %v12670_v44, %v2569_v53  ;;  %3758 = vrot.lane.b32.xlu0 %v12638_v3, %s9044_s27  ;;  %8287 = vmatpush1.bf16.msra.mxu1 %v14184_v56  ;;  %v14190_v44 = vld [vmem:[#allocation144_spill] sm:$0xff]  ;;  %v14191_v3 = vld [vmem:[#allocation146_spill] sm:$0xff] }
 0x739   :  { %8289 = vmatprep.subr.bf16.mxu1 %v14185_v5  ;;  %8471 = vmatpush3.bf16.msra.mxu0 %v14186_v25 }
 0x73a   :  { %3800 = vrot.lane.b32.xlu1 %v2605_v28, %s9043_s6  ;;  %8473 = vmatprep.subr.bf16.mxu0 %v14187_v1  ;;  %v12852_v1 = vld [vmem:[#allocation6 + $0x18] sm:$0xff]  ;;  %s9046_s6 = smov 110  }
 0x73b   :  { %2612 = vst.msk [vmem:[#allocation6 + $0x28] sm:$0xff] %vm2611_vm7, %v12852_v1  ;;  %vm4875_vm7 = vcmask 736256  }
 0x73c   :  { %3760 = vrot.lane.b32.xlu0 %v12640_v42, %s9044_s27  ;;  %8291 = vmatpush1.bf16.msra.mxu1 %v14188_v12  ;;  %v14194_v42 = vld [vmem:[#allocation150_spill] sm:$0xff] }
 0x73d   :  { %8293 = vmatprep.subr.bf16.mxu1 %v14189_v10  ;;  %8475 = vmatpush3.bf16.msra.mxu0 %v14190_v44 }
 0x73e   :  { %3762 = vrot.lane.b32.xlu1 %v12618_v0, %s9044_s27  ;;  %8477 = vmatprep.subr.bf16.mxu0 %v14191_v3  ;;  %v14198_v0 = vld [vmem:[#allocation154_spill] sm:$0xff]  ;;  %s14231_s27 = sld [smem:[#allocation186_spill]] }
 0x740   :  { %8295 = vmatpush1.bf16.msra.mxu1 %v11917_v30  ;;  %v14200_v30 = vld [vmem:[#allocation155_spill] sm:$0xff] }
 0x741   :  { %8297 = vmatprep.subr.bf16.mxu1 %v11928_v9  ;;  %8479 = vmatpush3.bf16.msra.mxu0 %v14192_v60  ;;  %v14201_v9 = vld [vmem:[#allocation156_spill] sm:$0xff] }
 0x742   :  { %8481 = vmatprep.subr.bf16.mxu0 %v11930_v7  ;;  %v14202_v7 = vld [vmem:[#allocation157_spill] sm:$0xff] }
 0x744   :  { %8299 = vmatpush1.bf16.msra.mxu1 %v14193_v34 }
 0x745   :  { %8301 = vmatprep.subr.bf16.mxu1 %v14194_v42  ;;  %8483 = vmatpush3.bf16.msra.mxu0 %v14195_v40 }
 0x746   :  { %8485 = vmatprep.subr.bf16.mxu0 %v14196_v51 }
 0x748   :  { %8303 = vmatpush1.bf16.msra.mxu1 %v14197_v2 }
 0x749   :  { %8305 = vmatprep.subr.bf16.mxu1 %v14198_v0  ;;  %8487 = vmatpush3.bf16.msra.mxu0 %v14199_v54 }
 0x74a   :  { %8489 = vmatprep.subr.bf16.mxu0 %v14200_v30 }
 0x74c   :  { %8307 = vmatpush1.bf16.msra.mxu1 %v12043_v24  ;;  %v14209_v24 = vld [vmem:[#allocation165_spill] sm:$0xff] }
 0x74d   :  { %8309 = vmatprep.subr.bf16.mxu1 %v12055_v32  ;;  %8491 = vmatpush3.bf16.msra.mxu0 %v14201_v9  ;;  %v14208_v32 = vld [vmem:[#allocation163_spill] sm:$0xff] }
 0x74e   :  { %8493 = vmatprep.subr.bf16.mxu0 %v12057_v39  ;;  %v14210_v39 = vld [vmem:[#allocation166_spill] sm:$0xff] }
 0x750   :  { %8311 = vmatpush1.bf16.msra.mxu1 %v14202_v7 }
 0x751   :  { %8313 = vmatprep.subr.bf16.mxu1 %v14203_v29  ;;  %8495 = vmatpush3.bf16.msra.mxu0 %v14204_v4 }
 0x752   :  { %8497 = vmatprep.subr.bf16.mxu0 %v14205_v45 }
 0x754   :  { %8315 = vmatpush1.bf16.msra.mxu1 %v12109_v48  ;;  %v14215_v48 = vld [vmem:[#allocation174_spill] sm:$0xff] }
 0x755   :  { %8317 = vmatprep.subr.bf16.mxu1 %v14206_v18  ;;  %8499 = vmatpush3.bf16.msra.mxu0 %v14207_v8 }
 0x756   :  { %8500 = vmatprep.subr.bf16.mxu0 %v14043_v43 }
 0x758   :  { %8319 = vmatpush1.bf16.msra.mxu1 %v14208_v32 }
 0x759   :  { %8321 = vmatprep.subr.bf16.mxu1 %v14209_v24 }
 0x75c   :  { %8323 = vmatpush1.bf16.msra.mxu1 %v14210_v39 }
 0x75d   :  { %8325 = vmatprep.subr.bf16.mxu1 %v14211_v35 }
 0x760   :  { %8327 = vmatpush1.bf16.msra.mxu1 %v14212_v21 }
 0x761   :  { %8329 = vmatprep.subr.bf16.mxu1 %v14213_v62 }
 0x764   :  { %8331 = vmatpush1.bf16.msra.mxu1 %v14214_v36 }
 0x765   :  { %8333 = vmatprep.subr.bf16.mxu1 %v14215_v48 }
 0x768   :  { %8335 = vmatpush1.bf16.msra.mxu1 %v14216_v16 }
 0x769   :  { %8337 = vmatprep.subr.bf16.mxu1 %v12270_v13 }
 0x76c   :  { %8339 = vmatpush1.bf16.msra.mxu1 %v12289_v37 }
 0x76d   :  { %8341 = vmatprep.subr.bf16.mxu1 %v12295_v19 }
 0x770   :  { %8343 = vmatpush1.bf16.msra.mxu1 %v12314_v11 }
 0x771   :  { %8345 = vmatprep.subr.bf16.mxu1 %v12323_v59 }
 0x774   :  { %8347 = vmatpush1.bf16.msra.mxu1 %v12343_v47  ;;  %v14217_v47 = vld [vmem:[#allocation164_spill] sm:$0xff] }
 0x775   :  { %8349 = vmatprep.subr.bf16.mxu1 %v12348_v41 }
 0x78e   :  { %v7125_v33 = vpop.f32.mrb[12].mxu0 }
 0x78f   :  { %v7126_v58 = vpop.f32.mrb[13].mxu0 }
 0x790   :  { %v7127_v50 = vadd.f32 %v7126_v58, %v7125_v33 }
 0x792   :  { %v4313_v53 = vadd.f32 %v7127_v50, %v12726_v14 }
 0x7a6   :  { %v3799_v28 = vpop.permute.xlu0 %3798 }
 0x7a7   :  { %v3809_v41 = vsel %vm3802_vm15, %v8884_v23, %v3799_v28 }
 0x7aa   :  { %v3759_v13 = vpop.permute.xlu0 %3758 }
 0x7ab   :  { %3771 = vst.msk [vmem:[#allocation6] sm:$0xf] %vm3770_vm0, %v3759_v13  ;;  %vm4750_vm0 = vcmask 883712  }
 0x7ac   :  { %v3801_v37 = vpop.permute.xlu1 %3800 }
 0x7ad   :  { %v3810_v19 = vsel %vm3802_vm15, %v3799_v28, %v3801_v37  ;;  %vm4666_vm15 = vcmask 900096  }
 0x7ae   :  { %4098 = vmatprep.mubr.f32.mxu1 %v3810_v19  ;;  %4450 = vmatprep.mubr.f32.mxu0 %v3810_v19  ;;  %v3761_v11 = vpop.permute.xlu0 %3760 }
 0x7af   :  { %v3765_v59 = vsel %vm3764_vm3, %v3759_v13, %v3761_v11  ;;  %4099 = vmatmul.mubr.f32.vlgmr.msra.gmra.mrb[22].mxu1 %v3809_v41  ;;  %4451 = vmatmul.mubr.f32.vlgmr.msra.gmra.mrb[16].mxu0 %v3809_v41 }
 0x7b0   :  { %3772 = vst [vmem:[#allocation6 + $0x8] sm:$0xf] %v3765_v59  ;;  %8351 = vmatpush1.bf16.msra.mxu1 %v12365_v52  ;;  %8502 = vmatpush3.bf16.msra.mxu0 %v14217_v47  ;;  %v3763_v14 = vpop.permute.xlu1 %3762 }
 0x7b1   :  { %v3766_v56 = vsel %vm3764_vm3, %v3761_v11, %v3763_v14  ;;  %8353 = vmatprep.subr.bf16.mxu1 %v12369_v20  ;;  %8503 = vmatprep.subr.bf16.mxu0 %v14043_v43  ;;  %v14219_v20 = vld [vmem:[#allocation170_spill] sm:$0xff]  ;;  %vm4708_vm3 = vcmask 891904  }
 0x7b2   :  { %v12806_v5 = vld [vmem:[#allocation6] sm:$0xff]  ;;  %3774 = vst.msk [vmem:[#allocation6 + $0x10] sm:$0xf] %vm3773_vm6, %v3766_v56  ;;  %4169 = vmatprep.mubr.f32.mxu1 %v12199_v26  ;;  %7408 = vmatprep.mubr.msk.f32.mxu0 %vm9041_vm11, %v12199_v26  ;;  %vm4833_vm6 = vcmask 744448  }
 0x7b4   :  { %8355 = vmatpush1.bf16.msra.mxu1 %v12386_v27  ;;  %8505 = vmatpush3.bf16.msra.mxu0 %v14218_v15  ;;  %v14220_v27 = vld [vmem:[#allocation173_spill] sm:$0xff] }
 0x7b5   :  { %8357 = vmatprep.subr.bf16.mxu1 %v12390_v17  ;;  %8506 = vmatprep.subr.bf16.mxu0 %v14043_v43  ;;  %v14221_v17 = vld [vmem:[#allocation176_spill] sm:$0xff] }
 0x7b7   :  { %v12815_v52 = vld [vmem:[#allocation6 + $0x8] sm:$0xff] }
 0x7b8   :  { %8359 = vmatpush1.bf16.msra.mxu1 %v12407_v63  ;;  %8508 = vmatpush3.bf16.msra.mxu0 %v14219_v20  ;;  %v14222_v63 = vld [vmem:[#allocation177_spill] sm:$0xff] }
 0x7b9   :  { %4574 = vrot.lane.b32.xlu0 %v12815_v52, %s9031_s28  ;;  %8361 = vmatprep.subr.bf16.mxu1 %v12411_v49 }
 0x7ba   :  { %8509 = vmatprep.subr.bf16.mxu0 %v14043_v43 }
 0x7bc   :  { %8363 = vmatpush1.bf16.msra.mxu1 %v12427_v6  ;;  %8511 = vmatpush3.bf16.msra.mxu0 %v14220_v27 }
 0x7bd   :  { %4572 = vrot.lane.b32.xlu0 %v12806_v5, %s9031_s28  ;;  %8365 = vmatprep.subr.bf16.mxu1 %v12431_v22 }
 0x7be   :  { %8512 = vmatprep.subr.bf16.mxu0 %v14043_v43 }
 0x7c0   :  { %8367 = vmatpush1.bf16.msra.mxu1 %v12447_v38  ;;  %8514 = vmatpush3.bf16.msra.mxu0 %v14221_v17 }
 0x7c1   :  { %8369 = vmatprep.subr.bf16.mxu1 %v12451_v55  ;;  %8515 = vmatprep.subr.bf16.mxu0 %v14043_v43 }
 0x7c4   :  { %8371 = vmatpush1.bf16.msra.mxu1 %v12461_v61  ;;  %8517 = vmatpush3.bf16.msra.mxu0 %v14222_v63 }
 0x7c5   :  { %6867 = vmatprep.subr.msk.mxu1 %vm3040_vm13, %v12468_v46  ;;  %7406 = vmatprep.subr.mxu0 %v12199_v26 }
 0x7c8   :  { %6868 = vmatpush1.msk.msra.mxu1 %vm3040_vm13, %v12478_v31  ;;  %7407 = vmatpush3.msk.msra.mxu0 %vm3040_vm13, %v12321_v57 }
 0x7c9   :  { %6869 = vmatmul.mubr.msk.f32.vlgmr.msra.gmra.mrb[22].mxu1 %vm3036_vm14, %v3801_v37  ;;  %7409 = vmatmul.mubr.msk.f32.vlgmr.msra.gmra.mrb[18].mxu0 %vm3036_vm14, %v3801_v37  ;;  %vm4546_vm14 = vcmask 216064  }
 0x7ca   :  { %5015 = vmatprep.mubr.f32.mxu0 %v12199_v26  ;;  %5086 = vmatprep.mubr.f32.mxu1 %v12199_v26 }
 0x80a   :  { %v7160_v49 = vpop.f32.mrb[14].mxu0 }
 0x80b   :  { %v7161_v6 = vpop.f32.mrb[15].mxu0 }
 0x80c   :  { %v7162_v22 = vadd.f32 %v7161_v6, %v7160_v49 }
 0x80e   :  { %v4383_v38 = vadd.f32 %v7162_v22, %v4313_v53 }
 0x82b   :  { %v12846_v55 = vpop.permute.xlu0 %4574 }
 0x82f   :  { %v4573_v61 = vpop.permute.xlu0 %4572 }
 0x830   :  { %v12850_v46 = vsel %vm212_vm1, %v4573_v61, %v12846_v55 }
 0x831   :  { %v8520_v6 = vpack.c.bf16 %v12850_v46, %v12806_v5 }
 0x882   :  { %v7195_v57 = vpop.f32.mrb[16].mxu0 }
 0x883   :  { %v7196_v31 = vpop.f32.mrb[17].mxu0 }
 0x884   :  { %v7197_v23 = vadd.f32 %v7196_v31, %v7195_v57 }
 0x886   :  { %v4453_v25 = vadd.f32 %v7197_v23, %v4383_v38 }
 0x89c   :  { %v4171_v26 = vpop.f32.mrb[22].mxu1  ;;  %v4522_v12 = vpop.f32.mrb[18].mxu0 }
 0x89d   :  { %v4523_v10 = vadd.f32 %v4522_v12, %v4453_v25  ;;  %v4173_v44 = vpop.f32.mrb[23].mxu1  ;;  %v7410_v3 = vpop.f32.mrb[19].mxu0  ;;  %4529 = vrot.lane.b32.xlu1 %v4171_v26, %s9045_s4 }
 0x89e   :  { %4531 = vrot.lane.b32.xlu0 %v4173_v44, %s9045_s4 }
 0x8a1   :  { %4533 = vrot.lane.b32.xlu1 %v4523_v10, %s9045_s4 }
 0x8a2   :  { %4654 = vrot.lane.b32.xlu0 %v12806_v5, %s9046_s6 }
 0x8a5   :  { %4615 = vrot.lane.b32.xlu1 %v12815_v52, %s9032_s10 }
 0x8a6   :  { %4738 = vrot.lane.b32.xlu0 %v12806_v5, %s9047_s5 }
 0x8a9   :  { %4656 = vrot.lane.b32.xlu1 %v12815_v52, %s9046_s6 }
 0x8aa   :  { %4821 = vrot.lane.b32.xlu0 %v12806_v5, %s9048_s20 }
 0x8ad   :  { %4613 = vrot.lane.b32.xlu1 %v12806_v5, %s9032_s10 }
 0x8ae   :  { %4863 = vrot.lane.b32.xlu0 %v12806_v5, %s9049_s3 }
 0x8b1   :  { %4698 = vrot.lane.b32.xlu1 %v12815_v52, %s9050_s1 }
 0x8b5   :  { %4740 = vrot.lane.b32.xlu1 %v12815_v52, %s9047_s5 }
 0x8b9   :  { %4696 = vrot.lane.b32.xlu1 %v12806_v5, %s9050_s1 }
 0x8bd   :  { %4782 = vrot.lane.b32.xlu1 %v12815_v52, %s9035_s7 }
 0x8c1   :  { %4823 = vrot.lane.b32.xlu1 %v12815_v52, %s9048_s20 }
 0x8c5   :  { %4780 = vrot.lane.b32.xlu1 %v12806_v5, %s9035_s7 }
 0x8c9   :  { %4865 = vrot.lane.b32.xlu1 %v12815_v52, %s9049_s3 }
 0x90f   :  { %v4530_v60 = vpop.permute.xlu1 %4529 }
 0x910   :  { %4543 = vst.msk [vmem:[#allocation6 + $0x10] sm:$0xf] %vm4542_vm10, %v4530_v60  ;;  %v4532_v34 = vpop.permute.xlu0 %4531  ;;  %vm5725_vm10 = vcmask 965632  }
 0x911   :  { %v4536_v42 = vsel %vm4535_vm12, %v4530_v60, %v4532_v34 }
 0x912   :  { %4544 = vst [vmem:[#allocation6 + $0x18] sm:$0xf] %v4536_v42 }
 0x913   :  { %v4534_v40 = vpop.permute.xlu1 %4533 }
 0x914   :  { %v4537_v51 = vsel %vm4535_vm12, %v4532_v34, %v4534_v40  ;;  %4547 = vst.msk [vmem:[#allocation6 + $0x28] sm:$0xf] %vm4546_vm14, %v4534_v40  ;;  %v4655_v9 = vpop.permute.xlu0 %4654  ;;  %vm5739_vm12 = vcmask 957440   ;;  %vm5780_vm14 = vcmask 875520  }
 0x915   :  { %4545 = vst [vmem:[#allocation6 + $0x20] sm:$0xf] %v4537_v51 }
 0x917   :  { %v12883_v2 = vld [vmem:[#allocation6 + $0x10] sm:$0xff]  ;;  %v12885_v0 = vpop.permute.xlu1 %4615 }
 0x918   :  { %v4739_v24 = vpop.permute.xlu0 %4738 }
 0x919   :  { %v12887_v54 = vld [vmem:[#allocation6 + $0x18] sm:$0xff] }
 0x91b   :  { %v4553_v30 = vld [vmem:[#allocation6 + $0x28] sm:$0xff]  ;;  %v12889_v7 = vpop.permute.xlu1 %4656 }
 0x91c   :  { %v12891_v29 = vld [vmem:[#allocation6 + $0x20] sm:$0xff]  ;;  %4559 = vst.msk [vmem:[#allocation3 + $0x28] sm:$0xff] %vm134_vm9, %v4553_v30  ;;  %v12896_v4 = vsel %vm4666_vm15, %v4655_v9, %v12889_v7  ;;  %4664 = vrot.lane.b32.xlu0 %v4553_v30, %s9046_s6  ;;  %4582 = vrot.lane.b32.xlu1 %v4553_v30, %s9031_s28  ;;  %v4822_v16 = vpop.permute.xlu0 %4821 }
 0x91f   :  { %v4614_v45 = vpop.permute.xlu1 %4613 }
 0x920   :  { %v12902_v18 = vsel %vm345_vm2, %v4614_v45, %v12885_v0  ;;  %4748 = vrot.lane.b32.xlu0 %v4553_v30, %s9047_s5  ;;  %4623 = vrot.lane.b32.xlu1 %v4553_v30, %s9032_s10  ;;  %v4864_v13 = vpop.permute.xlu0 %4863 }
 0x921   :  { %v8524_v8 = vpack.c.bf16 %v12896_v4, %v12902_v18  ;;  %v13053_v4 = vld [vmem:[%s14223_s0] sm:$0xff]  ;;  %s9054_s0 = smov 117  }
 0x923   :  { %v12908_v32 = vpop.permute.xlu1 %4698 }
 0x924   :  { %4617 = vrot.lane.b32.xlu0 %v12883_v2, %s9032_s10  ;;  %4706 = vrot.lane.b32.xlu1 %v4553_v30, %s9050_s1 }
 0x927   :  { %v12913_v39 = vpop.permute.xlu1 %4740 }
 0x928   :  { %v12917_v35 = vsel %vm4750_vm0, %v4739_v24, %v12913_v39  ;;  %4658 = vrot.lane.b32.xlu0 %v12883_v2, %s9046_s6  ;;  %4576 = vrot.lane.b32.xlu1 %v12883_v2, %s9031_s28 }
 0x92b   :  { %v4697_v21 = vpop.permute.xlu1 %4696 }
 0x92c   :  { %v12925_v62 = vsel %vm4708_vm3, %v4697_v21, %v12908_v32  ;;  %4700 = vrot.lane.b32.xlu0 %v12883_v2, %s9050_s1  ;;  %4578 = vrot.lane.b32.xlu1 %v12887_v54, %s9031_s28 }
 0x92d   :  { %v8528_v36 = vpack.c.bf16 %v12917_v35, %v12925_v62 }
 0x92f   :  { %v12933_v48 = vpop.permute.xlu1 %4782 }
 0x930   :  { %4742 = vrot.lane.b32.xlu0 %v12883_v2, %s9047_s5  ;;  %4619 = vrot.lane.b32.xlu1 %v12887_v54, %s9032_s10 }
 0x933   :  { %v12939_v33 = vpop.permute.xlu1 %4823 }
 0x934   :  { %v12943_v58 = vsel %vm4833_vm6, %v4822_v16, %v12939_v33  ;;  %4784 = vrot.lane.b32.xlu0 %v12883_v2, %s9035_s7  ;;  %4660 = vrot.lane.b32.xlu1 %v12887_v54, %s9046_s6 }
 0x937   :  { %v4781_v50 = vpop.permute.xlu1 %4780 }
 0x938   :  { %v12951_v53 = vsel %vm744_vm4, %v4781_v50, %v12933_v48  ;;  %4825 = vrot.lane.b32.xlu0 %v12883_v2, %s9048_s20  ;;  %4702 = vrot.lane.b32.xlu1 %v12887_v54, %s9050_s1 }
 0x939   :  { %v8532_v28 = vpack.c.bf16 %v12943_v58, %v12951_v53 }
 0x93b   :  { %v12959_v37 = vpop.permute.xlu1 %4865 }
 0x93c   :  { %v12963_v19 = vsel %vm4875_vm7, %v4864_v13, %v12959_v37  ;;  %4867 = vrot.lane.b32.xlu0 %v12883_v2, %s9049_s3  ;;  %4744 = vrot.lane.b32.xlu1 %v12887_v54, %s9047_s5 }
 0x940   :  { %4786 = vrot.lane.b32.xlu1 %v12887_v54, %s9035_s7  ;;  %4580 = vrot.lane.b32.xlu0 %v12891_v29, %s9031_s28 }
 0x944   :  { %4827 = vrot.lane.b32.xlu1 %v12887_v54, %s9048_s20  ;;  %4621 = vrot.lane.b32.xlu0 %v12891_v29, %s9032_s10 }
 0x948   :  { %4790 = vrot.lane.b32.xlu1 %v4553_v30, %s9035_s7  ;;  %4662 = vrot.lane.b32.xlu0 %v12891_v29, %s9046_s6 }
 0x94c   :  { %4869 = vrot.lane.b32.xlu1 %v12887_v54, %s9049_s3  ;;  %4704 = vrot.lane.b32.xlu0 %v12891_v29, %s9050_s1  ;;  %s9051_s1 = smov 11  }
 0x950   :  { %4873 = vrot.lane.b32.xlu1 %v4553_v30, %s9049_s3  ;;  %4746 = vrot.lane.b32.xlu0 %v12891_v29, %s9047_s5 }
 0x954   :  { %4788 = vrot.lane.b32.xlu0 %v12891_v29, %s9035_s7  ;;  %s9052_s7 = smov 111  }
 0x958   :  { %4829 = vrot.lane.b32.xlu0 %v12891_v29, %s9048_s20 }
 0x95c   :  { %4831 = vrot.lane.b32.xlu0 %v4553_v30, %s9048_s20 }
 0x960   :  { %4871 = vrot.lane.b32.xlu0 %v12891_v29, %s9049_s3 }
 0x98e   :  { %v12994_v11 = vpop.permute.xlu0 %4664  ;;  %v4583_v41 = vpop.permute.xlu1 %4582 }
 0x98f   :  { %4683 = vst.msk [vmem:[#allocation3 + $0xb8] sm:$0xff] %vm134_vm9, %v12994_v11  ;;  %4600 = vst.msk [vmem:[#allocation3 + $0x58] sm:$0xff] %vm134_vm9, %v4583_v41 }
 0x992   :  { %v12999_v59 = vpop.permute.xlu0 %4748  ;;  %v13001_v47 = vpop.permute.xlu1 %4623 }
 0x993   :  { %4767 = vst.msk [vmem:[#allocation3 + $0x118] sm:$0xff] %vm134_vm9, %v12999_v59  ;;  %4641 = vst.msk [vmem:[#allocation3 + $0x88] sm:$0xff] %vm134_vm9, %v13001_v47 }
 0x996   :  { %v4618_v14 = vpop.permute.xlu0 %4617  ;;  %v13007_v56 = vpop.permute.xlu1 %4706  ;;  %v4905_v9 = vld [vmem:[#allocation3 + $0x58] sm:$0xff] }
 0x997   :  { %v4626_v15 = vsel %vm345_vm2, %v12885_v0, %v4618_v14  ;;  %4725 = vst.msk [vmem:[#allocation3 + $0xe8] sm:$0xff] %vm134_vm9, %v13007_v56 }
 0x99a   :  { %v4659_v20 = vpop.permute.xlu0 %4658  ;;  %v4577_v27 = vpop.permute.xlu1 %4576 }
 0x99b   :  { %v4668_v17 = vsel %vm4666_vm15, %v12889_v7, %v4659_v20  ;;  %v4585_v63 = vsel %vm212_vm1, %v12846_v55, %v4577_v27  ;;  %v4899_v7 = vld [vmem:[#allocation3 + $0x28] sm:$0xff] }
 0x99c   :  { %v8518_v49 = vpack.c.bf16 %v4585_v63, %v12815_v52  ;;  %v8522_v61 = vpack.c.bf16 %v4668_v17, %v4626_v15 }
 0x99e   :  { %v4701_v22 = vpop.permute.xlu0 %4700  ;;  %v4579_v38 = vpop.permute.xlu1 %4578  ;;  %8519 = vmatprep.subr.bf16.mxu0 %v8518_v49  ;;  %v4923_v13 = vld [vmem:[#allocation3 + $0xe8] sm:$0xff] }
 0x99f   :  { %v4710_v57 = vsel %vm4708_vm3, %v12908_v32, %v4701_v22  ;;  %v4586_v31 = vsel %vm212_vm1, %v4577_v27, %v4579_v38  ;;  %8521 = vmatpush1.bf16.msra.mxu0 %v8520_v6  ;;  %v4911_v32 = vld [vmem:[#allocation3 + $0x88] sm:$0xff] }
 0x9a0   :  { %8523 = vmatprep.subr.bf16.mxu0 %v8522_v61 }
 0x9a2   :  { %v4743_v23 = vpop.permute.xlu0 %4742  ;;  %v4620_v25 = vpop.permute.xlu1 %4619 }
 0x9a3   :  { %v4752_v55 = vsel %vm4750_vm0, %v12913_v39, %v4743_v23  ;;  %v13026_v52 = vsel %vm345_vm2, %v4618_v14, %v4620_v25  ;;  %8525 = vmatpush1.bf16.msra.mxu0 %v8524_v8  ;;  %v8550_v8 = vpack.c.bf16 %v4905_v9, %v4899_v7  ;;  %v4929_v14 = vld [vmem:[#allocation3 + $0x118] sm:$0xff]  ;;  %v14225_v9 = vld [vmem:[#allocation13_spill] sm:$0xff] }
 0x9a4   :  { %v8526_v5 = vpack.c.bf16 %v4752_v55, %v4710_v57 }
 0x9a6   :  { %v4785_v46 = vpop.permute.xlu0 %4784  ;;  %v4661_v26 = vpop.permute.xlu1 %4660  ;;  %8527 = vmatprep.subr.bf16.mxu0 %v8526_v5 }
 0x9a7   :  { %v4793_v12 = vsel %vm744_vm4, %v12933_v48, %v4785_v46  ;;  %v4669_v10 = vsel %vm4666_vm15, %v4659_v20, %v4661_v26  ;;  %8529 = vmatpush1.bf16.msra.mxu0 %v8528_v36  ;;  %v4917_v36 = vld [vmem:[#allocation3 + $0xb8] sm:$0xff]  ;;  %v8536_v48 = vpack.c.bf16 %v4586_v31, %v12883_v2 }
 0x9a8   :  { %v8554_v16 = vpack.c.bf16 %v4917_v36, %v4911_v32  ;;  %v8540_v15 = vpack.c.bf16 %v4669_v10, %v13026_v52  ;;  %v14227_v36 = vld [vmem:[#allocation15_spill] sm:$0xff] }
 0x9aa   :  { %v4826_v44 = vpop.permute.xlu0 %4825  ;;  %v4703_v3 = vpop.permute.xlu1 %4702 }
 0x9ab   :  { %v4835_v60 = vsel %vm4833_vm6, %v12939_v33, %v4826_v44  ;;  %v13040_v34 = vsel %vm4708_vm3, %v4701_v22, %v4703_v3 }
 0x9ac   :  { %v8530_v42 = vpack.c.bf16 %v4835_v60, %v4793_v12 }
 0x9ae   :  { %v4868_v40 = vpop.permute.xlu0 %4867  ;;  %v4745_v51 = vpop.permute.xlu1 %4744  ;;  %8531 = vmatprep.subr.bf16.mxu0 %v8530_v42 }
 0x9af   :  { %v4877_v0 = vsel %vm4875_vm7, %v12959_v37, %v4868_v40  ;;  %v13045_v30 = vsel %vm4750_vm0, %v4743_v23, %v4745_v51  ;;  %8533 = vmatpush1.bf16.msra.mxu0 %v8532_v28 }
 0x9b0   :  { %4967 = vmatprep.subr.mxu0 %v4877_v0  ;;  %v8544_v31 = vpack.c.bf16 %v13045_v30, %v13040_v34  ;;  %v14224_v0 = vld [vmem:[#allocation12_spill] sm:$0xff] }
 0x9b2   :  { %v4581_v45 = vpop.permute.xlu0 %4580  ;;  %v4787_v18 = vpop.permute.xlu1 %4786 }
 0x9b3   :  { %v4587_v24 = vsel %vm212_vm1, %v4579_v38, %v4581_v45  ;;  %v4588_v39 = vsel %vm212_vm1, %v4581_v45, %v4583_v41  ;;  %v4794_v35 = vsel %vm744_vm4, %v4785_v46, %v4787_v18  ;;  %4968 = vmatpush1.msra.mxu0 %v12963_v19 }
 0x9b4   :  { %8551 = vmatprep.subr.bf16.mxu0 %v8550_v8  ;;  %6872 = vmatmul.mubr.msk.f32.vlgmr.msra.gmra.mrb[20].mxu0 %vm1372_vm8, %v13053_v4  ;;  %v8534_v21 = vpack.c.bf16 %v4587_v24, %v12887_v54  ;;  %v8552_v62 = vpack.c.bf16 %v4588_v39, %v12891_v29 }
 0x9b5   :  { %5157 = vmatprep.mubr.f32.mxu0 %v12852_v1 }
 0x9b6   :  { %v4622_v33 = vpop.permute.xlu0 %4621  ;;  %v4828_v58 = vpop.permute.xlu1 %4827  ;;  %8535 = vmatprep.subr.bf16.mxu1 %v8534_v21  ;;  %8553 = vmatpush1.bf16.msra.mxu0 %v8552_v62  ;;  %v14226_v21 = vld [vmem:[#allocation14_spill] sm:$0xff] }
 0x9b7   :  { %v4628_v50 = vsel %vm345_vm2, %v4620_v25, %v4622_v33  ;;  %v4629_v53 = vsel %vm345_vm2, %v4622_v33, %v13001_v47  ;;  %v4836_v28 = vsel %vm4833_vm6, %v4826_v44, %v4828_v58  ;;  %8537 = vmatpush1.bf16.msra.mxu1 %v8536_v48  ;;  %8555 = vmatprep.subr.bf16.mxu0 %v8554_v16 }
 0x9b8   :  { %v8558_v47 = vpack.c.bf16 %v4929_v14, %v4923_v13 }
 0x9ba   :  { %v4663_v54 = vpop.permute.xlu0 %4662  ;;  %v4791_v29 = vpop.permute.xlu1 %4790 }
 0x9bb   :  { %v4670_v2 = vsel %vm4666_vm15, %v4661_v26, %v4663_v54  ;;  %v4671_v37 = vsel %vm4666_vm15, %v4663_v54, %v12994_v11  ;;  %4808 = vst.msk [vmem:[#allocation3 + $0x148] sm:$0xff] %vm134_vm9, %v4791_v29 }
 0x9bc   :  { %v8538_v19 = vpack.c.bf16 %v4670_v2, %v4628_v50  ;;  %v8556_v41 = vpack.c.bf16 %v4671_v37, %v4629_v53  ;;  %v14228_v2 = vld [vmem:[#allocation16_spill] sm:$0xff] }
 0x9be   :  { %v4705_v20 = vpop.permute.xlu0 %4704  ;;  %v4870_v27 = vpop.permute.xlu1 %4869  ;;  %8539 = vmatprep.subr.bf16.mxu1 %v8538_v19  ;;  %8557 = vmatpush1.bf16.msra.mxu0 %v8556_v41  ;;  %v14229_v41 = vld [vmem:[#allocation17_spill] sm:$0xff] }
 0x9bf   :  { %v4712_v17 = vsel %vm4708_vm3, %v4703_v3, %v4705_v20  ;;  %v4713_v63 = vsel %vm4708_vm3, %v4705_v20, %v13007_v56  ;;  %v4878_v49 = vsel %vm4875_vm7, %v4868_v40, %v4870_v27  ;;  %8541 = vmatpush1.bf16.msra.mxu1 %v8540_v15  ;;  %8559 = vmatprep.subr.bf16.mxu0 %v8558_v47 }
 0x9c2   :  { %v4747_v11 = vpop.permute.xlu0 %4746  ;;  %v4874_v6 = vpop.permute.xlu1 %4873  ;;  %v4935_v3 = vld [vmem:[#allocation3 + $0x148] sm:$0xff] }
 0x9c3   :  { %v4754_v22 = vsel %vm4750_vm0, %v4745_v51, %v4747_v11  ;;  %v4755_v38 = vsel %vm4750_vm0, %v4747_v11, %v12999_v59  ;;  %4892 = vst.msk [vmem:[#allocation3 + $0x1a8] sm:$0xff] %vm134_vm9, %v4874_v6  ;;  %v8548_v59 = vpack.c.bf16 %v4836_v28, %v4794_v35  ;;  %v5164_v51 = vld [vmem:[%s13639_s11] sm:$0x3f]  ;;  %s9057_s11 = smov 106  }
 0x9c4   :  { %v8542_v61 = vpack.c.bf16 %v4754_v22, %v4712_v17  ;;  %v8560_v57 = vpack.c.bf16 %v4755_v38, %v4713_v63  ;;  %v5169_v30 = vrot.slane %v5164_v51, %v14224_v0  ;;  %v5173_v7 = vrot.slane %v5164_v51, %v14225_v9 }
 0x9c5   :  { %v5177_v62 = vrot.slane %v5164_v51, %v14226_v21  ;;  %v5181_v48 = vrot.slane %v5164_v51, %v14227_v36  ;;  %v5185_v37 = vrot.slane %v5164_v51, %v14228_v2  ;;  %v5189_v14 = vrot.slane %v5164_v51, %v14229_v41  ;;  %v5336_v2 = vld [vmem:[%s13640_s12 + $0x18] sm:$0xff] }
 0x9c6   :  { %v4789_v23 = vpop.permute.xlu0 %4788  ;;  %8543 = vmatprep.subr.bf16.mxu1 %v8542_v61  ;;  %8561 = vmatpush1.bf16.msra.mxu0 %v8560_v57 }
 0x9c7   :  { %v4795_v56 = vsel %vm744_vm4, %v4787_v18, %v4789_v23  ;;  %v4796_v25 = vsel %vm744_vm4, %v4789_v23, %v4791_v29  ;;  %8545 = vmatpush1.bf16.msra.mxu1 %v8544_v31  ;;  %vm5372_vm4 = vcmask 400384  }
 0x9ca   :  { %v4830_v55 = vpop.permute.xlu0 %4829  ;;  %v4947_v40 = vld [vmem:[#allocation3 + $0x1a8] sm:$0xff] }
 0x9cb   :  { %v4837_v52 = vsel %vm4833_vm6, %v4828_v58, %v4830_v55 }
 0x9cc   :  { %v8546_v5 = vpack.c.bf16 %v4837_v52, %v4795_v56 }
 0x9ce   :  { %v4832_v46 = vpop.permute.xlu0 %4831  ;;  %8547 = vmatprep.subr.bf16.mxu1 %v8546_v5  ;;  %v5228_v5 = vld [vmem:[%s14230_s9] sm:$0xff] }
 0x9cf   :  { %v4838_v26 = vsel %vm4833_vm6, %v4830_v55, %v4832_v46  ;;  %4850 = vst.msk [vmem:[#allocation3 + $0x178] sm:$0xff] %vm134_vm9, %v4832_v46  ;;  %8549 = vmatpush1.bf16.msra.mxu1 %v8548_v59  ;;  %vm6158_vm6 = vcmask 228352  }
 0x9d0   :  { %v8564_v42 = vpack.c.bf16 %v4838_v26, %v4796_v25  ;;  %v5232_v26 = vld [vmem:[%s14231_s27] sm:$0xff] }
 0x9d2   :  { %v4872_v12 = vpop.permute.xlu0 %4871 }
 0x9d3   :  { %v4879_v10 = vsel %vm4875_vm7, %v4870_v27, %v4872_v12  ;;  %v4880_v44 = vsel %vm4875_vm7, %v4872_v12, %v4874_v6  ;;  %vm6145_vm7 = vcmask 351288  }
 0x9d4   :  { %5038 = vmatprep.subr.mxu1 %v4879_v10 }
 0x9d5   :  { %5039 = vmatpush1.msra.mxu1 %v4878_v49 }
 0x9d6   :  { %v4941_v60 = vld [vmem:[#allocation3 + $0x178] sm:$0xff]  ;;  %6873 = vmatmul.mubr.msk.f32.vlgmr.msra.gmra.mrb[24].mxu1 %vm1372_vm8, %v13053_v4 }
 0x9d7   :  { %v8562_v34 = vpack.c.bf16 %v4941_v60, %v4935_v3 }
 0x9d9   :  { %8563 = vmatprep.subr.bf16.mxu0 %v8562_v34 }
 0x9da   :  { %8565 = vmatpush1.bf16.msra.mxu0 %v8564_v42 }
 0x9db   :  { %5109 = vmatprep.subr.mxu0 %v4947_v40 }
 0x9de   :  { %5110 = vmatpush1.msra.mxu0 %v4880_v44 }
 0x9df   :  { %6874 = vmatmul.mubr.msk.f32.vlgmr.msra.gmra.mrb[22].mxu0 %vm1372_vm8, %v13053_v4  ;;  %8598 = vmatprep.subr.bf16.mxu0 %v14043_v43 }
 0x9e0   :  { %7425 = vmatprep.mubr.msk.f32.mxu0 %vm9041_vm11, %v12852_v1 }
 0xa87   :  { %v5017_v45 = vpop.f32.mrb[20].mxu0 }
 0xa88   :  { %v5196_v18 = vmul.f32 %v5169_v30, %v5017_v45  ;;  %v5019_v8 = vpop.f32.mrb[21].mxu0 }
 0xa89   :  { %v5197_v32 = vmul.f32 %v5173_v7, %v5019_v8 }
 0xa8a   :  { %v5211_v24 = vmul.f32 %v5196_v18, %v5017_v45 }
 0xa8b   :  { %v5202_v39 = vadd.f32 %v5197_v32, %v5196_v18  ;;  %v5212_v4 = vmul.f32 %v5197_v32, %v5019_v8 }
 0xa8d   :  { %v5217_v35 = vadd.f32 %v5212_v4, %v5211_v24 }
 0xaa9   :  { %v5088_v16 = vpop.f32.mrb[24].mxu1 }
 0xaaa   :  { %v5198_v33 = vmul.f32 %v5177_v62, %v5088_v16  ;;  %v5090_v58 = vpop.f32.mrb[25].mxu1 }
 0xaab   :  { %v5199_v50 = vmul.f32 %v5181_v48, %v5090_v58  ;;  %v5349_v48 = vld [vmem:[%s13640_s12 + $0x80] sm:$0xff] }
 0xaac   :  { %v5203_v53 = vadd.f32 %v5202_v39, %v5198_v33  ;;  %v5213_v28 = vmul.f32 %v5198_v33, %v5088_v16  ;;  %v5333_v33 = vld [vmem:[%s13640_s12] sm:$0xff] }
 0xaad   :  { %v5214_v54 = vmul.f32 %v5199_v50, %v5090_v58 }
 0xaae   :  { %v5218_v29 = vadd.f32 %v5217_v35, %v5213_v28  ;;  %v5204_v13 = vadd.f32 %v5203_v53, %v5199_v50  ;;  %v5334_v50 = vld [vmem:[%s13640_s12 + $0x8] sm:$0xff]  ;;  %v5351_v53 = vld [vmem:[%s13640_s12 + $0x90] sm:$0xff]  ;;  %v5352_v28 = vld [vmem:[%s13640_s12 + $0x98] sm:$0xff] }
 0xab0   :  { %v5219_v19 = vadd.f32 %v5218_v29, %v5214_v54  ;;  %v13165_v54 = vpack.c.bf16 %v5334_v50, %v5333_v33  ;;  %v13167_v29 = vpack.c.bf16 %v5352_v28, %v5351_v53  ;;  %v5361_v33 = vld [vmem:[%s13640_s12 + $0xe0] sm:$0xff]  ;;  %v5362_v50 = vld [vmem:[%s13640_s12 + $0xe8] sm:$0xff]  ;;  %v13300_v53 = vld [vmem:[%s13640_s12 + $0x130] sm:$0x1] }
 0xab1   :  { %v13302_v28 = vpack.c.bf16 %v5362_v50, %v5361_v33 }
 0xab2   :  { %v5159_v15 = vpop.f32.mrb[22].mxu0 }
 0xab3   :  { %v5200_v47 = vmul.f32 %v5185_v37, %v5159_v15  ;;  %v5161_v20 = vpop.f32.mrb[23].mxu0  ;;  %v5353_v37 = vld [vmem:[%s13640_s12 + $0xa0] sm:$0xff] }
 0xab4   :  { %v5201_v27 = vmul.f32 %v5189_v14, %v5161_v20 }
 0xab5   :  { %v5205_v17 = vadd.f32 %v5204_v13, %v5200_v47  ;;  %v5215_v63 = vmul.f32 %v5200_v47, %v5159_v15  ;;  %v5335_v13 = vld [vmem:[%s13640_s12 + $0x10] sm:$0xff] }
 0xab6   :  { %v5216_v49 = vmul.f32 %v5201_v27, %v5161_v20  ;;  %v5206_v11 = vsel %vm134_vm9, %v5201_v27, 0.0  ;;  %v13187_v14 = vpack.c.bf16 %v5336_v2, %v5335_v13  ;;  %v5365_v27 = vld [vmem:[%s13640_s12 + $0x100] sm:$0xff] }
 0xab7   :  { %v5220_v6 = vadd.f32 %v5219_v19, %v5215_v63  ;;  %v5207_v22 = vadd.f32 %v5206_v11, %v5205_v17  ;;  %v5354_v19 = vld [vmem:[%s13640_s12 + $0xa8] sm:$0xff]  ;;  %v5355_v63 = vld [vmem:[%s13640_s12 + $0xb0] sm:$0xff] }
 0xab8   :  { %v5221_v38 = vsel %vm134_vm9, %v5216_v49, 0.0  ;;  %v13193_v47 = vpack.c.bf16 %v5354_v19, %v5353_v37  ;;  %v5366_v17 = vld [vmem:[%s13640_s12 + $0x108] sm:$0xff]  ;;  %v5356_v49 = vld [vmem:[%s13640_s12 + $0xb8] sm:$0xff]  ;;  %vm5523_vm9 = vcmask 908376  }
 0xab9   :  { %5208 = vadd.xlane.f32.xlu0 %v5207_v22  ;;  %v5222_v61 = vadd.f32 %v5221_v38, %v5220_v6  ;;  %v13211_v11 = vpack.c.bf16 %v5366_v17, %v5365_v27  ;;  %v13218_v22 = vpack.c.bf16 %v5356_v49, %v5355_v63  ;;  %v5339_v38 = vld [vmem:[%s13640_s12 + $0x30] sm:$0xff]  ;;  %v5364_v27 = vld [vmem:[%s13640_s12 + $0xf8] sm:$0xff] }
 0xabb   :  { %5223 = vadd.xlane.f32.xlu1 %v5222_v61  ;;  %8600 = vmatpush3.bf16.msra.mxu0 %v13211_v11  ;;  %v5340_v61 = vld [vmem:[%s13640_s12 + $0x38] sm:$0xff] }
 0xabc   :  { %8601 = vmatprep.subr.bf16.mxu0 %v14043_v43 }
 0xb46   :  { %v5209_v57 = vpop.xlane.xlu0 %5208 }
 0xb47   :  { %v5210_v31 = vmul.f32 0.001953125, %v5209_v57  ;;  %v13228_v57 = vpack.c.bf16 %v5340_v61, %v5339_v38 }
 0xb48   :  { %v5224_v23 = vpop.xlane.xlu1 %5223 }
 0xb49   :  { %v5226_v56 = vmul.f32 %v5210_v31, %v5210_v31  ;;  %v5225_v25 = vmul.f32 0.001953125, %v5224_v23  ;;  %v5358_v23 = vld [vmem:[%s13640_s12 + $0xc8] sm:$0xff] }
 0xb4b   :  { %v5227_v55 = vsub.f32 %v5225_v25, %v5226_v56  ;;  %v5367_v56 = vld [vmem:[%s13640_s12 + $0x110] sm:$0xff] }
 0xb4d   :  { %v5229_v52 = vadd.f32 1e-05, %v5227_v55  ;;  %v5368_v55 = vld [vmem:[%s13640_s12 + $0x118] sm:$0xff] }
 0xb4f   :  { %8982 = vrsqrt.f32 %v5229_v52  ;;  %v5341_v52 = vld [vmem:[%s13640_s12 + $0x40] sm:$0xff] }
 0xb59   :  { %v8983_v59 = vpop.eup %8982 }
 0xb5a   :  { %v5231_v46 = vmul.f32 %v8983_v59, %v5228_v5  ;;  %v5342_v5 = vld [vmem:[%s13640_s12 + $0x48] sm:$0xff]  ;;  %v13252_v59 = vpack.c.bf16 %v5368_v55, %v5367_v56 }
 0xb5c   :  { %5237 = vperm.xlu0 %8808, %v5231_v46   ;;  %v5233_v12 = vmul.f32 %v5231_v46, %v5210_v31  ;;  %v5357_v31 = vld [vmem:[%s13640_s12 + $0xc0] sm:$0xff]  ;;  %v13254_v46 = vpack.c.bf16 %v5342_v5, %v5341_v52  ;;  %8603 = vmatpush3.bf16.msra.mxu0 %v13252_v59 }
 0xb5d   :  { %v13241_v25 = vpack.c.bf16 %v5358_v23, %v5357_v31  ;;  %8604 = vmatprep.subr.bf16.mxu0 %v14043_v43 }
 0xb5e   :  { %v5234_v10 = vsub.f32 %v5232_v26, %v5233_v12  ;;  %v5359_v26 = vld [vmem:[%s13640_s12 + $0xd0] sm:$0xff]  ;;  %v5360_v12 = vld [vmem:[%s13640_s12 + $0xd8] sm:$0xff] }
 0xb60   :  { %5248 = vperm.xlu1 %8809, %v5234_v10   ;;  %v5369_v10 = vld [vmem:[%s13640_s12 + $0x120] sm:$0xff] }
 0xbdb   :  { %v5238_v44 = vpop.permute.xlu0 %5237 }
 0xbdc   :  { %v5244_v3 = vmul.f32 %v5238_v44, %v5159_v15  ;;  %v5243_v60 = vmul.f32 %v5238_v44, %v5090_v58  ;;  %v5245_v42 = vmul.f32 %v5238_v44, %v5161_v20  ;;  %v5242_v40 = vmul.f32 %v5238_v44, %v5088_v16  ;;  %v5350_v16 = vld [vmem:[%s13640_s12 + $0x88] sm:$0xff]  ;;  %v5337_v15 = vld [vmem:[%s13640_s12 + $0x20] sm:$0xff] }
 0xbdd   :  { %v5240_v7 = vmul.f32 %v5238_v44, %v5017_v45  ;;  %v5241_v18 = vmul.f32 %v5238_v44, %v5019_v8  ;;  %v13148_v58 = vpack.c.bf16 %v5350_v16, %v5349_v48  ;;  %v5338_v20 = vld [vmem:[%s13640_s12 + $0x28] sm:$0xff]  ;;  %v13269_v44 = vpack.c.bf16 %v5360_v12, %v5359_v26 }
 0xbde   :  { %v13214_v6 = vpack.c.bf16 %v5338_v20, %v5337_v15  ;;  %v5363_v20 = vld [vmem:[%s13640_s12 + $0xf0] sm:$0xff] }
 0xbdf   :  { %v5249_v34 = vpop.permute.xlu1 %5248  ;;  %8567 = vmatprep.subr.bf16.mxu1 %v13148_v58 }
 0xbe0   :  { %v13115_v51 = vadd.f32 %v5249_v34, %v5244_v3  ;;  %v13117_v30 = vadd.f32 %v5249_v34, %v5243_v60  ;;  %v13119_v32 = vadd.f32 %v5249_v34, %v5245_v42  ;;  %v13121_v24 = vadd.f32 %v5249_v34, %v5242_v40  ;;  %8569 = vmatpush3.bf16.msra.mxu1 %v13165_v54  ;;  %v5370_v3 = vld [vmem:[%s13640_s12 + $0x128] sm:$0xff]  ;;  %v5343_v60 = vld [vmem:[%s13640_s12 + $0x50] sm:$0xff] }
 0xbe1   :  { %v13125_v35 = vadd.f32 %v5249_v34, %v5240_v7  ;;  %v13127_v21 = vadd.f32 %v5249_v34, %v5241_v18  ;;  %8571 = vmatprep.subr.bf16.mxu1 %v13167_v29  ;;  %v5344_v34 = vld [vmem:[%s13640_s12 + $0x58] sm:$0xff]  ;;  %v13280_v42 = vpack.c.bf16 %v5370_v3, %v5369_v10 }
 0xbe2   :  { %v5261_v39 = vmax.f32 %v13115_v51, 0.0  ;;  %v5260_v4 = vmax.f32 %v13117_v30, 0.0  ;;  %v5262_v45 = vmax.f32 %v13119_v32, 0.0  ;;  %v5259_v8 = vmax.f32 %v13121_v24, 0.0  ;;  %v5345_v30 = vld [vmem:[%s13640_s12 + $0x60] sm:$0xff]  ;;  %v5347_v32 = vld [vmem:[%s13640_s12 + $0x70] sm:$0xff] }
 0xbe3   :  { %v5257_v62 = vmax.f32 %v13125_v35, 0.0  ;;  %v5258_v36 = vmax.f32 %v13127_v21, 0.0  ;;  %v13282_v40 = vpack.c.bf16 %v5344_v34, %v5343_v60  ;;  %8606 = vmatpush3.bf16.msra.mxu0 %v13280_v42  ;;  %v5348_v51 = vld [vmem:[%s13640_s12 + $0x78] sm:$0xff] }
 0xbe4   :  { %5277 = vrot.lane.b32.xlu1 %v5261_v39, %s9031_s28  ;;  %5275 = vrot.lane.b32.xlu0 %v5260_v4, %s9031_s28  ;;  %v8596_v17 = vpack.c.bf16 %v5348_v51, %v5347_v32 }
 0xbe5   :  { %v8885_v41 = vpack.i.bf16 %v5257_v62, %v5258_v36  ;;  %8573 = vmatpush3.bf16.msra.mxu1 %v13187_v14  ;;  %7423 = vmatprep.subr.mxu0 %v12852_v1 }
 0xbe6   :  { %8575 = vmatprep.subr.bf16.mxu1 %v13193_v47 }
 0xbe7   :  { %7424 = vmatpush3.msk.msra.mxu0 %vm3040_vm13, %v13300_v53 }
 0xbe8   :  { %5279 = vrot.lane.b32.xlu0 %v5262_v45, %s9031_s28  ;;  %5273 = vrot.lane.b32.xlu1 %v5259_v8, %s9031_s28 }
 0xbe9   :  { %8577 = vmatpush3.bf16.msra.mxu1 %v13214_v6  ;;  %8608 = vmatprep.subr.bf16.mxu0 %v13148_v58  ;;  %v13333_v58 = vpack.c.bf16 %v5364_v27, %v5363_v20 }
 0xbea   :  { %8579 = vmatprep.subr.bf16.mxu1 %v13218_v22 }
 0xbec   :  { %8886 = vrot.lane.b32.xlu0 %v8885_v41, %s9031_s28 }
 0xbed   :  { %8581 = vmatpush3.bf16.msra.mxu1 %v13228_v57 }
 0xbee   :  { %8583 = vmatprep.subr.bf16.mxu1 %v13241_v25 }
 0xbf1   :  { %8585 = vmatpush3.bf16.msra.mxu1 %v13254_v46 }
 0xbf2   :  { %8587 = vmatprep.subr.bf16.mxu1 %v13269_v44 }
 0xbf5   :  { %8589 = vmatpush3.bf16.msra.mxu1 %v13282_v40 }
 0xbf6   :  { %8591 = vmatprep.subr.bf16.mxu1 %v13302_v28 }
 0xc56   :  { %v5278_v7 = vpop.permute.xlu1 %5277  ;;  %v5276_v18 = vpop.permute.xlu0 %5275 }
 0xc57   :  { %v5284_v48 = vsel %vm212_vm1, %v5276_v18, %v5278_v7 }
 0xc58   :  { %v5295_v16 = vmax.f32 %v5260_v4, %v5284_v48  ;;  %v5346_v4 = vld [vmem:[%s13640_s12 + $0x68] sm:$0xff]  ;;  %s14232_s12 = smov 60  }
 0xc59   :  { %v13313_v37 = vpack.c.bf16 %v5346_v4, %v5345_v30 }
 0xc5a   :  { %v5280_v13 = vpop.permute.xlu0 %5279  ;;  %5310 = vrot.lane.b32.xlu1 %v5295_v16, %s9046_s6  ;;  %v5274_v2 = vpop.permute.xlu1 %5273 }
 0xc5b   :  { %v5285_v19 = vsel %vm212_vm1, %v5278_v7, %v5280_v13  ;;  %v5297_v41 = vmax.f32 %v5262_v45, %v5280_v13  ;;  %8593 = vmatpush3.bf16.msra.mxu1 %v13313_v37  ;;  %v5283_v45 = vsel %vm212_vm1, %v5274_v2, %v5276_v18 }
 0xc5c   :  { %v5296_v15 = vmax.f32 %v5261_v39, %v5285_v19  ;;  %8595 = vmatprep.subr.bf16.mxu1 %v13333_v58  ;;  %v5294_v38 = vmax.f32 %v5259_v8, %v5283_v45 }
 0xc5e   :  { %5314 = vrot.lane.b32.xlu1 %v5297_v41, %s9046_s6  ;;  %5312 = vrot.lane.b32.xlu0 %v5296_v15, %s9046_s6  ;;  %v8887_v39 = vpop.permute.xlu0 %8886 }
 0xc5f   :  { %v8889_v63 = vunpack.i.h.bf16 %v8887_v39  ;;  %v8888_v49 = vunpack.i.l.bf16 %v8887_v39  ;;  %8597 = vmatpush3.bf16.msra.mxu1 %v8596_v17 }
 0xc60   :  { %8639 = vmatprep.subr.bf16.mxu1 %v14043_v43 }
 0xc61   :  { %v5281_v61 = vsel %vm212_vm1, %v8889_v63, %v8888_v49  ;;  %v5282_v31 = vsel %vm212_vm1, %v8888_v49, %v5274_v2 }
 0xc62   :  { %v5292_v23 = vmax.f32 %v5257_v62, %v5281_v61  ;;  %v5293_v56 = vmax.f32 %v5258_v36, %v5282_v31  ;;  %5308 = vrot.lane.b32.xlu0 %v5294_v38, %s9046_s6 }
 0xc64   :  { %v8890_v55 = vpack.i.bf16 %v5292_v23, %v5293_v56 }
 0xc66   :  { %8891 = vrot.lane.b32.xlu1 %v8890_v55, %s9046_s6 }
 0xccc   :  { %v5311_v24 = vpop.permute.xlu1 %5310 }
 0xcd0   :  { %v5315_v8 = vpop.permute.xlu1 %5314  ;;  %v5313_v52 = vpop.permute.xlu0 %5312 }
 0xcd1   :  { %v5320_v5 = vsel %vm4666_vm15, %v5313_v52, %v5315_v8  ;;  %v5319_v12 = vsel %vm4666_vm15, %v5311_v24, %v5313_v52 }
 0xcd2   :  { %v5330_v26 = vmax.f32 %v5296_v15, %v5320_v5  ;;  %v5329_v21 = vmax.f32 %v5295_v16, %v5319_v12 }
 0xcd4   :  { %v5309_v10 = vpop.permute.xlu0 %5308  ;;  %5531 = vrot.lane.b32.xlu1 %v5330_v26, %s14232_s12 }
 0xcd5   :  { %v5318_v35 = vsel %vm4666_vm15, %v5309_v10, %v5311_v24 }
 0xcd6   :  { %v5328_v62 = vmax.f32 %v5294_v38, %v5318_v35 }
 0xcd8   :  { %v8895_v36 = vpack.i.bf16 %v5328_v62, %v5329_v21  ;;  %7426 = vmatmul.mubr.msk.f32.vlgmr.msra.gmra.mrb[24].mxu0 %vm5372_vm4, %v5328_v62  ;;  %v8892_v3 = vpop.permute.xlu1 %8891 }
 0xcd9   :  { %v8894_v60 = vunpack.i.h.bf16 %v8892_v3  ;;  %v8893_v34 = vunpack.i.l.bf16 %v8892_v3  ;;  %8610 = vmatpush3.bf16.msra.mxu0 %v13165_v54  ;;  %v13376_v54 = vld [vmem:[#allocation7] sm:$0xff] }
 0xcda   :  { %8896 = vrot.lane.b32.xlu0 %v8895_v36, %s14232_s12  ;;  %8612 = vmatprep.subr.bf16.mxu0 %v13167_v29 }
 0xcdb   :  { %v5316_v7 = vsel %vm4666_vm15, %v8894_v60, %v8893_v34  ;;  %v5317_v18 = vsel %vm4666_vm15, %v8893_v34, %v5309_v10  ;;  %vm5794_vm15 = vcmask 867328  }
 0xcdc   :  { %v5326_v48 = vmax.f32 %v5292_v23, %v5316_v7  ;;  %v5327_v33 = vmax.f32 %v5293_v56, %v5317_v18 }
 0xcdd   :  { %8614 = vmatpush3.bf16.msra.mxu0 %v13187_v14 }
 0xcde   :  { %5443 = vmatprep.mubr.f32.mxu1 %v5327_v33  ;;  %8616 = vmatprep.subr.bf16.mxu0 %v13193_v47 }
 0xcdf   :  { %5444 = vmatmul.mubr.f32.vlgmr.msra.gmra.mrb[26].mxu1 %v5326_v48 }
 0xce0   :  { %8641 = vmatpush3.bf16.msra.mxu1 %v13211_v11  ;;  %7442 = vmatprep.mubr.msk.f32.mxu1 %vm9041_vm11, %v12852_v1  ;;  %vm5685_vm11 = vcmask 678912  }
 0xce1   :  { %8618 = vmatpush3.bf16.msra.mxu0 %v13214_v6  ;;  %8642 = vmatprep.subr.bf16.mxu1 %v14043_v43 }
 0xce2   :  { %8620 = vmatprep.subr.bf16.mxu0 %v13218_v22 }
 0xce4   :  { %8644 = vmatpush3.bf16.msra.mxu1 %v13252_v59 }
 0xce5   :  { %8622 = vmatpush3.bf16.msra.mxu0 %v13228_v57  ;;  %8645 = vmatprep.subr.bf16.mxu1 %v14043_v43 }
 0xce6   :  { %8624 = vmatprep.subr.bf16.mxu0 %v13241_v25 }
 0xce8   :  { %8647 = vmatpush3.bf16.msra.mxu1 %v13280_v42 }
 0xce9   :  { %8626 = vmatpush3.bf16.msra.mxu0 %v13254_v46  ;;  %7440 = vmatprep.subr.mxu1 %v13376_v54 }
 0xcea   :  { %8628 = vmatprep.subr.bf16.mxu0 %v13269_v44 }
 0xcec   :  { %7441 = vmatpush3.msk.msra.mxu1 %vm3040_vm13, %v13300_v53 }
 0xced   :  { %8630 = vmatpush3.bf16.msra.mxu0 %v13282_v40 }
 0xcee   :  { %8632 = vmatprep.subr.bf16.mxu0 %v13302_v28 }
 0xcf1   :  { %8634 = vmatpush3.bf16.msra.mxu0 %v13313_v37 }
 0xcf2   :  { %8636 = vmatprep.subr.bf16.mxu0 %v13333_v58 }
 0xcf5   :  { %8638 = vmatpush3.bf16.msra.mxu0 %v8596_v17 }
 0xd46   :  { %v5532_v1 = vpop.permute.xlu1 %5531 }
 0xd47   :  { %7443 = vmatmul.mubr.msk.f32.vlgmr.msra.gmra.mrb[28].mxu1 %vm5372_vm4, %v5532_v1  ;;  %vm6248_vm4 = vcmask 646488  }
 0xd48   :  { %5890 = vmatprep.mubr.f32.mxu1 %v13376_v54 }
 0xd4c   :  { %v8897_v29 = vpop.permute.xlu0 %8896 }
 0xd4d   :  { %v8899_v14 = vunpack.i.h.bf16 %v8897_v29  ;;  %v8898_v47 = vunpack.i.l.bf16 %v8897_v29 }
 0xd4f   :  { %v5534_v11 = vsel %vm877_vm5, %v8898_v47, %v5532_v1  ;;  %v5533_v6 = vsel %vm877_vm5, %v8899_v14, %v8898_v47  ;;  %vm5683_vm5 = vcmask 1048440   ;;  %v5800_v47 = vld [vmem:[%s13641_s13] sm:$0xff] }
 0xd50   :  { %5603 = vmatprep.mubr.f32.mxu0 %v5534_v11  ;;  %v5801_v11 = vld [vmem:[%s13641_s13 + $0x8] sm:$0xff] }
 0xd51   :  { %5604 = vmatmul.mubr.f32.vlgmr.msra.gmra.mrb[26].mxu0 %v5533_v6  ;;  %v5903_v6 = vld [vmem:[%s13645_s17] sm:$0x3] }
 0xdab   :  { %v5515_v22 = vpop.f32.mrb[24].mxu0 }
 0xdac   :  { %v7427_v57 = vpop.f32.mrb[25].mxu0 }
 0xdad   :  { %v5912_v57 = vrot.slane %v5903_v6, %v14225_v9 }
 0xdb2   :  { %v7244_v25 = vpop.f32.mrb[26].mxu1 }
 0xdb3   :  { %v7245_v59 = vpop.f32.mrb[27].mxu1 }
 0xdb4   :  { %v7246_v46 = vadd.f32 %v7245_v59, %v7244_v25 }
 0xdb6   :  { %v5516_v44 = vadd.f32 %v7246_v46, %v5515_v22  ;;  %v5908_v22 = vrot.slane %v5903_v6, %v14224_v0  ;;  %v6045_v6 = vld [vmem:[#allocation9 + $0x28] sm:$0xff] }
 0xdb8   :  { %5520 = vrot.lane.b32.xlu0 %v5516_v44, %s9051_s1 }
 0xe1a   :  { %v5675_v42 = vpop.f32.mrb[28].mxu1 }
 0xe1b   :  { %v7444_v40 = vpop.f32.mrb[29].mxu1 }
 0xe24   :  { %v7287_v16 = vpop.f32.mrb[26].mxu0 }
 0xe25   :  { %v7288_v50 = vpop.f32.mrb[27].mxu0 }
 0xe26   :  { %v7289_v53 = vadd.f32 %v7288_v50, %v7287_v16 }
 0xe28   :  { %v5676_v28 = vadd.f32 %v7289_v53, %v5675_v42 }
 0xe2a   :  { %5680 = vrot.lane.b32.xlu1 %v5676_v28, %s9052_s7  ;;  %v5521_v30 = vpop.permute.xlu0 %5520 }
 0xe2b   :  { %5524 = vst.msk [vmem:[#allocation7] sm:$0xff] %vm5523_vm9, %v5521_v30  ;;  %vm6377_vm9 = vcmask 130048  }
 0xe9c   :  { %v5681_v4 = vpop.permute.xlu1 %5680 }
 0xe9d   :  { %5684 = vst.msk [vmem:[#allocation7] sm:$0xff] %vm5683_vm5, %v5681_v4  ;;  %vm6742_vm5 = vcmask 7168  }
 0xe9e   :  { %5686 = vst.msk [vmem:[#allocation7 + $0x8] sm:$0xff] %vm5685_vm11, %v5681_v4  ;;  %vm6845_vm11 = vcmask 9216  }
 0xea4   :  { %v5687_v13 = vld [vmem:[#allocation7] sm:$0xff] }
 0xea5   :  { %v5688_v2 = vld [vmem:[#allocation7 + $0x8] sm:$0xff]  ;;  %5695 = vrot.lane.b32.xlu0 %v5687_v13, %s9031_s28 }
 0xea6   :  { %5690 = vst.msk [vmem:[#allocation4 + $0x8] sm:$0xff] %vm1372_vm8, %v5688_v2  ;;  %5697 = vrot.lane.b32.xlu1 %v5688_v2, %s9031_s28 }
 0xea9   :  { %5708 = vrot.lane.b32.xlu0 %v5687_v13, %s9032_s10 }
 0xeaa   :  { %5710 = vrot.lane.b32.xlu1 %v5688_v2, %s9032_s10 }
 0xead   :  { %5721 = vrot.lane.b32.xlu0 %v5687_v13, %s9053_s14  ;;  %v5803_v58 = vld [vmem:[#allocation4 + $0x8] sm:$0xff] }
 0xeae   :  { %5723 = vrot.lane.b32.xlu1 %v5688_v2, %s9053_s14 }
 0xeb1   :  { %5735 = vrot.lane.b32.xlu0 %v5687_v13, %s9054_s0 }
 0xeb2   :  { %5737 = vrot.lane.b32.xlu1 %v5688_v2, %s9054_s0  ;;  %s9062_s0 = smov 122  }
 0xeb5   :  { %5749 = vrot.lane.b32.xlu0 %v5687_v13, %s9055_s8 }
 0xeb6   :  { %5751 = vrot.lane.b32.xlu1 %v5688_v2, %s9055_s8 }
 0xeb9   :  { %5763 = vrot.lane.b32.xlu0 %v5687_v13, %s9047_s5 }
 0xeba   :  { %5765 = vrot.lane.b32.xlu1 %v5688_v2, %s9047_s5  ;;  %s9065_s5 = smov 115  }
 0xebd   :  { %5776 = vrot.lane.b32.xlu0 %v5687_v13, %s9056_s29 }
 0xebe   :  { %5778 = vrot.lane.b32.xlu1 %v5688_v2, %s9056_s29  ;;  %s9063_s29 = smov 121  }
 0xec1   :  { %5790 = vrot.lane.b32.xlu0 %v5687_v13, %s9057_s11 }
 0xec2   :  { %5792 = vrot.lane.b32.xlu1 %v5688_v2, %s9057_s11  ;;  %s9064_s11 = smov 120  }
 0xf17   :  { %v5696_v19 = vpop.permute.xlu0 %5695 }
 0xf18   :  { %v5698_v37 = vpop.permute.xlu1 %5697 }
 0xf19   :  { %5703 = vst.msk [vmem:[#allocation4 + $0x18] sm:$0xff] %vm1372_vm8, %v5698_v37  ;;  %v5699_v41 = vsel %vm212_vm1, %v5696_v19, %v5698_v37 }
 0xf1a   :  { %v8650_v63 = vpack.c.bf16 %v5699_v41, %v5687_v13 }
 0xf1b   :  { %v5709_v20 = vpop.permute.xlu0 %5708 }
 0xf1c   :  { %v5711_v15 = vpop.permute.xlu1 %5710 }
 0xf1d   :  { %5716 = vst.msk [vmem:[#allocation4 + $0x28] sm:$0xff] %vm1372_vm8, %v5711_v15  ;;  %v5712_v27 = vsel %vm345_vm2, %v5709_v20, %v5711_v15  ;;  %vm5753_vm2 = vcmask 949248  }
 0xf1f   :  { %v5722_v45 = vpop.permute.xlu0 %5721 }
 0xf20   :  { %v5724_v32 = vpop.permute.xlu1 %5723  ;;  %v5805_v51 = vld [vmem:[#allocation4 + $0x18] sm:$0xff] }
 0xf21   :  { %5730 = vst.msk [vmem:[#allocation4 + $0x38] sm:$0xff] %vm1372_vm8, %v5724_v32  ;;  %v5726_v39 = vsel %vm5725_vm10, %v5722_v45, %v5724_v32  ;;  %v8648_v17 = vpack.c.bf16 %v5805_v51, %v5803_v58 }
 0xf22   :  { %v8654_v52 = vpack.c.bf16 %v5726_v39, %v5712_v27 }
 0xf23   :  { %8649 = vmatprep.subr.bf16.mxu1 %v8648_v17  ;;  %v5736_v38 = vpop.permute.xlu0 %5735 }
 0xf24   :  { %v5738_v49 = vpop.permute.xlu1 %5737  ;;  %8651 = vmatpush1.bf16.msra.mxu1 %v8650_v63  ;;  %v5807_v56 = vld [vmem:[#allocation4 + $0x28] sm:$0xff] }
 0xf25   :  { %5744 = vst.msk [vmem:[#allocation4 + $0x48] sm:$0xff] %vm1372_vm8, %v5738_v49  ;;  %v5740_v61 = vsel %vm5739_vm12, %v5736_v38, %v5738_v49 }
 0xf27   :  { %v5750_v23 = vpop.permute.xlu0 %5749 }
 0xf28   :  { %v5752_v31 = vpop.permute.xlu1 %5751  ;;  %v5809_v55 = vld [vmem:[#allocation4 + $0x38] sm:$0xff] }
 0xf29   :  { %5758 = vst.msk [vmem:[#allocation4 + $0x58] sm:$0xff] %vm1372_vm8, %v5752_v31  ;;  %v5754_v24 = vsel %vm5753_vm2, %v5750_v23, %v5752_v31  ;;  %v8652_v8 = vpack.c.bf16 %v5809_v55, %v5807_v56  ;;  %v5947_v56 = vld [vmem:[%s13643_s15] sm:$0xff] }
 0xf2a   :  { %v8658_v60 = vpack.c.bf16 %v5754_v24, %v5740_v61 }
 0xf2b   :  { %8653 = vmatprep.subr.bf16.mxu1 %v8652_v8  ;;  %v5764_v26 = vpop.permute.xlu0 %5763  ;;  %v5955_v8 = vld [vmem:[%s13644_s16] sm:$0xff] }
 0xf2c   :  { %v5766_v5 = vpop.permute.xlu1 %5765  ;;  %8655 = vmatpush1.bf16.msra.mxu1 %v8654_v52  ;;  %v5811_v21 = vld [vmem:[#allocation4 + $0x48] sm:$0xff]  ;;  %v5948_v52 = vld [vmem:[%s13643_s15 + $0x8] sm:$0xff]  ;;  %s9059_s15 = smov 28  }
 0xf2d   :  { %5771 = vst.msk [vmem:[#allocation4 + $0x68] sm:$0xff] %vm1372_vm8, %v5766_v5  ;;  %v5767_v12 = vsel %vm4750_vm0, %v5764_v26, %v5766_v5  ;;  %vm9058_vm0 = vmmov 1  }
 0xf2e   :  { %vm8685_vm3 = vmpackc.low %vm3040_vm13, %vm9058_vm0  ;;  %vm6052_vm13 = vcmask 728064  }
 0xf2f   :  { %v5777_v35 = vpop.permute.xlu0 %5776 }
 0xf30   :  { %v5779_v10 = vpop.permute.xlu1 %5778  ;;  %v5813_v62 = vld [vmem:[#allocation4 + $0x58] sm:$0xff] }
 0xf31   :  { %5785 = vst.msk [vmem:[#allocation4 + $0x78] sm:$0xff] %vm1372_vm8, %v5779_v10  ;;  %v5781_v36 = vsel %vm5780_vm14, %v5777_v35, %v5779_v10  ;;  %v8656_v3 = vpack.c.bf16 %v5813_v62, %v5811_v21  ;;  %v5956_v35 = vld [vmem:[%s13644_s16 + $0x8] sm:$0xff]  ;;  %s9060_s16 = smov 7  }
 0xf32   :  { %v8662_v29 = vpack.c.bf16 %v5781_v36, %v5767_v12 }
 0xf33   :  { %8657 = vmatprep.subr.bf16.mxu1 %v8656_v3  ;;  %v5791_v7 = vpop.permute.xlu0 %5790 }
 0xf34   :  { %v5793_v34 = vpop.permute.xlu1 %5792  ;;  %8659 = vmatpush1.bf16.msra.mxu1 %v8658_v60  ;;  %v5815_v48 = vld [vmem:[#allocation4 + $0x68] sm:$0xff] }
 0xf35   :  { %5799 = vst.msk [vmem:[#allocation4 + $0x88] sm:$0xff] %vm1372_vm8, %v5793_v34  ;;  %v5795_v18 = vsel %vm5794_vm15, %v5791_v7, %v5793_v34  ;;  %v6040_v34 = vld [vmem:[#allocation9] sm:$0xff]  ;;  %v6041_v7 = vld [vmem:[#allocation9 + $0x8] sm:$0xff] }
 0xf38   :  { %v5817_v33 = vld [vmem:[#allocation4 + $0x78] sm:$0xff] }
 0xf39   :  { %v8660_v1 = vpack.c.bf16 %v5817_v33, %v5815_v48 }
 0xf3b   :  { %8661 = vmatprep.subr.bf16.mxu1 %v8660_v1  ;;  %v8664_v1 = vpack.c.bf16 %v6041_v7, %v6040_v34 }
 0xf3c   :  { %8663 = vmatpush1.bf16.msra.mxu1 %v8662_v29  ;;  %v5819_v14 = vld [vmem:[#allocation4 + $0x88] sm:$0xff] }
 0xf3d   :  { %5842 = vmatprep.subr.mxu1 %v5819_v14  ;;  %v6043_v29 = vld [vmem:[#allocation9 + $0x18] sm:$0xff]  ;;  %8665 = vmatprep.subr.bf16.mxu0 %v8664_v1 }
 0xf3e   :  { %8667 = vmatpush3.bf16.msra.mxu0 %v8664_v1 }
 0xf40   :  { %5843 = vmatpush1.msra.mxu1 %v5795_v18  ;;  %v6042_v18 = vld [vmem:[#allocation9 + $0x10] sm:$0xff] }
 0xf41   :  { %6879 = vmatmul.mubr.msk.f32.vlgmr.msra.gmra.mrb[30].mxu1 %vm1372_vm8, %v5800_v47  ;;  %8691 = vmatprep.subr.bf16.mxu1 %v8664_v1 }
 0xf42   :  { %5896 = vmatprep.mubr.f32.mxu1 %v13376_v54  ;;  %8693 = vmatpush3.bf16.msra.mxu1 %v8664_v1 }
 0xf45   :  { %6880 = vmatmul.mubr.msk.f32.gmra.mrb[32].mxu1 %vm1372_vm8, %v5801_v11  ;;  %v6044_v11 = vld [vmem:[#allocation9 + $0x20] sm:$0xff] }
0x1014   :  { %v5892_v25 = vpop.f32.mrb[30].mxu1 }
0x1015   :  { %v5915_v59 = vmul.f32 %v5908_v22, %v5892_v25  ;;  %v5894_v46 = vpop.f32.mrb[31].mxu1 }
0x1016   :  { %v5916_v44 = vmul.f32 %v5912_v57, %v5894_v46 }
0x1017   :  { %v5929_v50 = vmul.f32 %v5915_v59, %v5892_v25 }
0x1018   :  { %v5930_v42 = vmul.f32 %v5916_v44, %v5894_v46  ;;  %v13427_v40 = vpop.f32.mrb[32].mxu1  ;;  %v5919_v16 = vsel %vm1372_vm8, %v5916_v44, 0.0 }
0x1019   :  { %v5917_v53 = vmul.f32 %v5908_v22, %v13427_v40  ;;  %v13431_v28 = vpop.f32.mrb[33].mxu1  ;;  %v5920_v30 = vadd.f32 %v5919_v16, %v5915_v59  ;;  %v8668_v22 = vpack.c.bf16 %v6043_v29, %v6042_v18 }
0x101a   :  { %v5918_v4 = vmul.f32 %v5912_v57, %v13431_v28  ;;  %v5933_v0 = vsel %vm1372_vm8, %v5930_v42, 0.0  ;;  %v8672_v42 = vpack.c.bf16 %v6045_v6, %v6044_v11 }
0x101b   :  { %5921 = vadd.xlane.f32.xlu0 %v5920_v30  ;;  %v5934_v9 = vadd.f32 %v5933_v0, %v5929_v50  ;;  %v5931_v37 = vmul.f32 %v5917_v53, %v13427_v40  ;;  %8669 = vmatprep.subr.bf16.mxu0 %v8668_v22  ;;  %v6047_v30 = vld [vmem:[#allocation9 + $0x38] sm:$0xff]  ;;  %v6048_v0 = vld [vmem:[#allocation9 + $0x40] sm:$0xff] }
0x101c   :  { %v5932_v13 = vmul.f32 %v5918_v4, %v13431_v28  ;;  %v5923_v2 = vsel %vm1372_vm8, %v5918_v4, 0.0  ;;  %8695 = vmatprep.subr.bf16.mxu1 %v8668_v22  ;;  %8671 = vmatpush3.bf16.msra.mxu0 %v8668_v22 }
0x101d   :  { %v5924_v19 = vadd.f32 %v5923_v2, %v5917_v53  ;;  %v6046_v53 = vld [vmem:[#allocation9 + $0x30] sm:$0xff]  ;;  %8697 = vmatpush3.bf16.msra.mxu1 %v8668_v22  ;;  %8673 = vmatprep.subr.bf16.mxu0 %v8672_v42 }
0x101e   :  { %v5937_v41 = vsel %vm1372_vm8, %v5932_v13, 0.0  ;;  %8699 = vmatprep.subr.bf16.mxu1 %v8672_v42  ;;  %v6050_v2 = vld [vmem:[#allocation9 + $0x50] sm:$0xff] }
0x101f   :  { %5935 = vadd.xlane.f32.xlu0 %v5934_v9  ;;  %5925 = vadd.xlane.f32.xlu1 %v5924_v19  ;;  %v5938_v15 = vadd.f32 %v5937_v41, %v5931_v37  ;;  %v6049_v9 = vld [vmem:[#allocation9 + $0x48] sm:$0xff]  ;;  %v6051_v37 = vld [vmem:[#allocation9 + $0x58] sm:$0x1] }
0x1020   :  { %8675 = vmatpush3.bf16.msra.mxu0 %v8672_v42  ;;  %v8680_v13 = vpack.c.bf16 %v6049_v9, %v6048_v0  ;;  %v8684_v19 = vpack.c.bf16 %v6051_v37, %v6050_v2 }
0x1021   :  { %8701 = vmatpush3.bf16.msra.mxu1 %v8672_v42 }
0x1023   :  { %5939 = vadd.xlane.f32.xlu0 %v5938_v15 }
0x10a8   :  { %v5922_v20 = vpop.xlane.xlu0 %5921 }
0x10a9   :  { %v5927_v27 = vmul.f32 0.0078125, %v5922_v20 }
0x10ab   :  { %v5943_v58 = vmul.f32 %v5927_v27, %v5927_v27 }
0x10ac   :  { %v5936_v32 = vpop.xlane.xlu0 %5935  ;;  %v5926_v45 = vpop.xlane.xlu1 %5925 }
0x10ad   :  { %v5941_v51 = vmul.f32 0.0078125, %v5936_v32  ;;  %v5928_v39 = vmul.f32 0.0078125, %v5926_v45 }
0x10af   :  { %v5945_v17 = vsub.f32 %v5941_v51, %v5943_v58  ;;  %v5944_v38 = vmul.f32 %v5928_v39, %v5928_v39 }
0x10b0   :  { %v5940_v63 = vpop.xlane.xlu0 %5939 }
0x10b1   :  { %v5949_v49 = vadd.f32 1e-05, %v5945_v17  ;;  %v5942_v61 = vmul.f32 0.0078125, %v5940_v63 }
0x10b3   :  { %8984 = vrsqrt.f32 %v5949_v49  ;;  %v5946_v31 = vsub.f32 %v5942_v61, %v5944_v38 }
0x10b5   :  { %v5950_v23 = vadd.f32 1e-05, %v5946_v31 }
0x10b7   :  { %8986 = vrsqrt.f32 %v5950_v23 }
0x10bd   :  { %v8985_v55 = vpop.eup %8984 }
0x10be   :  { %v5953_v24 = vmul.f32 %v8985_v55, %v5947_v56 }
0x10c0   :  { %5963 = vperm.xlu1 %8809, %v5953_v24   ;;  %v5957_v5 = vmul.f32 %v5953_v24, %v5927_v27 }
0x10c1   :  { %v8987_v26 = vpop.eup %8986 }
0x10c2   :  { %v5959_v12 = vsub.f32 %v5955_v8, %v5957_v5  ;;  %v5954_v10 = vmul.f32 %v8987_v26, %v5948_v52 }
0x10c4   :  { %5977 = vperm.xlu1 %8809, %v5959_v12   ;;  %5968 = vperm.xlu0 %8808, %v5954_v10   ;;  %v5958_v21 = vmul.f32 %v5954_v10, %v5928_v39 }
0x10c6   :  { %v5960_v62 = vsub.f32 %v5956_v35, %v5958_v21 }
0x10c8   :  { %5982 = vperm.xlu1 %8809, %v5960_v62  }
0x113f   :  { %v5964_v36 = vpop.permute.xlu1 %5963 }
0x1140   :  { %v5971_v3 = vmul.f32 %v5964_v36, %v5892_v25  ;;  %v5972_v60 = vmul.f32 %v5964_v36, %v5894_v46 }
0x1143   :  { %v5969_v48 = vpop.permute.xlu0 %5968  ;;  %v5978_v33 = vpop.permute.xlu1 %5977 }
0x1144   :  { %v5985_v14 = vadd.f32 %v5978_v33, %v5971_v3  ;;  %v5986_v47 = vadd.f32 %v5978_v33, %v5972_v60  ;;  %v5973_v57 = vmul.f32 %v5969_v48, %v13427_v40  ;;  %v5974_v59 = vmul.f32 %v5969_v48, %v13431_v28 }
0x1145   :  { %v8676_v28 = vpack.c.bf16 %v6047_v30, %v6046_v53 }
0x1146   :  { %v5989_v25 = vmax.f32 %v5985_v14, 0.0  ;;  %v5990_v46 = vmax.f32 %v5986_v47, 0.0  ;;  %v6352_v14 = vld [vmem:[%s13647_s19 + $0x8] sm:$0xff] }
0x1147   :  { %v5983_v44 = vpop.permute.xlu1 %5982  ;;  %8677 = vmatprep.subr.bf16.mxu0 %v8676_v28  ;;  %8703 = vmatprep.subr.bf16.mxu1 %v8676_v28 }
0x1148   :  { %v5987_v16 = vadd.f32 %v5983_v44, %v5973_v57  ;;  %v5988_v50 = vadd.f32 %v5983_v44, %v5974_v59  ;;  %5999 = vrot.lane.b32.xlu1 %v5990_v46, %s9031_s28  ;;  %5997 = vrot.lane.b32.xlu0 %v5989_v25, %s9031_s28 }
0x1149   :  { %8679 = vmatpush3.bf16.msra.mxu0 %v8676_v28  ;;  %8705 = vmatpush3.bf16.msra.mxu1 %v8676_v28 }
0x114a   :  { %v5991_v4 = vmax.f32 %v5987_v16, 0.0  ;;  %v5992_v40 = vmax.f32 %v5988_v50, 0.0  ;;  %8681 = vmatprep.subr.bf16.mxu0 %v8680_v13  ;;  %8707 = vmatprep.subr.bf16.mxu1 %v8680_v13 }
0x114c   :  { %6003 = vrot.lane.b32.xlu1 %v5992_v40, %s9031_s28  ;;  %6001 = vrot.lane.b32.xlu0 %v5991_v4, %s9031_s28 }
0x114d   :  { %8683 = vmatpush3.bf16.msra.mxu0 %v8680_v13  ;;  %8709 = vmatpush3.bf16.msra.mxu1 %v8680_v13 }
0x114e   :  { %8686 = vmatprep.subr.msk.bf16.mxu0 %vm8685_vm3, %v8684_v19  ;;  %8712 = vmatprep.subr.msk.bf16.mxu1 %vm8685_vm3, %v8684_v19 }
0x1151   :  { %8689 = vmatpush3.bf16.msk.msra.mxu0 %vm8685_vm3, %v8684_v19  ;;  %8715 = vmatpush3.bf16.msk.msra.mxu1 %vm8685_vm3, %v8684_v19 }
0x1152   :  { %8716 = vmatprep.subr.bf16.mxu0 %v14043_v43 }
0x11ba   :  { %v5998_v41 = vpop.permute.xlu0 %5997  ;;  %v6000_v15 = vpop.permute.xlu1 %5999 }
0x11bb   :  { %v6005_v20 = vsel %vm212_vm1, %v5998_v41, %v6000_v15  ;;  %v6012_v27 = vmax.f32 %v5990_v46, %v6000_v15 }
0x11bc   :  { %v6011_v32 = vmax.f32 %v5989_v25, %v6005_v20 }
0x11bd   :  { %6021 = vrot.lane.b32.xlu1 %v6012_v27, %s9053_s14 }
0x11be   :  { %v6002_v45 = vpop.permute.xlu0 %6001  ;;  %6019 = vrot.lane.b32.xlu0 %v6011_v32, %s9053_s14  ;;  %v6004_v58 = vpop.permute.xlu1 %6003 }
0x11bf   :  { %v6006_v51 = vsel %vm212_vm1, %v6002_v45, %v6004_v58  ;;  %v6014_v39 = vmax.f32 %v5992_v40, %v6004_v58  ;;  %vm6037_vm1 = vcmask 703488  }
0x11c0   :  { %v6013_v17 = vmax.f32 %v5991_v4, %v6006_v51  ;;  %6039 = vst.msk [vmem:[#allocation8 + $0x8] sm:$0xff] %vm6037_vm1, %v13376_v54  ;;  %6038 = vst.msk [vmem:[#allocation8] sm:$0xff] %vm6037_vm1, %v13376_v54 }
0x11c1   :  { %6025 = vrot.lane.b32.xlu1 %v6014_v39, %s9053_s14 }
0x11c2   :  { %6023 = vrot.lane.b32.xlu0 %v6013_v17, %s9053_s14  ;;  %s9061_s14 = smov 43  }
0x122f   :  { %v6022_v63 = vpop.permute.xlu1 %6021 }
0x1230   :  { %v6034_v49 = vmax.f32 %v6012_v27, %v6022_v63  ;;  %v6020_v38 = vpop.permute.xlu0 %6019 }
0x1231   :  { %v6027_v61 = vsel %vm5725_vm10, %v6020_v38, %v6022_v63 }
0x1232   :  { %v6033_v31 = vmax.f32 %v6011_v32, %v6027_v61  ;;  %6152 = vrot.lane.b32.xlu1 %v6034_v49, %s9059_s15 }
0x1233   :  { %v6026_v23 = vpop.permute.xlu1 %6025 }
0x1234   :  { %v6036_v56 = vmax.f32 %v6014_v39, %v6026_v23  ;;  %v6024_v55 = vpop.permute.xlu0 %6023  ;;  %6150 = vrot.lane.b32.xlu0 %v6033_v31, %s9059_s15  ;;  %7469 = vmatprep.mubr.msk.f32.mxu0 %vm6052_vm13, %v6033_v31 }
0x1235   :  { %v6028_v24 = vsel %vm5725_vm10, %v6024_v55, %v6026_v23  ;;  %v6351_v55 = vld [vmem:[%s13647_s19] sm:$0xff]  ;;  %vm6843_vm10 = vcmask 15360  }
0x1236   :  { %v6035_v8 = vmax.f32 %v6013_v17, %v6028_v24  ;;  %6156 = vrot.lane.b32.xlu1 %v6036_v56, %s9059_s15  ;;  %v6354_v24 = vld [vmem:[%s13647_s19 + $0x18] sm:$0xff] }
0x1238   :  { %6154 = vrot.lane.b32.xlu0 %v6035_v8, %s9059_s15  ;;  %7470 = vmatmul.mubr.msk.f32.vlgmr.msra.gmra.mrb[28].mxu0 %vm6052_vm13, %v6035_v8  ;;  %v6353_v8 = vld [vmem:[%s13647_s19 + $0x10] sm:$0xff] }
0x1239   :  { %6887 = vmatprep.mubr.msk.f32.mxu0 %vm6377_vm9, %v6352_v14 }
0x12a4   :  { %v6153_v52 = vpop.permute.xlu1 %6152 }
0x12a6   :  { %v6151_v5 = vpop.permute.xlu0 %6150 }
0x12a7   :  { %v6159_v26 = vsel %vm6158_vm6, %v6151_v5, %v6153_v52  ;;  %v6355_v52 = vld [vmem:[%s13647_s19 + $0x20] sm:$0xff]  ;;  %v6358_v5 = vld [vmem:[%s13647_s19 + $0x38] sm:$0xff] }
0x12a8   :  { %7496 = vmatprep.mubr.msk.f32.mxu1 %vm6052_vm13, %v6159_v26  ;;  %v6157_v12 = vpop.permute.xlu1 %6156  ;;  %v6357_v26 = vld [vmem:[%s13647_s19 + $0x30] sm:$0xff] }
0x12aa   :  { %v6155_v10 = vpop.permute.xlu0 %6154 }
0x12ab   :  { %v6160_v35 = vsel %vm6158_vm6, %v6155_v10, %v6157_v12  ;;  %v6891_v12 = vld [vmem:[%s13651_s23] ss:$0 sm:$0xff] }
0x12ac   :  { %7497 = vmatmul.mubr.msk.f32.vlgmr.msra.gmra.mrb[34].mxu1 %vm6052_vm13, %v6160_v35 }
0x130b   :  { %v7471_v21 = vpop.f32.mrb[28].mxu0 }
0x130c   :  { %6141 = vrot.lane.b32.xlu1 %v7471_v21, %s9060_s16  ;;  %v6128_v62 = vpop.f32.mrb[29].mxu0 }
0x130d   :  { %6139 = vrot.lane.b32.xlu0 %v6128_v62, %s9060_s16 }
0x137e   :  { %v6142_v36 = vpop.permute.xlu1 %6141 }
0x137f   :  { %6147 = vst.msk [vmem:[#allocation8 + $0x8] sm:$0xff] %vm6145_vm7, %v6142_v36  ;;  %v6140_v54 = vpop.permute.xlu0 %6139  ;;  %v7498_v3 = vpop.f32.mrb[34].mxu1 }
0x1380   :  { %6146 = vst.msk [vmem:[#allocation8] sm:$0xff] %vm6145_vm7, %v6140_v54  ;;  %6244 = vrot.lane.b32.xlu1 %v7498_v3, %s9061_s14  ;;  %v6231_v60 = vpop.f32.mrb[35].mxu1 }
0x1381   :  { %6242 = vrot.lane.b32.xlu0 %v6231_v60, %s9061_s14 }
0x13f2   :  { %v6245_v34 = vpop.permute.xlu1 %6244 }
0x13f3   :  { %6250 = vst.msk [vmem:[#allocation8 + $0x8] sm:$0xff] %vm6248_vm4, %v6245_v34  ;;  %v6243_v7 = vpop.permute.xlu0 %6242 }
0x13f4   :  { %6249 = vst.msk [vmem:[#allocation8] sm:$0xff] %vm6248_vm4, %v6243_v7 }
0x13fa   :  { %v6252_v18 = vld [vmem:[#allocation8 + $0x8] sm:$0xff] }
0x13fb   :  { %6254 = vst.msk [vmem:[#allocation5 + $0x8] sm:$0xff] %vm1372_vm8, %v6252_v18  ;;  %v6251_v48 = vld [vmem:[#allocation8] sm:$0xff]  ;;  %6261 = vrot.lane.b32.xlu1 %v6252_v18, %s9031_s28 }
0x13fc   :  { %6253 = vst.msk [vmem:[#allocation5] sm:$0xff] %vm1372_vm8, %v6251_v48  ;;  %6259 = vrot.lane.b32.xlu0 %v6251_v48, %s9031_s28 }
0x13ff   :  { %6273 = vrot.lane.b32.xlu1 %v6252_v18, %s9032_s10 }
0x1400   :  { %6271 = vrot.lane.b32.xlu0 %v6251_v48, %s9032_s10 }
0x1402   :  { %v6360_v33 = vld [vmem:[#allocation5 + $0x8] sm:$0xff] }
0x1403   :  { %6285 = vrot.lane.b32.xlu1 %v6252_v18, %s9062_s0  ;;  %v6359_v1 = vld [vmem:[#allocation5] sm:$0xff] }
0x1404   :  { %6283 = vrot.lane.b32.xlu0 %v6251_v48, %s9062_s0  ;;  %v8717_v29 = vpack.c.bf16 %v6360_v33, %v6359_v1 }
0x1406   :  { %8718 = vmatpush1.bf16.msra.mxu0 %v8717_v29 }
0x1407   :  { %6297 = vrot.lane.b32.xlu1 %v6252_v18, %s9063_s29  ;;  %8719 = vmatprep.subr.bf16.mxu0 %v14043_v43 }
0x1408   :  { %6295 = vrot.lane.b32.xlu0 %v6251_v48, %s9063_s29 }
0x140b   :  { %6309 = vrot.lane.b32.xlu1 %v6252_v18, %s9064_s11 }
0x140c   :  { %6307 = vrot.lane.b32.xlu0 %v6251_v48, %s9064_s11 }
0x140f   :  { %6321 = vrot.lane.b32.xlu1 %v6252_v18, %s9055_s8 }
0x1410   :  { %6319 = vrot.lane.b32.xlu0 %v6251_v48, %s9055_s8 }
0x1413   :  { %6333 = vrot.lane.b32.xlu1 %v6252_v18, %s9065_s5 }
0x1414   :  { %6331 = vrot.lane.b32.xlu0 %v6251_v48, %s9065_s5 }
0x1417   :  { %6345 = vrot.lane.b32.xlu1 %v6252_v18, %s9066_s30 }
0x1418   :  { %6343 = vrot.lane.b32.xlu0 %v6251_v48, %s9066_s30 }
0x146d   :  { %v6262_v47 = vpop.permute.xlu1 %6261 }
0x146e   :  { %6266 = vst.msk [vmem:[#allocation5 + $0x18] sm:$0xff] %vm1372_vm8, %v6262_v47  ;;  %v6260_v11 = vpop.permute.xlu0 %6259 }
0x146f   :  { %6265 = vst.msk [vmem:[#allocation5 + $0x10] sm:$0xff] %vm1372_vm8, %v6260_v11 }
0x1471   :  { %v6274_v6 = vpop.permute.xlu1 %6273 }
0x1472   :  { %6278 = vst.msk [vmem:[#allocation5 + $0x28] sm:$0xff] %vm1372_vm8, %v6274_v6  ;;  %v6272_v22 = vpop.permute.xlu0 %6271 }
0x1473   :  { %6277 = vst.msk [vmem:[#allocation5 + $0x20] sm:$0xff] %vm1372_vm8, %v6272_v22 }
0x1475   :  { %v6286_v57 = vpop.permute.xlu1 %6285  ;;  %v6362_v59 = vld [vmem:[#allocation5 + $0x18] sm:$0xff] }
0x1476   :  { %6290 = vst.msk [vmem:[#allocation5 + $0x38] sm:$0xff] %vm1372_vm8, %v6286_v57  ;;  %v6284_v25 = vpop.permute.xlu0 %6283  ;;  %v6361_v46 = vld [vmem:[#allocation5 + $0x10] sm:$0xff] }
0x1477   :  { %6289 = vst.msk [vmem:[#allocation5 + $0x30] sm:$0xff] %vm1372_vm8, %v6284_v25  ;;  %v8720_v44 = vpack.c.bf16 %v6362_v59, %v6361_v46 }
0x1479   :  { %v6298_v42 = vpop.permute.xlu1 %6297  ;;  %8721 = vmatpush1.bf16.msra.mxu0 %v8720_v44  ;;  %v6364_v16 = vld [vmem:[#allocation5 + $0x28] sm:$0xff] }
0x147a   :  { %6302 = vst.msk [vmem:[#allocation5 + $0x48] sm:$0xff] %vm1372_vm8, %v6298_v42  ;;  %v6296_v50 = vpop.permute.xlu0 %6295  ;;  %8722 = vmatprep.subr.bf16.mxu0 %v14043_v43  ;;  %v6363_v53 = vld [vmem:[#allocation5 + $0x20] sm:$0xff] }
0x147b   :  { %6301 = vst.msk [vmem:[#allocation5 + $0x40] sm:$0xff] %vm1372_vm8, %v6296_v50  ;;  %v8723_v30 = vpack.c.bf16 %v6364_v16, %v6363_v53 }
0x147d   :  { %v6310_v4 = vpop.permute.xlu1 %6309  ;;  %8724 = vmatpush1.bf16.msra.mxu0 %v8723_v30  ;;  %v6366_v40 = vld [vmem:[#allocation5 + $0x38] sm:$0xff] }
0x147e   :  { %6314 = vst.msk [vmem:[#allocation5 + $0x58] sm:$0xff] %vm1372_vm8, %v6310_v4  ;;  %v6308_v28 = vpop.permute.xlu0 %6307  ;;  %8725 = vmatprep.subr.bf16.mxu0 %v14043_v43  ;;  %v6365_v0 = vld [vmem:[#allocation5 + $0x30] sm:$0xff] }
0x147f   :  { %6313 = vst.msk [vmem:[#allocation5 + $0x50] sm:$0xff] %vm1372_vm8, %v6308_v28  ;;  %v8726_v9 = vpack.c.bf16 %v6366_v40, %v6365_v0 }
0x1481   :  { %v6322_v13 = vpop.permute.xlu1 %6321  ;;  %8727 = vmatpush1.bf16.msra.mxu0 %v8726_v9  ;;  %v6368_v2 = vld [vmem:[#allocation5 + $0x48] sm:$0xff] }
0x1482   :  { %6326 = vst.msk [vmem:[#allocation5 + $0x68] sm:$0xff] %vm1372_vm8, %v6322_v13  ;;  %v6320_v37 = vpop.permute.xlu0 %6319  ;;  %8728 = vmatprep.subr.bf16.mxu0 %v14043_v43  ;;  %v6367_v19 = vld [vmem:[#allocation5 + $0x40] sm:$0xff] }
0x1483   :  { %6325 = vst.msk [vmem:[#allocation5 + $0x60] sm:$0xff] %vm1372_vm8, %v6320_v37  ;;  %v8729_v41 = vpack.c.bf16 %v6368_v2, %v6367_v19 }
0x1485   :  { %v6334_v15 = vpop.permute.xlu1 %6333  ;;  %8730 = vmatpush1.bf16.msra.mxu0 %v8729_v41  ;;  %v6370_v20 = vld [vmem:[#allocation5 + $0x58] sm:$0xff] }
0x1486   :  { %6338 = vst.msk [vmem:[#allocation5 + $0x78] sm:$0xff] %vm1372_vm8, %v6334_v15  ;;  %v6332_v27 = vpop.permute.xlu0 %6331  ;;  %8731 = vmatprep.subr.bf16.mxu0 %v14043_v43  ;;  %v6369_v32 = vld [vmem:[#allocation5 + $0x50] sm:$0xff] }
0x1487   :  { %6337 = vst.msk [vmem:[#allocation5 + $0x70] sm:$0xff] %vm1372_vm8, %v6332_v27  ;;  %v8732_v45 = vpack.c.bf16 %v6370_v20, %v6369_v32 }
0x1489   :  { %v6346_v58 = vpop.permute.xlu1 %6345  ;;  %8733 = vmatpush1.bf16.msra.mxu0 %v8732_v45  ;;  %v6372_v51 = vld [vmem:[#allocation5 + $0x68] sm:$0xff] }
0x148a   :  { %6350 = vst.msk [vmem:[#allocation5 + $0x88] sm:$0xff] %vm1372_vm8, %v6346_v58  ;;  %v6344_v39 = vpop.permute.xlu0 %6343  ;;  %8734 = vmatprep.subr.bf16.mxu0 %v14043_v43  ;;  %v6371_v17 = vld [vmem:[#allocation5 + $0x60] sm:$0xff] }
0x148b   :  { %6349 = vst.msk [vmem:[#allocation5 + $0x80] sm:$0xff] %vm1372_vm8, %v6344_v39  ;;  %v8735_v63 = vpack.c.bf16 %v6372_v51, %v6371_v17 }
0x148d   :  { %8736 = vmatpush1.bf16.msra.mxu0 %v8735_v63  ;;  %v6374_v49 = vld [vmem:[#allocation5 + $0x78] sm:$0xff] }
0x148e   :  { %8737 = vmatprep.subr.bf16.mxu0 %v14043_v43  ;;  %v6373_v38 = vld [vmem:[#allocation5 + $0x70] sm:$0xff] }
0x148f   :  { %v8738_v61 = vpack.c.bf16 %v6374_v49, %v6373_v38  ;;  %v6530_v38 = vld [vmem:[%s13649_s21] sm:$0xff] }
0x1491   :  { %8739 = vmatpush1.bf16.msra.mxu0 %v8738_v61  ;;  %v6376_v31 = vld [vmem:[#allocation5 + $0x88] sm:$0xff] }
0x1492   :  { %8740 = vmatprep.subr.bf16.mxu0 %v14043_v43  ;;  %v6375_v23 = vld [vmem:[#allocation5 + $0x80] sm:$0xff]  ;;  %v6356_v43 = vld [vmem:[%s13647_s19 + $0x28] sm:$0xff] }
0x1493   :  { %v8741_v56 = vpack.c.bf16 %v6376_v31, %v6375_v23 }
0x1495   :  { %8742 = vmatpush1.bf16.msra.mxu0 %v8741_v56  ;;  %v6546_v56 = vld [vmem:[%s13650_s22] sm:$0xff] }
0x1498   :  { %6455 = vmatmul.mubr.f32.vlgmr.msra.gmra.mrb[30].mxu0 %v6351_v55  ;;  %v6531_v55 = vld [vmem:[%s13649_s21 + $0x8] sm:$0xff] }
0x1499   :  { %6888 = vmatprep.mubr.msk.f32.mxu0 %vm6377_vm9, %v6354_v24 }
0x149c   :  { %6460 = vmatmul.mubr.f32.gmra.mrb[32].mxu0 %v6353_v8 }
0x149d   :  { %6889 = vmatprep.mubr.msk.f32.mxu0 %vm6377_vm9, %v6356_v43 }
0x14a0   :  { %6465 = vmatmul.mubr.f32.gmra.mrb[34].mxu0 %v6355_v52 }
0x14a1   :  { %6890 = vmatprep.mubr.msk.f32.mxu0 %vm6377_vm9, %v6358_v5  ;;  %v6547_v5 = vld [vmem:[%s13650_s22 + $0x8] sm:$0xff] }
0x14a4   :  { %6470 = vmatmul.mubr.f32.gmra.mrb[36].mxu0 %v6357_v26  ;;  %v6532_v26 = vld [vmem:[%s13649_s21 + $0x10] sm:$0xff] }
0x156b   :  { %v13540_v10 = vpop.f32.mrb[30].mxu0 }
0x156c   :  { %v6482_v35 = vmul.f32 %v6891_v12, %v13540_v10  ;;  %v6458_v21 = vpop.f32.mrb[31].mxu0 }
0x156e   :  { %v6502_v62 = vmul.f32 %v6482_v35, %v13540_v10  ;;  %v6486_v36 = vsel %vm1372_vm8, %v6482_v35, 0.0 }
0x156f   :  { %6487 = vadd.xlane.f32.xlu0 %v6486_v36  ;;  %v13545_v54 = vpop.f32.mrb[32].mxu0  ;;  %v6548_v36 = vld [vmem:[%s13650_s22 + $0x10] sm:$0xff] }
0x1570   :  { %v6483_v3 = vmul.f32 %v6891_v12, %v13545_v54  ;;  %v6463_v60 = vpop.f32.mrb[33].mxu0  ;;  %v6506_v7 = vsel %vm1372_vm8, %v6502_v62, 0.0 }
0x1572   :  { %v6503_v34 = vmul.f32 %v6483_v3, %v13545_v54  ;;  %v6489_v18 = vsel %vm1372_vm8, %v6483_v3, 0.0  ;;  %v6533_v3 = vld [vmem:[%s13649_s21 + $0x18] sm:$0xff]  ;;  %s9067_s21 = smov 125  }
0x1573   :  { %6507 = vadd.xlane.f32.xlu0 %v6506_v7  ;;  %6490 = vadd.xlane.f32.xlu1 %v6489_v18  ;;  %v13551_v48 = vpop.f32.mrb[34].mxu0 }
0x1574   :  { %v6484_v33 = vmul.f32 %v6891_v12, %v13551_v48  ;;  %v6468_v1 = vpop.f32.mrb[35].mxu0  ;;  %v6509_v14 = vsel %vm1372_vm8, %v6503_v34, 0.0 }
0x1576   :  { %v6504_v29 = vmul.f32 %v6484_v33, %v13551_v48  ;;  %v6492_v47 = vsel %vm1372_vm8, %v6484_v33, 0.0  ;;  %v6549_v33 = vld [vmem:[%s13650_s22 + $0x18] sm:$0xff]  ;;  %s9068_s22 = smov 86  }
0x1577   :  { %6510 = vadd.xlane.f32.xlu0 %v6509_v14  ;;  %6493 = vadd.xlane.f32.xlu1 %v6492_v47  ;;  %v13557_v11 = vpop.f32.mrb[36].mxu0 }
0x1578   :  { %v6485_v6 = vmul.f32 %v6891_v12, %v13557_v11  ;;  %v6473_v22 = vpop.f32.mrb[37].mxu0  ;;  %v6512_v59 = vsel %vm1372_vm8, %v6504_v29, 0.0 }
0x157a   :  { %v6505_v57 = vmul.f32 %v6485_v6, %v13557_v11  ;;  %v6495_v25 = vsel %vm1372_vm8, %v6485_v6, 0.0 }
0x157b   :  { %6513 = vadd.xlane.f32.xlu1 %v6512_v59  ;;  %6496 = vadd.xlane.f32.xlu0 %v6495_v25 }
0x157c   :  { %v6515_v46 = vsel %vm1372_vm8, %v6505_v57, 0.0  ;;  %vm6761_vm8 = vcmask 261120  }
0x157f   :  { %6516 = vadd.xlane.f32.xlu0 %v6515_v46 }
0x15fc   :  { %v6488_v44 = vpop.xlane.xlu0 %6487 }
0x15fd   :  { %v6498_v42 = vmul.f32 0.03125, %v6488_v44 }
0x15ff   :  { %v6522_v53 = vmul.f32 %v6498_v42, %v6498_v42 }
0x1600   :  { %v6508_v16 = vpop.xlane.xlu0 %6507  ;;  %v6491_v50 = vpop.xlane.xlu1 %6490 }
0x1601   :  { %v6518_v30 = vmul.f32 0.03125, %v6508_v16  ;;  %v6499_v4 = vmul.f32 0.03125, %v6491_v50 }
0x1603   :  { %v6526_v40 = vsub.f32 %v6518_v30, %v6522_v53  ;;  %v6523_v13 = vmul.f32 %v6499_v4, %v6499_v4 }
0x1604   :  { %v6511_v28 = vpop.xlane.xlu0 %6510  ;;  %v6494_v0 = vpop.xlane.xlu1 %6493 }
0x1605   :  { %v6534_v9 = vadd.f32 1e-05, %v6526_v40  ;;  %v6519_v2 = vmul.f32 0.03125, %v6511_v28  ;;  %v6500_v37 = vmul.f32 0.03125, %v6494_v0 }
0x1607   :  { %8988 = vrsqrt.f32 %v6534_v9  ;;  %v6527_v19 = vsub.f32 %v6519_v2, %v6523_v13  ;;  %v6524_v27 = vmul.f32 %v6500_v37, %v6500_v37 }
0x1608   :  { %v6514_v41 = vpop.xlane.xlu1 %6513  ;;  %v6497_v15 = vpop.xlane.xlu0 %6496 }
0x1609   :  { %v6535_v20 = vadd.f32 1e-05, %v6527_v19  ;;  %v6520_v32 = vmul.f32 0.03125, %v6514_v41  ;;  %v6501_v45 = vmul.f32 0.03125, %v6497_v15 }
0x160b   :  { %8990 = vrsqrt.f32 %v6535_v20  ;;  %v6528_v58 = vsub.f32 %v6520_v32, %v6524_v27  ;;  %v6525_v17 = vmul.f32 %v6501_v45, %v6501_v45 }
0x160c   :  { %v6517_v51 = vpop.xlane.xlu0 %6516 }
0x160d   :  { %v6536_v39 = vadd.f32 1e-05, %v6528_v58  ;;  %v6521_v63 = vmul.f32 0.03125, %v6517_v51 }
0x160f   :  { %8992 = vrsqrt.f32 %v6536_v39  ;;  %v6529_v49 = vsub.f32 %v6521_v63, %v6525_v17 }
0x1611   :  { %v8989_v61 = vpop.eup %8988  ;;  %v6537_v31 = vadd.f32 1e-05, %v6529_v49 }
0x1612   :  { %v6542_v23 = vmul.f32 %v8989_v61, %v6530_v38 }
0x1613   :  { %8994 = vrsqrt.f32 %v6537_v31 }
0x1614   :  { %6560 = vperm.xlu1 %8809, %v6542_v23   ;;  %v6550_v24 = vmul.f32 %v6542_v23, %v6498_v42 }
0x1615   :  { %v8991_v8 = vpop.eup %8990 }
0x1616   :  { %v6554_v43 = vsub.f32 %v6546_v56, %v6550_v24  ;;  %v6543_v52 = vmul.f32 %v8991_v8, %v6531_v55 }
0x1618   :  { %6584 = vperm.xlu1 %8809, %v6554_v43   ;;  %6565 = vperm.xlu0 %8808, %v6543_v52   ;;  %v6551_v12 = vmul.f32 %v6543_v52, %v6499_v4 }
0x1619   :  { %v8993_v35 = vpop.eup %8992 }
0x161a   :  { %v6555_v21 = vsub.f32 %v6547_v5, %v6551_v12  ;;  %v6544_v62 = vmul.f32 %v8993_v35, %v6532_v26 }
0x161c   :  { %6589 = vperm.xlu1 %8809, %v6555_v21   ;;  %6570 = vperm.xlu0 %8808, %v6544_v62   ;;  %v6552_v60 = vmul.f32 %v6544_v62, %v6500_v37 }
0x161d   :  { %v8995_v34 = vpop.eup %8994 }
0x161e   :  { %v6556_v7 = vsub.f32 %v6548_v36, %v6552_v60  ;;  %v6545_v18 = vmul.f32 %v8995_v34, %v6533_v3 }
0x1620   :  { %6594 = vperm.xlu0 %8808, %v6556_v7   ;;  %6575 = vperm.xlu1 %8809, %v6545_v18   ;;  %v6553_v1 = vmul.f32 %v6545_v18, %v6501_v45 }
0x1622   :  { %v6557_v29 = vsub.f32 %v6549_v33, %v6553_v1 }
0x1624   :  { %6599 = vperm.xlu1 %8809, %v6557_v29  }
0x1693   :  { %v6561_v14 = vpop.permute.xlu1 %6560 }
0x1694   :  { %v6578_v22 = vmul.f32 %v6561_v14, %v13540_v10 }
0x1697   :  { %v6585_v47 = vpop.permute.xlu1 %6584  ;;  %v6566_v6 = vpop.permute.xlu0 %6565 }
0x1698   :  { %v6602_v57 = vadd.f32 %v6585_v47, %v6578_v22  ;;  %v6579_v59 = vmul.f32 %v6566_v6, %v13545_v54 }
0x169a   :  { %v6606_v42 = vmax.f32 %v6602_v57, 0.0 }
0x169b   :  { %v6590_v25 = vpop.permute.xlu1 %6589  ;;  %v6571_v46 = vpop.permute.xlu0 %6570 }
0x169c   :  { %v6603_v44 = vadd.f32 %v6590_v25, %v6579_v59  ;;  %v6580_v30 = vmul.f32 %v6571_v46, %v13551_v48 }
0x169e   :  { %v6607_v16 = vmax.f32 %v6603_v44, 0.0 }
0x169f   :  { %v6576_v50 = vpop.permute.xlu1 %6575  ;;  %v6595_v53 = vpop.permute.xlu0 %6594 }
0x16a0   :  { %v8905_v4 = vpack.i.bf16 %v6607_v16, %v6606_v42  ;;  %v6581_v40 = vmul.f32 %v6576_v50, %v13557_v11  ;;  %v6604_v28 = vadd.f32 %v6595_v53, %v6580_v30 }
0x16a2   :  { %8906 = vrot.lane.b32.xlu1 %v8905_v4, %s9032_s10  ;;  %8901 = vrot.lane.b32.xlu0 %v8905_v4, %s9031_s28  ;;  %v6608_v54 = vmax.f32 %v6604_v28, 0.0 }
0x16a3   :  { %v6600_v10 = vpop.permute.xlu1 %6599 }
0x16a4   :  { %v6605_v0 = vadd.f32 %v6600_v10, %v6581_v40  ;;  %v6747_v40 = vld [vmem:[%s13652_s24] sm:$0xff] }
0x16a5   :  { %7507 = vmatprep.mubr.msk.f32.mxu1 %vm6761_vm8, %v6747_v40 }
0x16a6   :  { %v6609_v9 = vmax.f32 %v6605_v0, 0.0  ;;  %8911 = vrot.lane.b32.xlu1 %v8905_v4, %s9067_s21 }
0x16a8   :  { %v8925_v13 = vpack.i.bf16 %v6609_v9, %v6608_v54 }
0x16aa   :  { %8926 = vrot.lane.b32.xlu1 %v8925_v13, %s9067_s21  ;;  %8916 = vrot.lane.b32.xlu0 %v8925_v13, %s9031_s28 }
0x16ae   :  { %8921 = vrot.lane.b32.xlu0 %v8925_v13, %s9032_s10 }
0x1714   :  { %v8907_v48 = vpop.permute.xlu1 %8906  ;;  %v8902_v2 = vpop.permute.xlu0 %8901 }
0x1715   :  { %v8904_v11 = vunpack.i.h.bf16 %v8902_v2  ;;  %v8903_v37 = vunpack.i.l.bf16 %v8902_v2  ;;  %v8909_v19 = vunpack.i.h.bf16 %v8907_v48  ;;  %v8908_v41 = vunpack.i.l.bf16 %v8907_v48  ;;  %v6750_v2 = vld [vmem:[%s13653_s25 + $0x8] sm:$0x3] }
0x1717   :  { %v6627_v15 = vmax.f32 %v6607_v16, %v8904_v11  ;;  %v6626_v20 = vmax.f32 %v6606_v42, %v8903_v37  ;;  %v6749_v11 = vld [vmem:[%s13653_s25] sm:$0xff] }
0x1718   :  { %v8912_v27 = vpop.permute.xlu1 %8911 }
0x1719   :  { %v8914_v32 = vunpack.i.h.bf16 %v8912_v27  ;;  %v8913_v45 = vunpack.i.l.bf16 %v8912_v27  ;;  %v6642_v58 = vmax.f32 %v6626_v20, %v8908_v41  ;;  %v6643_v51 = vmax.f32 %v6627_v15, %v8909_v19 }
0x171b   :  { %v6658_v39 = vmax.f32 %v6642_v58, %v8913_v45  ;;  %v6659_v17 = vmax.f32 %v6643_v51, %v8914_v32 }
0x171c   :  { %v8917_v63 = vpop.permute.xlu0 %8916  ;;  %v8927_v31 = vpop.permute.xlu1 %8926 }
0x171d   :  { %v8919_v49 = vunpack.i.h.bf16 %v8917_v63  ;;  %v8918_v38 = vunpack.i.l.bf16 %v8917_v63  ;;  %v8935_v61 = vpack.i.bf16 %v6659_v17, %v6658_v39  ;;  %v8929_v43 = vunpack.i.h.bf16 %v8927_v31 }
0x171e   :  { %v8928_v52 = vunpack.i.l.bf16 %v8927_v31 }
0x171f   :  { %8936 = vrot.lane.b32.xlu1 %v8935_v61, %s9055_s8  ;;  %8931 = vrot.lane.b32.xlu0 %v8935_v61, %s9062_s0  ;;  %v6629_v56 = vmax.f32 %v6609_v9, %v8919_v49  ;;  %v6628_v55 = vmax.f32 %v6608_v54, %v8918_v38 }
0x1720   :  { %v8922_v23 = vpop.permute.xlu0 %8921 }
0x1721   :  { %v8924_v24 = vunpack.i.h.bf16 %v8922_v23  ;;  %v8923_v8 = vunpack.i.l.bf16 %v8922_v23 }
0x1723   :  { %v6644_v5 = vmax.f32 %v6628_v55, %v8923_v8  ;;  %v6645_v26 = vmax.f32 %v6629_v56, %v8924_v24  ;;  %8941 = vrot.lane.b32.xlu1 %v8935_v61, %s9046_s6  ;;  %v6748_v56 = vld [vmem:[%s13652_s24 + $0x8] sm:$0x3] }
0x1725   :  { %v6660_v12 = vmax.f32 %v6644_v5, %v8928_v52  ;;  %v6661_v35 = vmax.f32 %v6645_v26, %v8929_v43 }
0x1727   :  { %v8955_v21 = vpack.i.bf16 %v6661_v35, %v6660_v12 }
0x1729   :  { %8956 = vrot.lane.b32.xlu1 %v8955_v21, %s9046_s6  ;;  %8946 = vrot.lane.b32.xlu0 %v8955_v21, %s9062_s0 }
0x172d   :  { %8951 = vrot.lane.b32.xlu0 %v8955_v21, %s9055_s8 }
0x1791   :  { %v8937_v62 = vpop.permute.xlu1 %8936  ;;  %v8932_v36 = vpop.permute.xlu0 %8931 }
0x1792   :  { %v8934_v3 = vunpack.i.h.bf16 %v8932_v36  ;;  %v8933_v60 = vunpack.i.l.bf16 %v8932_v36  ;;  %v8939_v34 = vunpack.i.h.bf16 %v8937_v62  ;;  %v8938_v7 = vunpack.i.l.bf16 %v8937_v62 }
0x1794   :  { %v6679_v18 = vmax.f32 %v6659_v17, %v8934_v3  ;;  %v6678_v33 = vmax.f32 %v6658_v39, %v8933_v60 }
0x1795   :  { %v8942_v1 = vpop.permute.xlu1 %8941 }
0x1796   :  { %v8944_v29 = vunpack.i.h.bf16 %v8942_v1  ;;  %v8943_v14 = vunpack.i.l.bf16 %v8942_v1  ;;  %v6694_v47 = vmax.f32 %v6678_v33, %v8938_v7  ;;  %v6695_v6 = vmax.f32 %v6679_v18, %v8939_v34 }
0x1798   :  { %v6710_v22 = vmax.f32 %v6694_v47, %v8943_v14  ;;  %v6711_v57 = vmax.f32 %v6695_v6, %v8944_v29 }
0x179a   :  { %v8965_v59 = vpack.i.bf16 %v6711_v57, %v6710_v22 }
0x179b   :  { %v8947_v25 = vpop.permute.xlu0 %8946  ;;  %v8957_v42 = vpop.permute.xlu1 %8956 }
0x179c   :  { %v8949_v46 = vunpack.i.h.bf16 %v8947_v25  ;;  %v8948_v44 = vunpack.i.l.bf16 %v8947_v25  ;;  %8966 = vrot.lane.b32.xlu1 %v8965_v59, %s9068_s22  ;;  %8961 = vrot.lane.b32.xlu0 %v8965_v59, %s9063_s29  ;;  %v8959_v28 = vunpack.i.h.bf16 %v8957_v42  ;;  %v8958_v10 = vunpack.i.l.bf16 %v8957_v42 }
0x179e   :  { %v6681_v50 = vmax.f32 %v6661_v35, %v8949_v46  ;;  %v6680_v53 = vmax.f32 %v6660_v12, %v8948_v44 }
0x179f   :  { %v8952_v16 = vpop.permute.xlu0 %8951 }
0x17a0   :  { %v8954_v30 = vunpack.i.h.bf16 %v8952_v16  ;;  %v8953_v4 = vunpack.i.l.bf16 %v8952_v16 }
0x17a2   :  { %v6696_v0 = vmax.f32 %v6680_v53, %v8953_v4  ;;  %v6697_v54 = vmax.f32 %v6681_v50, %v8954_v30 }
0x17a4   :  { %v6712_v9 = vmax.f32 %v6696_v0, %v8958_v10  ;;  %v6713_v13 = vmax.f32 %v6697_v54, %v8959_v28 }
0x17a6   :  { %v8975_v48 = vpack.i.bf16 %v6713_v13, %v6712_v9 }
0x17a8   :  { %8976 = vrot.lane.b32.xlu1 %v8975_v48, %s9068_s22  ;;  %8971 = vrot.lane.b32.xlu0 %v8975_v48, %s9063_s29 }
0x17ac   :  { %6758 = vperm.xlu1 %8809, %v6750_v2   ;;  %6753 = vperm.xlu0 %8808, %v6749_v11  }
0x180e   :  { %v8967_v37 = vpop.permute.xlu1 %8966  ;;  %v8962_v19 = vpop.permute.xlu0 %8961 }
0x180f   :  { %v8969_v41 = vunpack.i.h.bf16 %v8967_v37  ;;  %v8968_v15 = vunpack.i.l.bf16 %v8967_v37  ;;  %v8964_v20 = vunpack.i.h.bf16 %v8962_v19  ;;  %v8963_v27 = vunpack.i.l.bf16 %v8962_v19 }
0x1811   :  { %v6743_v32 = vsel %vm6742_vm5, %v8963_v27, %v8968_v15  ;;  %v6744_v45 = vsel %vm6742_vm5, %v8964_v20, %v8969_v41 }
0x1812   :  { %v8743_v58 = vpack.c.bf16 %v6744_v45, %v6743_v32 }
0x1814   :  { %8744 = vmatprep.subr.bf16.mxu1 %v8743_v58 }
0x1815   :  { %8746 = vmatpush3.bf16.msra.mxu1 %v8743_v58 }
0x181a   :  { %v8977_v51 = vpop.permute.xlu1 %8976  ;;  %v8972_v39 = vpop.permute.xlu0 %8971 }
0x181b   :  { %v8979_v17 = vunpack.i.h.bf16 %v8977_v51  ;;  %v8978_v63 = vunpack.i.l.bf16 %v8977_v51  ;;  %v8974_v49 = vunpack.i.h.bf16 %v8972_v39  ;;  %v8973_v38 = vunpack.i.l.bf16 %v8972_v39 }
0x181d   :  { %v6745_v61 = vsel %vm6742_vm5, %v8973_v38, %v8978_v63  ;;  %v6746_v31 = vsel %vm6742_vm5, %v8974_v49, %v8979_v17 }
0x181e   :  { %v8747_v23 = vpack.c.bf16 %v6746_v31, %v6745_v61 }
0x1820   :  { %8748 = vmatprep.subr.bf16.mxu1 %v8747_v23 }
0x1821   :  { %8750 = vmatpush3.bf16.msra.mxu1 %v8747_v23 }
0x1824   :  { %7508 = vmatmul.mubr.msk.f32.vlgmr.msra.gmra.mrb[36].mxu1 %vm6761_vm8, %v6748_v56 }
0x182b   :  { %v6759_v55 = vpop.permute.xlu1 %6758  ;;  %v6754_v8 = vpop.permute.xlu0 %6753 }
0x18f7   :  { %v7509_v24 = vpop.f32.mrb[36].mxu1 }
0x18f8   :  { %v6840_v43 = vadd.f32 %v7509_v24, %v6759_v55  ;;  %v6834_v52 = vpop.f32.mrb[37].mxu1 }
0x18f9   :  { %v6835_v5 = vadd.f32 %v6834_v52, %v6754_v8 }
0x18fa   :  { %6846 = vst.msk [vmem:[%s13654_s26 + $0x8] sm:$0x3] %vm6845_vm11, %v6840_v43 }
0x18fb   :  { %6844 = vst.msk [vmem:[%s13654_s26] sm:$0xff] %vm6843_vm10, %v6835_v5 }
0x18fc   :  { %6851 = vsyncpa [#allocation10], 1 }

</bundles_post_ra>
